<compile_context>
chip_gen: v7x
topology: tpu7x:2x2x1
jax: 0.10.0
libtpu: 0.0.40
codegen_flags: <defaults>
</compile_context>

<pallas_src>
import functools

import numpy as np
import jax
import jax.numpy as jnp
from jax.experimental import pallas as pl
from jax.experimental.pallas import tpu as pltpu

BN_EPS = 1e-5
KSIZE = 3
HEAD_PAD = 256  # 225 kernel-head outputs padded to a full 2x128-lane tile


def _rup8(c):
    return max(8, ((c + 7) // 8) * 8)


# --------------------------------------------------------------------------
# Fused kernel
# --------------------------------------------------------------------------
def _bpn_kernel(z_ref, w_ref, sb_ref, mask_ref, s01_ref, s12_ref, s23_ref,
                wkb_ref, wnb_ref, k_out_ref, n_out_ref,
                *, layer_specs, geoms, batch, c_head):
    """Fully fused BPN forward.

    z_ref    : (Cin0_pad, L0) f32   flat padded layer-0 input (channel-major)
    w_ref    : (10, 9, Cmax, Cmax) bf16  per-(layer, tap) conv weights
    sb_ref   : (10, 2, Cmax, 1) f32      folded BN scale / bias per layer
    mask_ref : (4, 1, maxBP) f32         interior (non-halo) masks per geometry
    s*_ref   : (BP_in, BP_out) bf16      stride-2 subsample/repack selections
    wkb_ref  : (HEAD_PAD, c_head+1) f32  kernel head [weights | bias]
    wnb_ref  : (c_head+1, 1) f32         noise head  [weights ; bias]
    """
    sel_refs = (s01_ref, s12_ref, s23_ref)
    n_layers = len(layer_specs)

    z = z_ref[...]                                   # (ci_k, L) f32
    sel_i = 0
    core = None
    for l, (ci_k, co_k, stride, relu, gi) in enumerate(layer_specs):
        Hp, Wp, BP, G = geoms[gi]
        zb = z.astype(jnp.bfloat16)

        # 3x3 "same" conv (stride 1) = 9 accumulating MXU matmuls over
        # static lane-shifted views of the flat padded activation.
        acc = None
        for t in range(KSIZE * KSIZE):
            di, dj = t // KSIZE, t % KSIZE
            off = G + (di - 1) * Wp + (dj - 1)       # static, in [0, 2G]
            tap = zb[:, off:off + BP]                # (ci_k, BP) bf16
            wt = w_ref[l, t, 0:co_k, 0:ci_k]         # (co_k, ci_k) bf16
            d = jnp.dot(wt, tap, preferred_element_type=jnp.float32)
            acc = d if acc is None else acc + d

        # folded BatchNorm affine (+ conv bias) and ReLU, all f32.
        scale = sb_ref[l, 0, 0:co_k, :]              # (co_k, 1)
        bias = sb_ref[l, 1, 0:co_k, :]               # (co_k, 1)
        y = acc * scale + bias
        if relu:
            y = jnp.maximum(y, 0.0)

        if stride == 2:
            # stride-2 subsample + repack into the next geometry with one MXU
            # matmul against a 0/1 selection matrix (also zeroes the halos).
            _, _, n_bp, n_g = geoms[gi + 1]
            s_ref = sel_refs[sel_i]
            sel_i += 1
            core = jnp.dot(y.astype(jnp.bfloat16), s_ref[...],
                           preferred_element_type=jnp.float32)  # (co_k, n_bp)
            g_next, _ = n_g, n_bp
        else:
            # zero the halo lanes so the result is directly the next layer's
            # zero-padded input (one VPU multiply, no stores).
            core = y * mask_ref[gi, :, 0:BP]
            g_next = G

        if l + 1 < n_layers:
            guard = jnp.zeros((co_k, g_next), jnp.float32)
            z = jnp.concatenate([guard, core, guard], axis=1)

    # -------- global average pool (halo lanes are already zero) ------------
    hp_l, wp_l, bp_l, _ = geoms[layer_specs[-1][4]]
    p_img = bp_l // batch
    inv_hw = 1.0 / float((hp_l - 2) * (wp_l - 2))
    cols = []
    for b in range(batch):
        cols.append(jnp.sum(core[:, b * p_img:(b + 1) * p_img],
                            axis=1, keepdims=True))
    pooled = jnp.concatenate(cols, axis=1) * inv_hw          # (c_head, B)

    # -------- kernel head: 1x1 conv -> softmax -> *255 - 127.5 -------------
    wk = wkb_ref[:, 0:c_head]                                # (HEAD_PAD, c)
    bk = wkb_ref[:, c_head:c_head + 1]                       # (HEAD_PAD, 1)
    logits = jnp.dot(wk, pooled, preferred_element_type=jnp.float32) + bk
    m = jnp.max(logits, axis=0, keepdims=True)
    e = jnp.exp(logits - m)
    denom = jnp.sum(e, axis=0, keepdims=True)
    k_out_ref[...] = (e / denom) * 255.0 - 127.5             # (HEAD_PAD, B)

    # -------- noise head: 1x1 conv (1 channel) -> sigmoid -> *70 -----------
    wn = wnb_ref[0:c_head, :]                                # (c_head, 1)
    bn = wnb_ref[c_head:c_head + 1, :]                       # (1, 1)
    nl = jnp.sum(pooled * wn, axis=0, keepdims=True) + bn    # (1, B)
    n_out_ref[...] = jax.nn.sigmoid(nl) * 70.0


# --------------------------------------------------------------------------
# Parameters (PyTorch-default-style init, BN folded, packed into a few slabs)
# --------------------------------------------------------------------------
def init_bpn_params(key, n_colors=3, n_feats=4, ksize=KSIZE):
    n = n_feats
    chans = ((n_colors, n, 1, False),          # bpn_head: conv only
             (n, n, 1, True), (n, 2 * n, 2, True),
             (2 * n, 2 * n, 1, True), (2 * n, 2 * n, 1, True),
             (2 * n, 4 * n, 2, True), (4 * n, 4 * n, 1, True),
             (4 * n, 4 * n, 1, True), (4 * n, 8 * n, 2, True),
             (8 * n, 8 * n, 1, True))
    cmax = _rup8(max(max(ci, co) for ci, co, _, _ in chans))
    nl = len(chans)

    w_slab = np.zeros((nl, ksize * ksize, cmax, cmax), np.float32)
    sb_slab = np.zeros((nl, 2, cmax, 1), np.float32)
    for l, (ci, co, _, has_bn) in enumerate(chans):
        key, kw, kb = jax.random.split(key, 3)
        bound = 1.0 / float(ci * ksize * ksize) ** 0.5
        w = np.asarray(jax.random.uniform(kw, (co, ci, ksize, ksize),
                                          jnp.float32, -bound, bound))
        b = np.asarray(jax.random.uniform(kb, (co,), jnp.float32,
                                          -bound, bound))
        if has_bn:
            s = np.float32(1.0 / np.sqrt(1.0 + BN_EPS))
            scale = np.full((co,), s, np.float32)
            bias = (s * b).astype(np.float32)   # fold conv bias through BN
        else:
            scale = np.ones((co,), np.float32)
            bias = b.astype(np.float32)
        for i in range(ksize):
            for j in range(ksize):
                w_slab[l, i * ksize + j, :co, :ci] = w[:, :, i, j]
        sb_slab[l, 0, :co, 0] = scale
        sb_slab[l, 1, :co, 0] = bias

    c8 = 8 * n
    key, k1, k2, k3, k4 = jax.random.split(key, 5)
    bound = 1.0 / float(c8) ** 0.5
    wk = np.asarray(jax.random.uniform(k1, (225, c8), jnp.float32, -bound, bound))
    bk = np.asarray(jax.random.uniform(k2, (225,), jnp.float32, -bound, bound))
    wn = np.asarray(jax.random.uniform(k3, (c8,), jnp.float32, -bound, bound))
    bn = np.asarray(jax.random.uniform(k4, (1,), jnp.float32, -bound, bound))

    # kernel head packed [weights | bias], padded 225 -> HEAD_PAD rows; padded
    # rows get a -1e30 bias so softmax assigns them exactly 0.
    wkb = np.zeros((HEAD_PAD, c8 + 1), np.float32)
    wkb[:, c8] = -1e30
    wkb[:225, :c8] = wk
    wkb[:225, c8] = bk
    # noise head packed as a column [weights ; bias].
    wnb = np.zeros((c8 + 1, 1), np.float32)
    wnb[:c8, 0] = wn
    wnb[c8, 0] = float(bn[0])

    return dict(chans=chans, cmax=cmax, n_feats=n_feats, n_colors=n_colors,
                w=jnp.asarray(w_slab).astype(jnp.bfloat16),
                sb=jnp.asarray(sb_slab),
                wkb=jnp.asarray(wkb), wnb=jnp.asarray(wnb))


# --------------------------------------------------------------------------
# Forward wrapper (NCHW in, PyTorch-shaped outputs)
# --------------------------------------------------------------------------
def bpn_forward(x_nchw, params):
    x = x_nchw.astype(jnp.float32)
    B, C0, H, W = x.shape
    assert C0 == params["n_colors"]
    assert H % 8 == 0 and W % 8 == 0, "need 3 clean stride-2 halvings"

    chans = params["chans"]
    c_head = 8 * params["n_feats"]

    # static geometry / per-layer spec tables -------------------------------
    def geom(hh, ww):
        hp, wp = hh + 2, ww + 2
        return (hp, wp, B * hp * wp, wp + 1)       # (Hp, Wp, BP, G)

    geoms = [geom(H, W)]
    layer_specs = []
    gi, h, w = 0, H, W
    for (ci, co, stride, relu) in chans:
        layer_specs.append((_rup8(ci), _rup8(co), stride, relu, gi))
        if stride == 2:
            h, w = h // 2, w // 2
            geoms.append(geom(h, w))
            gi += 1

    # host-side constants: interior masks + stride-2 selection matrices -----
    max_bp = max(g[2] for g in geoms)
    mask = np.zeros((len(geoms), 1, max_bp), np.float32)
    for g_idx, (hp, wp, _, _) in enumerate(geoms):
        p = hp * wp
        for b in range(B):
            for hh in range(hp - 2):
                base = b * p + (hh + 1) * wp + 1
                mask[g_idx, 0, base:base + (wp - 2)] = 1.0
    sels = []
    for g_idx in range(len(geoms) - 1):
        hp, wp, bp, _ = geoms[g_idx]
        nhp, nwp, nbp, _ = geoms[g_idx + 1]
        p, np_ = hp * wp, nhp * nwp
        sel = np.zeros((bp, nbp), np.float32)
        for b in range(B):
            for ho in range(nhp - 2):
                for wo in range(nwp - 2):
                    p_out = b * np_ + (ho + 1) * nwp + (wo + 1)
                    p_in = b * p + (2 * ho + 1) * wp + (2 * wo + 1)
                    sel[p_in, p_out] = 1.0
        sels.append(jnp.asarray(sel).astype(jnp.bfloat16))

    # layer-0 input in the flat channel-major zero-padded layout (XLA ops) --
    hp0, wp0, bp0, g0 = geoms[0]
    ci0_k = _rup8(C0)
    xt = jnp.transpose(x, (1, 0, 2, 3))                        # (C0, B, H, W)
    xt = jnp.pad(xt, ((0, ci0_k - C0), (0, 0), (1, 1), (1, 1)))
    z0 = xt.reshape(ci0_k, bp0)
    z0 = jnp.pad(z0, ((0, 0), (g0, g0)))                       # (ci0_k, L0)

    kern_fn = functools.partial(
        _bpn_kernel, layer_specs=tuple(layer_specs), geoms=tuple(geoms),
        batch=B, c_head=c_head)

    vmem = pl.BlockSpec(memory_space=pltpu.MemorySpace.VMEM)
    k_t, n_t = pl.pallas_call(
        kern_fn,
        out_shape=(jax.ShapeDtypeStruct((HEAD_PAD, B), jnp.float32),
                   jax.ShapeDtypeStruct((1, B), jnp.float32)),
        in_specs=[vmem] * 9,
        out_specs=(vmem, vmem),
    )(z0, params["w"], params["sb"], jnp.asarray(mask),
      sels[0], sels[1], sels[2], params["wkb"], params["wnb"])

    # match PyTorch output shapes (B,225,1,1) and (B,1,1,1)
    kern = jnp.transpose(k_t)[:, :225].reshape(B, 225, 1, 1)
    noise = jnp.transpose(n_t).reshape(B, 1, 1, 1)
    return kern, noise


# --------------------------------------------------------------------------
if __name__ == "__main__":
    B, n_colors, H, W = 2, 3, 16, 16
    n_feats = 4

    key = jax.random.PRNGKey(0)
    key, kx = jax.random.split(key)
    x = jax.random.normal(kx, (B, n_colors, H, W), jnp.float32)

    params = init_bpn_params(jax.random.PRNGKey(1),
                             n_colors=n_colors, n_feats=n_feats)

    kern, noise = bpn_forward(x, params)
    jax.block_until_ready((kern, noise))

    assert kern.shape == (B, 225, 1, 1), kern.shape
    assert noise.shape == (B, 1, 1, 1), noise.shape
    assert bool(jnp.all(jnp.isfinite(kern)))
    assert bool(jnp.all(jnp.isfinite(noise)))
    # kernel head is softmax*255 - 127.5 => per-image sum of (kern+127.5) = 255
    ksum = jnp.sum(kern.reshape(B, 225) + 127.5, axis=1)
    assert bool(jnp.all(jnp.abs(ksum - 255.0) < 1.0)), ksum
    # noise head is sigmoid*70 => in [0, 70]
    assert bool(jnp.all((noise >= 0.0) & (noise <= 70.0)))
    print("KERNEL_OK")
</pallas_src>

<mosaic_0001>
module attributes {stable_mosaic.version = 11 : i64} {
  func.func @_bpn_kernel(%arg0: memref<8x686xf32, #tpu.memory_space<vmem>>, %arg1: memref<10x9x32x32xbf16, #tpu.memory_space<vmem>>, %arg2: memref<10x2x32x1xf32, #tpu.memory_space<vmem>>, %arg3: memref<4x1x648xf32, #tpu.memory_space<vmem>>, %arg4: memref<648x200xbf16, #tpu.memory_space<vmem>>, %arg5: memref<200x72xbf16, #tpu.memory_space<vmem>>, %arg6: memref<72x32xbf16, #tpu.memory_space<vmem>>, %arg7: memref<256x33xf32, #tpu.memory_space<vmem>>, %arg8: memref<33x1xf32, #tpu.memory_space<vmem>>, %arg9: memref<256x2xf32, #tpu.memory_space<vmem>>, %arg10: memref<1x2xf32, #tpu.memory_space<vmem>>) attributes {dimension_semantics = [], scalar_prefetch = 0 : i64, scratch_operands = 0 : i64, tpu.core_type = #tpu.core_type<tc>} {
    %c0 = arith.constant 0 : index
    %c0_0 = arith.constant 0 : index
    %0 = vector.load %arg0[%c0, %c0_0] : memref<8x686xf32, #tpu.memory_space<vmem>>, vector<8x686xf32>
    %1 = arith.truncf %0 : vector<8x686xf32> to vector<8x686xbf16>
    %2 = vector.extract_strided_slice %1 {offsets = [0, 0], sizes = [8, 648], strides = [1, 1]} : vector<8x686xbf16> to vector<8x648xbf16>
    %c0_1 = arith.constant 0 : index
    %c0_2 = arith.constant 0 : index
    %c0_3 = arith.constant 0 : index
    %c0_4 = arith.constant 0 : index
    %3 = vector.load %arg1[%c0_1, %c0_2, %c0_3, %c0_4] : memref<10x9x32x32xbf16, #tpu.memory_space<vmem>>, vector<1x1x8x8xbf16>
    %4 = vector.shape_cast %3 : vector<1x1x8x8xbf16> to vector<8x8xbf16>
    %cst = arith.constant dense<0.000000e+00> : vector<8x648xf32>
    %5 = tpu.matmul %4, %2, %cst {dimension_numbers = #tpu.dot_dimension_numbers<[1], [0], [0], [1], [0, 0, 1, 1], [], []>} : vector<8x8xbf16>, vector<8x648xbf16>, vector<8x648xf32> -> vector<8x648xf32>
    %6 = vector.extract_strided_slice %1 {offsets = [0, 1], sizes = [8, 648], strides = [1, 1]} : vector<8x686xbf16> to vector<8x648xbf16>
    %c0_5 = arith.constant 0 : index
    %c1 = arith.constant 1 : index
    %c0_6 = arith.constant 0 : index
    %c0_7 = arith.constant 0 : index
    %7 = vector.load %arg1[%c0_5, %c1, %c0_6, %c0_7] : memref<10x9x32x32xbf16, #tpu.memory_space<vmem>>, vector<1x1x8x8xbf16>
    %8 = vector.shape_cast %7 : vector<1x1x8x8xbf16> to vector<8x8xbf16>
    %cst_8 = arith.constant dense<0.000000e+00> : vector<8x648xf32>
    %9 = tpu.matmul %8, %6, %cst_8 {dimension_numbers = #tpu.dot_dimension_numbers<[1], [0], [0], [1], [0, 0, 1, 1], [], []>} : vector<8x8xbf16>, vector<8x648xbf16>, vector<8x648xf32> -> vector<8x648xf32>
    %10 = arith.addf %5, %9 : vector<8x648xf32>
    %11 = vector.extract_strided_slice %1 {offsets = [0, 2], sizes = [8, 648], strides = [1, 1]} : vector<8x686xbf16> to vector<8x648xbf16>
    %c0_9 = arith.constant 0 : index
    %c2 = arith.constant 2 : index
    %c0_10 = arith.constant 0 : index
    %c0_11 = arith.constant 0 : index
    %12 = vector.load %arg1[%c0_9, %c2, %c0_10, %c0_11] : memref<10x9x32x32xbf16, #tpu.memory_space<vmem>>, vector<1x1x8x8xbf16>
    %13 = vector.shape_cast %12 : vector<1x1x8x8xbf16> to vector<8x8xbf16>
    %cst_12 = arith.constant dense<0.000000e+00> : vector<8x648xf32>
    %14 = tpu.matmul %13, %11, %cst_12 {dimension_numbers = #tpu.dot_dimension_numbers<[1], [0], [0], [1], [0, 0, 1, 1], [], []>} : vector<8x8xbf16>, vector<8x648xbf16>, vector<8x648xf32> -> vector<8x648xf32>
    %15 = arith.addf %10, %14 : vector<8x648xf32>
    %16 = vector.extract_strided_slice %1 {offsets = [0, 18], sizes = [8, 648], strides = [1, 1]} : vector<8x686xbf16> to vector<8x648xbf16>
    %c0_13 = arith.constant 0 : index
    %c3 = arith.constant 3 : index
    %c0_14 = arith.constant 0 : index
    %c0_15 = arith.constant 0 : index
    %17 = vector.load %arg1[%c0_13, %c3, %c0_14, %c0_15] : memref<10x9x32x32xbf16, #tpu.memory_space<vmem>>, vector<1x1x8x8xbf16>
    %18 = vector.shape_cast %17 : vector<1x1x8x8xbf16> to vector<8x8xbf16>
    %cst_16 = arith.constant dense<0.000000e+00> : vector<8x648xf32>
    %19 = tpu.matmul %18, %16, %cst_16 {dimension_numbers = #tpu.dot_dimension_numbers<[1], [0], [0], [1], [0, 0, 1, 1], [], []>} : vector<8x8xbf16>, vector<8x648xbf16>, vector<8x648xf32> -> vector<8x648xf32>
    %20 = arith.addf %15, %19 : vector<8x648xf32>
    %21 = vector.extract_strided_slice %1 {offsets = [0, 19], sizes = [8, 648], strides = [1, 1]} : vector<8x686xbf16> to vector<8x648xbf16>
    %c0_17 = arith.constant 0 : index
    %c4 = arith.constant 4 : index
    %c0_18 = arith.constant 0 : index
    %c0_19 = arith.constant 0 : index
    %22 = vector.load %arg1[%c0_17, %c4, %c0_18, %c0_19] : memref<10x9x32x32xbf16, #tpu.memory_space<vmem>>, vector<1x1x8x8xbf16>
    %23 = vector.shape_cast %22 : vector<1x1x8x8xbf16> to vector<8x8xbf16>
    %cst_20 = arith.constant dense<0.000000e+00> : vector<8x648xf32>
    %24 = tpu.matmul %23, %21, %cst_20 {dimension_numbers = #tpu.dot_dimension_numbers<[1], [0], [0], [1], [0, 0, 1, 1], [], []>} : vector<8x8xbf16>, vector<8x648xbf16>, vector<8x648xf32> -> vector<8x648xf32>
    %25 = arith.addf %20, %24 : vector<8x648xf32>
    %26 = vector.extract_strided_slice %1 {offsets = [0, 20], sizes = [8, 648], strides = [1, 1]} : vector<8x686xbf16> to vector<8x648xbf16>
    %c0_21 = arith.constant 0 : index
    %c5 = arith.constant 5 : index
    %c0_22 = arith.constant 0 : index
    %c0_23 = arith.constant 0 : index
    %27 = vector.load %arg1[%c0_21, %c5, %c0_22, %c0_23] : memref<10x9x32x32xbf16, #tpu.memory_space<vmem>>, vector<1x1x8x8xbf16>
    %28 = vector.shape_cast %27 : vector<1x1x8x8xbf16> to vector<8x8xbf16>
    %cst_24 = arith.constant dense<0.000000e+00> : vector<8x648xf32>
    %29 = tpu.matmul %28, %26, %cst_24 {dimension_numbers = #tpu.dot_dimension_numbers<[1], [0], [0], [1], [0, 0, 1, 1], [], []>} : vector<8x8xbf16>, vector<8x648xbf16>, vector<8x648xf32> -> vector<8x648xf32>
    %30 = arith.addf %25, %29 : vector<8x648xf32>
    %31 = vector.extract_strided_slice %1 {offsets = [0, 36], sizes = [8, 648], strides = [1, 1]} : vector<8x686xbf16> to vector<8x648xbf16>
    %c0_25 = arith.constant 0 : index
    %c6 = arith.constant 6 : index
    %c0_26 = arith.constant 0 : index
    %c0_27 = arith.constant 0 : index
    %32 = vector.load %arg1[%c0_25, %c6, %c0_26, %c0_27] : memref<10x9x32x32xbf16, #tpu.memory_space<vmem>>, vector<1x1x8x8xbf16>
    %33 = vector.shape_cast %32 : vector<1x1x8x8xbf16> to vector<8x8xbf16>
    %cst_28 = arith.constant dense<0.000000e+00> : vector<8x648xf32>
    %34 = tpu.matmul %33, %31, %cst_28 {dimension_numbers = #tpu.dot_dimension_numbers<[1], [0], [0], [1], [0, 0, 1, 1], [], []>} : vector<8x8xbf16>, vector<8x648xbf16>, vector<8x648xf32> -> vector<8x648xf32>
    %35 = arith.addf %30, %34 : vector<8x648xf32>
    %36 = vector.extract_strided_slice %1 {offsets = [0, 37], sizes = [8, 648], strides = [1, 1]} : vector<8x686xbf16> to vector<8x648xbf16>
    %c0_29 = arith.constant 0 : index
    %c7 = arith.constant 7 : index
    %c0_30 = arith.constant 0 : index
    %c0_31 = arith.constant 0 : index
    %37 = vector.load %arg1[%c0_29, %c7, %c0_30, %c0_31] : memref<10x9x32x32xbf16, #tpu.memory_space<vmem>>, vector<1x1x8x8xbf16>
    %38 = vector.shape_cast %37 : vector<1x1x8x8xbf16> to vector<8x8xbf16>
    %cst_32 = arith.constant dense<0.000000e+00> : vector<8x648xf32>
    %39 = tpu.matmul %38, %36, %cst_32 {dimension_numbers = #tpu.dot_dimension_numbers<[1], [0], [0], [1], [0, 0, 1, 1], [], []>} : vector<8x8xbf16>, vector<8x648xbf16>, vector<8x648xf32> -> vector<8x648xf32>
    %40 = arith.addf %35, %39 : vector<8x648xf32>
    %41 = vector.extract_strided_slice %1 {offsets = [0, 38], sizes = [8, 648], strides = [1, 1]} : vector<8x686xbf16> to vector<8x648xbf16>
    %c0_33 = arith.constant 0 : index
    %c8 = arith.constant 8 : index
    %c0_34 = arith.constant 0 : index
    %c0_35 = arith.constant 0 : index
    %42 = vector.load %arg1[%c0_33, %c8, %c0_34, %c0_35] : memref<10x9x32x32xbf16, #tpu.memory_space<vmem>>, vector<1x1x8x8xbf16>
    %43 = vector.shape_cast %42 : vector<1x1x8x8xbf16> to vector<8x8xbf16>
    %cst_36 = arith.constant dense<0.000000e+00> : vector<8x648xf32>
    %44 = tpu.matmul %43, %41, %cst_36 {dimension_numbers = #tpu.dot_dimension_numbers<[1], [0], [0], [1], [0, 0, 1, 1], [], []>} : vector<8x8xbf16>, vector<8x648xbf16>, vector<8x648xf32> -> vector<8x648xf32>
    %45 = arith.addf %40, %44 : vector<8x648xf32>
    %c0_37 = arith.constant 0 : index
    %c0_38 = arith.constant 0 : index
    %c0_39 = arith.constant 0 : index
    %c0_40 = arith.constant 0 : index
    %46 = vector.load %arg2[%c0_37, %c0_38, %c0_39, %c0_40] : memref<10x2x32x1xf32, #tpu.memory_space<vmem>>, vector<1x1x8x1xf32>
    %47 = vector.shape_cast %46 : vector<1x1x8x1xf32> to vector<8x1xf32>
    %c0_41 = arith.constant 0 : index
    %c1_42 = arith.constant 1 : index
    %c0_43 = arith.constant 0 : index
    %c0_44 = arith.constant 0 : index
    %48 = vector.load %arg2[%c0_41, %c1_42, %c0_43, %c0_44] : memref<10x2x32x1xf32, #tpu.memory_space<vmem>>, vector<1x1x8x1xf32>
    %49 = vector.shape_cast %48 : vector<1x1x8x1xf32> to vector<8x1xf32>
    %50 = vector.broadcast %47 : vector<8x1xf32> to vector<8x648xf32>
    %51 = arith.mulf %45, %50 : vector<8x648xf32>
    %52 = vector.broadcast %49 : vector<8x1xf32> to vector<8x648xf32>
    %53 = arith.addf %51, %52 : vector<8x648xf32>
    %c0_45 = arith.constant 0 : index
    %c0_46 = arith.constant 0 : index
    %c0_47 = arith.constant 0 : index
    %54 = vector.load %arg3[%c0_45, %c0_46, %c0_47] : memref<4x1x648xf32, #tpu.memory_space<vmem>>, vector<1x1x648xf32>
    %55 = vector.shape_cast %54 : vector<1x1x648xf32> to vector<1x648xf32>
    %56 = vector.broadcast %55 : vector<1x648xf32> to vector<8x648xf32>
    %57 = arith.mulf %53, %56 : vector<8x648xf32>
    %cst_48 = arith.constant 0.000000e+00 : f32
    %58 = vector.broadcast %cst_48 : f32 to vector<8x19xf32>
    %59 = tpu.concatenate %58, %57, %58 in 1 : vector<8x19xf32>, vector<8x648xf32>, vector<8x19xf32> -> vector<8x686xf32>
    %60 = arith.truncf %59 : vector<8x686xf32> to vector<8x686xbf16>
    %61 = vector.extract_strided_slice %60 {offsets = [0, 0], sizes = [8, 648], strides = [1, 1]} : vector<8x686xbf16> to vector<8x648xbf16>
    %c1_49 = arith.constant 1 : index
    %c0_50 = arith.constant 0 : index
    %c0_51 = arith.constant 0 : index
    %c0_52 = arith.constant 0 : index
    %62 = vector.load %arg1[%c1_49, %c0_50, %c0_51, %c0_52] : memref<10x9x32x32xbf16, #tpu.memory_space<vmem>>, vector<1x1x8x8xbf16>
    %63 = vector.shape_cast %62 : vector<1x1x8x8xbf16> to vector<8x8xbf16>
    %cst_53 = arith.constant dense<0.000000e+00> : vector<8x648xf32>
    %64 = tpu.matmul %63, %61, %cst_53 {dimension_numbers = #tpu.dot_dimension_numbers<[1], [0], [0], [1], [0, 0, 1, 1], [], []>} : vector<8x8xbf16>, vector<8x648xbf16>, vector<8x648xf32> -> vector<8x648xf32>
    %65 = vector.extract_strided_slice %60 {offsets = [0, 1], sizes = [8, 648], strides = [1, 1]} : vector<8x686xbf16> to vector<8x648xbf16>
    %c1_54 = arith.constant 1 : index
    %c1_55 = arith.constant 1 : index
    %c0_56 = arith.constant 0 : index
    %c0_57 = arith.constant 0 : index
    %66 = vector.load %arg1[%c1_54, %c1_55, %c0_56, %c0_57] : memref<10x9x32x32xbf16, #tpu.memory_space<vmem>>, vector<1x1x8x8xbf16>
    %67 = vector.shape_cast %66 : vector<1x1x8x8xbf16> to vector<8x8xbf16>
    %cst_58 = arith.constant dense<0.000000e+00> : vector<8x648xf32>
    %68 = tpu.matmul %67, %65, %cst_58 {dimension_numbers = #tpu.dot_dimension_numbers<[1], [0], [0], [1], [0, 0, 1, 1], [], []>} : vector<8x8xbf16>, vector<8x648xbf16>, vector<8x648xf32> -> vector<8x648xf32>
    %69 = arith.addf %64, %68 : vector<8x648xf32>
    %70 = vector.extract_strided_slice %60 {offsets = [0, 2], sizes = [8, 648], strides = [1, 1]} : vector<8x686xbf16> to vector<8x648xbf16>
    %c1_59 = arith.constant 1 : index
    %c2_60 = arith.constant 2 : index
    %c0_61 = arith.constant 0 : index
    %c0_62 = arith.constant 0 : index
    %71 = vector.load %arg1[%c1_59, %c2_60, %c0_61, %c0_62] : memref<10x9x32x32xbf16, #tpu.memory_space<vmem>>, vector<1x1x8x8xbf16>
    %72 = vector.shape_cast %71 : vector<1x1x8x8xbf16> to vector<8x8xbf16>
    %cst_63 = arith.constant dense<0.000000e+00> : vector<8x648xf32>
    %73 = tpu.matmul %72, %70, %cst_63 {dimension_numbers = #tpu.dot_dimension_numbers<[1], [0], [0], [1], [0, 0, 1, 1], [], []>} : vector<8x8xbf16>, vector<8x648xbf16>, vector<8x648xf32> -> vector<8x648xf32>
    %74 = arith.addf %69, %73 : vector<8x648xf32>
    %75 = vector.extract_strided_slice %60 {offsets = [0, 18], sizes = [8, 648], strides = [1, 1]} : vector<8x686xbf16> to vector<8x648xbf16>
    %c1_64 = arith.constant 1 : index
    %c3_65 = arith.constant 3 : index
    %c0_66 = arith.constant 0 : index
    %c0_67 = arith.constant 0 : index
    %76 = vector.load %arg1[%c1_64, %c3_65, %c0_66, %c0_67] : memref<10x9x32x32xbf16, #tpu.memory_space<vmem>>, vector<1x1x8x8xbf16>
    %77 = vector.shape_cast %76 : vector<1x1x8x8xbf16> to vector<8x8xbf16>
    %cst_68 = arith.constant dense<0.000000e+00> : vector<8x648xf32>
    %78 = tpu.matmul %77, %75, %cst_68 {dimension_numbers = #tpu.dot_dimension_numbers<[1], [0], [0], [1], [0, 0, 1, 1], [], []>} : vector<8x8xbf16>, vector<8x648xbf16>, vector<8x648xf32> -> vector<8x648xf32>
    %79 = arith.addf %74, %78 : vector<8x648xf32>
    %80 = vector.extract_strided_slice %60 {offsets = [0, 19], sizes = [8, 648], strides = [1, 1]} : vector<8x686xbf16> to vector<8x648xbf16>
    %c1_69 = arith.constant 1 : index
    %c4_70 = arith.constant 4 : index
    %c0_71 = arith.constant 0 : index
    %c0_72 = arith.constant 0 : index
    %81 = vector.load %arg1[%c1_69, %c4_70, %c0_71, %c0_72] : memref<10x9x32x32xbf16, #tpu.memory_space<vmem>>, vector<1x1x8x8xbf16>
    %82 = vector.shape_cast %81 : vector<1x1x8x8xbf16> to vector<8x8xbf16>
    %cst_73 = arith.constant dense<0.000000e+00> : vector<8x648xf32>
    %83 = tpu.matmul %82, %80, %cst_73 {dimension_numbers = #tpu.dot_dimension_numbers<[1], [0], [0], [1], [0, 0, 1, 1], [], []>} : vector<8x8xbf16>, vector<8x648xbf16>, vector<8x648xf32> -> vector<8x648xf32>
    %84 = arith.addf %79, %83 : vector<8x648xf32>
    %85 = vector.extract_strided_slice %60 {offsets = [0, 20], sizes = [8, 648], strides = [1, 1]} : vector<8x686xbf16> to vector<8x648xbf16>
    %c1_74 = arith.constant 1 : index
    %c5_75 = arith.constant 5 : index
    %c0_76 = arith.constant 0 : index
    %c0_77 = arith.constant 0 : index
    %86 = vector.load %arg1[%c1_74, %c5_75, %c0_76, %c0_77] : memref<10x9x32x32xbf16, #tpu.memory_space<vmem>>, vector<1x1x8x8xbf16>
    %87 = vector.shape_cast %86 : vector<1x1x8x8xbf16> to vector<8x8xbf16>
    %cst_78 = arith.constant dense<0.000000e+00> : vector<8x648xf32>
    %88 = tpu.matmul %87, %85, %cst_78 {dimension_numbers = #tpu.dot_dimension_numbers<[1], [0], [0], [1], [0, 0, 1, 1], [], []>} : vector<8x8xbf16>, vector<8x648xbf16>, vector<8x648xf32> -> vector<8x648xf32>
    %89 = arith.addf %84, %88 : vector<8x648xf32>
    %90 = vector.extract_strided_slice %60 {offsets = [0, 36], sizes = [8, 648], strides = [1, 1]} : vector<8x686xbf16> to vector<8x648xbf16>
    %c1_79 = arith.constant 1 : index
    %c6_80 = arith.constant 6 : index
    %c0_81 = arith.constant 0 : index
    %c0_82 = arith.constant 0 : index
    %91 = vector.load %arg1[%c1_79, %c6_80, %c0_81, %c0_82] : memref<10x9x32x32xbf16, #tpu.memory_space<vmem>>, vector<1x1x8x8xbf16>
    %92 = vector.shape_cast %91 : vector<1x1x8x8xbf16> to vector<8x8xbf16>
    %cst_83 = arith.constant dense<0.000000e+00> : vector<8x648xf32>
    %93 = tpu.matmul %92, %90, %cst_83 {dimension_numbers = #tpu.dot_dimension_numbers<[1], [0], [0], [1], [0, 0, 1, 1], [], []>} : vector<8x8xbf16>, vector<8x648xbf16>, vector<8x648xf32> -> vector<8x648xf32>
    %94 = arith.addf %89, %93 : vector<8x648xf32>
    %95 = vector.extract_strided_slice %60 {offsets = [0, 37], sizes = [8, 648], strides = [1, 1]} : vector<8x686xbf16> to vector<8x648xbf16>
    %c1_84 = arith.constant 1 : index
    %c7_85 = arith.constant 7 : index
    %c0_86 = arith.constant 0 : index
    %c0_87 = arith.constant 0 : index
    %96 = vector.load %arg1[%c1_84, %c7_85, %c0_86, %c0_87] : memref<10x9x32x32xbf16, #tpu.memory_space<vmem>>, vector<1x1x8x8xbf16>
    %97 = vector.shape_cast %96 : vector<1x1x8x8xbf16> to vector<8x8xbf16>
    %cst_88 = arith.constant dense<0.000000e+00> : vector<8x648xf32>
    %98 = tpu.matmul %97, %95, %cst_88 {dimension_numbers = #tpu.dot_dimension_numbers<[1], [0], [0], [1], [0, 0, 1, 1], [], []>} : vector<8x8xbf16>, vector<8x648xbf16>, vector<8x648xf32> -> vector<8x648xf32>
    %99 = arith.addf %94, %98 : vector<8x648xf32>
    %100 = vector.extract_strided_slice %60 {offsets = [0, 38], sizes = [8, 648], strides = [1, 1]} : vector<8x686xbf16> to vector<8x648xbf16>
    %c1_89 = arith.constant 1 : index
    %c8_90 = arith.constant 8 : index
    %c0_91 = arith.constant 0 : index
    %c0_92 = arith.constant 0 : index
    %101 = vector.load %arg1[%c1_89, %c8_90, %c0_91, %c0_92] : memref<10x9x32x32xbf16, #tpu.memory_space<vmem>>, vector<1x1x8x8xbf16>
    %102 = vector.shape_cast %101 : vector<1x1x8x8xbf16> to vector<8x8xbf16>
    %cst_93 = arith.constant dense<0.000000e+00> : vector<8x648xf32>
    %103 = tpu.matmul %102, %100, %cst_93 {dimension_numbers = #tpu.dot_dimension_numbers<[1], [0], [0], [1], [0, 0, 1, 1], [], []>} : vector<8x8xbf16>, vector<8x648xbf16>, vector<8x648xf32> -> vector<8x648xf32>
    %104 = arith.addf %99, %103 : vector<8x648xf32>
    %c1_94 = arith.constant 1 : index
    %c0_95 = arith.constant 0 : index
    %c0_96 = arith.constant 0 : index
    %c0_97 = arith.constant 0 : index
    %105 = vector.load %arg2[%c1_94, %c0_95, %c0_96, %c0_97] : memref<10x2x32x1xf32, #tpu.memory_space<vmem>>, vector<1x1x8x1xf32>
    %106 = vector.shape_cast %105 : vector<1x1x8x1xf32> to vector<8x1xf32>
    %c1_98 = arith.constant 1 : index
    %c1_99 = arith.constant 1 : index
    %c0_100 = arith.constant 0 : index
    %c0_101 = arith.constant 0 : index
    %107 = vector.load %arg2[%c1_98, %c1_99, %c0_100, %c0_101] : memref<10x2x32x1xf32, #tpu.memory_space<vmem>>, vector<1x1x8x1xf32>
    %108 = vector.shape_cast %107 : vector<1x1x8x1xf32> to vector<8x1xf32>
    %109 = vector.broadcast %106 : vector<8x1xf32> to vector<8x648xf32>
    %110 = arith.mulf %104, %109 : vector<8x648xf32>
    %111 = vector.broadcast %108 : vector<8x1xf32> to vector<8x648xf32>
    %112 = arith.addf %110, %111 : vector<8x648xf32>
    %cst_102 = arith.constant 0.000000e+00 : f32
    %113 = vector.broadcast %cst_102 : f32 to vector<8x648xf32>
    %114 = arith.maximumf %112, %113 : vector<8x648xf32>
    %c0_103 = arith.constant 0 : index
    %c0_104 = arith.constant 0 : index
    %c0_105 = arith.constant 0 : index
    %115 = vector.load %arg3[%c0_103, %c0_104, %c0_105] : memref<4x1x648xf32, #tpu.memory_space<vmem>>, vector<1x1x648xf32>
    %116 = vector.shape_cast %115 : vector<1x1x648xf32> to vector<1x648xf32>
    %117 = vector.broadcast %116 : vector<1x648xf32> to vector<8x648xf32>
    %118 = arith.mulf %114, %117 : vector<8x648xf32>
    %cst_106 = arith.constant 0.000000e+00 : f32
    %119 = vector.broadcast %cst_106 : f32 to vector<8x19xf32>
    %120 = tpu.concatenate %119, %118, %119 in 1 : vector<8x19xf32>, vector<8x648xf32>, vector<8x19xf32> -> vector<8x686xf32>
    %121 = arith.truncf %120 : vector<8x686xf32> to vector<8x686xbf16>
    %122 = vector.extract_strided_slice %121 {offsets = [0, 0], sizes = [8, 648], strides = [1, 1]} : vector<8x686xbf16> to vector<8x648xbf16>
    %c2_107 = arith.constant 2 : index
    %c0_108 = arith.constant 0 : index
    %c0_109 = arith.constant 0 : index
    %c0_110 = arith.constant 0 : index
    %123 = vector.load %arg1[%c2_107, %c0_108, %c0_109, %c0_110] : memref<10x9x32x32xbf16, #tpu.memory_space<vmem>>, vector<1x1x8x8xbf16>
    %124 = vector.shape_cast %123 : vector<1x1x8x8xbf16> to vector<8x8xbf16>
    %cst_111 = arith.constant dense<0.000000e+00> : vector<8x648xf32>
    %125 = tpu.matmul %124, %122, %cst_111 {dimension_numbers = #tpu.dot_dimension_numbers<[1], [0], [0], [1], [0, 0, 1, 1], [], []>} : vector<8x8xbf16>, vector<8x648xbf16>, vector<8x648xf32> -> vector<8x648xf32>
    %126 = vector.extract_strided_slice %121 {offsets = [0, 1], sizes = [8, 648], strides = [1, 1]} : vector<8x686xbf16> to vector<8x648xbf16>
    %c2_112 = arith.constant 2 : index
    %c1_113 = arith.constant 1 : index
    %c0_114 = arith.constant 0 : index
    %c0_115 = arith.constant 0 : index
    %127 = vector.load %arg1[%c2_112, %c1_113, %c0_114, %c0_115] : memref<10x9x32x32xbf16, #tpu.memory_space<vmem>>, vector<1x1x8x8xbf16>
    %128 = vector.shape_cast %127 : vector<1x1x8x8xbf16> to vector<8x8xbf16>
    %cst_116 = arith.constant dense<0.000000e+00> : vector<8x648xf32>
    %129 = tpu.matmul %128, %126, %cst_116 {dimension_numbers = #tpu.dot_dimension_numbers<[1], [0], [0], [1], [0, 0, 1, 1], [], []>} : vector<8x8xbf16>, vector<8x648xbf16>, vector<8x648xf32> -> vector<8x648xf32>
    %130 = arith.addf %125, %129 : vector<8x648xf32>
    %131 = vector.extract_strided_slice %121 {offsets = [0, 2], sizes = [8, 648], strides = [1, 1]} : vector<8x686xbf16> to vector<8x648xbf16>
    %c2_117 = arith.constant 2 : index
    %c2_118 = arith.constant 2 : index
    %c0_119 = arith.constant 0 : index
    %c0_120 = arith.constant 0 : index
    %132 = vector.load %arg1[%c2_117, %c2_118, %c0_119, %c0_120] : memref<10x9x32x32xbf16, #tpu.memory_space<vmem>>, vector<1x1x8x8xbf16>
    %133 = vector.shape_cast %132 : vector<1x1x8x8xbf16> to vector<8x8xbf16>
    %cst_121 = arith.constant dense<0.000000e+00> : vector<8x648xf32>
    %134 = tpu.matmul %133, %131, %cst_121 {dimension_numbers = #tpu.dot_dimension_numbers<[1], [0], [0], [1], [0, 0, 1, 1], [], []>} : vector<8x8xbf16>, vector<8x648xbf16>, vector<8x648xf32> -> vector<8x648xf32>
    %135 = arith.addf %130, %134 : vector<8x648xf32>
    %136 = vector.extract_strided_slice %121 {offsets = [0, 18], sizes = [8, 648], strides = [1, 1]} : vector<8x686xbf16> to vector<8x648xbf16>
    %c2_122 = arith.constant 2 : index
    %c3_123 = arith.constant 3 : index
    %c0_124 = arith.constant 0 : index
    %c0_125 = arith.constant 0 : index
    %137 = vector.load %arg1[%c2_122, %c3_123, %c0_124, %c0_125] : memref<10x9x32x32xbf16, #tpu.memory_space<vmem>>, vector<1x1x8x8xbf16>
    %138 = vector.shape_cast %137 : vector<1x1x8x8xbf16> to vector<8x8xbf16>
    %cst_126 = arith.constant dense<0.000000e+00> : vector<8x648xf32>
    %139 = tpu.matmul %138, %136, %cst_126 {dimension_numbers = #tpu.dot_dimension_numbers<[1], [0], [0], [1], [0, 0, 1, 1], [], []>} : vector<8x8xbf16>, vector<8x648xbf16>, vector<8x648xf32> -> vector<8x648xf32>
    %140 = arith.addf %135, %139 : vector<8x648xf32>
    %141 = vector.extract_strided_slice %121 {offsets = [0, 19], sizes = [8, 648], strides = [1, 1]} : vector<8x686xbf16> to vector<8x648xbf16>
    %c2_127 = arith.constant 2 : index
    %c4_128 = arith.constant 4 : index
    %c0_129 = arith.constant 0 : index
    %c0_130 = arith.constant 0 : index
    %142 = vector.load %arg1[%c2_127, %c4_128, %c0_129, %c0_130] : memref<10x9x32x32xbf16, #tpu.memory_space<vmem>>, vector<1x1x8x8xbf16>
    %143 = vector.shape_cast %142 : vector<1x1x8x8xbf16> to vector<8x8xbf16>
    %cst_131 = arith.constant dense<0.000000e+00> : vector<8x648xf32>
    %144 = tpu.matmul %143, %141, %cst_131 {dimension_numbers = #tpu.dot_dimension_numbers<[1], [0], [0], [1], [0, 0, 1, 1], [], []>} : vector<8x8xbf16>, vector<8x648xbf16>, vector<8x648xf32> -> vector<8x648xf32>
    %145 = arith.addf %140, %144 : vector<8x648xf32>
    %146 = vector.extract_strided_slice %121 {offsets = [0, 20], sizes = [8, 648], strides = [1, 1]} : vector<8x686xbf16> to vector<8x648xbf16>
    %c2_132 = arith.constant 2 : index
    %c5_133 = arith.constant 5 : index
    %c0_134 = arith.constant 0 : index
    %c0_135 = arith.constant 0 : index
    %147 = vector.load %arg1[%c2_132, %c5_133, %c0_134, %c0_135] : memref<10x9x32x32xbf16, #tpu.memory_space<vmem>>, vector<1x1x8x8xbf16>
    %148 = vector.shape_cast %147 : vector<1x1x8x8xbf16> to vector<8x8xbf16>
    %cst_136 = arith.constant dense<0.000000e+00> : vector<8x648xf32>
    %149 = tpu.matmul %148, %146, %cst_136 {dimension_numbers = #tpu.dot_dimension_numbers<[1], [0], [0], [1], [0, 0, 1, 1], [], []>} : vector<8x8xbf16>, vector<8x648xbf16>, vector<8x648xf32> -> vector<8x648xf32>
    %150 = arith.addf %145, %149 : vector<8x648xf32>
    %151 = vector.extract_strided_slice %121 {offsets = [0, 36], sizes = [8, 648], strides = [1, 1]} : vector<8x686xbf16> to vector<8x648xbf16>
    %c2_137 = arith.constant 2 : index
    %c6_138 = arith.constant 6 : index
    %c0_139 = arith.constant 0 : index
    %c0_140 = arith.constant 0 : index
    %152 = vector.load %arg1[%c2_137, %c6_138, %c0_139, %c0_140] : memref<10x9x32x32xbf16, #tpu.memory_space<vmem>>, vector<1x1x8x8xbf16>
    %153 = vector.shape_cast %152 : vector<1x1x8x8xbf16> to vector<8x8xbf16>
    %cst_141 = arith.constant dense<0.000000e+00> : vector<8x648xf32>
    %154 = tpu.matmul %153, %151, %cst_141 {dimension_numbers = #tpu.dot_dimension_numbers<[1], [0], [0], [1], [0, 0, 1, 1], [], []>} : vector<8x8xbf16>, vector<8x648xbf16>, vector<8x648xf32> -> vector<8x648xf32>
    %155 = arith.addf %150, %154 : vector<8x648xf32>
    %156 = vector.extract_strided_slice %121 {offsets = [0, 37], sizes = [8, 648], strides = [1, 1]} : vector<8x686xbf16> to vector<8x648xbf16>
    %c2_142 = arith.constant 2 : index
    %c7_143 = arith.constant 7 : index
    %c0_144 = arith.constant 0 : index
    %c0_145 = arith.constant 0 : index
    %157 = vector.load %arg1[%c2_142, %c7_143, %c0_144, %c0_145] : memref<10x9x32x32xbf16, #tpu.memory_space<vmem>>, vector<1x1x8x8xbf16>
    %158 = vector.shape_cast %157 : vector<1x1x8x8xbf16> to vector<8x8xbf16>
    %cst_146 = arith.constant dense<0.000000e+00> : vector<8x648xf32>
    %159 = tpu.matmul %158, %156, %cst_146 {dimension_numbers = #tpu.dot_dimension_numbers<[1], [0], [0], [1], [0, 0, 1, 1], [], []>} : vector<8x8xbf16>, vector<8x648xbf16>, vector<8x648xf32> -> vector<8x648xf32>
    %160 = arith.addf %155, %159 : vector<8x648xf32>
    %161 = vector.extract_strided_slice %121 {offsets = [0, 38], sizes = [8, 648], strides = [1, 1]} : vector<8x686xbf16> to vector<8x648xbf16>
    %c2_147 = arith.constant 2 : index
    %c8_148 = arith.constant 8 : index
    %c0_149 = arith.constant 0 : index
    %c0_150 = arith.constant 0 : index
    %162 = vector.load %arg1[%c2_147, %c8_148, %c0_149, %c0_150] : memref<10x9x32x32xbf16, #tpu.memory_space<vmem>>, vector<1x1x8x8xbf16>
    %163 = vector.shape_cast %162 : vector<1x1x8x8xbf16> to vector<8x8xbf16>
    %cst_151 = arith.constant dense<0.000000e+00> : vector<8x648xf32>
    %164 = tpu.matmul %163, %161, %cst_151 {dimension_numbers = #tpu.dot_dimension_numbers<[1], [0], [0], [1], [0, 0, 1, 1], [], []>} : vector<8x8xbf16>, vector<8x648xbf16>, vector<8x648xf32> -> vector<8x648xf32>
    %165 = arith.addf %160, %164 : vector<8x648xf32>
    %c2_152 = arith.constant 2 : index
    %c0_153 = arith.constant 0 : index
    %c0_154 = arith.constant 0 : index
    %c0_155 = arith.constant 0 : index
    %166 = vector.load %arg2[%c2_152, %c0_153, %c0_154, %c0_155] : memref<10x2x32x1xf32, #tpu.memory_space<vmem>>, vector<1x1x8x1xf32>
    %167 = vector.shape_cast %166 : vector<1x1x8x1xf32> to vector<8x1xf32>
    %c2_156 = arith.constant 2 : index
    %c1_157 = arith.constant 1 : index
    %c0_158 = arith.constant 0 : index
    %c0_159 = arith.constant 0 : index
    %168 = vector.load %arg2[%c2_156, %c1_157, %c0_158, %c0_159] : memref<10x2x32x1xf32, #tpu.memory_space<vmem>>, vector<1x1x8x1xf32>
    %169 = vector.shape_cast %168 : vector<1x1x8x1xf32> to vector<8x1xf32>
    %170 = vector.broadcast %167 : vector<8x1xf32> to vector<8x648xf32>
    %171 = arith.mulf %165, %170 : vector<8x648xf32>
    %172 = vector.broadcast %169 : vector<8x1xf32> to vector<8x648xf32>
    %173 = arith.addf %171, %172 : vector<8x648xf32>
    %cst_160 = arith.constant 0.000000e+00 : f32
    %174 = vector.broadcast %cst_160 : f32 to vector<8x648xf32>
    %175 = arith.maximumf %173, %174 : vector<8x648xf32>
    %176 = arith.truncf %175 : vector<8x648xf32> to vector<8x648xbf16>
    %c0_161 = arith.constant 0 : index
    %c0_162 = arith.constant 0 : index
    %177 = vector.load %arg4[%c0_161, %c0_162] : memref<648x200xbf16, #tpu.memory_space<vmem>>, vector<648x200xbf16>
    %cst_163 = arith.constant dense<0.000000e+00> : vector<8x200xf32>
    %178 = tpu.matmul %176, %177, %cst_163 {dimension_numbers = #tpu.dot_dimension_numbers<[1], [0], [0], [1], [0, 0, 1, 1], [], []>} : vector<8x648xbf16>, vector<648x200xbf16>, vector<8x200xf32> -> vector<8x200xf32>
    %cst_164 = arith.constant 0.000000e+00 : f32
    %179 = vector.broadcast %cst_164 : f32 to vector<8x11xf32>
    %180 = tpu.concatenate %179, %178, %179 in 1 : vector<8x11xf32>, vector<8x200xf32>, vector<8x11xf32> -> vector<8x222xf32>
    %181 = arith.truncf %180 : vector<8x222xf32> to vector<8x222xbf16>
    %182 = vector.extract_strided_slice %181 {offsets = [0, 0], sizes = [8, 200], strides = [1, 1]} : vector<8x222xbf16> to vector<8x200xbf16>
    %c3_165 = arith.constant 3 : index
    %c0_166 = arith.constant 0 : index
    %c0_167 = arith.constant 0 : index
    %c0_168 = arith.constant 0 : index
    %183 = vector.load %arg1[%c3_165, %c0_166, %c0_167, %c0_168] : memref<10x9x32x32xbf16, #tpu.memory_space<vmem>>, vector<1x1x8x8xbf16>
    %184 = vector.shape_cast %183 : vector<1x1x8x8xbf16> to vector<8x8xbf16>
    %cst_169 = arith.constant dense<0.000000e+00> : vector<8x200xf32>
    %185 = tpu.matmul %184, %182, %cst_169 {dimension_numbers = #tpu.dot_dimension_numbers<[1], [0], [0], [1], [0, 0, 1, 1], [], []>} : vector<8x8xbf16>, vector<8x200xbf16>, vector<8x200xf32> -> vector<8x200xf32>
    %186 = vector.extract_strided_slice %181 {offsets = [0, 1], sizes = [8, 200], strides = [1, 1]} : vector<8x222xbf16> to vector<8x200xbf16>
    %c3_170 = arith.constant 3 : index
    %c1_171 = arith.constant 1 : index
    %c0_172 = arith.constant 0 : index
    %c0_173 = arith.constant 0 : index
    %187 = vector.load %arg1[%c3_170, %c1_171, %c0_172, %c0_173] : memref<10x9x32x32xbf16, #tpu.memory_space<vmem>>, vector<1x1x8x8xbf16>
    %188 = vector.shape_cast %187 : vector<1x1x8x8xbf16> to vector<8x8xbf16>
    %cst_174 = arith.constant dense<0.000000e+00> : vector<8x200xf32>
    %189 = tpu.matmul %188, %186, %cst_174 {dimension_numbers = #tpu.dot_dimension_numbers<[1], [0], [0], [1], [0, 0, 1, 1], [], []>} : vector<8x8xbf16>, vector<8x200xbf16>, vector<8x200xf32> -> vector<8x200xf32>
    %190 = arith.addf %185, %189 : vector<8x200xf32>
    %191 = vector.extract_strided_slice %181 {offsets = [0, 2], sizes = [8, 200], strides = [1, 1]} : vector<8x222xbf16> to vector<8x200xbf16>
    %c3_175 = arith.constant 3 : index
    %c2_176 = arith.constant 2 : index
    %c0_177 = arith.constant 0 : index
    %c0_178 = arith.constant 0 : index
    %192 = vector.load %arg1[%c3_175, %c2_176, %c0_177, %c0_178] : memref<10x9x32x32xbf16, #tpu.memory_space<vmem>>, vector<1x1x8x8xbf16>
    %193 = vector.shape_cast %192 : vector<1x1x8x8xbf16> to vector<8x8xbf16>
    %cst_179 = arith.constant dense<0.000000e+00> : vector<8x200xf32>
    %194 = tpu.matmul %193, %191, %cst_179 {dimension_numbers = #tpu.dot_dimension_numbers<[1], [0], [0], [1], [0, 0, 1, 1], [], []>} : vector<8x8xbf16>, vector<8x200xbf16>, vector<8x200xf32> -> vector<8x200xf32>
    %195 = arith.addf %190, %194 : vector<8x200xf32>
    %196 = vector.extract_strided_slice %181 {offsets = [0, 10], sizes = [8, 200], strides = [1, 1]} : vector<8x222xbf16> to vector<8x200xbf16>
    %c3_180 = arith.constant 3 : index
    %c3_181 = arith.constant 3 : index
    %c0_182 = arith.constant 0 : index
    %c0_183 = arith.constant 0 : index
    %197 = vector.load %arg1[%c3_180, %c3_181, %c0_182, %c0_183] : memref<10x9x32x32xbf16, #tpu.memory_space<vmem>>, vector<1x1x8x8xbf16>
    %198 = vector.shape_cast %197 : vector<1x1x8x8xbf16> to vector<8x8xbf16>
    %cst_184 = arith.constant dense<0.000000e+00> : vector<8x200xf32>
    %199 = tpu.matmul %198, %196, %cst_184 {dimension_numbers = #tpu.dot_dimension_numbers<[1], [0], [0], [1], [0, 0, 1, 1], [], []>} : vector<8x8xbf16>, vector<8x200xbf16>, vector<8x200xf32> -> vector<8x200xf32>
    %200 = arith.addf %195, %199 : vector<8x200xf32>
    %201 = vector.extract_strided_slice %181 {offsets = [0, 11], sizes = [8, 200], strides = [1, 1]} : vector<8x222xbf16> to vector<8x200xbf16>
    %c3_185 = arith.constant 3 : index
    %c4_186 = arith.constant 4 : index
    %c0_187 = arith.constant 0 : index
    %c0_188 = arith.constant 0 : index
    %202 = vector.load %arg1[%c3_185, %c4_186, %c0_187, %c0_188] : memref<10x9x32x32xbf16, #tpu.memory_space<vmem>>, vector<1x1x8x8xbf16>
    %203 = vector.shape_cast %202 : vector<1x1x8x8xbf16> to vector<8x8xbf16>
    %cst_189 = arith.constant dense<0.000000e+00> : vector<8x200xf32>
    %204 = tpu.matmul %203, %201, %cst_189 {dimension_numbers = #tpu.dot_dimension_numbers<[1], [0], [0], [1], [0, 0, 1, 1], [], []>} : vector<8x8xbf16>, vector<8x200xbf16>, vector<8x200xf32> -> vector<8x200xf32>
    %205 = arith.addf %200, %204 : vector<8x200xf32>
    %206 = vector.extract_strided_slice %181 {offsets = [0, 12], sizes = [8, 200], strides = [1, 1]} : vector<8x222xbf16> to vector<8x200xbf16>
    %c3_190 = arith.constant 3 : index
    %c5_191 = arith.constant 5 : index
    %c0_192 = arith.constant 0 : index
    %c0_193 = arith.constant 0 : index
    %207 = vector.load %arg1[%c3_190, %c5_191, %c0_192, %c0_193] : memref<10x9x32x32xbf16, #tpu.memory_space<vmem>>, vector<1x1x8x8xbf16>
    %208 = vector.shape_cast %207 : vector<1x1x8x8xbf16> to vector<8x8xbf16>
    %cst_194 = arith.constant dense<0.000000e+00> : vector<8x200xf32>
    %209 = tpu.matmul %208, %206, %cst_194 {dimension_numbers = #tpu.dot_dimension_numbers<[1], [0], [0], [1], [0, 0, 1, 1], [], []>} : vector<8x8xbf16>, vector<8x200xbf16>, vector<8x200xf32> -> vector<8x200xf32>
    %210 = arith.addf %205, %209 : vector<8x200xf32>
    %211 = vector.extract_strided_slice %181 {offsets = [0, 20], sizes = [8, 200], strides = [1, 1]} : vector<8x222xbf16> to vector<8x200xbf16>
    %c3_195 = arith.constant 3 : index
    %c6_196 = arith.constant 6 : index
    %c0_197 = arith.constant 0 : index
    %c0_198 = arith.constant 0 : index
    %212 = vector.load %arg1[%c3_195, %c6_196, %c0_197, %c0_198] : memref<10x9x32x32xbf16, #tpu.memory_space<vmem>>, vector<1x1x8x8xbf16>
    %213 = vector.shape_cast %212 : vector<1x1x8x8xbf16> to vector<8x8xbf16>
    %cst_199 = arith.constant dense<0.000000e+00> : vector<8x200xf32>
    %214 = tpu.matmul %213, %211, %cst_199 {dimension_numbers = #tpu.dot_dimension_numbers<[1], [0], [0], [1], [0, 0, 1, 1], [], []>} : vector<8x8xbf16>, vector<8x200xbf16>, vector<8x200xf32> -> vector<8x200xf32>
    %215 = arith.addf %210, %214 : vector<8x200xf32>
    %216 = vector.extract_strided_slice %181 {offsets = [0, 21], sizes = [8, 200], strides = [1, 1]} : vector<8x222xbf16> to vector<8x200xbf16>
    %c3_200 = arith.constant 3 : index
    %c7_201 = arith.constant 7 : index
    %c0_202 = arith.constant 0 : index
    %c0_203 = arith.constant 0 : index
    %217 = vector.load %arg1[%c3_200, %c7_201, %c0_202, %c0_203] : memref<10x9x32x32xbf16, #tpu.memory_space<vmem>>, vector<1x1x8x8xbf16>
    %218 = vector.shape_cast %217 : vector<1x1x8x8xbf16> to vector<8x8xbf16>
    %cst_204 = arith.constant dense<0.000000e+00> : vector<8x200xf32>
    %219 = tpu.matmul %218, %216, %cst_204 {dimension_numbers = #tpu.dot_dimension_numbers<[1], [0], [0], [1], [0, 0, 1, 1], [], []>} : vector<8x8xbf16>, vector<8x200xbf16>, vector<8x200xf32> -> vector<8x200xf32>
    %220 = arith.addf %215, %219 : vector<8x200xf32>
    %221 = vector.extract_strided_slice %181 {offsets = [0, 22], sizes = [8, 200], strides = [1, 1]} : vector<8x222xbf16> to vector<8x200xbf16>
    %c3_205 = arith.constant 3 : index
    %c8_206 = arith.constant 8 : index
    %c0_207 = arith.constant 0 : index
    %c0_208 = arith.constant 0 : index
    %222 = vector.load %arg1[%c3_205, %c8_206, %c0_207, %c0_208] : memref<10x9x32x32xbf16, #tpu.memory_space<vmem>>, vector<1x1x8x8xbf16>
    %223 = vector.shape_cast %222 : vector<1x1x8x8xbf16> to vector<8x8xbf16>
    %cst_209 = arith.constant dense<0.000000e+00> : vector<8x200xf32>
    %224 = tpu.matmul %223, %221, %cst_209 {dimension_numbers = #tpu.dot_dimension_numbers<[1], [0], [0], [1], [0, 0, 1, 1], [], []>} : vector<8x8xbf16>, vector<8x200xbf16>, vector<8x200xf32> -> vector<8x200xf32>
    %225 = arith.addf %220, %224 : vector<8x200xf32>
    %c3_210 = arith.constant 3 : index
    %c0_211 = arith.constant 0 : index
    %c0_212 = arith.constant 0 : index
    %c0_213 = arith.constant 0 : index
    %226 = vector.load %arg2[%c3_210, %c0_211, %c0_212, %c0_213] : memref<10x2x32x1xf32, #tpu.memory_space<vmem>>, vector<1x1x8x1xf32>
    %227 = vector.shape_cast %226 : vector<1x1x8x1xf32> to vector<8x1xf32>
    %c3_214 = arith.constant 3 : index
    %c1_215 = arith.constant 1 : index
    %c0_216 = arith.constant 0 : index
    %c0_217 = arith.constant 0 : index
    %228 = vector.load %arg2[%c3_214, %c1_215, %c0_216, %c0_217] : memref<10x2x32x1xf32, #tpu.memory_space<vmem>>, vector<1x1x8x1xf32>
    %229 = vector.shape_cast %228 : vector<1x1x8x1xf32> to vector<8x1xf32>
    %230 = vector.broadcast %227 : vector<8x1xf32> to vector<8x200xf32>
    %231 = arith.mulf %225, %230 : vector<8x200xf32>
    %232 = vector.broadcast %229 : vector<8x1xf32> to vector<8x200xf32>
    %233 = arith.addf %231, %232 : vector<8x200xf32>
    %cst_218 = arith.constant 0.000000e+00 : f32
    %234 = vector.broadcast %cst_218 : f32 to vector<8x200xf32>
    %235 = arith.maximumf %233, %234 : vector<8x200xf32>
    %c1_219 = arith.constant 1 : index
    %c0_220 = arith.constant 0 : index
    %c0_221 = arith.constant 0 : index
    %236 = vector.load %arg3[%c1_219, %c0_220, %c0_221] : memref<4x1x648xf32, #tpu.memory_space<vmem>>, vector<1x1x200xf32>
    %237 = vector.shape_cast %236 : vector<1x1x200xf32> to vector<1x200xf32>
    %238 = vector.broadcast %237 : vector<1x200xf32> to vector<8x200xf32>
    %239 = arith.mulf %235, %238 : vector<8x200xf32>
    %cst_222 = arith.constant 0.000000e+00 : f32
    %240 = vector.broadcast %cst_222 : f32 to vector<8x11xf32>
    %241 = tpu.concatenate %240, %239, %240 in 1 : vector<8x11xf32>, vector<8x200xf32>, vector<8x11xf32> -> vector<8x222xf32>
    %242 = arith.truncf %241 : vector<8x222xf32> to vector<8x222xbf16>
    %243 = vector.extract_strided_slice %242 {offsets = [0, 0], sizes = [8, 200], strides = [1, 1]} : vector<8x222xbf16> to vector<8x200xbf16>
    %c4_223 = arith.constant 4 : index
    %c0_224 = arith.constant 0 : index
    %c0_225 = arith.constant 0 : index
    %c0_226 = arith.constant 0 : index
    %244 = vector.load %arg1[%c4_223, %c0_224, %c0_225, %c0_226] : memref<10x9x32x32xbf16, #tpu.memory_space<vmem>>, vector<1x1x8x8xbf16>
    %245 = vector.shape_cast %244 : vector<1x1x8x8xbf16> to vector<8x8xbf16>
    %cst_227 = arith.constant dense<0.000000e+00> : vector<8x200xf32>
    %246 = tpu.matmul %245, %243, %cst_227 {dimension_numbers = #tpu.dot_dimension_numbers<[1], [0], [0], [1], [0, 0, 1, 1], [], []>} : vector<8x8xbf16>, vector<8x200xbf16>, vector<8x200xf32> -> vector<8x200xf32>
    %247 = vector.extract_strided_slice %242 {offsets = [0, 1], sizes = [8, 200], strides = [1, 1]} : vector<8x222xbf16> to vector<8x200xbf16>
    %c4_228 = arith.constant 4 : index
    %c1_229 = arith.constant 1 : index
    %c0_230 = arith.constant 0 : index
    %c0_231 = arith.constant 0 : index
    %248 = vector.load %arg1[%c4_228, %c1_229, %c0_230, %c0_231] : memref<10x9x32x32xbf16, #tpu.memory_space<vmem>>, vector<1x1x8x8xbf16>
    %249 = vector.shape_cast %248 : vector<1x1x8x8xbf16> to vector<8x8xbf16>
    %cst_232 = arith.constant dense<0.000000e+00> : vector<8x200xf32>
    %250 = tpu.matmul %249, %247, %cst_232 {dimension_numbers = #tpu.dot_dimension_numbers<[1], [0], [0], [1], [0, 0, 1, 1], [], []>} : vector<8x8xbf16>, vector<8x200xbf16>, vector<8x200xf32> -> vector<8x200xf32>
    %251 = arith.addf %246, %250 : vector<8x200xf32>
    %252 = vector.extract_strided_slice %242 {offsets = [0, 2], sizes = [8, 200], strides = [1, 1]} : vector<8x222xbf16> to vector<8x200xbf16>
    %c4_233 = arith.constant 4 : index
    %c2_234 = arith.constant 2 : index
    %c0_235 = arith.constant 0 : index
    %c0_236 = arith.constant 0 : index
    %253 = vector.load %arg1[%c4_233, %c2_234, %c0_235, %c0_236] : memref<10x9x32x32xbf16, #tpu.memory_space<vmem>>, vector<1x1x8x8xbf16>
    %254 = vector.shape_cast %253 : vector<1x1x8x8xbf16> to vector<8x8xbf16>
    %cst_237 = arith.constant dense<0.000000e+00> : vector<8x200xf32>
    %255 = tpu.matmul %254, %252, %cst_237 {dimension_numbers = #tpu.dot_dimension_numbers<[1], [0], [0], [1], [0, 0, 1, 1], [], []>} : vector<8x8xbf16>, vector<8x200xbf16>, vector<8x200xf32> -> vector<8x200xf32>
    %256 = arith.addf %251, %255 : vector<8x200xf32>
    %257 = vector.extract_strided_slice %242 {offsets = [0, 10], sizes = [8, 200], strides = [1, 1]} : vector<8x222xbf16> to vector<8x200xbf16>
    %c4_238 = arith.constant 4 : index
    %c3_239 = arith.constant 3 : index
    %c0_240 = arith.constant 0 : index
    %c0_241 = arith.constant 0 : index
    %258 = vector.load %arg1[%c4_238, %c3_239, %c0_240, %c0_241] : memref<10x9x32x32xbf16, #tpu.memory_space<vmem>>, vector<1x1x8x8xbf16>
    %259 = vector.shape_cast %258 : vector<1x1x8x8xbf16> to vector<8x8xbf16>
    %cst_242 = arith.constant dense<0.000000e+00> : vector<8x200xf32>
    %260 = tpu.matmul %259, %257, %cst_242 {dimension_numbers = #tpu.dot_dimension_numbers<[1], [0], [0], [1], [0, 0, 1, 1], [], []>} : vector<8x8xbf16>, vector<8x200xbf16>, vector<8x200xf32> -> vector<8x200xf32>
    %261 = arith.addf %256, %260 : vector<8x200xf32>
    %262 = vector.extract_strided_slice %242 {offsets = [0, 11], sizes = [8, 200], strides = [1, 1]} : vector<8x222xbf16> to vector<8x200xbf16>
    %c4_243 = arith.constant 4 : index
    %c4_244 = arith.constant 4 : index
    %c0_245 = arith.constant 0 : index
    %c0_246 = arith.constant 0 : index
    %263 = vector.load %arg1[%c4_243, %c4_244, %c0_245, %c0_246] : memref<10x9x32x32xbf16, #tpu.memory_space<vmem>>, vector<1x1x8x8xbf16>
    %264 = vector.shape_cast %263 : vector<1x1x8x8xbf16> to vector<8x8xbf16>
    %cst_247 = arith.constant dense<0.000000e+00> : vector<8x200xf32>
    %265 = tpu.matmul %264, %262, %cst_247 {dimension_numbers = #tpu.dot_dimension_numbers<[1], [0], [0], [1], [0, 0, 1, 1], [], []>} : vector<8x8xbf16>, vector<8x200xbf16>, vector<8x200xf32> -> vector<8x200xf32>
    %266 = arith.addf %261, %265 : vector<8x200xf32>
    %267 = vector.extract_strided_slice %242 {offsets = [0, 12], sizes = [8, 200], strides = [1, 1]} : vector<8x222xbf16> to vector<8x200xbf16>
    %c4_248 = arith.constant 4 : index
    %c5_249 = arith.constant 5 : index
    %c0_250 = arith.constant 0 : index
    %c0_251 = arith.constant 0 : index
    %268 = vector.load %arg1[%c4_248, %c5_249, %c0_250, %c0_251] : memref<10x9x32x32xbf16, #tpu.memory_space<vmem>>, vector<1x1x8x8xbf16>
    %269 = vector.shape_cast %268 : vector<1x1x8x8xbf16> to vector<8x8xbf16>
    %cst_252 = arith.constant dense<0.000000e+00> : vector<8x200xf32>
    %270 = tpu.matmul %269, %267, %cst_252 {dimension_numbers = #tpu.dot_dimension_numbers<[1], [0], [0], [1], [0, 0, 1, 1], [], []>} : vector<8x8xbf16>, vector<8x200xbf16>, vector<8x200xf32> -> vector<8x200xf32>
    %271 = arith.addf %266, %270 : vector<8x200xf32>
    %272 = vector.extract_strided_slice %242 {offsets = [0, 20], sizes = [8, 200], strides = [1, 1]} : vector<8x222xbf16> to vector<8x200xbf16>
    %c4_253 = arith.constant 4 : index
    %c6_254 = arith.constant 6 : index
    %c0_255 = arith.constant 0 : index
    %c0_256 = arith.constant 0 : index
    %273 = vector.load %arg1[%c4_253, %c6_254, %c0_255, %c0_256] : memref<10x9x32x32xbf16, #tpu.memory_space<vmem>>, vector<1x1x8x8xbf16>
    %274 = vector.shape_cast %273 : vector<1x1x8x8xbf16> to vector<8x8xbf16>
    %cst_257 = arith.constant dense<0.000000e+00> : vector<8x200xf32>
    %275 = tpu.matmul %274, %272, %cst_257 {dimension_numbers = #tpu.dot_dimension_numbers<[1], [0], [0], [1], [0, 0, 1, 1], [], []>} : vector<8x8xbf16>, vector<8x200xbf16>, vector<8x200xf32> -> vector<8x200xf32>
    %276 = arith.addf %271, %275 : vector<8x200xf32>
    %277 = vector.extract_strided_slice %242 {offsets = [0, 21], sizes = [8, 200], strides = [1, 1]} : vector<8x222xbf16> to vector<8x200xbf16>
    %c4_258 = arith.constant 4 : index
    %c7_259 = arith.constant 7 : index
    %c0_260 = arith.constant 0 : index
    %c0_261 = arith.constant 0 : index
    %278 = vector.load %arg1[%c4_258, %c7_259, %c0_260, %c0_261] : memref<10x9x32x32xbf16, #tpu.memory_space<vmem>>, vector<1x1x8x8xbf16>
    %279 = vector.shape_cast %278 : vector<1x1x8x8xbf16> to vector<8x8xbf16>
    %cst_262 = arith.constant dense<0.000000e+00> : vector<8x200xf32>
    %280 = tpu.matmul %279, %277, %cst_262 {dimension_numbers = #tpu.dot_dimension_numbers<[1], [0], [0], [1], [0, 0, 1, 1], [], []>} : vector<8x8xbf16>, vector<8x200xbf16>, vector<8x200xf32> -> vector<8x200xf32>
    %281 = arith.addf %276, %280 : vector<8x200xf32>
    %282 = vector.extract_strided_slice %242 {offsets = [0, 22], sizes = [8, 200], strides = [1, 1]} : vector<8x222xbf16> to vector<8x200xbf16>
    %c4_263 = arith.constant 4 : index
    %c8_264 = arith.constant 8 : index
    %c0_265 = arith.constant 0 : index
    %c0_266 = arith.constant 0 : index
    %283 = vector.load %arg1[%c4_263, %c8_264, %c0_265, %c0_266] : memref<10x9x32x32xbf16, #tpu.memory_space<vmem>>, vector<1x1x8x8xbf16>
    %284 = vector.shape_cast %283 : vector<1x1x8x8xbf16> to vector<8x8xbf16>
    %cst_267 = arith.constant dense<0.000000e+00> : vector<8x200xf32>
    %285 = tpu.matmul %284, %282, %cst_267 {dimension_numbers = #tpu.dot_dimension_numbers<[1], [0], [0], [1], [0, 0, 1, 1], [], []>} : vector<8x8xbf16>, vector<8x200xbf16>, vector<8x200xf32> -> vector<8x200xf32>
    %286 = arith.addf %281, %285 : vector<8x200xf32>
    %c4_268 = arith.constant 4 : index
    %c0_269 = arith.constant 0 : index
    %c0_270 = arith.constant 0 : index
    %c0_271 = arith.constant 0 : index
    %287 = vector.load %arg2[%c4_268, %c0_269, %c0_270, %c0_271] : memref<10x2x32x1xf32, #tpu.memory_space<vmem>>, vector<1x1x8x1xf32>
    %288 = vector.shape_cast %287 : vector<1x1x8x1xf32> to vector<8x1xf32>
    %c4_272 = arith.constant 4 : index
    %c1_273 = arith.constant 1 : index
    %c0_274 = arith.constant 0 : index
    %c0_275 = arith.constant 0 : index
    %289 = vector.load %arg2[%c4_272, %c1_273, %c0_274, %c0_275] : memref<10x2x32x1xf32, #tpu.memory_space<vmem>>, vector<1x1x8x1xf32>
    %290 = vector.shape_cast %289 : vector<1x1x8x1xf32> to vector<8x1xf32>
    %291 = vector.broadcast %288 : vector<8x1xf32> to vector<8x200xf32>
    %292 = arith.mulf %286, %291 : vector<8x200xf32>
    %293 = vector.broadcast %290 : vector<8x1xf32> to vector<8x200xf32>
    %294 = arith.addf %292, %293 : vector<8x200xf32>
    %cst_276 = arith.constant 0.000000e+00 : f32
    %295 = vector.broadcast %cst_276 : f32 to vector<8x200xf32>
    %296 = arith.maximumf %294, %295 : vector<8x200xf32>
    %c1_277 = arith.constant 1 : index
    %c0_278 = arith.constant 0 : index
    %c0_279 = arith.constant 0 : index
    %297 = vector.load %arg3[%c1_277, %c0_278, %c0_279] : memref<4x1x648xf32, #tpu.memory_space<vmem>>, vector<1x1x200xf32>
    %298 = vector.shape_cast %297 : vector<1x1x200xf32> to vector<1x200xf32>
    %299 = vector.broadcast %298 : vector<1x200xf32> to vector<8x200xf32>
    %300 = arith.mulf %296, %299 : vector<8x200xf32>
    %cst_280 = arith.constant 0.000000e+00 : f32
    %301 = vector.broadcast %cst_280 : f32 to vector<8x11xf32>
    %302 = tpu.concatenate %301, %300, %301 in 1 : vector<8x11xf32>, vector<8x200xf32>, vector<8x11xf32> -> vector<8x222xf32>
    %303 = arith.truncf %302 : vector<8x222xf32> to vector<8x222xbf16>
    %304 = vector.extract_strided_slice %303 {offsets = [0, 0], sizes = [8, 200], strides = [1, 1]} : vector<8x222xbf16> to vector<8x200xbf16>
    %c5_281 = arith.constant 5 : index
    %c0_282 = arith.constant 0 : index
    %c0_283 = arith.constant 0 : index
    %c0_284 = arith.constant 0 : index
    %305 = vector.load %arg1[%c5_281, %c0_282, %c0_283, %c0_284] : memref<10x9x32x32xbf16, #tpu.memory_space<vmem>>, vector<1x1x16x8xbf16>
    %306 = vector.shape_cast %305 : vector<1x1x16x8xbf16> to vector<16x8xbf16>
    %cst_285 = arith.constant dense<0.000000e+00> : vector<16x200xf32>
    %307 = tpu.matmul %306, %304, %cst_285 {dimension_numbers = #tpu.dot_dimension_numbers<[1], [0], [0], [1], [0, 0, 1, 1], [], []>} : vector<16x8xbf16>, vector<8x200xbf16>, vector<16x200xf32> -> vector<16x200xf32>
    %308 = vector.extract_strided_slice %303 {offsets = [0, 1], sizes = [8, 200], strides = [1, 1]} : vector<8x222xbf16> to vector<8x200xbf16>
    %c5_286 = arith.constant 5 : index
    %c1_287 = arith.constant 1 : index
    %c0_288 = arith.constant 0 : index
    %c0_289 = arith.constant 0 : index
    %309 = vector.load %arg1[%c5_286, %c1_287, %c0_288, %c0_289] : memref<10x9x32x32xbf16, #tpu.memory_space<vmem>>, vector<1x1x16x8xbf16>
    %310 = vector.shape_cast %309 : vector<1x1x16x8xbf16> to vector<16x8xbf16>
    %cst_290 = arith.constant dense<0.000000e+00> : vector<16x200xf32>
    %311 = tpu.matmul %310, %308, %cst_290 {dimension_numbers = #tpu.dot_dimension_numbers<[1], [0], [0], [1], [0, 0, 1, 1], [], []>} : vector<16x8xbf16>, vector<8x200xbf16>, vector<16x200xf32> -> vector<16x200xf32>
    %312 = arith.addf %307, %311 : vector<16x200xf32>
    %313 = vector.extract_strided_slice %303 {offsets = [0, 2], sizes = [8, 200], strides = [1, 1]} : vector<8x222xbf16> to vector<8x200xbf16>
    %c5_291 = arith.constant 5 : index
    %c2_292 = arith.constant 2 : index
    %c0_293 = arith.constant 0 : index
    %c0_294 = arith.constant 0 : index
    %314 = vector.load %arg1[%c5_291, %c2_292, %c0_293, %c0_294] : memref<10x9x32x32xbf16, #tpu.memory_space<vmem>>, vector<1x1x16x8xbf16>
    %315 = vector.shape_cast %314 : vector<1x1x16x8xbf16> to vector<16x8xbf16>
    %cst_295 = arith.constant dense<0.000000e+00> : vector<16x200xf32>
    %316 = tpu.matmul %315, %313, %cst_295 {dimension_numbers = #tpu.dot_dimension_numbers<[1], [0], [0], [1], [0, 0, 1, 1], [], []>} : vector<16x8xbf16>, vector<8x200xbf16>, vector<16x200xf32> -> vector<16x200xf32>
    %317 = arith.addf %312, %316 : vector<16x200xf32>
    %318 = vector.extract_strided_slice %303 {offsets = [0, 10], sizes = [8, 200], strides = [1, 1]} : vector<8x222xbf16> to vector<8x200xbf16>
    %c5_296 = arith.constant 5 : index
    %c3_297 = arith.constant 3 : index
    %c0_298 = arith.constant 0 : index
    %c0_299 = arith.constant 0 : index
    %319 = vector.load %arg1[%c5_296, %c3_297, %c0_298, %c0_299] : memref<10x9x32x32xbf16, #tpu.memory_space<vmem>>, vector<1x1x16x8xbf16>
    %320 = vector.shape_cast %319 : vector<1x1x16x8xbf16> to vector<16x8xbf16>
    %cst_300 = arith.constant dense<0.000000e+00> : vector<16x200xf32>
    %321 = tpu.matmul %320, %318, %cst_300 {dimension_numbers = #tpu.dot_dimension_numbers<[1], [0], [0], [1], [0, 0, 1, 1], [], []>} : vector<16x8xbf16>, vector<8x200xbf16>, vector<16x200xf32> -> vector<16x200xf32>
    %322 = arith.addf %317, %321 : vector<16x200xf32>
    %323 = vector.extract_strided_slice %303 {offsets = [0, 11], sizes = [8, 200], strides = [1, 1]} : vector<8x222xbf16> to vector<8x200xbf16>
    %c5_301 = arith.constant 5 : index
    %c4_302 = arith.constant 4 : index
    %c0_303 = arith.constant 0 : index
    %c0_304 = arith.constant 0 : index
    %324 = vector.load %arg1[%c5_301, %c4_302, %c0_303, %c0_304] : memref<10x9x32x32xbf16, #tpu.memory_space<vmem>>, vector<1x1x16x8xbf16>
    %325 = vector.shape_cast %324 : vector<1x1x16x8xbf16> to vector<16x8xbf16>
    %cst_305 = arith.constant dense<0.000000e+00> : vector<16x200xf32>
    %326 = tpu.matmul %325, %323, %cst_305 {dimension_numbers = #tpu.dot_dimension_numbers<[1], [0], [0], [1], [0, 0, 1, 1], [], []>} : vector<16x8xbf16>, vector<8x200xbf16>, vector<16x200xf32> -> vector<16x200xf32>
    %327 = arith.addf %322, %326 : vector<16x200xf32>
    %328 = vector.extract_strided_slice %303 {offsets = [0, 12], sizes = [8, 200], strides = [1, 1]} : vector<8x222xbf16> to vector<8x200xbf16>
    %c5_306 = arith.constant 5 : index
    %c5_307 = arith.constant 5 : index
    %c0_308 = arith.constant 0 : index
    %c0_309 = arith.constant 0 : index
    %329 = vector.load %arg1[%c5_306, %c5_307, %c0_308, %c0_309] : memref<10x9x32x32xbf16, #tpu.memory_space<vmem>>, vector<1x1x16x8xbf16>
    %330 = vector.shape_cast %329 : vector<1x1x16x8xbf16> to vector<16x8xbf16>
    %cst_310 = arith.constant dense<0.000000e+00> : vector<16x200xf32>
    %331 = tpu.matmul %330, %328, %cst_310 {dimension_numbers = #tpu.dot_dimension_numbers<[1], [0], [0], [1], [0, 0, 1, 1], [], []>} : vector<16x8xbf16>, vector<8x200xbf16>, vector<16x200xf32> -> vector<16x200xf32>
    %332 = arith.addf %327, %331 : vector<16x200xf32>
    %333 = vector.extract_strided_slice %303 {offsets = [0, 20], sizes = [8, 200], strides = [1, 1]} : vector<8x222xbf16> to vector<8x200xbf16>
    %c5_311 = arith.constant 5 : index
    %c6_312 = arith.constant 6 : index
    %c0_313 = arith.constant 0 : index
    %c0_314 = arith.constant 0 : index
    %334 = vector.load %arg1[%c5_311, %c6_312, %c0_313, %c0_314] : memref<10x9x32x32xbf16, #tpu.memory_space<vmem>>, vector<1x1x16x8xbf16>
    %335 = vector.shape_cast %334 : vector<1x1x16x8xbf16> to vector<16x8xbf16>
    %cst_315 = arith.constant dense<0.000000e+00> : vector<16x200xf32>
    %336 = tpu.matmul %335, %333, %cst_315 {dimension_numbers = #tpu.dot_dimension_numbers<[1], [0], [0], [1], [0, 0, 1, 1], [], []>} : vector<16x8xbf16>, vector<8x200xbf16>, vector<16x200xf32> -> vector<16x200xf32>
    %337 = arith.addf %332, %336 : vector<16x200xf32>
    %338 = vector.extract_strided_slice %303 {offsets = [0, 21], sizes = [8, 200], strides = [1, 1]} : vector<8x222xbf16> to vector<8x200xbf16>
    %c5_316 = arith.constant 5 : index
    %c7_317 = arith.constant 7 : index
    %c0_318 = arith.constant 0 : index
    %c0_319 = arith.constant 0 : index
    %339 = vector.load %arg1[%c5_316, %c7_317, %c0_318, %c0_319] : memref<10x9x32x32xbf16, #tpu.memory_space<vmem>>, vector<1x1x16x8xbf16>
    %340 = vector.shape_cast %339 : vector<1x1x16x8xbf16> to vector<16x8xbf16>
    %cst_320 = arith.constant dense<0.000000e+00> : vector<16x200xf32>
    %341 = tpu.matmul %340, %338, %cst_320 {dimension_numbers = #tpu.dot_dimension_numbers<[1], [0], [0], [1], [0, 0, 1, 1], [], []>} : vector<16x8xbf16>, vector<8x200xbf16>, vector<16x200xf32> -> vector<16x200xf32>
    %342 = arith.addf %337, %341 : vector<16x200xf32>
    %343 = vector.extract_strided_slice %303 {offsets = [0, 22], sizes = [8, 200], strides = [1, 1]} : vector<8x222xbf16> to vector<8x200xbf16>
    %c5_321 = arith.constant 5 : index
    %c8_322 = arith.constant 8 : index
    %c0_323 = arith.constant 0 : index
    %c0_324 = arith.constant 0 : index
    %344 = vector.load %arg1[%c5_321, %c8_322, %c0_323, %c0_324] : memref<10x9x32x32xbf16, #tpu.memory_space<vmem>>, vector<1x1x16x8xbf16>
    %345 = vector.shape_cast %344 : vector<1x1x16x8xbf16> to vector<16x8xbf16>
    %cst_325 = arith.constant dense<0.000000e+00> : vector<16x200xf32>
    %346 = tpu.matmul %345, %343, %cst_325 {dimension_numbers = #tpu.dot_dimension_numbers<[1], [0], [0], [1], [0, 0, 1, 1], [], []>} : vector<16x8xbf16>, vector<8x200xbf16>, vector<16x200xf32> -> vector<16x200xf32>
    %347 = arith.addf %342, %346 : vector<16x200xf32>
    %c5_326 = arith.constant 5 : index
    %c0_327 = arith.constant 0 : index
    %c0_328 = arith.constant 0 : index
    %c0_329 = arith.constant 0 : index
    %348 = vector.load %arg2[%c5_326, %c0_327, %c0_328, %c0_329] : memref<10x2x32x1xf32, #tpu.memory_space<vmem>>, vector<1x1x16x1xf32>
    %349 = vector.shape_cast %348 : vector<1x1x16x1xf32> to vector<16x1xf32>
    %c5_330 = arith.constant 5 : index
    %c1_331 = arith.constant 1 : index
    %c0_332 = arith.constant 0 : index
    %c0_333 = arith.constant 0 : index
    %350 = vector.load %arg2[%c5_330, %c1_331, %c0_332, %c0_333] : memref<10x2x32x1xf32, #tpu.memory_space<vmem>>, vector<1x1x16x1xf32>
    %351 = vector.shape_cast %350 : vector<1x1x16x1xf32> to vector<16x1xf32>
    %352 = vector.broadcast %349 : vector<16x1xf32> to vector<16x200xf32>
    %353 = arith.mulf %347, %352 : vector<16x200xf32>
    %354 = vector.broadcast %351 : vector<16x1xf32> to vector<16x200xf32>
    %355 = arith.addf %353, %354 : vector<16x200xf32>
    %cst_334 = arith.constant 0.000000e+00 : f32
    %356 = vector.broadcast %cst_334 : f32 to vector<16x200xf32>
    %357 = arith.maximumf %355, %356 : vector<16x200xf32>
    %358 = arith.truncf %357 : vector<16x200xf32> to vector<16x200xbf16>
    %c0_335 = arith.constant 0 : index
    %c0_336 = arith.constant 0 : index
    %359 = vector.load %arg5[%c0_335, %c0_336] : memref<200x72xbf16, #tpu.memory_space<vmem>>, vector<200x72xbf16>
    %cst_337 = arith.constant dense<0.000000e+00> : vector<16x72xf32>
    %360 = tpu.matmul %358, %359, %cst_337 {dimension_numbers = #tpu.dot_dimension_numbers<[1], [0], [0], [1], [0, 0, 1, 1], [], []>} : vector<16x200xbf16>, vector<200x72xbf16>, vector<16x72xf32> -> vector<16x72xf32>
    %cst_338 = arith.constant 0.000000e+00 : f32
    %361 = vector.broadcast %cst_338 : f32 to vector<16x7xf32>
    %362 = tpu.concatenate %361, %360, %361 in 1 : vector<16x7xf32>, vector<16x72xf32>, vector<16x7xf32> -> vector<16x86xf32>
    %363 = arith.truncf %362 : vector<16x86xf32> to vector<16x86xbf16>
    %364 = vector.extract_strided_slice %363 {offsets = [0, 0], sizes = [16, 72], strides = [1, 1]} : vector<16x86xbf16> to vector<16x72xbf16>
    %c6_339 = arith.constant 6 : index
    %c0_340 = arith.constant 0 : index
    %c0_341 = arith.constant 0 : index
    %c0_342 = arith.constant 0 : index
    %365 = vector.load %arg1[%c6_339, %c0_340, %c0_341, %c0_342] : memref<10x9x32x32xbf16, #tpu.memory_space<vmem>>, vector<1x1x16x16xbf16>
    %366 = vector.shape_cast %365 : vector<1x1x16x16xbf16> to vector<16x16xbf16>
    %cst_343 = arith.constant dense<0.000000e+00> : vector<16x72xf32>
    %367 = tpu.matmul %366, %364, %cst_343 {dimension_numbers = #tpu.dot_dimension_numbers<[1], [0], [0], [1], [0, 0, 1, 1], [], []>} : vector<16x16xbf16>, vector<16x72xbf16>, vector<16x72xf32> -> vector<16x72xf32>
    %368 = vector.extract_strided_slice %363 {offsets = [0, 1], sizes = [16, 72], strides = [1, 1]} : vector<16x86xbf16> to vector<16x72xbf16>
    %c6_344 = arith.constant 6 : index
    %c1_345 = arith.constant 1 : index
    %c0_346 = arith.constant 0 : index
    %c0_347 = arith.constant 0 : index
    %369 = vector.load %arg1[%c6_344, %c1_345, %c0_346, %c0_347] : memref<10x9x32x32xbf16, #tpu.memory_space<vmem>>, vector<1x1x16x16xbf16>
    %370 = vector.shape_cast %369 : vector<1x1x16x16xbf16> to vector<16x16xbf16>
    %cst_348 = arith.constant dense<0.000000e+00> : vector<16x72xf32>
    %371 = tpu.matmul %370, %368, %cst_348 {dimension_numbers = #tpu.dot_dimension_numbers<[1], [0], [0], [1], [0, 0, 1, 1], [], []>} : vector<16x16xbf16>, vector<16x72xbf16>, vector<16x72xf32> -> vector<16x72xf32>
    %372 = arith.addf %367, %371 : vector<16x72xf32>
    %373 = vector.extract_strided_slice %363 {offsets = [0, 2], sizes = [16, 72], strides = [1, 1]} : vector<16x86xbf16> to vector<16x72xbf16>
    %c6_349 = arith.constant 6 : index
    %c2_350 = arith.constant 2 : index
    %c0_351 = arith.constant 0 : index
    %c0_352 = arith.constant 0 : index
    %374 = vector.load %arg1[%c6_349, %c2_350, %c0_351, %c0_352] : memref<10x9x32x32xbf16, #tpu.memory_space<vmem>>, vector<1x1x16x16xbf16>
    %375 = vector.shape_cast %374 : vector<1x1x16x16xbf16> to vector<16x16xbf16>
    %cst_353 = arith.constant dense<0.000000e+00> : vector<16x72xf32>
    %376 = tpu.matmul %375, %373, %cst_353 {dimension_numbers = #tpu.dot_dimension_numbers<[1], [0], [0], [1], [0, 0, 1, 1], [], []>} : vector<16x16xbf16>, vector<16x72xbf16>, vector<16x72xf32> -> vector<16x72xf32>
    %377 = arith.addf %372, %376 : vector<16x72xf32>
    %378 = vector.extract_strided_slice %363 {offsets = [0, 6], sizes = [16, 72], strides = [1, 1]} : vector<16x86xbf16> to vector<16x72xbf16>
    %c6_354 = arith.constant 6 : index
    %c3_355 = arith.constant 3 : index
    %c0_356 = arith.constant 0 : index
    %c0_357 = arith.constant 0 : index
    %379 = vector.load %arg1[%c6_354, %c3_355, %c0_356, %c0_357] : memref<10x9x32x32xbf16, #tpu.memory_space<vmem>>, vector<1x1x16x16xbf16>
    %380 = vector.shape_cast %379 : vector<1x1x16x16xbf16> to vector<16x16xbf16>
    %cst_358 = arith.constant dense<0.000000e+00> : vector<16x72xf32>
    %381 = tpu.matmul %380, %378, %cst_358 {dimension_numbers = #tpu.dot_dimension_numbers<[1], [0], [0], [1], [0, 0, 1, 1], [], []>} : vector<16x16xbf16>, vector<16x72xbf16>, vector<16x72xf32> -> vector<16x72xf32>
    %382 = arith.addf %377, %381 : vector<16x72xf32>
    %383 = vector.extract_strided_slice %363 {offsets = [0, 7], sizes = [16, 72], strides = [1, 1]} : vector<16x86xbf16> to vector<16x72xbf16>
    %c6_359 = arith.constant 6 : index
    %c4_360 = arith.constant 4 : index
    %c0_361 = arith.constant 0 : index
    %c0_362 = arith.constant 0 : index
    %384 = vector.load %arg1[%c6_359, %c4_360, %c0_361, %c0_362] : memref<10x9x32x32xbf16, #tpu.memory_space<vmem>>, vector<1x1x16x16xbf16>
    %385 = vector.shape_cast %384 : vector<1x1x16x16xbf16> to vector<16x16xbf16>
    %cst_363 = arith.constant dense<0.000000e+00> : vector<16x72xf32>
    %386 = tpu.matmul %385, %383, %cst_363 {dimension_numbers = #tpu.dot_dimension_numbers<[1], [0], [0], [1], [0, 0, 1, 1], [], []>} : vector<16x16xbf16>, vector<16x72xbf16>, vector<16x72xf32> -> vector<16x72xf32>
    %387 = arith.addf %382, %386 : vector<16x72xf32>
    %388 = vector.extract_strided_slice %363 {offsets = [0, 8], sizes = [16, 72], strides = [1, 1]} : vector<16x86xbf16> to vector<16x72xbf16>
    %c6_364 = arith.constant 6 : index
    %c5_365 = arith.constant 5 : index
    %c0_366 = arith.constant 0 : index
    %c0_367 = arith.constant 0 : index
    %389 = vector.load %arg1[%c6_364, %c5_365, %c0_366, %c0_367] : memref<10x9x32x32xbf16, #tpu.memory_space<vmem>>, vector<1x1x16x16xbf16>
    %390 = vector.shape_cast %389 : vector<1x1x16x16xbf16> to vector<16x16xbf16>
    %cst_368 = arith.constant dense<0.000000e+00> : vector<16x72xf32>
    %391 = tpu.matmul %390, %388, %cst_368 {dimension_numbers = #tpu.dot_dimension_numbers<[1], [0], [0], [1], [0, 0, 1, 1], [], []>} : vector<16x16xbf16>, vector<16x72xbf16>, vector<16x72xf32> -> vector<16x72xf32>
    %392 = arith.addf %387, %391 : vector<16x72xf32>
    %393 = vector.extract_strided_slice %363 {offsets = [0, 12], sizes = [16, 72], strides = [1, 1]} : vector<16x86xbf16> to vector<16x72xbf16>
    %c6_369 = arith.constant 6 : index
    %c6_370 = arith.constant 6 : index
    %c0_371 = arith.constant 0 : index
    %c0_372 = arith.constant 0 : index
    %394 = vector.load %arg1[%c6_369, %c6_370, %c0_371, %c0_372] : memref<10x9x32x32xbf16, #tpu.memory_space<vmem>>, vector<1x1x16x16xbf16>
    %395 = vector.shape_cast %394 : vector<1x1x16x16xbf16> to vector<16x16xbf16>
    %cst_373 = arith.constant dense<0.000000e+00> : vector<16x72xf32>
    %396 = tpu.matmul %395, %393, %cst_373 {dimension_numbers = #tpu.dot_dimension_numbers<[1], [0], [0], [1], [0, 0, 1, 1], [], []>} : vector<16x16xbf16>, vector<16x72xbf16>, vector<16x72xf32> -> vector<16x72xf32>
    %397 = arith.addf %392, %396 : vector<16x72xf32>
    %398 = vector.extract_strided_slice %363 {offsets = [0, 13], sizes = [16, 72], strides = [1, 1]} : vector<16x86xbf16> to vector<16x72xbf16>
    %c6_374 = arith.constant 6 : index
    %c7_375 = arith.constant 7 : index
    %c0_376 = arith.constant 0 : index
    %c0_377 = arith.constant 0 : index
    %399 = vector.load %arg1[%c6_374, %c7_375, %c0_376, %c0_377] : memref<10x9x32x32xbf16, #tpu.memory_space<vmem>>, vector<1x1x16x16xbf16>
    %400 = vector.shape_cast %399 : vector<1x1x16x16xbf16> to vector<16x16xbf16>
    %cst_378 = arith.constant dense<0.000000e+00> : vector<16x72xf32>
    %401 = tpu.matmul %400, %398, %cst_378 {dimension_numbers = #tpu.dot_dimension_numbers<[1], [0], [0], [1], [0, 0, 1, 1], [], []>} : vector<16x16xbf16>, vector<16x72xbf16>, vector<16x72xf32> -> vector<16x72xf32>
    %402 = arith.addf %397, %401 : vector<16x72xf32>
    %403 = vector.extract_strided_slice %363 {offsets = [0, 14], sizes = [16, 72], strides = [1, 1]} : vector<16x86xbf16> to vector<16x72xbf16>
    %c6_379 = arith.constant 6 : index
    %c8_380 = arith.constant 8 : index
    %c0_381 = arith.constant 0 : index
    %c0_382 = arith.constant 0 : index
    %404 = vector.load %arg1[%c6_379, %c8_380, %c0_381, %c0_382] : memref<10x9x32x32xbf16, #tpu.memory_space<vmem>>, vector<1x1x16x16xbf16>
    %405 = vector.shape_cast %404 : vector<1x1x16x16xbf16> to vector<16x16xbf16>
    %cst_383 = arith.constant dense<0.000000e+00> : vector<16x72xf32>
    %406 = tpu.matmul %405, %403, %cst_383 {dimension_numbers = #tpu.dot_dimension_numbers<[1], [0], [0], [1], [0, 0, 1, 1], [], []>} : vector<16x16xbf16>, vector<16x72xbf16>, vector<16x72xf32> -> vector<16x72xf32>
    %407 = arith.addf %402, %406 : vector<16x72xf32>
    %c6_384 = arith.constant 6 : index
    %c0_385 = arith.constant 0 : index
    %c0_386 = arith.constant 0 : index
    %c0_387 = arith.constant 0 : index
    %408 = vector.load %arg2[%c6_384, %c0_385, %c0_386, %c0_387] : memref<10x2x32x1xf32, #tpu.memory_space<vmem>>, vector<1x1x16x1xf32>
    %409 = vector.shape_cast %408 : vector<1x1x16x1xf32> to vector<16x1xf32>
    %c6_388 = arith.constant 6 : index
    %c1_389 = arith.constant 1 : index
    %c0_390 = arith.constant 0 : index
    %c0_391 = arith.constant 0 : index
    %410 = vector.load %arg2[%c6_388, %c1_389, %c0_390, %c0_391] : memref<10x2x32x1xf32, #tpu.memory_space<vmem>>, vector<1x1x16x1xf32>
    %411 = vector.shape_cast %410 : vector<1x1x16x1xf32> to vector<16x1xf32>
    %412 = vector.broadcast %409 : vector<16x1xf32> to vector<16x72xf32>
    %413 = arith.mulf %407, %412 : vector<16x72xf32>
    %414 = vector.broadcast %411 : vector<16x1xf32> to vector<16x72xf32>
    %415 = arith.addf %413, %414 : vector<16x72xf32>
    %cst_392 = arith.constant 0.000000e+00 : f32
    %416 = vector.broadcast %cst_392 : f32 to vector<16x72xf32>
    %417 = arith.maximumf %415, %416 : vector<16x72xf32>
    %c2_393 = arith.constant 2 : index
    %c0_394 = arith.constant 0 : index
    %c0_395 = arith.constant 0 : index
    %418 = vector.load %arg3[%c2_393, %c0_394, %c0_395] : memref<4x1x648xf32, #tpu.memory_space<vmem>>, vector<1x1x72xf32>
    %419 = vector.shape_cast %418 : vector<1x1x72xf32> to vector<1x72xf32>
    %420 = vector.broadcast %419 : vector<1x72xf32> to vector<16x72xf32>
    %421 = arith.mulf %417, %420 : vector<16x72xf32>
    %cst_396 = arith.constant 0.000000e+00 : f32
    %422 = vector.broadcast %cst_396 : f32 to vector<16x7xf32>
    %423 = tpu.concatenate %422, %421, %422 in 1 : vector<16x7xf32>, vector<16x72xf32>, vector<16x7xf32> -> vector<16x86xf32>
    %424 = arith.truncf %423 : vector<16x86xf32> to vector<16x86xbf16>
    %425 = vector.extract_strided_slice %424 {offsets = [0, 0], sizes = [16, 72], strides = [1, 1]} : vector<16x86xbf16> to vector<16x72xbf16>
    %c7_397 = arith.constant 7 : index
    %c0_398 = arith.constant 0 : index
    %c0_399 = arith.constant 0 : index
    %c0_400 = arith.constant 0 : index
    %426 = vector.load %arg1[%c7_397, %c0_398, %c0_399, %c0_400] : memref<10x9x32x32xbf16, #tpu.memory_space<vmem>>, vector<1x1x16x16xbf16>
    %427 = vector.shape_cast %426 : vector<1x1x16x16xbf16> to vector<16x16xbf16>
    %cst_401 = arith.constant dense<0.000000e+00> : vector<16x72xf32>
    %428 = tpu.matmul %427, %425, %cst_401 {dimension_numbers = #tpu.dot_dimension_numbers<[1], [0], [0], [1], [0, 0, 1, 1], [], []>} : vector<16x16xbf16>, vector<16x72xbf16>, vector<16x72xf32> -> vector<16x72xf32>
    %429 = vector.extract_strided_slice %424 {offsets = [0, 1], sizes = [16, 72], strides = [1, 1]} : vector<16x86xbf16> to vector<16x72xbf16>
    %c7_402 = arith.constant 7 : index
    %c1_403 = arith.constant 1 : index
    %c0_404 = arith.constant 0 : index
    %c0_405 = arith.constant 0 : index
    %430 = vector.load %arg1[%c7_402, %c1_403, %c0_404, %c0_405] : memref<10x9x32x32xbf16, #tpu.memory_space<vmem>>, vector<1x1x16x16xbf16>
    %431 = vector.shape_cast %430 : vector<1x1x16x16xbf16> to vector<16x16xbf16>
    %cst_406 = arith.constant dense<0.000000e+00> : vector<16x72xf32>
    %432 = tpu.matmul %431, %429, %cst_406 {dimension_numbers = #tpu.dot_dimension_numbers<[1], [0], [0], [1], [0, 0, 1, 1], [], []>} : vector<16x16xbf16>, vector<16x72xbf16>, vector<16x72xf32> -> vector<16x72xf32>
    %433 = arith.addf %428, %432 : vector<16x72xf32>
    %434 = vector.extract_strided_slice %424 {offsets = [0, 2], sizes = [16, 72], strides = [1, 1]} : vector<16x86xbf16> to vector<16x72xbf16>
    %c7_407 = arith.constant 7 : index
    %c2_408 = arith.constant 2 : index
    %c0_409 = arith.constant 0 : index
    %c0_410 = arith.constant 0 : index
    %435 = vector.load %arg1[%c7_407, %c2_408, %c0_409, %c0_410] : memref<10x9x32x32xbf16, #tpu.memory_space<vmem>>, vector<1x1x16x16xbf16>
    %436 = vector.shape_cast %435 : vector<1x1x16x16xbf16> to vector<16x16xbf16>
    %cst_411 = arith.constant dense<0.000000e+00> : vector<16x72xf32>
    %437 = tpu.matmul %436, %434, %cst_411 {dimension_numbers = #tpu.dot_dimension_numbers<[1], [0], [0], [1], [0, 0, 1, 1], [], []>} : vector<16x16xbf16>, vector<16x72xbf16>, vector<16x72xf32> -> vector<16x72xf32>
    %438 = arith.addf %433, %437 : vector<16x72xf32>
    %439 = vector.extract_strided_slice %424 {offsets = [0, 6], sizes = [16, 72], strides = [1, 1]} : vector<16x86xbf16> to vector<16x72xbf16>
    %c7_412 = arith.constant 7 : index
    %c3_413 = arith.constant 3 : index
    %c0_414 = arith.constant 0 : index
    %c0_415 = arith.constant 0 : index
    %440 = vector.load %arg1[%c7_412, %c3_413, %c0_414, %c0_415] : memref<10x9x32x32xbf16, #tpu.memory_space<vmem>>, vector<1x1x16x16xbf16>
    %441 = vector.shape_cast %440 : vector<1x1x16x16xbf16> to vector<16x16xbf16>
    %cst_416 = arith.constant dense<0.000000e+00> : vector<16x72xf32>
    %442 = tpu.matmul %441, %439, %cst_416 {dimension_numbers = #tpu.dot_dimension_numbers<[1], [0], [0], [1], [0, 0, 1, 1], [], []>} : vector<16x16xbf16>, vector<16x72xbf16>, vector<16x72xf32> -> vector<16x72xf32>
    %443 = arith.addf %438, %442 : vector<16x72xf32>
    %444 = vector.extract_strided_slice %424 {offsets = [0, 7], sizes = [16, 72], strides = [1, 1]} : vector<16x86xbf16> to vector<16x72xbf16>
    %c7_417 = arith.constant 7 : index
    %c4_418 = arith.constant 4 : index
    %c0_419 = arith.constant 0 : index
    %c0_420 = arith.constant 0 : index
    %445 = vector.load %arg1[%c7_417, %c4_418, %c0_419, %c0_420] : memref<10x9x32x32xbf16, #tpu.memory_space<vmem>>, vector<1x1x16x16xbf16>
    %446 = vector.shape_cast %445 : vector<1x1x16x16xbf16> to vector<16x16xbf16>
    %cst_421 = arith.constant dense<0.000000e+00> : vector<16x72xf32>
    %447 = tpu.matmul %446, %444, %cst_421 {dimension_numbers = #tpu.dot_dimension_numbers<[1], [0], [0], [1], [0, 0, 1, 1], [], []>} : vector<16x16xbf16>, vector<16x72xbf16>, vector<16x72xf32> -> vector<16x72xf32>
    %448 = arith.addf %443, %447 : vector<16x72xf32>
    %449 = vector.extract_strided_slice %424 {offsets = [0, 8], sizes = [16, 72], strides = [1, 1]} : vector<16x86xbf16> to vector<16x72xbf16>
    %c7_422 = arith.constant 7 : index
    %c5_423 = arith.constant 5 : index
    %c0_424 = arith.constant 0 : index
    %c0_425 = arith.constant 0 : index
    %450 = vector.load %arg1[%c7_422, %c5_423, %c0_424, %c0_425] : memref<10x9x32x32xbf16, #tpu.memory_space<vmem>>, vector<1x1x16x16xbf16>
    %451 = vector.shape_cast %450 : vector<1x1x16x16xbf16> to vector<16x16xbf16>
    %cst_426 = arith.constant dense<0.000000e+00> : vector<16x72xf32>
    %452 = tpu.matmul %451, %449, %cst_426 {dimension_numbers = #tpu.dot_dimension_numbers<[1], [0], [0], [1], [0, 0, 1, 1], [], []>} : vector<16x16xbf16>, vector<16x72xbf16>, vector<16x72xf32> -> vector<16x72xf32>
    %453 = arith.addf %448, %452 : vector<16x72xf32>
    %454 = vector.extract_strided_slice %424 {offsets = [0, 12], sizes = [16, 72], strides = [1, 1]} : vector<16x86xbf16> to vector<16x72xbf16>
    %c7_427 = arith.constant 7 : index
    %c6_428 = arith.constant 6 : index
    %c0_429 = arith.constant 0 : index
    %c0_430 = arith.constant 0 : index
    %455 = vector.load %arg1[%c7_427, %c6_428, %c0_429, %c0_430] : memref<10x9x32x32xbf16, #tpu.memory_space<vmem>>, vector<1x1x16x16xbf16>
    %456 = vector.shape_cast %455 : vector<1x1x16x16xbf16> to vector<16x16xbf16>
    %cst_431 = arith.constant dense<0.000000e+00> : vector<16x72xf32>
    %457 = tpu.matmul %456, %454, %cst_431 {dimension_numbers = #tpu.dot_dimension_numbers<[1], [0], [0], [1], [0, 0, 1, 1], [], []>} : vector<16x16xbf16>, vector<16x72xbf16>, vector<16x72xf32> -> vector<16x72xf32>
    %458 = arith.addf %453, %457 : vector<16x72xf32>
    %459 = vector.extract_strided_slice %424 {offsets = [0, 13], sizes = [16, 72], strides = [1, 1]} : vector<16x86xbf16> to vector<16x72xbf16>
    %c7_432 = arith.constant 7 : index
    %c7_433 = arith.constant 7 : index
    %c0_434 = arith.constant 0 : index
    %c0_435 = arith.constant 0 : index
    %460 = vector.load %arg1[%c7_432, %c7_433, %c0_434, %c0_435] : memref<10x9x32x32xbf16, #tpu.memory_space<vmem>>, vector<1x1x16x16xbf16>
    %461 = vector.shape_cast %460 : vector<1x1x16x16xbf16> to vector<16x16xbf16>
    %cst_436 = arith.constant dense<0.000000e+00> : vector<16x72xf32>
    %462 = tpu.matmul %461, %459, %cst_436 {dimension_numbers = #tpu.dot_dimension_numbers<[1], [0], [0], [1], [0, 0, 1, 1], [], []>} : vector<16x16xbf16>, vector<16x72xbf16>, vector<16x72xf32> -> vector<16x72xf32>
    %463 = arith.addf %458, %462 : vector<16x72xf32>
    %464 = vector.extract_strided_slice %424 {offsets = [0, 14], sizes = [16, 72], strides = [1, 1]} : vector<16x86xbf16> to vector<16x72xbf16>
    %c7_437 = arith.constant 7 : index
    %c8_438 = arith.constant 8 : index
    %c0_439 = arith.constant 0 : index
    %c0_440 = arith.constant 0 : index
    %465 = vector.load %arg1[%c7_437, %c8_438, %c0_439, %c0_440] : memref<10x9x32x32xbf16, #tpu.memory_space<vmem>>, vector<1x1x16x16xbf16>
    %466 = vector.shape_cast %465 : vector<1x1x16x16xbf16> to vector<16x16xbf16>
    %cst_441 = arith.constant dense<0.000000e+00> : vector<16x72xf32>
    %467 = tpu.matmul %466, %464, %cst_441 {dimension_numbers = #tpu.dot_dimension_numbers<[1], [0], [0], [1], [0, 0, 1, 1], [], []>} : vector<16x16xbf16>, vector<16x72xbf16>, vector<16x72xf32> -> vector<16x72xf32>
    %468 = arith.addf %463, %467 : vector<16x72xf32>
    %c7_442 = arith.constant 7 : index
    %c0_443 = arith.constant 0 : index
    %c0_444 = arith.constant 0 : index
    %c0_445 = arith.constant 0 : index
    %469 = vector.load %arg2[%c7_442, %c0_443, %c0_444, %c0_445] : memref<10x2x32x1xf32, #tpu.memory_space<vmem>>, vector<1x1x16x1xf32>
    %470 = vector.shape_cast %469 : vector<1x1x16x1xf32> to vector<16x1xf32>
    %c7_446 = arith.constant 7 : index
    %c1_447 = arith.constant 1 : index
    %c0_448 = arith.constant 0 : index
    %c0_449 = arith.constant 0 : index
    %471 = vector.load %arg2[%c7_446, %c1_447, %c0_448, %c0_449] : memref<10x2x32x1xf32, #tpu.memory_space<vmem>>, vector<1x1x16x1xf32>
    %472 = vector.shape_cast %471 : vector<1x1x16x1xf32> to vector<16x1xf32>
    %473 = vector.broadcast %470 : vector<16x1xf32> to vector<16x72xf32>
    %474 = arith.mulf %468, %473 : vector<16x72xf32>
    %475 = vector.broadcast %472 : vector<16x1xf32> to vector<16x72xf32>
    %476 = arith.addf %474, %475 : vector<16x72xf32>
    %cst_450 = arith.constant 0.000000e+00 : f32
    %477 = vector.broadcast %cst_450 : f32 to vector<16x72xf32>
    %478 = arith.maximumf %476, %477 : vector<16x72xf32>
    %c2_451 = arith.constant 2 : index
    %c0_452 = arith.constant 0 : index
    %c0_453 = arith.constant 0 : index
    %479 = vector.load %arg3[%c2_451, %c0_452, %c0_453] : memref<4x1x648xf32, #tpu.memory_space<vmem>>, vector<1x1x72xf32>
    %480 = vector.shape_cast %479 : vector<1x1x72xf32> to vector<1x72xf32>
    %481 = vector.broadcast %480 : vector<1x72xf32> to vector<16x72xf32>
    %482 = arith.mulf %478, %481 : vector<16x72xf32>
    %cst_454 = arith.constant 0.000000e+00 : f32
    %483 = vector.broadcast %cst_454 : f32 to vector<16x7xf32>
    %484 = tpu.concatenate %483, %482, %483 in 1 : vector<16x7xf32>, vector<16x72xf32>, vector<16x7xf32> -> vector<16x86xf32>
    %485 = arith.truncf %484 : vector<16x86xf32> to vector<16x86xbf16>
    %486 = vector.extract_strided_slice %485 {offsets = [0, 0], sizes = [16, 72], strides = [1, 1]} : vector<16x86xbf16> to vector<16x72xbf16>
    %c8_455 = arith.constant 8 : index
    %c0_456 = arith.constant 0 : index
    %c0_457 = arith.constant 0 : index
    %c0_458 = arith.constant 0 : index
    %487 = vector.load %arg1[%c8_455, %c0_456, %c0_457, %c0_458] : memref<10x9x32x32xbf16, #tpu.memory_space<vmem>>, vector<1x1x32x16xbf16>
    %488 = vector.shape_cast %487 : vector<1x1x32x16xbf16> to vector<32x16xbf16>
    %cst_459 = arith.constant dense<0.000000e+00> : vector<32x72xf32>
    %489 = tpu.matmul %488, %486, %cst_459 {dimension_numbers = #tpu.dot_dimension_numbers<[1], [0], [0], [1], [0, 0, 1, 1], [], []>} : vector<32x16xbf16>, vector<16x72xbf16>, vector<32x72xf32> -> vector<32x72xf32>
    %490 = vector.extract_strided_slice %485 {offsets = [0, 1], sizes = [16, 72], strides = [1, 1]} : vector<16x86xbf16> to vector<16x72xbf16>
    %c8_460 = arith.constant 8 : index
    %c1_461 = arith.constant 1 : index
    %c0_462 = arith.constant 0 : index
    %c0_463 = arith.constant 0 : index
    %491 = vector.load %arg1[%c8_460, %c1_461, %c0_462, %c0_463] : memref<10x9x32x32xbf16, #tpu.memory_space<vmem>>, vector<1x1x32x16xbf16>
    %492 = vector.shape_cast %491 : vector<1x1x32x16xbf16> to vector<32x16xbf16>
    %cst_464 = arith.constant dense<0.000000e+00> : vector<32x72xf32>
    %493 = tpu.matmul %492, %490, %cst_464 {dimension_numbers = #tpu.dot_dimension_numbers<[1], [0], [0], [1], [0, 0, 1, 1], [], []>} : vector<32x16xbf16>, vector<16x72xbf16>, vector<32x72xf32> -> vector<32x72xf32>
    %494 = arith.addf %489, %493 : vector<32x72xf32>
    %495 = vector.extract_strided_slice %485 {offsets = [0, 2], sizes = [16, 72], strides = [1, 1]} : vector<16x86xbf16> to vector<16x72xbf16>
    %c8_465 = arith.constant 8 : index
    %c2_466 = arith.constant 2 : index
    %c0_467 = arith.constant 0 : index
    %c0_468 = arith.constant 0 : index
    %496 = vector.load %arg1[%c8_465, %c2_466, %c0_467, %c0_468] : memref<10x9x32x32xbf16, #tpu.memory_space<vmem>>, vector<1x1x32x16xbf16>
    %497 = vector.shape_cast %496 : vector<1x1x32x16xbf16> to vector<32x16xbf16>
    %cst_469 = arith.constant dense<0.000000e+00> : vector<32x72xf32>
    %498 = tpu.matmul %497, %495, %cst_469 {dimension_numbers = #tpu.dot_dimension_numbers<[1], [0], [0], [1], [0, 0, 1, 1], [], []>} : vector<32x16xbf16>, vector<16x72xbf16>, vector<32x72xf32> -> vector<32x72xf32>
    %499 = arith.addf %494, %498 : vector<32x72xf32>
    %500 = vector.extract_strided_slice %485 {offsets = [0, 6], sizes = [16, 72], strides = [1, 1]} : vector<16x86xbf16> to vector<16x72xbf16>
    %c8_470 = arith.constant 8 : index
    %c3_471 = arith.constant 3 : index
    %c0_472 = arith.constant 0 : index
    %c0_473 = arith.constant 0 : index
    %501 = vector.load %arg1[%c8_470, %c3_471, %c0_472, %c0_473] : memref<10x9x32x32xbf16, #tpu.memory_space<vmem>>, vector<1x1x32x16xbf16>
    %502 = vector.shape_cast %501 : vector<1x1x32x16xbf16> to vector<32x16xbf16>
    %cst_474 = arith.constant dense<0.000000e+00> : vector<32x72xf32>
    %503 = tpu.matmul %502, %500, %cst_474 {dimension_numbers = #tpu.dot_dimension_numbers<[1], [0], [0], [1], [0, 0, 1, 1], [], []>} : vector<32x16xbf16>, vector<16x72xbf16>, vector<32x72xf32> -> vector<32x72xf32>
    %504 = arith.addf %499, %503 : vector<32x72xf32>
    %505 = vector.extract_strided_slice %485 {offsets = [0, 7], sizes = [16, 72], strides = [1, 1]} : vector<16x86xbf16> to vector<16x72xbf16>
    %c8_475 = arith.constant 8 : index
    %c4_476 = arith.constant 4 : index
    %c0_477 = arith.constant 0 : index
    %c0_478 = arith.constant 0 : index
    %506 = vector.load %arg1[%c8_475, %c4_476, %c0_477, %c0_478] : memref<10x9x32x32xbf16, #tpu.memory_space<vmem>>, vector<1x1x32x16xbf16>
    %507 = vector.shape_cast %506 : vector<1x1x32x16xbf16> to vector<32x16xbf16>
    %cst_479 = arith.constant dense<0.000000e+00> : vector<32x72xf32>
    %508 = tpu.matmul %507, %505, %cst_479 {dimension_numbers = #tpu.dot_dimension_numbers<[1], [0], [0], [1], [0, 0, 1, 1], [], []>} : vector<32x16xbf16>, vector<16x72xbf16>, vector<32x72xf32> -> vector<32x72xf32>
    %509 = arith.addf %504, %508 : vector<32x72xf32>
    %510 = vector.extract_strided_slice %485 {offsets = [0, 8], sizes = [16, 72], strides = [1, 1]} : vector<16x86xbf16> to vector<16x72xbf16>
    %c8_480 = arith.constant 8 : index
    %c5_481 = arith.constant 5 : index
    %c0_482 = arith.constant 0 : index
    %c0_483 = arith.constant 0 : index
    %511 = vector.load %arg1[%c8_480, %c5_481, %c0_482, %c0_483] : memref<10x9x32x32xbf16, #tpu.memory_space<vmem>>, vector<1x1x32x16xbf16>
    %512 = vector.shape_cast %511 : vector<1x1x32x16xbf16> to vector<32x16xbf16>
    %cst_484 = arith.constant dense<0.000000e+00> : vector<32x72xf32>
    %513 = tpu.matmul %512, %510, %cst_484 {dimension_numbers = #tpu.dot_dimension_numbers<[1], [0], [0], [1], [0, 0, 1, 1], [], []>} : vector<32x16xbf16>, vector<16x72xbf16>, vector<32x72xf32> -> vector<32x72xf32>
    %514 = arith.addf %509, %513 : vector<32x72xf32>
    %515 = vector.extract_strided_slice %485 {offsets = [0, 12], sizes = [16, 72], strides = [1, 1]} : vector<16x86xbf16> to vector<16x72xbf16>
    %c8_485 = arith.constant 8 : index
    %c6_486 = arith.constant 6 : index
    %c0_487 = arith.constant 0 : index
    %c0_488 = arith.constant 0 : index
    %516 = vector.load %arg1[%c8_485, %c6_486, %c0_487, %c0_488] : memref<10x9x32x32xbf16, #tpu.memory_space<vmem>>, vector<1x1x32x16xbf16>
    %517 = vector.shape_cast %516 : vector<1x1x32x16xbf16> to vector<32x16xbf16>
    %cst_489 = arith.constant dense<0.000000e+00> : vector<32x72xf32>
    %518 = tpu.matmul %517, %515, %cst_489 {dimension_numbers = #tpu.dot_dimension_numbers<[1], [0], [0], [1], [0, 0, 1, 1], [], []>} : vector<32x16xbf16>, vector<16x72xbf16>, vector<32x72xf32> -> vector<32x72xf32>
    %519 = arith.addf %514, %518 : vector<32x72xf32>
    %520 = vector.extract_strided_slice %485 {offsets = [0, 13], sizes = [16, 72], strides = [1, 1]} : vector<16x86xbf16> to vector<16x72xbf16>
    %c8_490 = arith.constant 8 : index
    %c7_491 = arith.constant 7 : index
    %c0_492 = arith.constant 0 : index
    %c0_493 = arith.constant 0 : index
    %521 = vector.load %arg1[%c8_490, %c7_491, %c0_492, %c0_493] : memref<10x9x32x32xbf16, #tpu.memory_space<vmem>>, vector<1x1x32x16xbf16>
    %522 = vector.shape_cast %521 : vector<1x1x32x16xbf16> to vector<32x16xbf16>
    %cst_494 = arith.constant dense<0.000000e+00> : vector<32x72xf32>
    %523 = tpu.matmul %522, %520, %cst_494 {dimension_numbers = #tpu.dot_dimension_numbers<[1], [0], [0], [1], [0, 0, 1, 1], [], []>} : vector<32x16xbf16>, vector<16x72xbf16>, vector<32x72xf32> -> vector<32x72xf32>
    %524 = arith.addf %519, %523 : vector<32x72xf32>
    %525 = vector.extract_strided_slice %485 {offsets = [0, 14], sizes = [16, 72], strides = [1, 1]} : vector<16x86xbf16> to vector<16x72xbf16>
    %c8_495 = arith.constant 8 : index
    %c8_496 = arith.constant 8 : index
    %c0_497 = arith.constant 0 : index
    %c0_498 = arith.constant 0 : index
    %526 = vector.load %arg1[%c8_495, %c8_496, %c0_497, %c0_498] : memref<10x9x32x32xbf16, #tpu.memory_space<vmem>>, vector<1x1x32x16xbf16>
    %527 = vector.shape_cast %526 : vector<1x1x32x16xbf16> to vector<32x16xbf16>
    %cst_499 = arith.constant dense<0.000000e+00> : vector<32x72xf32>
    %528 = tpu.matmul %527, %525, %cst_499 {dimension_numbers = #tpu.dot_dimension_numbers<[1], [0], [0], [1], [0, 0, 1, 1], [], []>} : vector<32x16xbf16>, vector<16x72xbf16>, vector<32x72xf32> -> vector<32x72xf32>
    %529 = arith.addf %524, %528 : vector<32x72xf32>
    %c8_500 = arith.constant 8 : index
    %c0_501 = arith.constant 0 : index
    %c0_502 = arith.constant 0 : index
    %c0_503 = arith.constant 0 : index
    %530 = vector.load %arg2[%c8_500, %c0_501, %c0_502, %c0_503] : memref<10x2x32x1xf32, #tpu.memory_space<vmem>>, vector<1x1x32x1xf32>
    %531 = vector.shape_cast %530 : vector<1x1x32x1xf32> to vector<32x1xf32>
    %c8_504 = arith.constant 8 : index
    %c1_505 = arith.constant 1 : index
    %c0_506 = arith.constant 0 : index
    %c0_507 = arith.constant 0 : index
    %532 = vector.load %arg2[%c8_504, %c1_505, %c0_506, %c0_507] : memref<10x2x32x1xf32, #tpu.memory_space<vmem>>, vector<1x1x32x1xf32>
    %533 = vector.shape_cast %532 : vector<1x1x32x1xf32> to vector<32x1xf32>
    %534 = vector.broadcast %531 : vector<32x1xf32> to vector<32x72xf32>
    %535 = arith.mulf %529, %534 : vector<32x72xf32>
    %536 = vector.broadcast %533 : vector<32x1xf32> to vector<32x72xf32>
    %537 = arith.addf %535, %536 : vector<32x72xf32>
    %cst_508 = arith.constant 0.000000e+00 : f32
    %538 = vector.broadcast %cst_508 : f32 to vector<32x72xf32>
    %539 = arith.maximumf %537, %538 : vector<32x72xf32>
    %540 = arith.truncf %539 : vector<32x72xf32> to vector<32x72xbf16>
    %c0_509 = arith.constant 0 : index
    %c0_510 = arith.constant 0 : index
    %541 = vector.load %arg6[%c0_509, %c0_510] : memref<72x32xbf16, #tpu.memory_space<vmem>>, vector<72x32xbf16>
    %cst_511 = arith.constant dense<0.000000e+00> : vector<32x32xf32>
    %542 = tpu.matmul %540, %541, %cst_511 {dimension_numbers = #tpu.dot_dimension_numbers<[1], [0], [0], [1], [0, 0, 1, 1], [], []>} : vector<32x72xbf16>, vector<72x32xbf16>, vector<32x32xf32> -> vector<32x32xf32>
    %cst_512 = arith.constant 0.000000e+00 : f32
    %543 = vector.broadcast %cst_512 : f32 to vector<32x5xf32>
    %544 = tpu.concatenate %543, %542, %543 in 1 : vector<32x5xf32>, vector<32x32xf32>, vector<32x5xf32> -> vector<32x42xf32>
    %545 = arith.truncf %544 : vector<32x42xf32> to vector<32x42xbf16>
    %546 = vector.extract_strided_slice %545 {offsets = [0, 0], sizes = [32, 32], strides = [1, 1]} : vector<32x42xbf16> to vector<32x32xbf16>
    %c9 = arith.constant 9 : index
    %c0_513 = arith.constant 0 : index
    %c0_514 = arith.constant 0 : index
    %c0_515 = arith.constant 0 : index
    %547 = vector.load %arg1[%c9, %c0_513, %c0_514, %c0_515] : memref<10x9x32x32xbf16, #tpu.memory_space<vmem>>, vector<1x1x32x32xbf16>
    %548 = vector.shape_cast %547 : vector<1x1x32x32xbf16> to vector<32x32xbf16>
    %cst_516 = arith.constant dense<0.000000e+00> : vector<32x32xf32>
    %549 = tpu.matmul %548, %546, %cst_516 {dimension_numbers = #tpu.dot_dimension_numbers<[1], [0], [0], [1], [0, 0, 1, 1], [], []>} : vector<32x32xbf16>, vector<32x32xbf16>, vector<32x32xf32> -> vector<32x32xf32>
    %550 = vector.extract_strided_slice %545 {offsets = [0, 1], sizes = [32, 32], strides = [1, 1]} : vector<32x42xbf16> to vector<32x32xbf16>
    %c9_517 = arith.constant 9 : index
    %c1_518 = arith.constant 1 : index
    %c0_519 = arith.constant 0 : index
    %c0_520 = arith.constant 0 : index
    %551 = vector.load %arg1[%c9_517, %c1_518, %c0_519, %c0_520] : memref<10x9x32x32xbf16, #tpu.memory_space<vmem>>, vector<1x1x32x32xbf16>
    %552 = vector.shape_cast %551 : vector<1x1x32x32xbf16> to vector<32x32xbf16>
    %cst_521 = arith.constant dense<0.000000e+00> : vector<32x32xf32>
    %553 = tpu.matmul %552, %550, %cst_521 {dimension_numbers = #tpu.dot_dimension_numbers<[1], [0], [0], [1], [0, 0, 1, 1], [], []>} : vector<32x32xbf16>, vector<32x32xbf16>, vector<32x32xf32> -> vector<32x32xf32>
    %554 = arith.addf %549, %553 : vector<32x32xf32>
    %555 = vector.extract_strided_slice %545 {offsets = [0, 2], sizes = [32, 32], strides = [1, 1]} : vector<32x42xbf16> to vector<32x32xbf16>
    %c9_522 = arith.constant 9 : index
    %c2_523 = arith.constant 2 : index
    %c0_524 = arith.constant 0 : index
    %c0_525 = arith.constant 0 : index
    %556 = vector.load %arg1[%c9_522, %c2_523, %c0_524, %c0_525] : memref<10x9x32x32xbf16, #tpu.memory_space<vmem>>, vector<1x1x32x32xbf16>
    %557 = vector.shape_cast %556 : vector<1x1x32x32xbf16> to vector<32x32xbf16>
    %cst_526 = arith.constant dense<0.000000e+00> : vector<32x32xf32>
    %558 = tpu.matmul %557, %555, %cst_526 {dimension_numbers = #tpu.dot_dimension_numbers<[1], [0], [0], [1], [0, 0, 1, 1], [], []>} : vector<32x32xbf16>, vector<32x32xbf16>, vector<32x32xf32> -> vector<32x32xf32>
    %559 = arith.addf %554, %558 : vector<32x32xf32>
    %560 = vector.extract_strided_slice %545 {offsets = [0, 4], sizes = [32, 32], strides = [1, 1]} : vector<32x42xbf16> to vector<32x32xbf16>
    %c9_527 = arith.constant 9 : index
    %c3_528 = arith.constant 3 : index
    %c0_529 = arith.constant 0 : index
    %c0_530 = arith.constant 0 : index
    %561 = vector.load %arg1[%c9_527, %c3_528, %c0_529, %c0_530] : memref<10x9x32x32xbf16, #tpu.memory_space<vmem>>, vector<1x1x32x32xbf16>
    %562 = vector.shape_cast %561 : vector<1x1x32x32xbf16> to vector<32x32xbf16>
    %cst_531 = arith.constant dense<0.000000e+00> : vector<32x32xf32>
    %563 = tpu.matmul %562, %560, %cst_531 {dimension_numbers = #tpu.dot_dimension_numbers<[1], [0], [0], [1], [0, 0, 1, 1], [], []>} : vector<32x32xbf16>, vector<32x32xbf16>, vector<32x32xf32> -> vector<32x32xf32>
    %564 = arith.addf %559, %563 : vector<32x32xf32>
    %565 = vector.extract_strided_slice %545 {offsets = [0, 5], sizes = [32, 32], strides = [1, 1]} : vector<32x42xbf16> to vector<32x32xbf16>
    %c9_532 = arith.constant 9 : index
    %c4_533 = arith.constant 4 : index
    %c0_534 = arith.constant 0 : index
    %c0_535 = arith.constant 0 : index
    %566 = vector.load %arg1[%c9_532, %c4_533, %c0_534, %c0_535] : memref<10x9x32x32xbf16, #tpu.memory_space<vmem>>, vector<1x1x32x32xbf16>
    %567 = vector.shape_cast %566 : vector<1x1x32x32xbf16> to vector<32x32xbf16>
    %cst_536 = arith.constant dense<0.000000e+00> : vector<32x32xf32>
    %568 = tpu.matmul %567, %565, %cst_536 {dimension_numbers = #tpu.dot_dimension_numbers<[1], [0], [0], [1], [0, 0, 1, 1], [], []>} : vector<32x32xbf16>, vector<32x32xbf16>, vector<32x32xf32> -> vector<32x32xf32>
    %569 = arith.addf %564, %568 : vector<32x32xf32>
    %570 = vector.extract_strided_slice %545 {offsets = [0, 6], sizes = [32, 32], strides = [1, 1]} : vector<32x42xbf16> to vector<32x32xbf16>
    %c9_537 = arith.constant 9 : index
    %c5_538 = arith.constant 5 : index
    %c0_539 = arith.constant 0 : index
    %c0_540 = arith.constant 0 : index
    %571 = vector.load %arg1[%c9_537, %c5_538, %c0_539, %c0_540] : memref<10x9x32x32xbf16, #tpu.memory_space<vmem>>, vector<1x1x32x32xbf16>
    %572 = vector.shape_cast %571 : vector<1x1x32x32xbf16> to vector<32x32xbf16>
    %cst_541 = arith.constant dense<0.000000e+00> : vector<32x32xf32>
    %573 = tpu.matmul %572, %570, %cst_541 {dimension_numbers = #tpu.dot_dimension_numbers<[1], [0], [0], [1], [0, 0, 1, 1], [], []>} : vector<32x32xbf16>, vector<32x32xbf16>, vector<32x32xf32> -> vector<32x32xf32>
    %574 = arith.addf %569, %573 : vector<32x32xf32>
    %575 = vector.extract_strided_slice %545 {offsets = [0, 8], sizes = [32, 32], strides = [1, 1]} : vector<32x42xbf16> to vector<32x32xbf16>
    %c9_542 = arith.constant 9 : index
    %c6_543 = arith.constant 6 : index
    %c0_544 = arith.constant 0 : index
    %c0_545 = arith.constant 0 : index
    %576 = vector.load %arg1[%c9_542, %c6_543, %c0_544, %c0_545] : memref<10x9x32x32xbf16, #tpu.memory_space<vmem>>, vector<1x1x32x32xbf16>
    %577 = vector.shape_cast %576 : vector<1x1x32x32xbf16> to vector<32x32xbf16>
    %cst_546 = arith.constant dense<0.000000e+00> : vector<32x32xf32>
    %578 = tpu.matmul %577, %575, %cst_546 {dimension_numbers = #tpu.dot_dimension_numbers<[1], [0], [0], [1], [0, 0, 1, 1], [], []>} : vector<32x32xbf16>, vector<32x32xbf16>, vector<32x32xf32> -> vector<32x32xf32>
    %579 = arith.addf %574, %578 : vector<32x32xf32>
    %580 = vector.extract_strided_slice %545 {offsets = [0, 9], sizes = [32, 32], strides = [1, 1]} : vector<32x42xbf16> to vector<32x32xbf16>
    %c9_547 = arith.constant 9 : index
    %c7_548 = arith.constant 7 : index
    %c0_549 = arith.constant 0 : index
    %c0_550 = arith.constant 0 : index
    %581 = vector.load %arg1[%c9_547, %c7_548, %c0_549, %c0_550] : memref<10x9x32x32xbf16, #tpu.memory_space<vmem>>, vector<1x1x32x32xbf16>
    %582 = vector.shape_cast %581 : vector<1x1x32x32xbf16> to vector<32x32xbf16>
    %cst_551 = arith.constant dense<0.000000e+00> : vector<32x32xf32>
    %583 = tpu.matmul %582, %580, %cst_551 {dimension_numbers = #tpu.dot_dimension_numbers<[1], [0], [0], [1], [0, 0, 1, 1], [], []>} : vector<32x32xbf16>, vector<32x32xbf16>, vector<32x32xf32> -> vector<32x32xf32>
    %584 = arith.addf %579, %583 : vector<32x32xf32>
    %585 = vector.extract_strided_slice %545 {offsets = [0, 10], sizes = [32, 32], strides = [1, 1]} : vector<32x42xbf16> to vector<32x32xbf16>
    %c9_552 = arith.constant 9 : index
    %c8_553 = arith.constant 8 : index
    %c0_554 = arith.constant 0 : index
    %c0_555 = arith.constant 0 : index
    %586 = vector.load %arg1[%c9_552, %c8_553, %c0_554, %c0_555] : memref<10x9x32x32xbf16, #tpu.memory_space<vmem>>, vector<1x1x32x32xbf16>
    %587 = vector.shape_cast %586 : vector<1x1x32x32xbf16> to vector<32x32xbf16>
    %cst_556 = arith.constant dense<0.000000e+00> : vector<32x32xf32>
    %588 = tpu.matmul %587, %585, %cst_556 {dimension_numbers = #tpu.dot_dimension_numbers<[1], [0], [0], [1], [0, 0, 1, 1], [], []>} : vector<32x32xbf16>, vector<32x32xbf16>, vector<32x32xf32> -> vector<32x32xf32>
    %589 = arith.addf %584, %588 : vector<32x32xf32>
    %c9_557 = arith.constant 9 : index
    %c0_558 = arith.constant 0 : index
    %c0_559 = arith.constant 0 : index
    %c0_560 = arith.constant 0 : index
    %590 = vector.load %arg2[%c9_557, %c0_558, %c0_559, %c0_560] : memref<10x2x32x1xf32, #tpu.memory_space<vmem>>, vector<1x1x32x1xf32>
    %591 = vector.shape_cast %590 : vector<1x1x32x1xf32> to vector<32x1xf32>
    %c9_561 = arith.constant 9 : index
    %c1_562 = arith.constant 1 : index
    %c0_563 = arith.constant 0 : index
    %c0_564 = arith.constant 0 : index
    %592 = vector.load %arg2[%c9_561, %c1_562, %c0_563, %c0_564] : memref<10x2x32x1xf32, #tpu.memory_space<vmem>>, vector<1x1x32x1xf32>
    %593 = vector.shape_cast %592 : vector<1x1x32x1xf32> to vector<32x1xf32>
    %594 = vector.broadcast %591 : vector<32x1xf32> to vector<32x32xf32>
    %595 = arith.mulf %589, %594 : vector<32x32xf32>
    %596 = vector.broadcast %593 : vector<32x1xf32> to vector<32x32xf32>
    %597 = arith.addf %595, %596 : vector<32x32xf32>
    %cst_565 = arith.constant 0.000000e+00 : f32
    %598 = vector.broadcast %cst_565 : f32 to vector<32x32xf32>
    %599 = arith.maximumf %597, %598 : vector<32x32xf32>
    %c3_566 = arith.constant 3 : index
    %c0_567 = arith.constant 0 : index
    %c0_568 = arith.constant 0 : index
    %600 = vector.load %arg3[%c3_566, %c0_567, %c0_568] : memref<4x1x648xf32, #tpu.memory_space<vmem>>, vector<1x1x32xf32>
    %601 = vector.shape_cast %600 : vector<1x1x32xf32> to vector<1x32xf32>
    %602 = vector.broadcast %601 : vector<1x32xf32> to vector<32x32xf32>
    %603 = arith.mulf %599, %602 : vector<32x32xf32>
    %604 = vector.extract_strided_slice %603 {offsets = [0, 0], sizes = [32, 16], strides = [1, 1]} : vector<32x32xf32> to vector<32x16xf32>
    %cst_569 = arith.constant dense<0.000000e+00> : vector<32xf32>
    %605 = vector.multi_reduction <add>, %604, %cst_569 [1] : vector<32x16xf32> to vector<32xf32>
    %606 = vector.shape_cast %605 : vector<32xf32> to vector<32x1xf32>
    %607 = vector.extract_strided_slice %603 {offsets = [0, 16], sizes = [32, 16], strides = [1, 1]} : vector<32x32xf32> to vector<32x16xf32>
    %cst_570 = arith.constant dense<0.000000e+00> : vector<32xf32>
    %608 = vector.multi_reduction <add>, %607, %cst_570 [1] : vector<32x16xf32> to vector<32xf32>
    %609 = vector.shape_cast %608 : vector<32xf32> to vector<32x1xf32>
    %610 = tpu.concatenate %606, %609 in 1 : vector<32x1xf32>, vector<32x1xf32> -> vector<32x2xf32>
    %cst_571 = arith.constant 2.500000e-01 : f32
    %611 = vector.broadcast %cst_571 : f32 to vector<32x2xf32>
    %612 = arith.mulf %610, %611 : vector<32x2xf32>
    %c0_572 = arith.constant 0 : index
    %c0_573 = arith.constant 0 : index
    %613 = vector.load %arg7[%c0_572, %c0_573] : memref<256x33xf32, #tpu.memory_space<vmem>>, vector<256x32xf32>
    %c0_574 = arith.constant 0 : index
    %c32 = arith.constant 32 : index
    %614 = vector.load %arg7[%c0_574, %c32] : memref<256x33xf32, #tpu.memory_space<vmem>>, vector<256x1xf32>
    %cst_575 = arith.constant dense<0.000000e+00> : vector<256x2xf32>
    %615 = tpu.matmul %613, %612, %cst_575 {dimension_numbers = #tpu.dot_dimension_numbers<[1], [0], [0], [1], [0, 0, 1, 1], [], []>} : vector<256x32xf32>, vector<32x2xf32>, vector<256x2xf32> -> vector<256x2xf32>
    %616 = vector.broadcast %614 : vector<256x1xf32> to vector<256x2xf32>
    %617 = arith.addf %615, %616 : vector<256x2xf32>
    %cst_576 = arith.constant dense<0xFF800000> : vector<2xf32>
    %618 = vector.multi_reduction <maximumf>, %617, %cst_576 [0] : vector<256x2xf32> to vector<2xf32>
    %619 = vector.shape_cast %618 : vector<2xf32> to vector<1x2xf32>
    %620 = vector.broadcast %619 : vector<1x2xf32> to vector<256x2xf32>
    %621 = arith.subf %617, %620 : vector<256x2xf32>
    %622 = math.exp %621 : vector<256x2xf32>
    %cst_577 = arith.constant dense<0.000000e+00> : vector<2xf32>
    %623 = vector.multi_reduction <add>, %622, %cst_577 [0] : vector<256x2xf32> to vector<2xf32>
    %624 = vector.shape_cast %623 : vector<2xf32> to vector<1x2xf32>
    %625 = vector.broadcast %624 : vector<1x2xf32> to vector<256x2xf32>
    %626 = arith.divf %622, %625 : vector<256x2xf32>
    %cst_578 = arith.constant 2.550000e+02 : f32
    %627 = vector.broadcast %cst_578 : f32 to vector<256x2xf32>
    %628 = arith.mulf %626, %627 : vector<256x2xf32>
    %cst_579 = arith.constant 1.275000e+02 : f32
    %629 = vector.broadcast %cst_579 : f32 to vector<256x2xf32>
    %630 = arith.subf %628, %629 : vector<256x2xf32>
    %c0_580 = arith.constant 0 : index
    %c0_581 = arith.constant 0 : index
    %631 = vector.load %arg9[%c0_580, %c0_581] : memref<256x2xf32, #tpu.memory_space<vmem>>, vector<256x2xf32>
    tpu.vector_store %arg9[%c0_580, %c0_581], %630 {strides = array<i32>} : memref<256x2xf32, #tpu.memory_space<vmem>>, vector<256x2xf32>,
    %c0_582 = arith.constant 0 : index
    %c0_583 = arith.constant 0 : index
    %632 = vector.load %arg8[%c0_582, %c0_583] : memref<33x1xf32, #tpu.memory_space<vmem>>, vector<32x1xf32>
    %c32_584 = arith.constant 32 : index
    %c0_585 = arith.constant 0 : index
    %633 = vector.load %arg8[%c32_584, %c0_585] : memref<33x1xf32, #tpu.memory_space<vmem>>, vector<1x1xf32>
    %634 = vector.broadcast %632 : vector<32x1xf32> to vector<32x2xf32>
    %635 = arith.mulf %612, %634 : vector<32x2xf32>
    %cst_586 = arith.constant dense<0.000000e+00> : vector<2xf32>
    %636 = vector.multi_reduction <add>, %635, %cst_586 [0] : vector<32x2xf32> to vector<2xf32>
    %637 = vector.shape_cast %636 : vector<2xf32> to vector<1x2xf32>
    %638 = vector.broadcast %633 : vector<1x1xf32> to vector<1x2xf32>
    %639 = arith.addf %637, %638 : vector<1x2xf32>
    %640 = arith.negf %639 : vector<1x2xf32>
    %641 = math.exp %640 : vector<1x2xf32>
    %cst_587 = arith.constant 1.000000e+00 : f32
    %642 = vector.broadcast %cst_587 : f32 to vector<1x2xf32>
    %643 = arith.addf %642, %641 : vector<1x2xf32>
    %644 = arith.divf %642, %643 : vector<1x2xf32>
    %cst_588 = arith.constant 7.000000e+01 : f32
    %645 = vector.broadcast %cst_588 : f32 to vector<1x2xf32>
    %646 = arith.mulf %644, %645 : vector<1x2xf32>
    %c0_589 = arith.constant 0 : index
    %c0_590 = arith.constant 0 : index
    %647 = vector.load %arg10[%c0_589, %c0_590] : memref<1x2xf32, #tpu.memory_space<vmem>>, vector<1x2xf32>
    tpu.vector_store %arg10[%c0_589, %c0_590], %646 {strides = array<i32>} : memref<1x2xf32, #tpu.memory_space<vmem>>, vector<1x2xf32>,
    return
  }
}

</mosaic_0001>

<bundles_post_ra>
// kernel: tpu_custom_call.1
= control target key start
LH: loop header
LB: loop body
LE: loop exit
PB: predicated region body
PF: predicated region fallthrough
CT: control target
= control target key end

     0   :  { %s13183_s25 = smov 127   ;;  %vm79_vm0 = vcmask 1043456   ;;  %v13184_v10 = vmov 0   ;;  %vm75_vm1 = vcmask 64512   ;;  %s13185_s27 = smov 126   ;;  %s16335_s0 = inlined_call_operand.vmem [shape: f32[8,686], index: 0, kind: input, shape index: {}]   ;;  %s16336_s1 = inlined_call_operand.vmem [shape: bf16[10,9,32,32], index: 1, kind: input, shape index: {}]   ;;  %s16337_s2 = inlined_call_operand.vmem [shape: f32[10,2,32,1], index: 2, kind: input, shape index: {}]   ;;  %s16338_s3 = inlined_call_operand.vmem [shape: f32[4,1,648], index: 3, kind: input, shape index: {}]   ;;  %s16339_s4 = inlined_call_operand.vmem [shape: bf16[648,200], index: 4, kind: input, shape index: {}]   ;;  %s16340_s5 = inlined_call_operand.vmem [shape: bf16[200,72], index: 5, kind: input, shape index: {}]   ;;  %s16341_s6 = inlined_call_operand.vmem [shape: bf16[72,32], index: 6, kind: input, shape index: {}]   ;;  %s16342_s7 = inlined_call_operand.vmem [shape: f32[256,33], index: 7, kind: input, shape index: {}]   ;;  %s16343_s8 = inlined_call_operand.vmem [shape: f32[33,1], index: 8, kind: input, shape index: {}]   ;;  %s16344_s9 = inlined_call_operand.vmem [shape: f32[256,2], index: 9, kind: output, shape index: {0}]   ;;  %s16345_s10 = inlined_call_operand.hbm [shape: f32[1,2], index: 10, kind: output, shape index: {1}]  }
   0x1   :  { %v38_v0 = vld [vmem:[%s16335_s0 + $0x10] sm:$0xff]  ;;  %v36_v1 = vld [vmem:[%s16335_s0] sm:$0xff]  ;;  %v39_v2 = vld [vmem:[%s16335_s0 + $0x18] sm:$0xff]  ;;  %130 = vmatprep.mubr.bf16.mxu0 %v13184_v10  ;;  %315 = vmatprep.mubr.bf16.mxu1 %v13184_v10  ;;  %s13186_s28 = smov 110   ;;  %s13187_s29 = smov 109  }
   0x2   :  { %v13278_v3 = vpack.c.bf16 %v38_v0, %v38_v0  ;;  %v13280_v4 = vpack.c.bf16 %v36_v1, %v36_v1  ;;  %v37_v5 = vld [vmem:[%s16335_s0 + $0x8] sm:$0xff]  ;;  %v13285_v6 = vpack.c.bf16 %v39_v2, %v39_v2  ;;  %v40_v7 = vld [vmem:[%s16335_s0 + $0x20] sm:$0xff]  ;;  %12820 = vset.pattern.permute.xlu0 %v13184_v10  ;;  %12821 = vset.pattern.permute.xlu1 %v13184_v10  ;;  %s13188_s30 = smov 108   ;;  %s13189_s11 = smov 92  }
   0x3   :  { %v41_v8 = vld [vmem:[%s16335_s0 + $0x28] sm:$0xff]  ;;  %v13297_v9 = vpack.c.bf16 %v37_v5, %v37_v5  ;;  %v13309_v11 = vpack.c.bf16 %v40_v7, %v40_v7  ;;  %v13318_v14 = vld [vmem:[%s16336_s1] sm:$0xf]  ;;  %s13190_s12 = smov 91   ;;  %s13191_s13 = smov 90  }
   0x4   :  { %61 = vrot.lane.b32.xlu1 %v13278_v3, %s13183_s25  ;;  %57 = vrot.lane.b32.xlu0 %v13280_v4, %s13183_s25  ;;  %v13311_v12 = vpack.c.bf16 %v41_v8, %v41_v8  ;;  %v231_v13 = vsel %vm79_vm0, %v13278_v3, 0 }
   0x5   :  { %11095 = vmatprep.subr.msk.bf16.mxu1 %vm79_vm0, %v13285_v6 }
   0x6   :  { %284 = vmatpush1.bf16.msra.mxu1 %v231_v13 }
   0x8   :  { %63 = vrot.lane.b32.xlu1 %v13285_v6, %s13183_s25  ;;  %59 = vrot.lane.b32.xlu0 %v13297_v9, %s13183_s25 }
   0x9   :  { %11096 = vmatmul.mubr.msk.bf16.vlgmr.msra.gmra.mrb[0].mxu1 %vm75_vm1, %v13318_v14 }
   0xa   :  { %479 = vmatprep.mubr.bf16.mxu1 %v13184_v10 }
   0xc   :  { %65 = vrot.lane.b32.xlu0 %v13309_v11, %s13183_s25  ;;  %67 = vrot.lane.b32.xlu1 %v13311_v12, %s13183_s25 }
  0x10   :  { %367 = vrot.lane.b32.xlu0 %v13280_v4, %s13185_s27  ;;  %369 = vrot.lane.b32.xlu1 %v13297_v9, %s13185_s27 }
  0x14   :  { %371 = vrot.lane.b32.xlu0 %v13278_v3, %s13185_s27  ;;  %375 = vrot.lane.b32.xlu1 %v13309_v11, %s13185_s27 }
  0x18   :  { %377 = vrot.lane.b32.xlu0 %v13311_v12, %s13185_s27  ;;  %537 = vrot.lane.b32.xlu1 %v13280_v4, %s13186_s28 }
  0x1c   :  { %539 = vrot.lane.b32.xlu0 %v13297_v9, %s13186_s28  ;;  %541 = vrot.lane.b32.xlu1 %v13278_v3, %s13186_s28 }
  0x20   :  { %373 = vrot.lane.b32.xlu0 %v13285_v6, %s13185_s27  ;;  %545 = vrot.lane.b32.xlu1 %v13309_v11, %s13186_s28 }
  0x24   :  { %547 = vrot.lane.b32.xlu0 %v13311_v12, %s13186_s28  ;;  %707 = vrot.lane.b32.xlu1 %v13280_v4, %s13187_s29 }
  0x28   :  { %709 = vrot.lane.b32.xlu0 %v13297_v9, %s13187_s29  ;;  %711 = vrot.lane.b32.xlu1 %v13278_v3, %s13187_s29 }
  0x2c   :  { %543 = vrot.lane.b32.xlu0 %v13285_v6, %s13186_s28  ;;  %715 = vrot.lane.b32.xlu1 %v13309_v11, %s13187_s29 }
  0x30   :  { %713 = vrot.lane.b32.xlu1 %v13285_v6, %s13187_s29  ;;  %717 = vrot.lane.b32.xlu0 %v13311_v12, %s13187_s29 }
  0x34   :  { %879 = vrot.lane.b32.xlu1 %v13297_v9, %s13188_s30  ;;  %877 = vrot.lane.b32.xlu0 %v13280_v4, %s13188_s30 }
  0x38   :  { %885 = vrot.lane.b32.xlu1 %v13309_v11, %s13188_s30  ;;  %881 = vrot.lane.b32.xlu0 %v13278_v3, %s13188_s30 }
  0x3c   :  { %883 = vrot.lane.b32.xlu1 %v13285_v6, %s13188_s30  ;;  %887 = vrot.lane.b32.xlu0 %v13311_v12, %s13188_s30 }
  0x40   :  { %1047 = vrot.lane.b32.xlu0 %v13280_v4, %s13189_s11  ;;  %1049 = vrot.lane.b32.xlu1 %v13297_v9, %s13189_s11 }
  0x44   :  { %1051 = vrot.lane.b32.xlu0 %v13278_v3, %s13189_s11  ;;  %1053 = vrot.lane.b32.xlu1 %v13285_v6, %s13189_s11 }
  0x48   :  { %1055 = vrot.lane.b32.xlu0 %v13309_v11, %s13189_s11  ;;  %1057 = vrot.lane.b32.xlu1 %v13311_v12, %s13189_s11 }
  0x4c   :  { %1217 = vrot.lane.b32.xlu0 %v13280_v4, %s13190_s12  ;;  %1219 = vrot.lane.b32.xlu1 %v13297_v9, %s13190_s12 }
  0x50   :  { %1221 = vrot.lane.b32.xlu0 %v13278_v3, %s13190_s12  ;;  %1223 = vrot.lane.b32.xlu1 %v13285_v6, %s13190_s12 }
  0x54   :  { %1225 = vrot.lane.b32.xlu0 %v13309_v11, %s13190_s12  ;;  %1227 = vrot.lane.b32.xlu1 %v13311_v12, %s13190_s12 }
  0x58   :  { %1391 = vrot.lane.b32.xlu0 %v13278_v3, %s13191_s13  ;;  %1393 = vrot.lane.b32.xlu1 %v13285_v6, %s13191_s13 }
  0x5c   :  { %1395 = vrot.lane.b32.xlu0 %v13309_v11, %s13191_s13  ;;  %1387 = vrot.lane.b32.xlu1 %v13280_v4, %s13191_s13 }
  0x5d   :  { %16 = vsyncpa [#allocation3], 0  ;;  %vm69_vm2 = vcmask 1039360   ;;  %v11086_v23 = vld [vmem:[%s16336_s1 + $0x10] sm:$0xf]  ;;  %v225_v37 = vsel %vm79_vm0, %v13280_v4, 0 }
  0x5e   :  { %vm379_vm3 = vcmask 1031168   ;;  %v1555_v39 = vld [vmem:[%s16337_s2] sm:$0xff]  ;;  %v237_v48 = vsel %vm79_vm0, %v13309_v11, 0  ;;  %vm549_vm4 = vcmask 900096   ;;  %vm719_vm5 = vcmask 891904   ;;  %s13192_s23 = smov 19  }
  0x5f   :  { %v11148_v40 = vld [vmem:[%s16337_s2 + $0x20] sm:$0xff]  ;;  %v13487_v60 = vld [vmem:[%s16336_s1 + $0x30] sm:$0xf]  ;;  %vm889_vm6 = vcmask 883712   ;;  %vm1059_vm7 = vcmask 752640   ;;  %vm1229_vm8 = vcmask 744448  }
  0x60   :  { %1389 = vrot.lane.b32.xlu0 %v13297_v9, %s13191_s13  ;;  %1397 = vrot.lane.b32.xlu1 %v13311_v12, %s13191_s13  ;;  %v11099_v46 = vld [vmem:[%s16336_s1 + $0x20] sm:$0xf]  ;;  %vm1399_vm9 = vcmask 736256   ;;  %vm1636_vm10 = vcmask 154624   ;;  %vm1649_vm11 = vcmask 220160   ;;  %vm5390_vm12 = vcmask 89088  }
  0x61   :  { %v13521_v11 = vld [vmem:[%s16336_s1 + $0x40] sm:$0xf]  ;;  %vm5395_vm13 = vcmask 678912   ;;  %s13195_s21 = smov 117   ;;  %s13197_s22 = smov 107   ;;  %vm5575_vm14 = vcmask 965632  }
  0x62   :  { %s13198_s24 = smov 106   ;;  %vm5635_vm15 = vcmask 957440   ;;  %s13202_s17 = smov 121  }
  0x63   :  { %s13203_s18 = smov 122   ;;  %s13205_s19 = smov 114  }
  0x64   :  { %1560 = vperm.xlu0 %12820, %v1555_v39   ;;  %1571 = vperm.xlu1 %12821, %v11148_v40   ;;  %s13210_s26 = smov 119  }
  0x76   :  { %v62_v15 = vpop.permute.xlu1 %61  ;;  %v58_v16 = vpop.permute.xlu0 %57 }
  0x7a   :  { %v64_v17 = vpop.permute.xlu1 %63  ;;  %v60_v18 = vpop.permute.xlu0 %59 }
  0x7b   :  { %v71_v19 = vsel %vm69_vm2, %v60_v18, %v62_v15  ;;  %v70_v20 = vsel %vm69_vm2, %v58_v16, %v60_v18  ;;  %v72_v22 = vsel %vm69_vm2, %v62_v15, %v64_v17 }
  0x7c   :  { %11087 = vmatprep.subr.msk.bf16.mxu0 %vm79_vm0, %v71_v19  ;;  %v81_v21 = vsel %vm79_vm0, %v70_v20, 0  ;;  %v87_v27 = vsel %vm79_vm0, %v72_v22, 0 }
  0x7d   :  { %99 = vmatpush1.bf16.msra.mxu0 %v81_v21 }
  0x7e   :  { %v66_v24 = vpop.permute.xlu0 %65  ;;  %v68_v25 = vpop.permute.xlu1 %67 }
  0x7f   :  { %v73_v26 = vsel %vm69_vm2, %v64_v17, %v66_v24  ;;  %v74_v30 = vsel %vm69_vm2, %v66_v24, %v68_v25 }
  0x80   :  { %11088 = vmatmul.mubr.msk.bf16.vlgmr.msra.gmra.mrb[0].mxu0 %vm75_vm1, %v11086_v23  ;;  %11089 = vmatprep.subr.msk.bf16.mxu0 %vm79_vm0, %v73_v26  ;;  %v93_v33 = vsel %vm79_vm0, %v74_v30, 0  ;;  %v13558_v26 = vld [vmem:[%s16336_s1 + $0x50] sm:$0xf] }
  0x81   :  { %140 = vmatpush1.bf16.msra.mxu0 %v87_v27  ;;  %171 = vmatprep.mubr.bf16.mxu0 %v13184_v10 }
  0x82   :  { %v368_v28 = vpop.permute.xlu0 %367  ;;  %11091 = vmatprep.subr.msk.bf16.mxu0 %vm79_vm0, %v68_v25  ;;  %v370_v29 = vpop.permute.xlu1 %369 }
  0x83   :  { %v380_v53 = vsel %vm379_vm3, %v368_v28, %v370_v29 }
  0x84   :  { %v389_v55 = vsel %vm79_vm0, %v380_v53, 0  ;;  %v11134_v53 = vld [vmem:[%s16336_s1 + $0x70] sm:$0xf] }
  0x86   :  { %v372_v31 = vpop.permute.xlu0 %371  ;;  %v376_v32 = vpop.permute.xlu1 %375 }
  0x87   :  { %v381_v50 = vsel %vm379_vm3, %v370_v29, %v372_v31 }
  0x88   :  { %11090 = vmatmul.mubr.msk.bf16.vlgmr.msra.gmra.mrb[4].mxu0 %vm75_vm1, %v11086_v23 }
  0x89   :  { %181 = vmatpush1.bf16.msra.mxu0 %v93_v33  ;;  %212 = vmatprep.mubr.bf16.mxu0 %v13184_v10 }
  0x8a   :  { %v378_v34 = vpop.permute.xlu0 %377  ;;  %v13429_v35 = vpop.permute.xlu1 %537  ;;  %11093 = vmatprep.subr.msk.bf16.mxu0 %vm79_vm0, %v13297_v9 }
  0x8b   :  { %v384_v63 = vsel %vm379_vm3, %v376_v32, %v378_v34 }
  0x8c   :  { %v401_v3 = vsel %vm79_vm0, %v384_v63, 0 }
  0x8e   :  { %v13433_v36 = vpop.permute.xlu0 %539  ;;  %v542_v38 = vpop.permute.xlu1 %541 }
  0x8f   :  { %v551_v6 = vsel %vm549_vm4, %v13433_v36, %v542_v38  ;;  %v550_v9 = vsel %vm549_vm4, %v13429_v35, %v13433_v36 }
  0x90   :  { %11092 = vmatmul.mubr.msk.bf16.vlgmr.msra.gmra.mrb[8].mxu0 %vm75_vm1, %v11086_v23 }
  0x91   :  { %243 = vmatpush1.bf16.msra.mxu0 %v225_v37  ;;  %274 = vmatprep.mubr.bf16.mxu0 %v13184_v10 }
  0x92   :  { %v374_v41 = vpop.permute.xlu0 %373  ;;  %v13445_v42 = vpop.permute.xlu1 %545  ;;  %11097 = vmatprep.subr.msk.bf16.mxu0 %vm79_vm0, %v13311_v12  ;;  %v559_v12 = vsel %vm79_vm0, %v550_v9, 0 }
  0x93   :  { %v382_v43 = vsel %vm379_vm3, %v372_v31, %v374_v41  ;;  %v383_v44 = vsel %vm379_vm3, %v374_v41, %v376_v32 }
  0x94   :  { %11102 = vmatprep.subr.msk.bf16.mxu1 %vm79_vm0, %v383_v44  ;;  %v395_v45 = vsel %vm79_vm0, %v382_v43, 0 }
  0x95   :  { %448 = vmatpush1.bf16.msra.mxu1 %v395_v45 }
  0x96   :  { %v13456_v47 = vpop.permute.xlu0 %547  ;;  %v13460_v49 = vpop.permute.xlu1 %707 }
  0x97   :  { %v554_v20 = vsel %vm549_vm4, %v13445_v42, %v13456_v47 }
  0x98   :  { %11094 = vmatmul.mubr.msk.bf16.vlgmr.msra.gmra.mrb[0].mxu0 %vm75_vm1, %v13318_v14  ;;  %11103 = vmatmul.mubr.msk.bf16.vlgmr.msra.gmra.mrb[0].mxu1 %vm75_vm1, %v11099_v46  ;;  %v571_v21 = vsel %vm79_vm0, %v554_v20, 0 }
  0x99   :  { %325 = vmatpush1.bf16.msra.mxu0 %v237_v48  ;;  %356 = vmatprep.mubr.bf16.mxu0 %v13184_v10 }
  0x9a   :  { %v13467_v51 = vpop.permute.xlu0 %709  ;;  %11100 = vmatprep.subr.msk.bf16.mxu0 %vm79_vm0, %v381_v50  ;;  %v13470_v52 = vpop.permute.xlu1 %711  ;;  %649 = vmatprep.mubr.bf16.mxu1 %v13184_v10 }
  0x9b   :  { %v721_v24 = vsel %vm719_vm5, %v13467_v51, %v13470_v52  ;;  %v720_v30 = vsel %vm719_vm5, %v13460_v49, %v13467_v51 }
  0x9c   :  { %v729_v32 = vsel %vm79_vm0, %v720_v30, 0 }
  0x9e   :  { %v544_v54 = vpop.permute.xlu0 %543  ;;  %v13475_v56 = vpop.permute.xlu1 %715 }
  0x9f   :  { %v552_v57 = vsel %vm549_vm4, %v542_v38, %v544_v54  ;;  %v553_v58 = vsel %vm549_vm4, %v544_v54, %v13445_v42  ;;  %v11127_v38 = vld [vmem:[%s16336_s1 + $0x60] sm:$0xf] }
  0xa0   :  { %11098 = vmatmul.mubr.msk.bf16.vlgmr.msra.gmra.mrb[8].mxu0 %vm75_vm1, %v13318_v14  ;;  %11109 = vmatprep.subr.msk.bf16.mxu1 %vm79_vm0, %v553_v58  ;;  %v565_v59 = vsel %vm79_vm0, %v552_v57, 0 }
  0xa1   :  { %407 = vmatpush1.bf16.msra.mxu0 %v389_v55  ;;  %618 = vmatpush1.bf16.msra.mxu1 %v565_v59  ;;  %v11141_v59 = vld [vmem:[%s16336_s1 + $0x80] sm:$0xf] }
  0xa2   :  { %438 = vmatprep.mubr.bf16.mxu0 %v13184_v10  ;;  %v714_v61 = vpop.permute.xlu1 %713  ;;  %v13490_v62 = vpop.permute.xlu0 %717  ;;  %11104 = vmatprep.subr.msk.bf16.mxu0 %vm79_vm0, %v378_v34 }
  0xa3   :  { %v722_v0 = vsel %vm719_vm5, %v13470_v52, %v714_v61  ;;  %v723_v1 = vsel %vm719_vm5, %v714_v61, %v13475_v56  ;;  %v724_v37 = vsel %vm719_vm5, %v13475_v56, %v13490_v62 }
  0xa4   :  { %11110 = vmatmul.mubr.msk.bf16.vlgmr.msra.gmra.mrb[0].mxu1 %vm75_vm1, %v13487_v60  ;;  %11116 = vmatprep.subr.msk.bf16.mxu1 %vm79_vm0, %v723_v1  ;;  %v735_v2 = vsel %vm79_vm0, %v722_v0, 0  ;;  %v741_v40 = vsel %vm79_vm0, %v724_v37, 0 }
  0xa5   :  { %788 = vmatpush1.bf16.msra.mxu1 %v735_v2  ;;  %819 = vmatprep.mubr.bf16.mxu1 %v13184_v10 }
  0xa6   :  { %v13504_v4 = vpop.permute.xlu1 %879  ;;  %v13506_v5 = vpop.permute.xlu0 %877 }
  0xa8   :  { %11101 = vmatmul.mubr.msk.bf16.vlgmr.msra.gmra.mrb[0].mxu0 %vm75_vm1, %v11099_v46 }
  0xa9   :  { %489 = vmatpush1.bf16.msra.mxu0 %v401_v3  ;;  %520 = vmatprep.mubr.bf16.mxu0 %v13184_v10 }
  0xaa   :  { %11107 = vmatprep.subr.msk.bf16.mxu0 %vm79_vm0, %v551_v6  ;;  %v13513_v7 = vpop.permute.xlu1 %885  ;;  %v882_v8 = vpop.permute.xlu0 %881 }
  0xab   :  { %v891_v43 = vsel %vm889_vm6, %v13504_v4, %v882_v8 }
  0xae   :  { %v884_v13 = vpop.permute.xlu1 %883  ;;  %v13524_v14 = vpop.permute.xlu0 %887 }
  0xaf   :  { %v892_v15 = vsel %vm889_vm6, %v882_v8, %v884_v13  ;;  %v893_v16 = vsel %vm889_vm6, %v884_v13, %v13513_v7  ;;  %v894_v55 = vsel %vm889_vm6, %v13513_v7, %v13524_v14 }
  0xb0   :  { %11105 = vmatmul.mubr.msk.bf16.vlgmr.msra.gmra.mrb[8].mxu0 %vm75_vm1, %v11099_v46  ;;  %11117 = vmatmul.mubr.msk.bf16.vlgmr.msra.gmra.mrb[0].mxu1 %vm75_vm1, %v13521_v11  ;;  %v905_v17 = vsel %vm79_vm0, %v892_v15, 0  ;;  %v911_v56 = vsel %vm79_vm0, %v894_v55, 0 }
  0xb1   :  { %577 = vmatpush1.bf16.msra.mxu0 %v559_v12  ;;  %608 = vmatprep.mubr.bf16.mxu0 %v13184_v10 }
  0xb2   :  { %11123 = vmatprep.subr.msk.bf16.mxu1 %vm79_vm0, %v893_v16  ;;  %v13535_v18 = vpop.permute.xlu0 %1047  ;;  %11111 = vmatprep.subr.msk.bf16.mxu0 %vm79_vm0, %v13456_v47  ;;  %v13539_v19 = vpop.permute.xlu1 %1049  ;;  %v890_v47 = vsel %vm889_vm6, %v13506_v5, %v13504_v4 }
  0xb3   :  { %958 = vmatpush1.bf16.msra.mxu1 %v905_v17  ;;  %989 = vmatprep.mubr.bf16.mxu1 %v13184_v10  ;;  %v899_v49 = vsel %vm79_vm0, %v890_v47, 0  ;;  %v1060_v58 = vsel %vm1059_vm7, %v13535_v18, %v13539_v19  ;;  %v1582_v17 = vlaneseq }
  0xb5   :  { %v13681_v18 = vshrl.u32 %v1582_v17, 7 }
  0xb6   :  { %v13546_v22 = vpop.permute.xlu0 %1051  ;;  %v1054_v23 = vpop.permute.xlu1 %1053 }
  0xb7   :  { %v1062_v25 = vsel %vm1059_vm7, %v13546_v22, %v1054_v23  ;;  %v1061_v57 = vsel %vm1059_vm7, %v13539_v19, %v13546_v22  ;;  %v1592_v19 = vsub.s32 2, %v13681_v18  ;;  %v1580_v22 = vld [vmem:[%s16338_s3] sm:$0x3f] }
  0xb8   :  { %11108 = vmatmul.mubr.msk.bf16.vlgmr.msra.gmra.mrb[0].mxu0 %vm75_vm1, %v13487_v60  ;;  %v1075_v28 = vsel %vm79_vm0, %v1062_v25, 0 }
  0xb9   :  { %659 = vmatpush1.bf16.msra.mxu0 %v571_v21  ;;  %690 = vmatprep.mubr.bf16.mxu0 %v13184_v10  ;;  %v13687_v30 = vrot.slane %v1580_v22, %v1592_v19 }
  0xba   :  { %11114 = vmatprep.subr.msk.bf16.mxu0 %vm79_vm0, %v721_v24  ;;  %v13562_v27 = vpop.permute.xlu0 %1055  ;;  %v13565_v29 = vpop.permute.xlu1 %1057 }
  0xbb   :  { %v1063_v31 = vsel %vm1059_vm7, %v1054_v23, %v13562_v27  ;;  %v1064_v61 = vsel %vm1059_vm7, %v13562_v27, %v13565_v29 }
  0xbc   :  { %11124 = vmatmul.mubr.msk.bf16.vlgmr.msra.gmra.mrb[0].mxu1 %vm75_vm1, %v13558_v26  ;;  %11130 = vmatprep.subr.msk.bf16.mxu1 %vm79_vm0, %v1063_v31 }
  0xbd   :  { %1128 = vmatpush1.bf16.msra.mxu1 %v1075_v28  ;;  %1159 = vmatprep.mubr.bf16.mxu1 %v13184_v10 }
  0xbe   :  { %v13577_v33 = vpop.permute.xlu0 %1217  ;;  %v13579_v34 = vpop.permute.xlu1 %1219 }
  0xbf   :  { %v1230_v0 = vsel %vm1229_vm8, %v13577_v33, %v13579_v34  ;;  %v1584_v33 = vsub.s32 0, %v13681_v18 }
  0xc0   :  { %11112 = vmatmul.mubr.msk.bf16.vlgmr.msra.gmra.mrb[8].mxu0 %vm75_vm1, %v13487_v60  ;;  %v1069_v60 = vsel %vm79_vm0, %v1060_v58, 0  ;;  %v1239_v1 = vsel %vm79_vm0, %v1230_v0, 0 }
  0xc1   :  { %747 = vmatpush1.bf16.msra.mxu0 %v729_v32  ;;  %778 = vmatprep.mubr.bf16.mxu0 %v13184_v10  ;;  %v13695_v37 = vrot.slane %v1580_v22, %v1584_v33 }
  0xc2   :  { %v1222_v35 = vpop.permute.xlu0 %1221  ;;  %11118 = vmatprep.subr.msk.bf16.mxu0 %vm79_vm0, %v13490_v62  ;;  %v1224_v36 = vpop.permute.xlu1 %1223  ;;  %v1081_v62 = vsel %vm79_vm0, %v1064_v61, 0 }
  0xc3   :  { %v1232_v39 = vsel %vm1229_vm8, %v1222_v35, %v1224_v36  ;;  %v1231_v63 = vsel %vm1229_vm8, %v13579_v34, %v1222_v35  ;;  %v1588_v34 = vsub.s32 1, %v13681_v18 }
  0xc4   :  { %v1245_v45 = vsel %vm79_vm0, %v1232_v39, 0 }
  0xc6   :  { %v1226_v41 = vpop.permute.xlu0 %1225  ;;  %v1228_v42 = vpop.permute.xlu1 %1227 }
  0xc7   :  { %v1233_v44 = vsel %vm1229_vm8, %v1224_v36, %v1226_v41  ;;  %v1234_v2 = vsel %vm1229_vm8, %v1226_v41, %v1228_v42 }
  0xc8   :  { %11115 = vmatmul.mubr.msk.bf16.vlgmr.msra.gmra.mrb[0].mxu0 %vm75_vm1, %v13521_v11  ;;  %11131 = vmatmul.mubr.msk.bf16.vlgmr.msra.gmra.mrb[0].mxu1 %vm75_vm1, %v11127_v38  ;;  %v1251_v4 = vsel %vm79_vm0, %v1234_v2, 0 }
  0xc9   :  { %829 = vmatpush1.bf16.msra.mxu0 %v741_v40  ;;  %860 = vmatprep.mubr.bf16.mxu0 %v13184_v10  ;;  %v13699_v40 = vrot.slane %v1580_v22, %v1588_v34 }
  0xca   :  { %11121 = vmatprep.subr.msk.bf16.mxu0 %vm79_vm0, %v891_v43  ;;  %11137 = vmatprep.subr.msk.bf16.mxu1 %vm79_vm0, %v1233_v44  ;;  %v1392_v46 = vpop.permute.xlu0 %1391  ;;  %v1394_v48 = vpop.permute.xlu1 %1393 }
  0xcb   :  { %1298 = vmatpush1.bf16.msra.mxu1 %v1245_v45  ;;  %1329 = vmatprep.mubr.bf16.mxu1 %v13184_v10  ;;  %v1402_v51 = vsel %vm1399_vm9, %v1392_v46, %v1394_v48 }
  0xcc   :  { %v1415_v54 = vsel %vm79_vm0, %v1402_v51, 0 }
  0xce   :  { %v1396_v50 = vpop.permute.xlu0 %1395  ;;  %v1388_v6 = vpop.permute.xlu1 %1387 }
  0xcf   :  { %v1403_v52 = vsel %vm1399_vm9, %v1394_v48, %v1396_v50  ;;  %v1596_v48 = vsub.s32 3, %v13681_v18 }
  0xd0   :  { %11119 = vmatmul.mubr.msk.bf16.vlgmr.msra.gmra.mrb[8].mxu0 %vm75_vm1, %v13521_v11  ;;  %11144 = vmatprep.subr.msk.bf16.mxu1 %vm79_vm0, %v1403_v52 }
  0xd1   :  { %917 = vmatpush1.bf16.msra.mxu0 %v899_v49  ;;  %948 = vmatprep.mubr.bf16.mxu0 %v13184_v10 }
  0xd2   :  { %11125 = vmatprep.subr.msk.bf16.mxu0 %vm79_vm0, %v13524_v14  ;;  %v1390_v3 = vpop.permute.xlu0 %1389  ;;  %v1398_v9 = vpop.permute.xlu1 %1397 }
  0xd3   :  { %v1401_v5 = vsel %vm1399_vm9, %v1390_v3, %v1392_v46  ;;  %v1400_v7 = vsel %vm1399_vm9, %v1388_v6, %v1390_v3  ;;  %v1404_v11 = vsel %vm1399_vm9, %v1396_v50, %v1398_v9  ;;  %v1600_v46 = vsub.s32 4, %v13681_v18 }
  0xd4   :  { %11138 = vmatmul.mubr.msk.bf16.vlgmr.msra.gmra.mrb[0].mxu1 %vm75_vm1, %v11134_v53  ;;  %v1409_v8 = vsel %vm79_vm0, %v1400_v7, 0  ;;  %v1421_v12 = vsel %vm79_vm0, %v1404_v11, 0  ;;  %v1604_v50 = vsub.s32 5, %v13681_v18 }
  0xd5   :  { %1468 = vmatpush1.bf16.msra.mxu1 %v1415_v54  ;;  %1499 = vmatprep.mubr.bf16.mxu1 %v13184_v10  ;;  %v13706_v54 = vrot.slane %v1580_v22, %v1600_v46 }
  0xd8   :  { %11122 = vmatmul.mubr.msk.bf16.vlgmr.msra.gmra.mrb[0].mxu0 %vm75_vm1, %v13558_v26 }
  0xd9   :  { %999 = vmatpush1.bf16.msra.mxu0 %v911_v56  ;;  %1030 = vmatprep.mubr.bf16.mxu0 %v13184_v10 }
  0xda   :  { %11128 = vmatprep.subr.msk.bf16.mxu0 %vm79_vm0, %v1061_v57  ;;  %v13708_v57 = vrot.slane %v1580_v22, %v1596_v48 }
  0xe0   :  { %11126 = vmatmul.mubr.msk.bf16.vlgmr.msra.gmra.mrb[8].mxu0 %vm75_vm1, %v13558_v26  ;;  %11145 = vmatmul.mubr.msk.bf16.vlgmr.msra.gmra.mrb[0].mxu1 %vm75_vm1, %v11141_v59 }
  0xe1   :  { %1087 = vmatpush1.bf16.msra.mxu0 %v1069_v60  ;;  %1118 = vmatprep.mubr.bf16.mxu0 %v13184_v10  ;;  %v13711_v60 = vrot.slane %v1580_v22, %v1604_v50  ;;  %v11149_v50 = vld [vmem:[%s16336_s1 + $0x90] sm:$0xf] }
  0xe2   :  { %11132 = vmatprep.subr.msk.bf16.mxu0 %vm79_vm0, %v13565_v29  ;;  %1737 = vmatprep.mubr.bf16.mxu1 %v13184_v10 }
  0xe3   :  { %v1561_v21 = vpop.permute.xlu0 %1560  ;;  %v1572_v27 = vpop.permute.xlu1 %1571 }
  0xe8   :  { %11129 = vmatmul.mubr.msk.bf16.vlgmr.msra.gmra.mrb[0].mxu0 %vm75_vm1, %v11127_v38 }
  0xe9   :  { %1169 = vmatpush1.bf16.msra.mxu0 %v1081_v62  ;;  %1200 = vmatprep.mubr.bf16.mxu0 %v13184_v10 }
  0xea   :  { %11135 = vmatprep.subr.msk.bf16.mxu0 %vm79_vm0, %v1231_v63 }
  0xf0   :  { %11133 = vmatmul.mubr.msk.bf16.vlgmr.msra.gmra.mrb[8].mxu0 %vm75_vm1, %v11127_v38 }
  0xf1   :  { %1257 = vmatpush1.bf16.msra.mxu0 %v1239_v1  ;;  %1288 = vmatprep.mubr.bf16.mxu0 %v13184_v10 }
  0xf2   :  { %11139 = vmatprep.subr.msk.bf16.mxu0 %vm79_vm0, %v1228_v42 }
  0xf8   :  { %11136 = vmatmul.mubr.msk.bf16.vlgmr.msra.gmra.mrb[0].mxu0 %vm75_vm1, %v11134_v53 }
  0xf9   :  { %1339 = vmatpush1.bf16.msra.mxu0 %v1251_v4  ;;  %1370 = vmatprep.mubr.bf16.mxu0 %v13184_v10 }
  0xfa   :  { %11142 = vmatprep.subr.msk.bf16.mxu0 %vm79_vm0, %v1401_v5 }
 0x100   :  { %11140 = vmatmul.mubr.msk.bf16.vlgmr.msra.gmra.mrb[8].mxu0 %vm75_vm1, %v11134_v53 }
 0x101   :  { %1427 = vmatpush1.bf16.msra.mxu0 %v1409_v8  ;;  %1458 = vmatprep.mubr.bf16.mxu0 %v13184_v10 }
 0x102   :  { %11146 = vmatprep.subr.msk.bf16.mxu0 %vm79_vm0, %v1398_v9 }
 0x108   :  { %11143 = vmatmul.mubr.msk.bf16.vlgmr.msra.gmra.mrb[0].mxu0 %vm75_vm1, %v11141_v59 }
 0x109   :  { %1509 = vmatpush1.bf16.msra.mxu0 %v1421_v12  ;;  %1540 = vmatprep.mubr.bf16.mxu0 %v13184_v10 }
 0x110   :  { %11147 = vmatmul.mubr.msk.bf16.vlgmr.msra.gmra.mrb[8].mxu0 %vm75_vm1, %v11141_v59 }
 0x111   :  { %3310 = vmatprep.mubr.bf16.mxu0 %v13184_v10 }
 0x15b   :  { %v173_v13 = vpop.f32.mrb[4].mxu0 }
 0x15c   :  { %v175_v14 = vpop.f32.mrb[5].mxu0 }
 0x15d   :  { %v177_v15 = vpop.f32.mrb[6].mxu0 }
 0x15e   :  { %v178_v16 = vpop.f32.mrb[7].mxu0 }
 0x1b3   :  { %v1501_v20 = vpop.f32.mrb[0].mxu1 }
 0x1b4   :  { %v12270_v23 = vadd.f32 %v1501_v20, %v173_v13  ;;  %v1503_v24 = vpop.f32.mrb[1].mxu1 }
 0x1b5   :  { %v12271_v25 = vadd.f32 %v1503_v24, %v175_v14  ;;  %v1505_v26 = vpop.f32.mrb[2].mxu1 }
 0x1b6   :  { %v1506_v28 = vpop.f32.mrb[3].mxu1  ;;  %v1565_v29 = vmul.f32 %v12270_v23, %v1561_v21 }
 0x1b7   :  { %v1566_v47 = vmul.f32 %v12271_v25, %v1561_v21  ;;  %v11213_v28 = vld [vmem:[%s16337_s2 + $0x60] sm:$0xff] }
 0x1b8   :  { %v1576_v31 = vadd.f32 %v1572_v27, %v1565_v29 }
 0x1b9   :  { %v1577_v56 = vadd.f32 %v1572_v27, %v1566_v47 }
 0x1ba   :  { %v1614_v32 = vmul.f32 %v13687_v30, %v1576_v31 }
 0x1bb   :  { %v1615_v1 = vmul.f32 %v13708_v57, %v1577_v56 }
 0x1bc   :  { %1628 = vrot.lane.b32.xlu0 %v1614_v32, %s13192_s23 }
 0x1db   :  { %v1460_v35 = vpop.f32.mrb[0].mxu0 }
 0x1dc   :  { %v1563_v36 = vmul.f32 %v1561_v21, %v1460_v35  ;;  %v1462_v38 = vpop.f32.mrb[1].mxu0 }
 0x1dd   :  { %v1564_v39 = vmul.f32 %v1561_v21, %v1462_v38  ;;  %v1464_v41 = vpop.f32.mrb[2].mxu0 }
 0x1de   :  { %v1574_v42 = vadd.f32 %v1572_v27, %v1563_v36  ;;  %v1465_v43 = vpop.f32.mrb[3].mxu0  ;;  %v11150_v41 = vld [vmem:[%s16336_s1 + $0xa0] sm:$0xf] }
 0x1df   :  { %v1575_v44 = vadd.f32 %v1572_v27, %v1564_v39 }
 0x1e0   :  { %v1612_v45 = vmul.f32 %v13695_v37, %v1574_v42 }
 0x1e1   :  { %v1613_v49 = vmul.f32 %v13699_v40, %v1575_v44 }
 0x1e3   :  { %v1542_v51 = vpop.f32.mrb[8].mxu0  ;;  %v12822_v52 = vpack.i.bf16 %v1613_v49, %v1612_v45 }
 0x1e4   :  { %v1567_v53 = vmul.f32 %v1561_v21, %v1542_v51  ;;  %v1544_v55 = vpop.f32.mrb[9].mxu0 }
 0x1e5   :  { %v1568_v58 = vmul.f32 %v1561_v21, %v1544_v55  ;;  %12823 = vrot.lane.b32.xlu1 %v12822_v52, %s13192_s23  ;;  %v1546_v59 = vpop.f32.mrb[10].mxu0 }
 0x1e6   :  { %v1578_v61 = vadd.f32 %v1572_v27, %v1567_v53  ;;  %v1547_v62 = vpop.f32.mrb[11].mxu0 }
 0x1e7   :  { %v1579_v63 = vadd.f32 %v1572_v27, %v1568_v58  ;;  %v11212_v27 = vld [vmem:[%s16337_s2 + $0x40] sm:$0xff] }
 0x1e8   :  { %v1616_v0 = vmul.f32 %v13706_v54, %v1578_v61 }
 0x1e9   :  { %v1617_v2 = vmul.f32 %v13711_v60, %v1579_v63 }
 0x1ea   :  { %v12827_v3 = vpack.i.bf16 %v1616_v0, %v1615_v1 }
 0x1eb   :  { %1634 = vrot.lane.b32.xlu0 %v1617_v2, %s13192_s23  ;;  %v11163_v2 = vld [vmem:[%s16336_s1 + $0xb0] sm:$0xf] }
 0x1ec   :  { %12828 = vrot.lane.b32.xlu1 %v12827_v3, %s13192_s23 }
 0x22e   :  { %v1629_v9 = vpop.permute.xlu0 %1628 }
 0x257   :  { %v12824_v4 = vpop.permute.xlu1 %12823 }
 0x258   :  { %v12826_v5 = vunpack.i.h.bf16 %v12824_v4  ;;  %v12825_v6 = vunpack.i.l.bf16 %v12824_v4 }
 0x25a   :  { %v1637_v7 = vsel %vm1636_vm10, %v12825_v6, %v12826_v5  ;;  %v1648_v8 = vsel %vm1636_vm10, 0.0, %v12825_v6  ;;  %v1638_v13 = vsel %vm1636_vm10, %v12826_v5, %v1629_v9 }
 0x25b   :  { %v13720_v11 = vpack.c.bf16 %v1648_v8, %v1648_v8  ;;  %v13722_v12 = vpack.c.bf16 %v1637_v7, %v1637_v7  ;;  %v13729_v15 = vpack.c.bf16 %v1638_v13, %v1638_v13 }
 0x25d   :  { %1667 = vrot.lane.b32.xlu1 %v13720_v11, %s13183_s25  ;;  %1669 = vrot.lane.b32.xlu0 %v13722_v12, %s13183_s25  ;;  %v1635_v19 = vpop.permute.xlu0 %1634  ;;  %v1832_v49 = vsel %vm79_vm0, %v13720_v11, 0  ;;  %v1838_v52 = vsel %vm79_vm0, %v13729_v15, 0 }
 0x25e   :  { %v12829_v14 = vpop.permute.xlu1 %12828 }
 0x25f   :  { %v12831_v16 = vunpack.i.h.bf16 %v12829_v14  ;;  %v12830_v17 = vunpack.i.l.bf16 %v12829_v14 }
 0x261   :  { %v1639_v20 = vsel %vm1636_vm10, %v1629_v9, %v12830_v17  ;;  %v1640_v21 = vsel %vm1636_vm10, %v12830_v17, %v12831_v16  ;;  %v1641_v22 = vsel %vm1636_vm10, %v12831_v16, %v1635_v19  ;;  %1671 = vrot.lane.b32.xlu1 %v13729_v15, %s13183_s25  ;;  %v11170_v19 = vld [vmem:[%s16336_s1 + $0xc0] sm:$0xf] }
 0x262   :  { %v13736_v23 = vpack.c.bf16 %v1639_v20, %v1639_v20  ;;  %v13738_v24 = vpack.c.bf16 %v1640_v21, %v1640_v21  ;;  %v1650_v25 = vsel %vm1649_vm11, %v1641_v22, 0.0 }
 0x263   :  { %v13745_v26 = vpack.c.bf16 %v1650_v25, %v1650_v25 }
 0x264   :  { %1673 = vrot.lane.b32.xlu0 %v13736_v23, %s13183_s25  ;;  %v1844_v56 = vsel %vm79_vm0, %v13738_v24, 0 }
 0x265   :  { %1675 = vrot.lane.b32.xlu1 %v13738_v24, %s13183_s25 }
 0x268   :  { %1677 = vrot.lane.b32.xlu0 %v13745_v26, %s13183_s25 }
 0x269   :  { %1974 = vrot.lane.b32.xlu1 %v13720_v11, %s13185_s27 }
 0x26c   :  { %1976 = vrot.lane.b32.xlu0 %v13722_v12, %s13185_s27 }
 0x26d   :  { %1978 = vrot.lane.b32.xlu1 %v13729_v15, %s13185_s27 }
 0x270   :  { %1980 = vrot.lane.b32.xlu0 %v13736_v23, %s13185_s27 }
 0x271   :  { %1982 = vrot.lane.b32.xlu1 %v13738_v24, %s13185_s27 }
 0x274   :  { %1984 = vrot.lane.b32.xlu0 %v13745_v26, %s13185_s27 }
 0x275   :  { %2143 = vrot.lane.b32.xlu1 %v13720_v11, %s13186_s28 }
 0x278   :  { %2145 = vrot.lane.b32.xlu0 %v13722_v12, %s13186_s28 }
 0x279   :  { %2147 = vrot.lane.b32.xlu1 %v13729_v15, %s13186_s28 }
 0x27c   :  { %2149 = vrot.lane.b32.xlu0 %v13736_v23, %s13186_s28 }
 0x27d   :  { %2151 = vrot.lane.b32.xlu1 %v13738_v24, %s13186_s28 }
 0x280   :  { %2153 = vrot.lane.b32.xlu0 %v13745_v26, %s13186_s28 }
 0x281   :  { %2312 = vrot.lane.b32.xlu1 %v13720_v11, %s13187_s29 }
 0x284   :  { %2314 = vrot.lane.b32.xlu0 %v13722_v12, %s13187_s29 }
 0x285   :  { %2316 = vrot.lane.b32.xlu1 %v13729_v15, %s13187_s29 }
 0x288   :  { %2318 = vrot.lane.b32.xlu0 %v13736_v23, %s13187_s29 }
 0x289   :  { %2320 = vrot.lane.b32.xlu1 %v13738_v24, %s13187_s29 }
 0x28c   :  { %2322 = vrot.lane.b32.xlu0 %v13745_v26, %s13187_s29 }
 0x28d   :  { %2481 = vrot.lane.b32.xlu1 %v13720_v11, %s13188_s30 }
 0x290   :  { %2483 = vrot.lane.b32.xlu0 %v13722_v12, %s13188_s30 }
 0x291   :  { %2485 = vrot.lane.b32.xlu1 %v13729_v15, %s13188_s30 }
 0x294   :  { %2487 = vrot.lane.b32.xlu0 %v13736_v23, %s13188_s30 }
 0x295   :  { %2489 = vrot.lane.b32.xlu1 %v13738_v24, %s13188_s30 }
 0x298   :  { %2491 = vrot.lane.b32.xlu0 %v13745_v26, %s13188_s30 }
 0x299   :  { %2650 = vrot.lane.b32.xlu1 %v13720_v11, %s13189_s11 }
 0x29c   :  { %2652 = vrot.lane.b32.xlu0 %v13722_v12, %s13189_s11 }
 0x29d   :  { %2654 = vrot.lane.b32.xlu1 %v13729_v15, %s13189_s11 }
 0x2a0   :  { %2656 = vrot.lane.b32.xlu0 %v13736_v23, %s13189_s11 }
 0x2a1   :  { %2658 = vrot.lane.b32.xlu1 %v13738_v24, %s13189_s11 }
 0x2a4   :  { %2660 = vrot.lane.b32.xlu0 %v13745_v26, %s13189_s11 }
 0x2a5   :  { %2819 = vrot.lane.b32.xlu1 %v13720_v11, %s13190_s12 }
 0x2a8   :  { %2821 = vrot.lane.b32.xlu0 %v13722_v12, %s13190_s12 }
 0x2a9   :  { %2823 = vrot.lane.b32.xlu1 %v13729_v15, %s13190_s12 }
 0x2ac   :  { %2825 = vrot.lane.b32.xlu0 %v13736_v23, %s13190_s12 }
 0x2ad   :  { %2827 = vrot.lane.b32.xlu1 %v13738_v24, %s13190_s12 }
 0x2b0   :  { %2829 = vrot.lane.b32.xlu0 %v13745_v26, %s13190_s12 }
 0x2b1   :  { %2988 = vrot.lane.b32.xlu1 %v13720_v11, %s13191_s13 }
 0x2b4   :  { %2990 = vrot.lane.b32.xlu0 %v13722_v12, %s13191_s13 }
 0x2b5   :  { %2992 = vrot.lane.b32.xlu1 %v13729_v15, %s13191_s13 }
 0x2b8   :  { %2994 = vrot.lane.b32.xlu0 %v13736_v23, %s13191_s13 }
 0x2b9   :  { %2996 = vrot.lane.b32.xlu1 %v13738_v24, %s13191_s13 }
 0x2bc   :  { %2998 = vrot.lane.b32.xlu0 %v13745_v26, %s13191_s13 }
 0x2bd   :  { %3161 = vperm.xlu1 %12821, %v11212_v27  }
 0x2c0   :  { %3172 = vperm.xlu0 %12820, %v11213_v28  }
 0x2cf   :  { %v1668_v29 = vpop.permute.xlu1 %1667  ;;  %v1670_v31 = vpop.permute.xlu0 %1669 }
 0x2d0   :  { %v1679_v32 = vsel %vm69_vm2, %v1668_v29, %v1670_v31 }
 0x2d1   :  { %v1688_v38 = vsel %vm79_vm0, %v1679_v32, 0 }
 0x2d3   :  { %v1672_v35 = vpop.permute.xlu1 %1671 }
 0x2d4   :  { %v1680_v36 = vsel %vm69_vm2, %v1670_v31, %v1672_v35 }
 0x2d5   :  { %11151 = vmatprep.subr.msk.bf16.mxu1 %vm79_vm0, %v1680_v36 }
 0x2d6   :  { %1706 = vmatpush1.bf16.msra.mxu1 %v1688_v38  ;;  %v1674_v39 = vpop.permute.xlu0 %1673  ;;  %v11177_v38 = vld [vmem:[%s16336_s1 + $0xd0] sm:$0xf] }
 0x2d7   :  { %v1681_v42 = vsel %vm69_vm2, %v1672_v35, %v1674_v39  ;;  %v1676_v43 = vpop.permute.xlu1 %1675 }
 0x2d8   :  { %v1682_v44 = vsel %vm69_vm2, %v1674_v39, %v1676_v43  ;;  %v1694_v45 = vsel %vm79_vm0, %v1681_v42, 0 }
 0x2d9   :  { %11152 = vmatmul.mubr.msk.bf16.vlgmr.msra.gmra.mrb[4].mxu1 %vm75_vm1, %v11150_v41  ;;  %11153 = vmatprep.subr.msk.bf16.mxu1 %vm79_vm0, %v1682_v44 }
 0x2da   :  { %1747 = vmatpush1.bf16.msra.mxu1 %v1694_v45  ;;  %v1678_v46 = vpop.permute.xlu0 %1677  ;;  %1778 = vmatprep.mubr.bf16.mxu1 %v13184_v10 }
 0x2db   :  { %11155 = vmatprep.subr.msk.bf16.mxu1 %vm79_vm0, %v1678_v46  ;;  %v1683_v47 = vsel %vm69_vm2, %v1676_v43, %v1678_v46  ;;  %v1975_v51 = vpop.permute.xlu1 %1974 }
 0x2dc   :  { %v1700_v48 = vsel %vm79_vm0, %v1683_v47, 0 }
 0x2de   :  { %v1977_v53 = vpop.permute.xlu0 %1976 }
 0x2df   :  { %v1979_v55 = vpop.permute.xlu1 %1978  ;;  %v1986_v59 = vsel %vm379_vm3, %v1975_v51, %v1977_v53 }
 0x2e0   :  { %v1987_v58 = vsel %vm379_vm3, %v1977_v53, %v1979_v55  ;;  %v1995_v63 = vsel %vm79_vm0, %v1986_v59, 0 }
 0x2e1   :  { %11154 = vmatmul.mubr.msk.bf16.vlgmr.msra.gmra.mrb[8].mxu1 %vm75_vm1, %v11150_v41 }
 0x2e2   :  { %1788 = vmatpush1.bf16.msra.mxu1 %v1700_v48  ;;  %1819 = vmatprep.mubr.bf16.mxu1 %v13184_v10  ;;  %v1981_v61 = vpop.permute.xlu0 %1980 }
 0x2e3   :  { %11157 = vmatprep.subr.msk.bf16.mxu1 %vm79_vm0, %v13722_v12  ;;  %v1983_v62 = vpop.permute.xlu1 %1982  ;;  %v1988_v1 = vsel %vm379_vm3, %v1979_v55, %v1981_v61  ;;  %v11184_v55 = vld [vmem:[%s16336_s1 + $0xe0] sm:$0xf] }
 0x2e4   :  { %v1989_v0 = vsel %vm379_vm3, %v1981_v61, %v1983_v62  ;;  %v2001_v5 = vsel %vm79_vm0, %v1988_v1, 0 }
 0x2e6   :  { %v1985_v3 = vpop.permute.xlu0 %1984 }
 0x2e7   :  { %v2144_v4 = vpop.permute.xlu1 %2143  ;;  %v1990_v6 = vsel %vm379_vm3, %v1983_v62, %v1985_v3 }
 0x2e8   :  { %v2007_v9 = vsel %vm79_vm0, %v1990_v6, 0 }
 0x2e9   :  { %11156 = vmatmul.mubr.msk.bf16.vlgmr.msra.gmra.mrb[12].mxu1 %vm75_vm1, %v11150_v41 }
 0x2ea   :  { %1850 = vmatpush1.bf16.msra.mxu1 %v1832_v49  ;;  %1881 = vmatprep.mubr.bf16.mxu1 %v13184_v10  ;;  %v2146_v7 = vpop.permute.xlu0 %2145 }
 0x2eb   :  { %11159 = vmatprep.subr.msk.bf16.mxu1 %vm79_vm0, %v13736_v23  ;;  %v2148_v8 = vpop.permute.xlu1 %2147  ;;  %v2155_v12 = vsel %vm549_vm4, %v2144_v4, %v2146_v7 }
 0x2ec   :  { %v2156_v11 = vsel %vm549_vm4, %v2146_v7, %v2148_v8  ;;  %v2164_v15 = vsel %vm79_vm0, %v2155_v12, 0 }
 0x2ee   :  { %v2150_v13 = vpop.permute.xlu0 %2149 }
 0x2ef   :  { %v2152_v14 = vpop.permute.xlu1 %2151  ;;  %v2157_v17 = vsel %vm549_vm4, %v2148_v8, %v2150_v13  ;;  %v11191_v8 = vld [vmem:[%s16336_s1 + $0xf0] sm:$0xf] }
 0x2f0   :  { %v2158_v16 = vsel %vm549_vm4, %v2150_v13, %v2152_v14  ;;  %v2170_v22 = vsel %vm79_vm0, %v2157_v17, 0 }
 0x2f1   :  { %11158 = vmatmul.mubr.msk.bf16.vlgmr.msra.gmra.mrb[4].mxu1 %vm75_vm1, %v11149_v50 }
 0x2f2   :  { %1891 = vmatpush1.bf16.msra.mxu1 %v1838_v52  ;;  %1922 = vmatprep.mubr.bf16.mxu1 %v13184_v10  ;;  %v2154_v20 = vpop.permute.xlu0 %2153 }
 0x2f3   :  { %11161 = vmatprep.subr.msk.bf16.mxu1 %vm79_vm0, %v13745_v26  ;;  %v2313_v21 = vpop.permute.xlu1 %2312  ;;  %v2159_v23 = vsel %vm549_vm4, %v2152_v14, %v2154_v20 }
 0x2f4   :  { %v2176_v26 = vsel %vm79_vm0, %v2159_v23, 0 }
 0x2f6   :  { %v2315_v24 = vpop.permute.xlu0 %2314 }
 0x2f7   :  { %v2317_v25 = vpop.permute.xlu1 %2316  ;;  %v2324_v28 = vsel %vm719_vm5, %v2313_v21, %v2315_v24 }
 0x2f8   :  { %v2325_v27 = vsel %vm719_vm5, %v2315_v24, %v2317_v25  ;;  %v2333_v32 = vsel %vm79_vm0, %v2324_v28, 0 }
 0x2f9   :  { %11160 = vmatmul.mubr.msk.bf16.vlgmr.msra.gmra.mrb[8].mxu1 %vm75_vm1, %v11149_v50 }
 0x2fa   :  { %1932 = vmatpush1.bf16.msra.mxu1 %v1844_v56  ;;  %1963 = vmatprep.mubr.bf16.mxu1 %v13184_v10  ;;  %v2319_v29 = vpop.permute.xlu0 %2318 }
 0x2fb   :  { %11164 = vmatprep.subr.msk.bf16.mxu1 %vm79_vm0, %v1987_v58  ;;  %v2321_v31 = vpop.permute.xlu1 %2320  ;;  %v2326_v36 = vsel %vm719_vm5, %v2317_v25, %v2319_v29  ;;  %v11198_v25 = vld [vmem:[%s16336_s1 + $0x100] sm:$0xf] }
 0x2fc   :  { %v2327_v35 = vsel %vm719_vm5, %v2319_v29, %v2321_v31  ;;  %v2339_v42 = vsel %vm79_vm0, %v2326_v36, 0 }
 0x2fe   :  { %v2323_v39 = vpop.permute.xlu0 %2322 }
 0x2ff   :  { %v2482_v41 = vpop.permute.xlu1 %2481  ;;  %v2328_v43 = vsel %vm719_vm5, %v2321_v31, %v2323_v39 }
 0x300   :  { %v2345_v46 = vsel %vm79_vm0, %v2328_v43, 0 }
 0x301   :  { %11162 = vmatmul.mubr.msk.bf16.vlgmr.msra.gmra.mrb[12].mxu1 %vm75_vm1, %v11149_v50 }
 0x302   :  { %2013 = vmatpush1.bf16.msra.mxu1 %v1995_v63  ;;  %2044 = vmatprep.mubr.bf16.mxu1 %v13184_v10  ;;  %v2484_v44 = vpop.permute.xlu0 %2483 }
 0x303   :  { %11166 = vmatprep.subr.msk.bf16.mxu1 %vm79_vm0, %v1989_v0  ;;  %v2486_v45 = vpop.permute.xlu1 %2485  ;;  %v2493_v48 = vsel %vm889_vm6, %v2482_v41, %v2484_v44 }
 0x304   :  { %v2494_v47 = vsel %vm889_vm6, %v2484_v44, %v2486_v45  ;;  %v2502_v51 = vsel %vm79_vm0, %v2493_v48, 0 }
 0x306   :  { %v2488_v49 = vpop.permute.xlu0 %2487 }
 0x307   :  { %v2490_v50 = vpop.permute.xlu1 %2489  ;;  %v2495_v53 = vsel %vm889_vm6, %v2486_v45, %v2488_v49  ;;  %v11205_v45 = vld [vmem:[%s16336_s1 + $0x110] sm:$0xf] }
 0x308   :  { %v2496_v52 = vsel %vm889_vm6, %v2488_v49, %v2490_v50  ;;  %v2508_v59 = vsel %vm79_vm0, %v2495_v53, 0 }
 0x309   :  { %11165 = vmatmul.mubr.msk.bf16.vlgmr.msra.gmra.mrb[4].mxu1 %vm75_vm1, %v11163_v2 }
 0x30a   :  { %2054 = vmatpush1.bf16.msra.mxu1 %v2001_v5  ;;  %2085 = vmatprep.mubr.bf16.mxu1 %v13184_v10  ;;  %v2492_v56 = vpop.permute.xlu0 %2491 }
 0x30b   :  { %11168 = vmatprep.subr.msk.bf16.mxu1 %vm79_vm0, %v1985_v3  ;;  %v2651_v58 = vpop.permute.xlu1 %2650  ;;  %v2497_v61 = vsel %vm889_vm6, %v2490_v50, %v2492_v56 }
 0x30c   :  { %v2514_v0 = vsel %vm79_vm0, %v2497_v61, 0 }
 0x30e   :  { %v2653_v62 = vpop.permute.xlu0 %2652 }
 0x30f   :  { %v2655_v63 = vpop.permute.xlu1 %2654 }
 0x310   :  { %v2663_v1 = vsel %vm1059_vm7, %v2653_v62, %v2655_v63 }
 0x311   :  { %11167 = vmatmul.mubr.msk.bf16.vlgmr.msra.gmra.mrb[8].mxu1 %vm75_vm1, %v11163_v2 }
 0x312   :  { %2095 = vmatpush1.bf16.msra.mxu1 %v2007_v9  ;;  %2126 = vmatprep.mubr.bf16.mxu1 %v13184_v10  ;;  %v2657_v3 = vpop.permute.xlu0 %2656 }
 0x313   :  { %11171 = vmatprep.subr.msk.bf16.mxu1 %vm79_vm0, %v2156_v11  ;;  %v2659_v4 = vpop.permute.xlu1 %2658  ;;  %v2664_v7 = vsel %vm1059_vm7, %v2655_v63, %v2657_v3 }
 0x314   :  { %v2665_v6 = vsel %vm1059_vm7, %v2657_v3, %v2659_v4  ;;  %v2677_v12 = vsel %vm79_vm0, %v2664_v7, 0 }
 0x316   :  { %v2661_v9 = vpop.permute.xlu0 %2660 }
 0x317   :  { %v2820_v11 = vpop.permute.xlu1 %2819  ;;  %v2666_v13 = vsel %vm1059_vm7, %v2659_v4, %v2661_v9 }
 0x319   :  { %11169 = vmatmul.mubr.msk.bf16.vlgmr.msra.gmra.mrb[12].mxu1 %vm75_vm1, %v11163_v2  ;;  %v2662_v2 = vsel %vm1059_vm7, %v2651_v58, %v2653_v62 }
 0x31a   :  { %2182 = vmatpush1.bf16.msra.mxu1 %v2164_v15  ;;  %2213 = vmatprep.mubr.bf16.mxu1 %v13184_v10  ;;  %v2671_v5 = vsel %vm79_vm0, %v2662_v2, 0  ;;  %v2822_v14 = vpop.permute.xlu0 %2821 }
 0x31b   :  { %11173 = vmatprep.subr.msk.bf16.mxu1 %vm79_vm0, %v2158_v16  ;;  %v2824_v15 = vpop.permute.xlu1 %2823  ;;  %v2683_v16 = vsel %vm79_vm0, %v2666_v13, 0 }
 0x31c   :  { %v2832_v17 = vsel %vm1229_vm8, %v2822_v14, %v2824_v15 }
 0x31f   :  { %v2828_v21 = vpop.permute.xlu1 %2827 }
 0x321   :  { %11172 = vmatmul.mubr.msk.bf16.vlgmr.msra.gmra.mrb[4].mxu1 %vm75_vm1, %v11170_v19 }
 0x322   :  { %2223 = vmatpush1.bf16.msra.mxu1 %v2170_v22  ;;  %2254 = vmatprep.mubr.bf16.mxu1 %v13184_v10 }
 0x323   :  { %11175 = vmatprep.subr.msk.bf16.mxu1 %vm79_vm0, %v2154_v20  ;;  %v2826_v20 = vpop.permute.xlu0 %2825 }
 0x324   :  { %v2834_v23 = vsel %vm1229_vm8, %v2826_v20, %v2828_v21  ;;  %v2833_v24 = vsel %vm1229_vm8, %v2824_v15, %v2826_v20 }
 0x325   :  { %v2846_v28 = vsel %vm79_vm0, %v2833_v24, 0 }
 0x329   :  { %11174 = vmatmul.mubr.msk.bf16.vlgmr.msra.gmra.mrb[8].mxu1 %vm75_vm1, %v11170_v19 }
 0x32a   :  { %2264 = vmatpush1.bf16.msra.mxu1 %v2176_v26  ;;  %2295 = vmatprep.mubr.bf16.mxu1 %v13184_v10  ;;  %v2830_v26 = vpop.permute.xlu0 %2829 }
 0x32b   :  { %11178 = vmatprep.subr.msk.bf16.mxu1 %vm79_vm0, %v2325_v27  ;;  %v2989_v27 = vpop.permute.xlu1 %2988  ;;  %v2835_v29 = vsel %vm1229_vm8, %v2828_v21, %v2830_v26 }
 0x32e   :  { %v2991_v31 = vpop.permute.xlu0 %2990 }
 0x331   :  { %11176 = vmatmul.mubr.msk.bf16.vlgmr.msra.gmra.mrb[12].mxu1 %vm75_vm1, %v11170_v19  ;;  %v2831_v19 = vsel %vm1229_vm8, %v2820_v11, %v2822_v14 }
 0x332   :  { %2351 = vmatpush1.bf16.msra.mxu1 %v2333_v32  ;;  %2382 = vmatprep.mubr.bf16.mxu1 %v13184_v10  ;;  %v2840_v22 = vsel %vm79_vm0, %v2831_v19, 0  ;;  %v2993_v32 = vpop.permute.xlu1 %2992 }
 0x333   :  { %11180 = vmatprep.subr.msk.bf16.mxu1 %vm79_vm0, %v2327_v35  ;;  %v2852_v35 = vsel %vm79_vm0, %v2835_v29, 0  ;;  %v3001_v36 = vsel %vm1399_vm9, %v2991_v31, %v2993_v32 }
 0x336   :  { %v2997_v41 = vpop.permute.xlu1 %2996 }
 0x339   :  { %11179 = vmatmul.mubr.msk.bf16.vlgmr.msra.gmra.mrb[4].mxu1 %vm75_vm1, %v11177_v38 }
 0x33a   :  { %2392 = vmatpush1.bf16.msra.mxu1 %v2339_v42  ;;  %2423 = vmatprep.mubr.bf16.mxu1 %v13184_v10 }
 0x33b   :  { %11182 = vmatprep.subr.msk.bf16.mxu1 %vm79_vm0, %v2323_v39  ;;  %v2995_v39 = vpop.permute.xlu0 %2994 }
 0x33c   :  { %v3003_v43 = vsel %vm1399_vm9, %v2995_v39, %v2997_v41  ;;  %v3002_v44 = vsel %vm1399_vm9, %v2993_v32, %v2995_v39  ;;  %v3162_v50 = vpop.permute.xlu1 %3161 }
 0x341   :  { %11181 = vmatmul.mubr.msk.bf16.vlgmr.msra.gmra.mrb[8].mxu1 %vm75_vm1, %v11177_v38 }
 0x342   :  { %2433 = vmatpush1.bf16.msra.mxu1 %v2345_v46  ;;  %2464 = vmatprep.mubr.bf16.mxu1 %v13184_v10  ;;  %v3015_v46 = vsel %vm79_vm0, %v3002_v44, 0 }
 0x343   :  { %11185 = vmatprep.subr.msk.bf16.mxu1 %vm79_vm0, %v2494_v47  ;;  %v2999_v47 = vpop.permute.xlu0 %2998 }
 0x344   :  { %v3004_v48 = vsel %vm1399_vm9, %v2997_v41, %v2999_v47 }
 0x345   :  { %v3021_v49 = vsel %vm79_vm0, %v3004_v48, 0 }
 0x349   :  { %11183 = vmatmul.mubr.msk.bf16.vlgmr.msra.gmra.mrb[12].mxu1 %vm75_vm1, %v11177_v38  ;;  %v3000_v38 = vsel %vm1399_vm9, %v2989_v27, %v2991_v31 }
 0x34a   :  { %2520 = vmatpush1.bf16.msra.mxu1 %v2502_v51  ;;  %2551 = vmatprep.mubr.bf16.mxu1 %v13184_v10  ;;  %v3009_v42 = vsel %vm79_vm0, %v3000_v38, 0 }
 0x34b   :  { %11187 = vmatprep.subr.msk.bf16.mxu1 %vm79_vm0, %v2496_v52 }
 0x351   :  { %11186 = vmatmul.mubr.msk.bf16.vlgmr.msra.gmra.mrb[4].mxu1 %vm75_vm1, %v11184_v55 }
 0x352   :  { %2561 = vmatpush1.bf16.msra.mxu1 %v2508_v59  ;;  %2592 = vmatprep.mubr.bf16.mxu1 %v13184_v10 }
 0x353   :  { %11189 = vmatprep.subr.msk.bf16.mxu1 %vm79_vm0, %v2492_v56 }
 0x359   :  { %11188 = vmatmul.mubr.msk.bf16.vlgmr.msra.gmra.mrb[8].mxu1 %vm75_vm1, %v11184_v55 }
 0x35a   :  { %2602 = vmatpush1.bf16.msra.mxu1 %v2514_v0  ;;  %2633 = vmatprep.mubr.bf16.mxu1 %v13184_v10 }
 0x35b   :  { %11192 = vmatprep.subr.msk.bf16.mxu1 %vm79_vm0, %v2663_v1 }
 0x361   :  { %11190 = vmatmul.mubr.msk.bf16.vlgmr.msra.gmra.mrb[12].mxu1 %vm75_vm1, %v11184_v55  ;;  %v3173_v55 = vpop.permute.xlu0 %3172 }
 0x362   :  { %2689 = vmatpush1.bf16.msra.mxu1 %v2671_v5  ;;  %2720 = vmatprep.mubr.bf16.mxu1 %v13184_v10 }
 0x363   :  { %11194 = vmatprep.subr.msk.bf16.mxu1 %vm79_vm0, %v2665_v6 }
 0x369   :  { %11193 = vmatmul.mubr.msk.bf16.vlgmr.msra.gmra.mrb[4].mxu1 %vm75_vm1, %v11191_v8 }
 0x36a   :  { %2730 = vmatpush1.bf16.msra.mxu1 %v2677_v12  ;;  %2761 = vmatprep.mubr.bf16.mxu1 %v13184_v10 }
 0x36b   :  { %11196 = vmatprep.subr.msk.bf16.mxu1 %vm79_vm0, %v2661_v9 }
 0x371   :  { %11195 = vmatmul.mubr.msk.bf16.vlgmr.msra.gmra.mrb[8].mxu1 %vm75_vm1, %v11191_v8 }
 0x372   :  { %2771 = vmatpush1.bf16.msra.mxu1 %v2683_v16  ;;  %2802 = vmatprep.mubr.bf16.mxu1 %v13184_v10 }
 0x373   :  { %11199 = vmatprep.subr.msk.bf16.mxu1 %vm79_vm0, %v2832_v17 }
 0x379   :  { %11197 = vmatmul.mubr.msk.bf16.vlgmr.msra.gmra.mrb[12].mxu1 %vm75_vm1, %v11191_v8 }
 0x37a   :  { %2858 = vmatpush1.bf16.msra.mxu1 %v2840_v22  ;;  %2889 = vmatprep.mubr.bf16.mxu1 %v13184_v10 }
 0x37b   :  { %11201 = vmatprep.subr.msk.bf16.mxu1 %vm79_vm0, %v2834_v23 }
 0x381   :  { %11200 = vmatmul.mubr.msk.bf16.vlgmr.msra.gmra.mrb[4].mxu1 %vm75_vm1, %v11198_v25 }
 0x382   :  { %2899 = vmatpush1.bf16.msra.mxu1 %v2846_v28  ;;  %2930 = vmatprep.mubr.bf16.mxu1 %v13184_v10 }
 0x383   :  { %11203 = vmatprep.subr.msk.bf16.mxu1 %vm79_vm0, %v2830_v26 }
 0x389   :  { %11202 = vmatmul.mubr.msk.bf16.vlgmr.msra.gmra.mrb[8].mxu1 %vm75_vm1, %v11198_v25 }
 0x38a   :  { %2940 = vmatpush1.bf16.msra.mxu1 %v2852_v35  ;;  %2971 = vmatprep.mubr.bf16.mxu1 %v13184_v10 }
 0x38b   :  { %11206 = vmatprep.subr.msk.bf16.mxu1 %vm79_vm0, %v3001_v36 }
 0x391   :  { %11204 = vmatmul.mubr.msk.bf16.vlgmr.msra.gmra.mrb[12].mxu1 %vm75_vm1, %v11198_v25 }
 0x392   :  { %3027 = vmatpush1.bf16.msra.mxu1 %v3009_v42  ;;  %3058 = vmatprep.mubr.bf16.mxu1 %v13184_v10 }
 0x393   :  { %11208 = vmatprep.subr.msk.bf16.mxu1 %vm79_vm0, %v3003_v43 }
 0x399   :  { %11207 = vmatmul.mubr.msk.bf16.vlgmr.msra.gmra.mrb[4].mxu1 %vm75_vm1, %v11205_v45 }
 0x39a   :  { %3068 = vmatpush1.bf16.msra.mxu1 %v3015_v46  ;;  %3099 = vmatprep.mubr.bf16.mxu1 %v13184_v10 }
 0x39b   :  { %11210 = vmatprep.subr.msk.bf16.mxu1 %vm79_vm0, %v2999_v47 }
 0x3a1   :  { %11209 = vmatmul.mubr.msk.bf16.vlgmr.msra.gmra.mrb[8].mxu1 %vm75_vm1, %v11205_v45 }
 0x3a2   :  { %3109 = vmatpush1.bf16.msra.mxu1 %v3021_v49  ;;  %3140 = vmatprep.mubr.bf16.mxu1 %v13184_v10 }
 0x3a9   :  { %11211 = vmatmul.mubr.msk.bf16.vlgmr.msra.gmra.mrb[12].mxu1 %vm75_vm1, %v11205_v45 }
 0x46c   :  { %v3060_v51 = vpop.f32.mrb[4].mxu1 }
 0x46d   :  { %v3164_v52 = vmul.f32 %v3162_v50, %v3060_v51  ;;  %v3062_v53 = vpop.f32.mrb[5].mxu1  ;;  %v11277_v51 = vld [vmem:[%s16337_s2 + $0x80] sm:$0xff] }
 0x46e   :  { %v3165_v56 = vmul.f32 %v3162_v50, %v3062_v53  ;;  %v3064_v58 = vpop.f32.mrb[6].mxu1 }
 0x46f   :  { %v3175_v59 = vadd.f32 %v3173_v55, %v3164_v52  ;;  %v3065_v61 = vpop.f32.mrb[7].mxu1  ;;  %v11278_v52 = vld [vmem:[%s16337_s2 + $0xa0] sm:$0xff] }
 0x470   :  { %v3176_v62 = vadd.f32 %v3173_v55, %v3165_v56 }
 0x471   :  { %v3181_v63 = vmax.f32 %v3175_v59, 0.0 }
 0x472   :  { %v3182_v0 = vmax.f32 %v3176_v62, 0.0  ;;  %v11215_v62 = vld [vmem:[%s16336_s1 + $0x130] sm:$0xf] }
 0x473   :  { %v3187_v1 = vmul.f32 %v3181_v63, %v13695_v37 }
 0x474   :  { %v3188_v2 = vmul.f32 %v3182_v0, %v13699_v40  ;;  %v3101_v3 = vpop.f32.mrb[8].mxu1 }
 0x475   :  { %v3166_v4 = vmul.f32 %v3162_v50, %v3101_v3  ;;  %v3103_v5 = vpop.f32.mrb[9].mxu1 }
 0x476   :  { %v12832_v6 = vpack.i.bf16 %v3188_v2, %v3187_v1  ;;  %v3105_v7 = vpop.f32.mrb[10].mxu1  ;;  %v3167_v9 = vmul.f32 %v3162_v50, %v3103_v5 }
 0x477   :  { %v3177_v8 = vadd.f32 %v3173_v55, %v3166_v4  ;;  %v3106_v11 = vpop.f32.mrb[11].mxu1 }
 0x478   :  { %12833 = vrot.lane.b32.xlu1 %v12832_v6, %s13192_s23  ;;  %v3178_v14 = vadd.f32 %v3173_v55, %v3167_v9 }
 0x479   :  { %v3183_v12 = vmax.f32 %v3177_v8, 0.0  ;;  %v11214_v8 = vld [vmem:[%s16336_s1 + $0x120] sm:$0xf] }
 0x47a   :  { %v3184_v19 = vmax.f32 %v3178_v14, 0.0 }
 0x47b   :  { %v3189_v13 = vmul.f32 %v3183_v12, %v13687_v30 }
 0x47c   :  { %v3142_v15 = vpop.f32.mrb[12].mxu1  ;;  %v3190_v25 = vmul.f32 %v3184_v19, %v13708_v57 }
 0x47d   :  { %v3168_v16 = vmul.f32 %v3162_v50, %v3142_v15  ;;  %v3144_v17 = vpop.f32.mrb[13].mxu1  ;;  %3203 = vrot.lane.b32.xlu0 %v3189_v13, %s13192_s23 }
 0x47e   :  { %v3169_v37 = vmul.f32 %v3162_v50, %v3144_v17  ;;  %v3146_v40 = vpop.f32.mrb[14].mxu1 }
 0x47f   :  { %v3179_v20 = vadd.f32 %v3173_v55, %v3168_v16  ;;  %v3147_v21 = vpop.f32.mrb[15].mxu1 }
 0x480   :  { %v3180_v22 = vadd.f32 %v3173_v55, %v3169_v37  ;;  %v11228_v21 = vld [vmem:[%s16336_s1 + $0x140] sm:$0xf] }
 0x481   :  { %v3185_v23 = vmax.f32 %v3179_v20, 0.0 }
 0x482   :  { %v3186_v24 = vmax.f32 %v3180_v22, 0.0 }
 0x483   :  { %v3191_v26 = vmul.f32 %v3185_v23, %v13706_v54 }
 0x484   :  { %v3192_v30 = vmul.f32 %v3186_v24, %v13711_v60 }
 0x485   :  { %v12837_v27 = vpack.i.bf16 %v3191_v26, %v3190_v25 }
 0x486   :  { %3209 = vrot.lane.b32.xlu0 %v3192_v30, %s13192_s23 }
 0x487   :  { %12838 = vrot.lane.b32.xlu1 %v12837_v27, %s13192_s23  ;;  %s13194_s23 = smov 118  }
 0x4ea   :  { %v12834_v28 = vpop.permute.xlu1 %12833 }
 0x4eb   :  { %v12836_v29 = vunpack.i.h.bf16 %v12834_v28  ;;  %v12835_v31 = vunpack.i.l.bf16 %v12834_v28 }
 0x4ed   :  { %v3211_v32 = vsel %vm1636_vm10, %v12835_v31, %v12836_v29  ;;  %v3222_v35 = vsel %vm1636_vm10, 0.0, %v12835_v31 }
 0x4ee   :  { %v14031_v36 = vpack.c.bf16 %v3222_v35, %v3222_v35  ;;  %v14033_v38 = vpack.c.bf16 %v3211_v32, %v3211_v32 }
 0x4ef   :  { %v3204_v57 = vpop.permute.xlu0 %3203 }
 0x4f0   :  { %v3212_v54 = vsel %vm1636_vm10, %v12836_v29, %v3204_v57  ;;  %3240 = vrot.lane.b32.xlu1 %v14031_v36, %s13183_s25  ;;  %3242 = vrot.lane.b32.xlu0 %v14033_v38, %s13183_s25  ;;  %v3405_v7 = vsel %vm79_vm0, %v14031_v36, 0 }
 0x4f1   :  { %v14040_v60 = vpack.c.bf16 %v3212_v54, %v3212_v54 }
 0x4f3   :  { %v3411_v11 = vsel %vm79_vm0, %v14040_v60, 0 }
 0x4f4   :  { %3244 = vrot.lane.b32.xlu1 %v14040_v60, %s13183_s25 }
 0x4f8   :  { %v3210_v43 = vpop.permute.xlu0 %3209 }
 0x4f9   :  { %v12839_v39 = vpop.permute.xlu1 %12838 }
 0x4fa   :  { %v12841_v41 = vunpack.i.h.bf16 %v12839_v39  ;;  %v12840_v42 = vunpack.i.l.bf16 %v12839_v39 }
 0x4fc   :  { %v3215_v44 = vsel %vm1636_vm10, %v12841_v41, %v3210_v43  ;;  %v3213_v45 = vsel %vm1636_vm10, %v3204_v57, %v12840_v42  ;;  %v3214_v46 = vsel %vm1636_vm10, %v12840_v42, %v12841_v41  ;;  %v11235_v57 = vld [vmem:[%s16336_s1 + $0x150] sm:$0xf]  ;;  %vm9327_vm10 = vcmask 302080  }
 0x4fd   :  { %v14047_v47 = vpack.c.bf16 %v3213_v45, %v3213_v45  ;;  %v14049_v48 = vpack.c.bf16 %v3214_v46, %v3214_v46  ;;  %v3223_v49 = vsel %vm1649_vm11, %v3215_v44, 0.0  ;;  %v12886_v45 = vld [vmem:[%s16339_s4] ss:$8 sps:$4 sm:$0xff]   ;;  %v12888_v46 = vld [vmem:[%s16339_s4 + $0x4] ss:$8 sps:$4 sm:$0xff]   ;;  %vm9362_vm11 = vcmask 261120  }
 0x4fe   :  { %v14056_v50 = vpack.c.bf16 %v3223_v49, %v3223_v49  ;;  %5261 = vmatprep.subr.bf16.mxu1 %v12888_v46  ;;  %v12889_v49 = vld [vmem:[%s16339_s4 + $0x10] ss:$8 sps:$4 sm:$0xff]  }
 0x4ff   :  { %3248 = vrot.lane.b32.xlu1 %v14049_v48, %s13183_s25  ;;  %3246 = vrot.lane.b32.xlu0 %v14047_v47, %s13183_s25  ;;  %v3417_v14 = vsel %vm79_vm0, %v14049_v48, 0 }
 0x500   :  { %5262 = vmatpush1.bf16.msra.mxu1 %v12886_v45 }
 0x503   :  { %3547 = vrot.lane.b32.xlu1 %v14031_v36, %s13185_s27  ;;  %3250 = vrot.lane.b32.xlu0 %v14056_v50, %s13183_s25 }
 0x507   :  { %3551 = vrot.lane.b32.xlu1 %v14040_v60, %s13185_s27  ;;  %3549 = vrot.lane.b32.xlu0 %v14033_v38, %s13185_s27 }
 0x50b   :  { %3555 = vrot.lane.b32.xlu1 %v14049_v48, %s13185_s27  ;;  %3553 = vrot.lane.b32.xlu0 %v14047_v47, %s13185_s27 }
 0x50f   :  { %3716 = vrot.lane.b32.xlu1 %v14031_v36, %s13186_s28  ;;  %3557 = vrot.lane.b32.xlu0 %v14056_v50, %s13185_s27 }
 0x513   :  { %3720 = vrot.lane.b32.xlu1 %v14040_v60, %s13186_s28  ;;  %3718 = vrot.lane.b32.xlu0 %v14033_v38, %s13186_s28 }
 0x517   :  { %3724 = vrot.lane.b32.xlu1 %v14049_v48, %s13186_s28  ;;  %3722 = vrot.lane.b32.xlu0 %v14047_v47, %s13186_s28 }
 0x51b   :  { %3885 = vrot.lane.b32.xlu1 %v14031_v36, %s13187_s29  ;;  %3726 = vrot.lane.b32.xlu0 %v14056_v50, %s13186_s28 }
 0x51f   :  { %3889 = vrot.lane.b32.xlu1 %v14040_v60, %s13187_s29  ;;  %3887 = vrot.lane.b32.xlu0 %v14033_v38, %s13187_s29 }
 0x523   :  { %3893 = vrot.lane.b32.xlu1 %v14049_v48, %s13187_s29  ;;  %3891 = vrot.lane.b32.xlu0 %v14047_v47, %s13187_s29 }
 0x527   :  { %4054 = vrot.lane.b32.xlu1 %v14031_v36, %s13188_s30  ;;  %3895 = vrot.lane.b32.xlu0 %v14056_v50, %s13187_s29 }
 0x52b   :  { %4058 = vrot.lane.b32.xlu1 %v14040_v60, %s13188_s30  ;;  %4056 = vrot.lane.b32.xlu0 %v14033_v38, %s13188_s30 }
 0x52f   :  { %4062 = vrot.lane.b32.xlu1 %v14049_v48, %s13188_s30  ;;  %4060 = vrot.lane.b32.xlu0 %v14047_v47, %s13188_s30 }
 0x533   :  { %4223 = vrot.lane.b32.xlu1 %v14031_v36, %s13189_s11  ;;  %4064 = vrot.lane.b32.xlu0 %v14056_v50, %s13188_s30 }
 0x537   :  { %4227 = vrot.lane.b32.xlu1 %v14040_v60, %s13189_s11  ;;  %4225 = vrot.lane.b32.xlu0 %v14033_v38, %s13189_s11 }
 0x53b   :  { %4231 = vrot.lane.b32.xlu1 %v14049_v48, %s13189_s11  ;;  %4229 = vrot.lane.b32.xlu0 %v14047_v47, %s13189_s11 }
 0x53f   :  { %4392 = vrot.lane.b32.xlu1 %v14031_v36, %s13190_s12  ;;  %4233 = vrot.lane.b32.xlu0 %v14056_v50, %s13189_s11 }
 0x543   :  { %4396 = vrot.lane.b32.xlu1 %v14040_v60, %s13190_s12  ;;  %4394 = vrot.lane.b32.xlu0 %v14033_v38, %s13190_s12 }
 0x547   :  { %4400 = vrot.lane.b32.xlu1 %v14049_v48, %s13190_s12  ;;  %4398 = vrot.lane.b32.xlu0 %v14047_v47, %s13190_s12 }
 0x54b   :  { %4561 = vrot.lane.b32.xlu1 %v14031_v36, %s13191_s13  ;;  %4402 = vrot.lane.b32.xlu0 %v14056_v50, %s13190_s12 }
 0x54f   :  { %4565 = vrot.lane.b32.xlu1 %v14040_v60, %s13191_s13  ;;  %4563 = vrot.lane.b32.xlu0 %v14033_v38, %s13191_s13 }
 0x553   :  { %4569 = vrot.lane.b32.xlu1 %v14049_v48, %s13191_s13  ;;  %4567 = vrot.lane.b32.xlu0 %v14047_v47, %s13191_s13  ;;  %v12891_v48 = vld [vmem:[%s16339_s4 + $0x14] ss:$8 sps:$4 sm:$0xff]  }
 0x554   :  { %5263 = vmatprep.subr.bf16.mxu1 %v12891_v48 }
 0x555   :  { %5264 = vmatpush1.bf16.msra.mxu1 %v12889_v49 }
 0x557   :  { %4734 = vperm.xlu1 %12821, %v11277_v51   ;;  %4571 = vrot.lane.b32.xlu0 %v14056_v50, %s13191_s13  ;;  %s13196_s13 = smov 116  }
 0x55b   :  { %4745 = vperm.xlu0 %12820, %v11278_v52  }
 0x562   :  { %v3241_v53 = vpop.permute.xlu1 %3240  ;;  %v3243_v55 = vpop.permute.xlu0 %3242 }
 0x563   :  { %v3252_v56 = vsel %vm69_vm2, %v3241_v53, %v3243_v55 }
 0x564   :  { %v3261_v61 = vsel %vm79_vm0, %v3252_v56, 0 }
 0x566   :  { %v3245_v58 = vpop.permute.xlu1 %3244 }
 0x567   :  { %v3253_v59 = vsel %vm69_vm2, %v3243_v55, %v3245_v58  ;;  %v12892_v55 = vld [vmem:[%s16339_s4 + $0x20] ss:$8 sps:$4 sm:$0xff]  }
 0x568   :  { %11216 = vmatprep.subr.msk.bf16.mxu0 %vm79_vm0, %v3253_v59 }
 0x569   :  { %3279 = vmatpush1.bf16.msra.mxu0 %v3261_v61  ;;  %v12895_v61 = vld [vmem:[%s16339_s4 + $0x30] ss:$8 sps:$4 sm:$0xff]  }
 0x56c   :  { %11217 = vmatmul.mubr.msk.bf16.vlgmr.msra.gmra.mrb[12].mxu0 %vm75_vm1, %v11215_v62 }
 0x56d   :  { %3351 = vmatprep.mubr.bf16.mxu0 %v13184_v10 }
 0x571   :  { %v3249_v63 = vpop.permute.xlu1 %3248  ;;  %v3247_v0 = vpop.permute.xlu0 %3246 }
 0x572   :  { %v3254_v1 = vsel %vm69_vm2, %v3245_v58, %v3247_v0  ;;  %v3255_v2 = vsel %vm69_vm2, %v3247_v0, %v3249_v63  ;;  %v12897_v58 = vld [vmem:[%s16339_s4 + $0x34] ss:$8 sps:$4 sm:$0xff]   ;;  %v11242_v0 = vld [vmem:[%s16336_s1 + $0x160] sm:$0xf] }
 0x573   :  { %11218 = vmatprep.subr.msk.bf16.mxu0 %vm79_vm0, %v3255_v2  ;;  %v3267_v3 = vsel %vm79_vm0, %v3254_v1, 0  ;;  %v12898_v1 = vld [vmem:[%s16339_s4 + $0x40] ss:$8 sps:$4 sm:$0xff]  }
 0x574   :  { %3320 = vmatpush1.bf16.msra.mxu0 %v3267_v3 }
 0x575   :  { %v3251_v4 = vpop.permute.xlu0 %3250  ;;  %v3548_v9 = vpop.permute.xlu1 %3547 }
 0x576   :  { %v3256_v5 = vsel %vm69_vm2, %v3249_v63, %v3251_v4  ;;  %11220 = vmatprep.subr.msk.bf16.mxu0 %vm79_vm0, %v3251_v4 }
 0x577   :  { %11219 = vmatmul.mubr.msk.bf16.vlgmr.msra.gmra.mrb[16].mxu0 %vm75_vm1, %v11215_v62  ;;  %v3273_v6 = vsel %vm79_vm0, %v3256_v5, 0  ;;  %v12903_v5 = vld [vmem:[%s16339_s4 + $0x54] ss:$8 sps:$4 sm:$0xff]  }
 0x578   :  { %3361 = vmatpush1.bf16.msra.mxu0 %v3273_v6  ;;  %3392 = vmatprep.mubr.bf16.mxu0 %v13184_v10  ;;  %v12901_v6 = vld [vmem:[%s16339_s4 + $0x50] ss:$8 sps:$4 sm:$0xff]  }
 0x579   :  { %11222 = vmatprep.subr.msk.bf16.mxu0 %vm79_vm0, %v14033_v38  ;;  %v3552_v12 = vpop.permute.xlu1 %3551  ;;  %v3550_v13 = vpop.permute.xlu0 %3549 }
 0x57a   :  { %v3560_v15 = vsel %vm379_vm3, %v3550_v13, %v3552_v12  ;;  %v3559_v16 = vsel %vm379_vm3, %v3548_v9, %v3550_v13 }
 0x57b   :  { %v3568_v40 = vsel %vm79_vm0, %v3559_v16, 0  ;;  %v12907_v16 = vld [vmem:[%s16339_s4 + $0x70] ss:$8 sps:$4 sm:$0xff]  }
 0x57d   :  { %v3556_v17 = vpop.permute.xlu1 %3555  ;;  %v3554_v37 = vpop.permute.xlu0 %3553 }
 0x57e   :  { %v3562_v19 = vsel %vm379_vm3, %v3554_v37, %v3556_v17  ;;  %v3561_v20 = vsel %vm379_vm3, %v3552_v12, %v3554_v37  ;;  %v12904_v12 = vld [vmem:[%s16339_s4 + $0x60] ss:$8 sps:$4 sm:$0xff]  }
 0x57f   :  { %11221 = vmatmul.mubr.msk.bf16.vlgmr.msra.gmra.mrb[20].mxu0 %vm75_vm1, %v11215_v62  ;;  %v3574_v24 = vsel %vm79_vm0, %v3561_v20, 0  ;;  %v12900_v62 = vld [vmem:[%s16339_s4 + $0x44] ss:$8 sps:$4 sm:$0xff]   ;;  %v12910_v20 = vld [vmem:[%s16339_s4 + $0x80] ss:$8 sps:$4 sm:$0xff]  }
 0x580   :  { %3423 = vmatpush1.bf16.msra.mxu0 %v3405_v7  ;;  %3454 = vmatprep.mubr.bf16.mxu0 %v13184_v10  ;;  %v12906_v7 = vld [vmem:[%s16339_s4 + $0x64] ss:$8 sps:$4 sm:$0xff]  }
 0x581   :  { %11224 = vmatprep.subr.msk.bf16.mxu0 %vm79_vm0, %v14047_v47  ;;  %v3717_v22 = vpop.permute.xlu1 %3716  ;;  %v3558_v23 = vpop.permute.xlu0 %3557 }
 0x582   :  { %v3563_v25 = vsel %vm379_vm3, %v3556_v17, %v3558_v23  ;;  %v12912_v17 = vld [vmem:[%s16339_s4 + $0x84] ss:$8 sps:$4 sm:$0xff]  }
 0x583   :  { %v3580_v27 = vsel %vm79_vm0, %v3563_v25, 0  ;;  %v12918_v25 = vld [vmem:[%s16339_s4 + $0xa4] ss:$8 sps:$4 sm:$0xff]  }
 0x585   :  { %v3721_v26 = vpop.permute.xlu1 %3720  ;;  %v3719_v30 = vpop.permute.xlu0 %3718 }
 0x586   :  { %v3729_v28 = vsel %vm549_vm4, %v3719_v30, %v3721_v26  ;;  %v3728_v29 = vsel %vm549_vm4, %v3717_v22, %v3719_v30  ;;  %v12915_v22 = vld [vmem:[%s16339_s4 + $0x94] ss:$8 sps:$4 sm:$0xff]   ;;  %v11249_v30 = vld [vmem:[%s16336_s1 + $0x170] sm:$0xf] }
 0x587   :  { %11223 = vmatmul.mubr.msk.bf16.vlgmr.msra.gmra.mrb[12].mxu0 %vm75_vm1, %v11214_v8  ;;  %v3737_v35 = vsel %vm79_vm0, %v3728_v29, 0 }
 0x588   :  { %3464 = vmatpush1.bf16.msra.mxu0 %v3411_v11  ;;  %3495 = vmatprep.mubr.bf16.mxu0 %v13184_v10 }
 0x589   :  { %11226 = vmatprep.subr.msk.bf16.mxu0 %vm79_vm0, %v14056_v50  ;;  %v3725_v31 = vpop.permute.xlu1 %3724  ;;  %v3723_v32 = vpop.permute.xlu0 %3722  ;;  %v12894_v50 = vld [vmem:[%s16339_s4 + $0x24] ss:$8 sps:$4 sm:$0xff]  }
 0x58a   :  { %v3731_v36 = vsel %vm549_vm4, %v3723_v32, %v3725_v31  ;;  %v3730_v38 = vsel %vm549_vm4, %v3721_v26, %v3723_v32  ;;  %5265 = vmatprep.subr.bf16.mxu1 %v12894_v50  ;;  %v12921_v32 = vld [vmem:[%s16339_s4 + $0xb4] ss:$8 sps:$4 sm:$0xff]   ;;  %v11256_v50 = vld [vmem:[%s16336_s1 + $0x180] sm:$0xf] }
 0x58b   :  { %v3743_v39 = vsel %vm79_vm0, %v3730_v38, 0  ;;  %5266 = vmatpush1.bf16.msra.mxu1 %v12892_v55 }
 0x58c   :  { %5267 = vmatprep.subr.bf16.mxu1 %v12897_v58 }
 0x58d   :  { %v3886_v54 = vpop.permute.xlu1 %3885  ;;  %v3727_v60 = vpop.permute.xlu0 %3726 }
 0x58e   :  { %v3732_v41 = vsel %vm549_vm4, %v3725_v31, %v3727_v60  ;;  %vm5695_vm4 = vcmask 949248  }
 0x58f   :  { %11225 = vmatmul.mubr.msk.bf16.vlgmr.msra.gmra.mrb[16].mxu0 %vm75_vm1, %v11214_v8  ;;  %v3749_v44 = vsel %vm79_vm0, %v3732_v41, 0  ;;  %5268 = vmatpush1.bf16.msra.mxu1 %v12895_v61  ;;  %v12927_v41 = vld [vmem:[%s16339_s4 + $0xd4] ss:$8 sps:$4 sm:$0xff]  }
 0x590   :  { %3505 = vmatpush1.bf16.msra.mxu0 %v3417_v14  ;;  %3536 = vmatprep.mubr.bf16.mxu0 %v13184_v10  ;;  %v12909_v14 = vld [vmem:[%s16339_s4 + $0x74] ss:$8 sps:$4 sm:$0xff]  }
 0x591   :  { %11229 = vmatprep.subr.msk.bf16.mxu0 %vm79_vm0, %v3560_v15  ;;  %v3890_v42 = vpop.permute.xlu1 %3889  ;;  %v3888_v43 = vpop.permute.xlu0 %3887  ;;  %5269 = vmatprep.subr.bf16.mxu1 %v12900_v62 }
 0x592   :  { %v3898_v47 = vsel %vm719_vm5, %v3888_v43, %v3890_v42  ;;  %v3897_v51 = vsel %vm719_vm5, %v3886_v54, %v3888_v43  ;;  %v12925_v43 = vld [vmem:[%s16339_s4 + $0xd0] ss:$8 sps:$4 sm:$0xff]  }
 0x593   :  { %v3906_v56 = vsel %vm79_vm0, %v3897_v51, 0  ;;  %5270 = vmatpush1.bf16.msra.mxu1 %v12898_v1 }
 0x594   :  { %5271 = vmatprep.subr.bf16.mxu1 %v12903_v5 }
 0x595   :  { %v3894_v52 = vpop.permute.xlu1 %3893  ;;  %v3892_v53 = vpop.permute.xlu0 %3891 }
 0x596   :  { %v3900_v59 = vsel %vm719_vm5, %v3892_v53, %v3894_v52  ;;  %v3899_v63 = vsel %vm719_vm5, %v3890_v42, %v3892_v53 }
 0x597   :  { %11227 = vmatmul.mubr.msk.bf16.vlgmr.msra.gmra.mrb[20].mxu0 %vm75_vm1, %v11214_v8  ;;  %v3912_v4 = vsel %vm79_vm0, %v3899_v63, 0  ;;  %5272 = vmatpush1.bf16.msra.mxu1 %v12901_v6 }
 0x598   :  { %3586 = vmatpush1.bf16.msra.mxu0 %v3568_v40  ;;  %3617 = vmatprep.mubr.bf16.mxu0 %v13184_v10 }
 0x599   :  { %11231 = vmatprep.subr.msk.bf16.mxu0 %vm79_vm0, %v3562_v19  ;;  %v4055_v2 = vpop.permute.xlu1 %4054  ;;  %v3896_v3 = vpop.permute.xlu0 %3895  ;;  %5273 = vmatprep.subr.bf16.mxu1 %v12906_v7 }
 0x59a   :  { %v3901_v8 = vsel %vm719_vm5, %v3894_v52, %v3896_v3  ;;  %vm5814_vm5 = vcmask 875520  }
 0x59b   :  { %v3918_v13 = vsel %vm79_vm0, %v3901_v8, 0  ;;  %5274 = vmatpush1.bf16.msra.mxu1 %v12904_v12 }
 0x59c   :  { %5275 = vmatprep.subr.bf16.mxu1 %v12909_v14 }
 0x59d   :  { %v4059_v9 = vpop.permute.xlu1 %4058  ;;  %v4057_v11 = vpop.permute.xlu0 %4056 }
 0x59e   :  { %v4067_v15 = vsel %vm889_vm6, %v4057_v11, %v4059_v9  ;;  %v4066_v37 = vsel %vm889_vm6, %v4055_v2, %v4057_v11 }
 0x59f   :  { %11230 = vmatmul.mubr.msk.bf16.vlgmr.msra.gmra.mrb[12].mxu0 %vm75_vm1, %v11228_v21  ;;  %5276 = vmatpush1.bf16.msra.mxu1 %v12907_v16 }
 0x5a0   :  { %3627 = vmatpush1.bf16.msra.mxu0 %v3574_v24  ;;  %3658 = vmatprep.mubr.bf16.mxu0 %v13184_v10  ;;  %v12913_v24 = vld [vmem:[%s16339_s4 + $0x90] ss:$8 sps:$4 sm:$0xff]  }
 0x5a1   :  { %11233 = vmatprep.subr.msk.bf16.mxu0 %vm79_vm0, %v3558_v23  ;;  %v4063_v40 = vpop.permute.xlu1 %4062  ;;  %v4061_v19 = vpop.permute.xlu0 %4060  ;;  %5277 = vmatprep.subr.bf16.mxu1 %v12912_v17 }
 0x5a2   :  { %v4069_v23 = vsel %vm889_vm6, %v4061_v19, %v4063_v40  ;;  %v4068_v26 = vsel %vm889_vm6, %v4059_v9, %v4061_v19  ;;  %v11270_v19 = vld [vmem:[%s16336_s1 + $0x1a0] sm:$0xf] }
 0x5a3   :  { %5278 = vmatpush1.bf16.msra.mxu1 %v12910_v20  ;;  %v4081_v31 = vsel %vm79_vm0, %v4068_v26, 0  ;;  %v12933_v26 = vld [vmem:[%s16339_s4 + $0xf4] ss:$8 sps:$4 sm:$0xff]  }
 0x5a4   :  { %5279 = vmatprep.subr.bf16.mxu1 %v12915_v22 }
 0x5a5   :  { %v4065_v29 = vpop.permute.xlu0 %4064 }
 0x5a6   :  { %v4070_v38 = vsel %vm889_vm6, %v4063_v40, %v4065_v29 }
 0x5a7   :  { %11232 = vmatmul.mubr.msk.bf16.vlgmr.msra.gmra.mrb[16].mxu0 %vm75_vm1, %v11228_v21  ;;  %5280 = vmatpush1.bf16.msra.mxu1 %v12913_v24  ;;  %v12930_v24 = vld [vmem:[%s16339_s4 + $0xe4] ss:$8 sps:$4 sm:$0xff]  }
 0x5a8   :  { %3668 = vmatpush1.bf16.msra.mxu0 %v3580_v27  ;;  %3699 = vmatprep.mubr.bf16.mxu0 %v13184_v10  ;;  %v12916_v27 = vld [vmem:[%s16339_s4 + $0xa0] ss:$8 sps:$4 sm:$0xff]  }
 0x5a9   :  { %11236 = vmatprep.subr.msk.bf16.mxu0 %vm79_vm0, %v3729_v28  ;;  %v4224_v28 = vpop.permute.xlu1 %4223  ;;  %5281 = vmatprep.subr.bf16.mxu1 %v12918_v25  ;;  %v4226_v54 = vpop.permute.xlu0 %4225  ;;  %v12928_v25 = vld [vmem:[%s16339_s4 + $0xe0] ss:$8 sps:$4 sm:$0xff]  }
 0x5ab   :  { %5282 = vmatpush1.bf16.msra.mxu1 %v12916_v27  ;;  %v12936_v27 = vld [vmem:[%s16339_s4 + $0x104] ss:$8 sps:$4 sm:$0xff]  }
 0x5ac   :  { %5283 = vmatprep.subr.bf16.mxu1 %v12921_v32 }
 0x5ad   :  { %v4230_v46 = vpop.permute.xlu0 %4229 }
 0x5af   :  { %11234 = vmatmul.mubr.msk.bf16.vlgmr.msra.gmra.mrb[20].mxu0 %vm75_vm1, %v11228_v21  ;;  %v4075_v21 = vsel %vm79_vm0, %v4066_v37, 0 }
 0x5b0   :  { %3755 = vmatpush1.bf16.msra.mxu0 %v3737_v35  ;;  %3786 = vmatprep.mubr.bf16.mxu0 %v13184_v10  ;;  %v12919_v35 = vld [vmem:[%s16339_s4 + $0xb0] ss:$8 sps:$4 sm:$0xff]  }
 0x5b1   :  { %11238 = vmatprep.subr.msk.bf16.mxu0 %vm79_vm0, %v3731_v36  ;;  %v12924_v36 = vld [vmem:[%s16339_s4 + $0xc4] ss:$8 sps:$4 sm:$0xff]   ;;  %5284 = vmatpush1.bf16.msra.mxu1 %v12919_v35  ;;  %v4234_v52 = vpop.permute.xlu0 %4233 }
 0x5b2   :  { %5285 = vmatprep.subr.bf16.mxu1 %v12924_v36 }
 0x5b5   :  { %v4395_v58 = vpop.permute.xlu0 %4394 }
 0x5b7   :  { %11237 = vmatmul.mubr.msk.bf16.vlgmr.msra.gmra.mrb[12].mxu0 %vm75_vm1, %v11235_v57 }
 0x5b8   :  { %3796 = vmatpush1.bf16.msra.mxu0 %v3743_v39  ;;  %3827 = vmatprep.mubr.bf16.mxu0 %v13184_v10  ;;  %v4087_v39 = vsel %vm79_vm0, %v4070_v38, 0 }
 0x5b9   :  { %11240 = vmatprep.subr.msk.bf16.mxu0 %vm79_vm0, %v3727_v60  ;;  %v12922_v60 = vld [vmem:[%s16339_s4 + $0xc0] ss:$8 sps:$4 sm:$0xff]  }
 0x5ba   :  { %5286 = vmatpush1.bf16.msra.mxu1 %v12922_v60 }
 0x5bb   :  { %5287 = vmatprep.subr.bf16.mxu1 %v12927_v41 }
 0x5be   :  { %5288 = vmatpush1.bf16.msra.mxu1 %v12925_v43 }
 0x5bf   :  { %11239 = vmatmul.mubr.msk.bf16.vlgmr.msra.gmra.mrb[16].mxu0 %vm75_vm1, %v11235_v57  ;;  %5289 = vmatprep.subr.bf16.mxu1 %v12930_v24 }
 0x5c0   :  { %3837 = vmatpush1.bf16.msra.mxu0 %v3749_v44  ;;  %3868 = vmatprep.mubr.bf16.mxu0 %v13184_v10  ;;  %v4235_v44 = vsel %vm1059_vm7, %v4224_v28, %v4226_v54 }
 0x5c1   :  { %11243 = vmatprep.subr.msk.bf16.mxu0 %vm79_vm0, %v3898_v47  ;;  %v4244_v47 = vsel %vm79_vm0, %v4235_v44, 0  ;;  %v12934_v44 = vld [vmem:[%s16339_s4 + $0x100] ss:$8 sps:$4 sm:$0xff]  }
 0x5c2   :  { %5290 = vmatpush1.bf16.msra.mxu1 %v12928_v25  ;;  %v12976_v25 = vld [vmem:[%s16339_s4 + $0x1e0] ss:$8 sps:$4 sm:$0xff]  }
 0x5c3   :  { %5291 = vmatprep.subr.bf16.mxu1 %v12933_v26 }
 0x5c7   :  { %11241 = vmatmul.mubr.msk.bf16.vlgmr.msra.gmra.mrb[20].mxu0 %vm75_vm1, %v11235_v57  ;;  %v4228_v57 = vpop.permute.xlu1 %4227 }
 0x5c8   :  { %3924 = vmatpush1.bf16.msra.mxu0 %v3906_v56  ;;  %3955 = vmatprep.mubr.bf16.mxu0 %v13184_v10  ;;  %v4236_v42 = vsel %vm1059_vm7, %v4226_v54, %v4228_v57  ;;  %v4237_v49 = vsel %vm1059_vm7, %v4228_v57, %v4230_v46 }
 0x5c9   :  { %11245 = vmatprep.subr.msk.bf16.mxu0 %vm79_vm0, %v3900_v59  ;;  %v4250_v53 = vsel %vm79_vm0, %v4237_v49, 0 }
 0x5cb   :  { %v4232_v45 = vpop.permute.xlu1 %4231 }
 0x5cc   :  { %v4238_v48 = vsel %vm1059_vm7, %v4230_v46, %v4232_v45  ;;  %v4239_v55 = vsel %vm1059_vm7, %v4232_v45, %v4234_v52  ;;  %vm5874_vm7 = vcmask 867328  }
 0x5cd   :  { %v4256_v59 = vsel %vm79_vm0, %v4239_v55, 0 }
 0x5cf   :  { %11244 = vmatmul.mubr.msk.bf16.vlgmr.msra.gmra.mrb[12].mxu0 %vm75_vm1, %v11242_v0  ;;  %v4393_v51 = vpop.permute.xlu1 %4392 }
 0x5d0   :  { %3965 = vmatpush1.bf16.msra.mxu0 %v3912_v4  ;;  %3996 = vmatprep.mubr.bf16.mxu0 %v13184_v10  ;;  %v4404_v62 = vsel %vm1229_vm8, %v4393_v51, %v4395_v58  ;;  %v11263_v4 = vld [vmem:[%s16336_s1 + $0x190] sm:$0xf] }
 0x5d1   :  { %11247 = vmatprep.subr.msk.bf16.mxu0 %vm79_vm0, %v3896_v3  ;;  %v4413_v1 = vsel %vm79_vm0, %v4404_v62, 0  ;;  %v12945_v62 = vld [vmem:[%s16339_s4 + $0x134] ss:$8 sps:$4 sm:$0xff]  }
 0x5d3   :  { %v4397_v56 = vpop.permute.xlu1 %4396 }
 0x5d4   :  { %v4405_v61 = vsel %vm1229_vm8, %v4395_v58, %v4397_v56 }
 0x5d7   :  { %11246 = vmatmul.mubr.msk.bf16.vlgmr.msra.gmra.mrb[16].mxu0 %vm75_vm1, %v11242_v0  ;;  %v4401_v63 = vpop.permute.xlu1 %4400 }
 0x5d8   :  { %4006 = vmatpush1.bf16.msra.mxu0 %v3918_v13  ;;  %4037 = vmatprep.mubr.bf16.mxu0 %v13184_v10 }
 0x5d9   :  { %11250 = vmatprep.subr.msk.bf16.mxu0 %vm79_vm0, %v4067_v15 }
 0x5db   :  { %v4562_v5 = vpop.permute.xlu1 %4561 }
 0x5df   :  { %11248 = vmatmul.mubr.msk.bf16.vlgmr.msra.gmra.mrb[20].mxu0 %vm75_vm1, %v11242_v0  ;;  %v4399_v0 = vpop.permute.xlu0 %4398  ;;  %v4566_v9 = vpop.permute.xlu1 %4565 }
 0x5e0   :  { %4093 = vmatpush1.bf16.msra.mxu0 %v4075_v21  ;;  %4124 = vmatprep.mubr.bf16.mxu0 %v13184_v10  ;;  %v4407_v2 = vsel %vm1229_vm8, %v4399_v0, %v4401_v63  ;;  %v4406_v3 = vsel %vm1229_vm8, %v4397_v56, %v4399_v0 }
 0x5e1   :  { %11252 = vmatprep.subr.msk.bf16.mxu0 %vm79_vm0, %v4069_v23  ;;  %v4419_v7 = vsel %vm79_vm0, %v4406_v3, 0  ;;  %v12946_v3 = vld [vmem:[%s16339_s4 + $0x140] ss:$8 sps:$4 sm:$0xff]  }
 0x5e3   :  { %v4403_v6 = vpop.permute.xlu0 %4402  ;;  %v4570_v15 = vpop.permute.xlu1 %4569 }
 0x5e4   :  { %v4408_v8 = vsel %vm1229_vm8, %v4401_v63, %v4403_v6  ;;  %vm7363_vm8 = vcmask 130048  }
 0x5e5   :  { %v4425_v12 = vsel %vm79_vm0, %v4408_v8, 0  ;;  %v12957_v8 = vld [vmem:[%s16339_s4 + $0x174] ss:$8 sps:$4 sm:$0xff]  }
 0x5e7   :  { %11251 = vmatmul.mubr.msk.bf16.vlgmr.msra.gmra.mrb[12].mxu0 %vm75_vm1, %v11249_v30  ;;  %v4564_v11 = vpop.permute.xlu0 %4563  ;;  %v14430_v28 = vpop.permute.xlu1 %4734 }
 0x5e8   :  { %4134 = vmatpush1.bf16.msra.mxu0 %v4081_v31  ;;  %4165 = vmatprep.mubr.bf16.mxu0 %v13184_v10  ;;  %v4574_v13 = vsel %vm1399_vm9, %v4564_v11, %v4566_v9  ;;  %v4573_v14 = vsel %vm1399_vm9, %v4562_v5, %v4564_v11  ;;  %v12949_v5 = vld [vmem:[%s16339_s4 + $0x150] ss:$8 sps:$4 sm:$0xff]   ;;  %v12960_v11 = vld [vmem:[%s16339_s4 + $0x184] ss:$8 sps:$4 sm:$0xff]  }
 0x5e9   :  { %11254 = vmatprep.subr.msk.bf16.mxu0 %vm79_vm0, %v4065_v29  ;;  %v4582_v17 = vsel %vm79_vm0, %v4573_v14, 0  ;;  %v12961_v14 = vld [vmem:[%s16339_s4 + $0x190] ss:$8 sps:$4 sm:$0xff]  }
 0x5eb   :  { %v4568_v16 = vpop.permute.xlu0 %4567 }
 0x5ec   :  { %v4576_v37 = vsel %vm1399_vm9, %v4568_v16, %v4570_v15  ;;  %v4575_v40 = vsel %vm1399_vm9, %v4566_v9, %v4568_v16  ;;  %v12955_v9 = vld [vmem:[%s16339_s4 + $0x170] ss:$8 sps:$4 sm:$0xff]   ;;  %v12964_v16 = vld [vmem:[%s16339_s4 + $0x1a0] ss:$8 sps:$4 sm:$0xff]  }
 0x5ed   :  { %v4588_v20 = vsel %vm79_vm0, %v4575_v40, 0  ;;  %v12972_v40 = vld [vmem:[%s16339_s4 + $0x1c4] ss:$8 sps:$4 sm:$0xff]  }
 0x5ef   :  { %11253 = vmatmul.mubr.msk.bf16.vlgmr.msra.gmra.mrb[16].mxu0 %vm75_vm1, %v11249_v30  ;;  %v4572_v21 = vpop.permute.xlu0 %4571 }
 0x5f0   :  { %4175 = vmatpush1.bf16.msra.mxu0 %v4087_v39  ;;  %4206 = vmatprep.mubr.bf16.mxu0 %v13184_v10  ;;  %v4577_v22 = vsel %vm1399_vm9, %v4570_v15, %v4572_v21  ;;  %v12966_v15 = vld [vmem:[%s16339_s4 + $0x1a4] ss:$8 sps:$4 sm:$0xff]  }
 0x5f1   :  { %11257 = vmatprep.subr.msk.bf16.mxu0 %vm79_vm0, %v4236_v42  ;;  %v4594_v23 = vsel %vm79_vm0, %v4577_v22, 0 }
 0x5f3   :  { %v14433_v35 = vpop.permute.xlu0 %4745 }
 0x5f7   :  { %11255 = vmatmul.mubr.msk.bf16.vlgmr.msra.gmra.mrb[20].mxu0 %vm75_vm1, %v11249_v30  ;;  %v12931_v30 = vld [vmem:[%s16339_s4 + $0xf0] ss:$8 sps:$4 sm:$0xff]  }
 0x5f8   :  { %4262 = vmatpush1.bf16.msra.mxu0 %v4244_v47  ;;  %4293 = vmatprep.mubr.bf16.mxu0 %v13184_v10  ;;  %v12939_v47 = vld [vmem:[%s16339_s4 + $0x114] ss:$8 sps:$4 sm:$0xff]  }
 0x5f9   :  { %11259 = vmatprep.subr.msk.bf16.mxu0 %vm79_vm0, %v4238_v48  ;;  %5292 = vmatpush1.bf16.msra.mxu1 %v12931_v30  ;;  %v12981_v30 = vld [vmem:[%s16339_s4 + $0x1f4] ss:$8 sps:$4 sm:$0xff]  }
 0x5fa   :  { %5302 = vmatprep.subr.bf16.mxu1 %v12936_v27 }
 0x5ff   :  { %11258 = vmatmul.mubr.msk.bf16.vlgmr.msra.gmra.mrb[12].mxu0 %vm75_vm1, %v11256_v50 }
 0x600   :  { %4303 = vmatpush1.bf16.msra.mxu0 %v4250_v53  ;;  %4334 = vmatprep.mubr.bf16.mxu0 %v13184_v10  ;;  %v12942_v53 = vld [vmem:[%s16339_s4 + $0x124] ss:$8 sps:$4 sm:$0xff]  }
 0x601   :  { %11261 = vmatprep.subr.msk.bf16.mxu0 %vm79_vm0, %v4234_v52  ;;  %v12937_v52 = vld [vmem:[%s16339_s4 + $0x110] ss:$8 sps:$4 sm:$0xff]  }
 0x607   :  { %11260 = vmatmul.mubr.msk.bf16.vlgmr.msra.gmra.mrb[16].mxu0 %vm75_vm1, %v11256_v50 }
 0x608   :  { %4344 = vmatpush1.bf16.msra.mxu0 %v4256_v59  ;;  %4375 = vmatprep.mubr.bf16.mxu0 %v13184_v10  ;;  %v12940_v59 = vld [vmem:[%s16339_s4 + $0x120] ss:$8 sps:$4 sm:$0xff]  }
 0x609   :  { %11264 = vmatprep.subr.msk.bf16.mxu0 %vm79_vm0, %v4405_v61 }
 0x60f   :  { %11262 = vmatmul.mubr.msk.bf16.vlgmr.msra.gmra.mrb[20].mxu0 %vm75_vm1, %v11256_v50 }
 0x610   :  { %4431 = vmatpush1.bf16.msra.mxu0 %v4413_v1  ;;  %4462 = vmatprep.mubr.bf16.mxu0 %v13184_v10  ;;  %v12943_v1 = vld [vmem:[%s16339_s4 + $0x130] ss:$8 sps:$4 sm:$0xff]  }
 0x611   :  { %11266 = vmatprep.subr.msk.bf16.mxu0 %vm79_vm0, %v4407_v2  ;;  %v12948_v2 = vld [vmem:[%s16339_s4 + $0x144] ss:$8 sps:$4 sm:$0xff]  }
 0x617   :  { %11265 = vmatmul.mubr.msk.bf16.vlgmr.msra.gmra.mrb[12].mxu0 %vm75_vm1, %v11263_v4 }
 0x618   :  { %4472 = vmatpush1.bf16.msra.mxu0 %v4419_v7  ;;  %4503 = vmatprep.mubr.bf16.mxu0 %v13184_v10  ;;  %v12952_v7 = vld [vmem:[%s16339_s4 + $0x160] ss:$8 sps:$4 sm:$0xff]  }
 0x619   :  { %11268 = vmatprep.subr.msk.bf16.mxu0 %vm79_vm0, %v4403_v6  ;;  %v12954_v6 = vld [vmem:[%s16339_s4 + $0x164] ss:$8 sps:$4 sm:$0xff]  }
 0x61f   :  { %11267 = vmatmul.mubr.msk.bf16.vlgmr.msra.gmra.mrb[16].mxu0 %vm75_vm1, %v11263_v4 }
 0x620   :  { %4513 = vmatpush1.bf16.msra.mxu0 %v4425_v12  ;;  %4544 = vmatprep.mubr.bf16.mxu0 %v13184_v10  ;;  %v12958_v12 = vld [vmem:[%s16339_s4 + $0x180] ss:$8 sps:$4 sm:$0xff]  }
 0x621   :  { %11271 = vmatprep.subr.msk.bf16.mxu0 %vm79_vm0, %v4574_v13  ;;  %v12963_v13 = vld [vmem:[%s16339_s4 + $0x194] ss:$8 sps:$4 sm:$0xff]  }
 0x627   :  { %11269 = vmatmul.mubr.msk.bf16.vlgmr.msra.gmra.mrb[20].mxu0 %vm75_vm1, %v11263_v4  ;;  %v12951_v4 = vld [vmem:[%s16339_s4 + $0x154] ss:$8 sps:$4 sm:$0xff]  }
 0x628   :  { %4600 = vmatpush1.bf16.msra.mxu0 %v4582_v17  ;;  %4631 = vmatprep.mubr.bf16.mxu0 %v13184_v10  ;;  %v12969_v17 = vld [vmem:[%s16339_s4 + $0x1b4] ss:$8 sps:$4 sm:$0xff]  }
 0x629   :  { %11273 = vmatprep.subr.msk.bf16.mxu0 %vm79_vm0, %v4576_v37  ;;  %v12967_v37 = vld [vmem:[%s16339_s4 + $0x1b0] ss:$8 sps:$4 sm:$0xff]  }
 0x62f   :  { %11272 = vmatmul.mubr.msk.bf16.vlgmr.msra.gmra.mrb[12].mxu0 %vm75_vm1, %v11270_v19 }
 0x630   :  { %4641 = vmatpush1.bf16.msra.mxu0 %v4588_v20  ;;  %4672 = vmatprep.mubr.bf16.mxu0 %v13184_v10  ;;  %v12975_v20 = vld [vmem:[%s16339_s4 + $0x1d4] ss:$8 sps:$4 sm:$0xff]  }
 0x631   :  { %11275 = vmatprep.subr.msk.bf16.mxu0 %vm79_vm0, %v4572_v21  ;;  %v12973_v21 = vld [vmem:[%s16339_s4 + $0x1d0] ss:$8 sps:$4 sm:$0xff]  }
 0x637   :  { %11274 = vmatmul.mubr.msk.bf16.vlgmr.msra.gmra.mrb[16].mxu0 %vm75_vm1, %v11270_v19 }
 0x638   :  { %4682 = vmatpush1.bf16.msra.mxu0 %v4594_v23  ;;  %4713 = vmatprep.mubr.bf16.mxu0 %v13184_v10  ;;  %v12978_v23 = vld [vmem:[%s16339_s4 + $0x1e4] ss:$8 sps:$4 sm:$0xff]  }
 0x63f   :  { %11276 = vmatmul.mubr.msk.bf16.vlgmr.msra.gmra.mrb[20].mxu0 %vm75_vm1, %v11270_v19  ;;  %v12970_v19 = vld [vmem:[%s16339_s4 + $0x1c0] ss:$8 sps:$4 sm:$0xff]  }
 0x640   :  { %5451 = vmatprep.mubr.bf16.mxu0 %v13184_v10 }
 0x702   :  { %v4633_v29 = vpop.f32.mrb[12].mxu0 }
 0x703   :  { %v4737_v31 = vmul.f32 %v14430_v28, %v4633_v29  ;;  %v4635_v32 = vpop.f32.mrb[13].mxu0  ;;  %v12979_v29 = vld [vmem:[%s16339_s4 + $0x1f0] ss:$8 sps:$4 sm:$0xff]  }
 0x704   :  { %v4738_v36 = vmul.f32 %v14430_v28, %v4635_v32  ;;  %v4637_v38 = vpop.f32.mrb[14].mxu0  ;;  %v12984_v32 = vld [vmem:[%s16339_s4 + $0x204] ss:$8 sps:$4 sm:$0xff]  }
 0x705   :  { %v4748_v57 = vadd.f32 %v14433_v35, %v4737_v31  ;;  %v4638_v54 = vpop.f32.mrb[15].mxu0  ;;  %v12982_v38 = vld [vmem:[%s16339_s4 + $0x200] ss:$8 sps:$4 sm:$0xff]  }
 0x706   :  { %v4749_v60 = vadd.f32 %v14433_v35, %v4738_v36  ;;  %v12987_v54 = vld [vmem:[%s16339_s4 + $0x214] ss:$8 sps:$4 sm:$0xff]  }
 0x707   :  { %v4754_v39 = vmax.f32 %v4748_v57, 0.0 }
 0x708   :  { %v4755_v41 = vmax.f32 %v4749_v60, 0.0 }
 0x709   :  { %v4760_v45 = vpack.c.bf16 %v4754_v39, %v4754_v39  ;;  %v12985_v39 = vld [vmem:[%s16339_s4 + $0x210] ss:$8 sps:$4 sm:$0xff]  }
 0x70a   :  { %v4761_v42 = vpack.c.bf16 %v4755_v41, %v4755_v41  ;;  %v14438_v43 = vpop.f32.mrb[16].mxu0  ;;  %v12990_v41 = vld [vmem:[%s16339_s4 + $0x224] ss:$8 sps:$4 sm:$0xff]  }
 0x70b   :  { %v4676_v46 = vpop.f32.mrb[17].mxu0  ;;  %v4739_v22 = vmul.f32 %v14430_v28, %v14438_v43  ;;  %v12993_v43 = vld [vmem:[%s16339_s4 + $0x234] ss:$8 sps:$4 sm:$0xff]  }
 0x70c   :  { %v4740_v48 = vmul.f32 %v14430_v28, %v4676_v46  ;;  %v4678_v49 = vpop.f32.mrb[18].mxu0  ;;  %5293 = vmatprep.mubr.bf16.mxu1 %v4761_v42  ;;  %v12988_v42 = vld [vmem:[%s16339_s4 + $0x220] ss:$8 sps:$4 sm:$0xff]  }
 0x70d   :  { %v4679_v50 = vpop.f32.mrb[19].mxu0  ;;  %5294 = vmatmul.mubr.bf16.vlgmr.msra.gmra.mrb[16].mxu1 %v4760_v45  ;;  %v4750_v26 = vadd.f32 %v14433_v35, %v4739_v22  ;;  %v12996_v45 = vld [vmem:[%s16339_s4 + $0x244] ss:$8 sps:$4 sm:$0xff]   ;;  %v12994_v46 = vld [vmem:[%s16339_s4 + $0x240] ss:$8 sps:$4 sm:$0xff]  }
 0x70e   :  { %v4751_v51 = vadd.f32 %v14433_v35, %v4740_v48  ;;  %5303 = vmatpush1.bf16.msra.mxu1 %v12934_v44  ;;  %v12991_v44 = vld [vmem:[%s16339_s4 + $0x230] ss:$8 sps:$4 sm:$0xff]   ;;  %v13002_v49 = vld [vmem:[%s16339_s4 + $0x264] ss:$8 sps:$4 sm:$0xff]   ;;  %v13000_v50 = vld [vmem:[%s16339_s4 + $0x260] ss:$8 sps:$4 sm:$0xff]  }
 0x70f   :  { %5304 = vmatprep.subr.bf16.mxu1 %v12939_v47  ;;  %v4756_v31 = vmax.f32 %v4750_v26, 0.0  ;;  %v12999_v47 = vld [vmem:[%s16339_s4 + $0x254] ss:$8 sps:$4 sm:$0xff]   ;;  %v12997_v48 = vld [vmem:[%s16339_s4 + $0x250] ss:$8 sps:$4 sm:$0xff]  }
 0x710   :  { %v4757_v55 = vmax.f32 %v4751_v51, 0.0  ;;  %v11363_v22 = vld [vmem:[%s16336_s1 + $0x1b0] sm:$0xf] }
 0x711   :  { %v4762_v57 = vpack.c.bf16 %v4756_v31, %v4756_v31 }
 0x712   :  { %v4763_v56 = vpack.c.bf16 %v4757_v55, %v4757_v55  ;;  %5305 = vmatpush1.bf16.msra.mxu1 %v12937_v52  ;;  %v14454_v58 = vpop.f32.mrb[20].mxu0  ;;  %v13005_v52 = vld [vmem:[%s16339_s4 + $0x274] ss:$8 sps:$4 sm:$0xff]   ;;  %v13003_v55 = vld [vmem:[%s16339_s4 + $0x270] ss:$8 sps:$4 sm:$0xff]  }
 0x713   :  { %v4717_v61 = vpop.f32.mrb[21].mxu0  ;;  %5306 = vmatprep.subr.bf16.mxu1 %v12942_v53  ;;  %v4741_v51 = vmul.f32 %v14430_v28, %v14454_v58  ;;  %v4846_v53 = vld [vmem:[%s16339_s4 + $0x280] sm:$0xff]  ;;  %s13193_s4 = smov 11  }
 0x714   :  { %v4719_v63 = vpop.f32.mrb[22].mxu0  ;;  %5334 = vmatprep.mubr.bf16.mxu1 %v4763_v56  ;;  %v4742_v24 = vmul.f32 %v14430_v28, %v4717_v61  ;;  %v11359_v61 = vcombine.low %v4846_v53, %v4846_v53 }
 0x715   :  { %v4720_v0 = vpop.f32.mrb[23].mxu0  ;;  %v4752_v56 = vadd.f32 %v14433_v35, %v4741_v51 }
 0x716   :  { %5307 = vmatpush1.bf16.msra.mxu1 %v12940_v59  ;;  %v4753_v27 = vadd.f32 %v14433_v35, %v4742_v24  ;;  %v11360_v59 = vcombine.high %v4846_v53, %v4846_v53  ;;  %v5256_v58 = vsel %vm79_vm0, %v11359_v61, 0  ;;  %v11387_v61 = vld [vmem:[%s16336_s1 + $0x230] sm:$0xf] }
 0x717   :  { %5308 = vmatprep.subr.bf16.mxu1 %v12945_v62  ;;  %v4758_v28 = vmax.f32 %v4752_v56, 0.0  ;;  %v11384_v56 = vld [vmem:[%s16336_s1 + $0x220] sm:$0xf] }
 0x718   :  { %v4759_v36 = vmax.f32 %v4753_v27, 0.0 }
 0x719   :  { %v4764_v62 = vpack.c.bf16 %v4758_v28, %v4758_v28 }
 0x71a   :  { %5309 = vmatpush1.bf16.msra.mxu1 %v12943_v1  ;;  %v4765_v60 = vpack.c.bf16 %v4759_v36, %v4759_v36  ;;  %v11372_v36 = vld [vmem:[%s16336_s1 + $0x1e0] sm:$0xf] }
 0x71b   :  { %5310 = vmatprep.subr.bf16.mxu1 %v12948_v2 }
 0x71e   :  { %5311 = vmatpush1.bf16.msra.mxu1 %v12946_v3 }
 0x71f   :  { %5312 = vmatprep.subr.bf16.mxu1 %v12951_v4 }
 0x722   :  { %5313 = vmatpush1.bf16.msra.mxu1 %v12949_v5 }
 0x723   :  { %5314 = vmatprep.subr.bf16.mxu1 %v12954_v6 }
 0x726   :  { %5315 = vmatpush1.bf16.msra.mxu1 %v12952_v7 }
 0x727   :  { %5316 = vmatprep.subr.bf16.mxu1 %v12957_v8 }
 0x72a   :  { %5317 = vmatpush1.bf16.msra.mxu1 %v12955_v9 }
 0x72b   :  { %5318 = vmatprep.subr.bf16.mxu1 %v12960_v11 }
 0x72e   :  { %5319 = vmatpush1.bf16.msra.mxu1 %v12958_v12  ;;  %v11390_v12 = vld [vmem:[%s16337_s2 + $0xc0] sm:$0xff] }
 0x72f   :  { %5320 = vmatprep.subr.bf16.mxu1 %v12963_v13  ;;  %v11391_v13 = vld [vmem:[%s16337_s2 + $0xe0] sm:$0xff] }
 0x732   :  { %5321 = vmatpush1.bf16.msra.mxu1 %v12961_v14 }
 0x733   :  { %5322 = vmatprep.subr.bf16.mxu1 %v12966_v15 }
 0x736   :  { %5323 = vmatpush1.bf16.msra.mxu1 %v12964_v16 }
 0x737   :  { %5324 = vmatprep.subr.bf16.mxu1 %v12969_v17 }
 0x73a   :  { %5325 = vmatpush1.bf16.msra.mxu1 %v12967_v37  ;;  %v11364_v37 = vld [vmem:[%s16336_s1 + $0x1c0] sm:$0xf] }
 0x73b   :  { %5326 = vmatprep.subr.bf16.mxu1 %v12972_v40 }
 0x73e   :  { %5327 = vmatpush1.bf16.msra.mxu1 %v12970_v19 }
 0x73f   :  { %5328 = vmatprep.subr.bf16.mxu1 %v12975_v20 }
 0x742   :  { %5329 = vmatpush1.bf16.msra.mxu1 %v12973_v21 }
 0x743   :  { %5330 = vmatprep.subr.bf16.mxu1 %v12978_v23 }
 0x746   :  { %5331 = vmatpush1.bf16.msra.mxu1 %v12976_v25 }
 0x747   :  { %5332 = vmatprep.subr.bf16.mxu1 %v12981_v30  ;;  %v11369_v30 = vld [vmem:[%s16336_s1 + $0x1d0] sm:$0xf] }
 0x74a   :  { %5333 = vmatpush1.bf16.msra.mxu1 %v12979_v29 }
 0x74b   :  { %5343 = vmatprep.subr.bf16.mxu1 %v12984_v32 }
 0x74d   :  { %5335 = vmatmul.mubr.bf16.vlgmr.msra.gmra.mrb[16].mxu1 %v4762_v57 }
 0x74e   :  { %5344 = vmatpush1.bf16.msra.mxu1 %v12982_v38  ;;  %11362 = vmatprep.mubr.msk.bf16.mxu1 %vm75_vm1, %v4765_v60 }
 0x74f   :  { %5345 = vmatprep.subr.bf16.mxu1 %v12987_v54 }
 0x752   :  { %5346 = vmatpush1.bf16.msra.mxu1 %v12985_v39  ;;  %v11375_v39 = vld [vmem:[%s16336_s1 + $0x1f0] sm:$0xf] }
 0x753   :  { %5347 = vmatprep.subr.bf16.mxu1 %v12990_v41 }
 0x756   :  { %5348 = vmatpush1.bf16.msra.mxu1 %v12988_v42 }
 0x757   :  { %5349 = vmatprep.subr.bf16.mxu1 %v12993_v43 }
 0x75a   :  { %5350 = vmatpush1.bf16.msra.mxu1 %v12991_v44 }
 0x75b   :  { %5351 = vmatprep.subr.bf16.mxu1 %v12996_v45  ;;  %v11378_v45 = vld [vmem:[%s16336_s1 + $0x200] sm:$0xf] }
 0x75e   :  { %5352 = vmatpush1.bf16.msra.mxu1 %v12994_v46 }
 0x75f   :  { %5353 = vmatprep.subr.bf16.mxu1 %v12999_v47 }
 0x762   :  { %5354 = vmatpush1.bf16.msra.mxu1 %v12997_v48 }
 0x763   :  { %5355 = vmatprep.subr.bf16.mxu1 %v13002_v49 }
 0x766   :  { %5356 = vmatpush1.bf16.msra.mxu1 %v13000_v50  ;;  %v11381_v50 = vld [vmem:[%s16336_s1 + $0x210] sm:$0xf] }
 0x767   :  { %5357 = vmatprep.subr.bf16.mxu1 %v13005_v52 }
 0x76a   :  { %5358 = vmatpush1.bf16.msra.mxu1 %v13003_v55 }
 0x76b   :  { %11361 = vmatprep.subr.msk.bf16.mxu1 %vm79_vm0, %v11360_v59 }
 0x76e   :  { %5360 = vmatpush1.bf16.msra.mxu1 %v5256_v58 }
 0x771   :  { %5376 = vmatmul.mubr.bf16.vlgmr.msra.gmra.mrb[16].mxu1 %v4764_v62  ;;  %v11392_v62 = vld [vmem:[%s16338_s3 + $0x6] sm:$0x3] }
 0x772   :  { %6594 = vmatprep.mubr.bf16.mxu1 %v13184_v10 }
 0x844   :  { %v5377_v63 = vpop.f32.mrb[16].mxu1 }
 0x845   :  { %v5379_v0 = vpop.f32.mrb[17].mxu1 }
 0x846   :  { %v12842_v1 = vpack.i.bf16 %v5379_v0, %v5377_v63  ;;  %v5381_v2 = vpop.f32.mrb[18].mxu1 }
 0x847   :  { %v5382_v3 = vpop.f32.mrb[19].mxu1 }
 0x848   :  { %12843 = vrot.lane.b32.xlu1 %v12842_v1, %s13193_s4 }
 0x8ba   :  { %v12844_v35 = vpop.permute.xlu1 %12843 }
 0x8bb   :  { %v12846_v4 = vunpack.i.h.bf16 %v12844_v35  ;;  %v12845_v5 = vunpack.i.l.bf16 %v12844_v35 }
 0x8bd   :  { %v5391_v6 = vsel %vm5390_vm12, %v12845_v5, %v12846_v4  ;;  %v5394_v7 = vsel %vm5390_vm12, 0.0, %v12845_v5  ;;  %v14702_v4 = vrot.slane %v11392_v62, %v1584_v33 }
 0x8be   :  { %v5396_v8 = vsel %vm5395_vm13, %v5391_v6, 0.0  ;;  %v5397_v9 = vpack.c.bf16 %v5394_v7, %v5394_v7  ;;  %v14706_v7 = vrot.slane %v11392_v62, %v1588_v34 }
 0x8bf   :  { %v5398_v11 = vpack.c.bf16 %v5396_v8, %v5396_v8 }
 0x8c0   :  { %5405 = vrot.lane.b32.xlu0 %v5397_v9, %s13183_s25  ;;  %v5464_v40 = vsel %vm79_vm0, %v5397_v9, 0 }
 0x8c1   :  { %5407 = vrot.lane.b32.xlu1 %v5398_v11, %s13183_s25 }
 0x8c4   :  { %5512 = vrot.lane.b32.xlu0 %v5397_v9, %s13185_s27 }
 0x8c5   :  { %5514 = vrot.lane.b32.xlu1 %v5398_v11, %s13185_s27 }
 0x8c8   :  { %5571 = vrot.lane.b32.xlu0 %v5397_v9, %s13194_s23 }
 0x8c9   :  { %5573 = vrot.lane.b32.xlu1 %v5398_v11, %s13194_s23 }
 0x8cc   :  { %5631 = vrot.lane.b32.xlu0 %v5397_v9, %s13195_s21 }
 0x8cd   :  { %5633 = vrot.lane.b32.xlu1 %v5398_v11, %s13195_s21 }
 0x8d0   :  { %5691 = vrot.lane.b32.xlu0 %v5397_v9, %s13196_s13 }
 0x8d1   :  { %5693 = vrot.lane.b32.xlu1 %v5398_v11, %s13196_s13 }
 0x8d4   :  { %5751 = vrot.lane.b32.xlu0 %v5397_v9, %s13188_s30 }
 0x8d5   :  { %5753 = vrot.lane.b32.xlu1 %v5398_v11, %s13188_s30 }
 0x8d8   :  { %5810 = vrot.lane.b32.xlu0 %v5397_v9, %s13197_s22 }
 0x8d9   :  { %5812 = vrot.lane.b32.xlu1 %v5398_v11, %s13197_s22 }
 0x8dc   :  { %5870 = vrot.lane.b32.xlu0 %v5397_v9, %s13198_s24 }
 0x8dd   :  { %5872 = vrot.lane.b32.xlu1 %v5398_v11, %s13198_s24 }
 0x8e0   :  { %5934 = vperm.xlu0 %12820, %v11390_v12  }
 0x8e1   :  { %5941 = vperm.xlu1 %12821, %v11391_v13  }
 0x932   :  { %v5406_v14 = vpop.permute.xlu0 %5405 }
 0x933   :  { %v5408_v15 = vpop.permute.xlu1 %5407 }
 0x934   :  { %v5409_v16 = vsel %vm69_vm2, %v5406_v14, %v5408_v15  ;;  %11365 = vmatprep.subr.msk.bf16.mxu0 %vm79_vm0, %v5408_v15 }
 0x935   :  { %v5414_v17 = vsel %vm79_vm0, %v5409_v16, 0 }
 0x936   :  { %5420 = vmatpush1.bf16.msra.mxu0 %v5414_v17  ;;  %v5513_v20 = vpop.permute.xlu0 %5512 }
 0x937   :  { %11367 = vmatprep.subr.msk.bf16.mxu0 %vm79_vm0, %v5398_v11  ;;  %v5515_v19 = vpop.permute.xlu1 %5514 }
 0x938   :  { %v5516_v21 = vsel %vm379_vm3, %v5513_v20, %v5515_v19 }
 0x939   :  { %11366 = vmatmul.mubr.msk.bf16.vlgmr.msra.gmra.mrb[24].mxu0 %vm75_vm1, %v11364_v37  ;;  %v5521_v23 = vsel %vm79_vm0, %v5516_v21, 0 }
 0x93a   :  { %5470 = vmatpush1.bf16.msra.mxu0 %v5464_v40  ;;  %5501 = vmatprep.mubr.bf16.mxu0 %v13184_v10  ;;  %v5572_v25 = vpop.permute.xlu0 %5571  ;;  %v11420_v40 = vld [vmem:[%s16337_s2 + $0x100] sm:$0xff] }
 0x93b   :  { %11370 = vmatprep.subr.msk.bf16.mxu0 %vm79_vm0, %v5515_v19  ;;  %v5574_v24 = vpop.permute.xlu1 %5573  ;;  %v11421_v19 = vld [vmem:[%s16337_s2 + $0x120] sm:$0xff] }
 0x93c   :  { %v5576_v26 = vsel %vm5575_vm14, %v5572_v25, %v5574_v24 }
 0x93d   :  { %v5581_v27 = vsel %vm79_vm0, %v5576_v26, 0 }
 0x93e   :  { %v5632_v31 = vpop.permute.xlu0 %5631 }
 0x93f   :  { %v5634_v29 = vpop.permute.xlu1 %5633 }
 0x940   :  { %v5636_v32 = vsel %vm5635_vm15, %v5632_v31, %v5634_v29 }
 0x941   :  { %v5641_v38 = vsel %vm79_vm0, %v5636_v32, 0 }
 0x942   :  { %v5692_v54 = vpop.permute.xlu0 %5691 }
 0x943   :  { %v5694_v57 = vpop.permute.xlu1 %5693 }
 0x944   :  { %v5696_v60 = vsel %vm5695_vm4, %v5692_v54, %v5694_v57 }
 0x945   :  { %11368 = vmatmul.mubr.msk.bf16.vlgmr.msra.gmra.mrb[24].mxu0 %vm75_vm1, %v11363_v22  ;;  %v5701_v41 = vsel %vm79_vm0, %v5696_v60, 0 }
 0x946   :  { %5527 = vmatpush1.bf16.msra.mxu0 %v5521_v23  ;;  %5558 = vmatprep.mubr.bf16.mxu0 %v13184_v10  ;;  %v5752_v43 = vpop.permute.xlu0 %5751 }
 0x947   :  { %11373 = vmatprep.subr.msk.bf16.mxu0 %vm79_vm0, %v5574_v24  ;;  %v5754_v42 = vpop.permute.xlu1 %5753  ;;  %v11394_v24 = vld [vmem:[%s16336_s1 + $0x250] sm:$0xf] }
 0x948   :  { %v5755_v44 = vsel %vm889_vm6, %v5752_v43, %v5754_v42 }
 0x949   :  { %v5760_v46 = vsel %vm79_vm0, %v5755_v44, 0 }
 0x94a   :  { %v5811_v48 = vpop.permute.xlu0 %5810 }
 0x94b   :  { %v5813_v47 = vpop.permute.xlu1 %5812 }
 0x94c   :  { %v5815_v49 = vsel %vm5814_vm5, %v5811_v48, %v5813_v47 }
 0x94d   :  { %v5820_v51 = vsel %vm79_vm0, %v5815_v49, 0 }
 0x94e   :  { %v5871_v53 = vpop.permute.xlu0 %5870 }
 0x94f   :  { %v5873_v52 = vpop.permute.xlu1 %5872 }
 0x950   :  { %v5875_v55 = vsel %vm5874_vm7, %v5871_v53, %v5873_v52 }
 0x951   :  { %11371 = vmatmul.mubr.msk.bf16.vlgmr.msra.gmra.mrb[24].mxu0 %vm75_vm1, %v11369_v30  ;;  %v5880_v59 = vsel %vm79_vm0, %v5875_v55, 0 }
 0x952   :  { %5587 = vmatpush1.bf16.msra.mxu0 %v5581_v27  ;;  %5618 = vmatprep.mubr.bf16.mxu0 %v13184_v10 }
 0x953   :  { %11376 = vmatprep.subr.msk.bf16.mxu0 %vm79_vm0, %v5634_v29  ;;  %v11393_v29 = vld [vmem:[%s16336_s1 + $0x240] sm:$0xf] }
 0x95d   :  { %11374 = vmatmul.mubr.msk.bf16.vlgmr.msra.gmra.mrb[24].mxu0 %vm75_vm1, %v11372_v36 }
 0x95e   :  { %5647 = vmatpush1.bf16.msra.mxu0 %v5641_v38  ;;  %5678 = vmatprep.mubr.bf16.mxu0 %v13184_v10 }
 0x95f   :  { %11379 = vmatprep.subr.msk.bf16.mxu0 %vm79_vm0, %v5694_v57  ;;  %v5935_v28 = vpop.permute.xlu0 %5934  ;;  %v11399_v57 = vld [vmem:[%s16336_s1 + $0x260] sm:$0xf] }
 0x960   :  { %v5942_v1 = vpop.permute.xlu1 %5941 }
 0x969   :  { %11377 = vmatmul.mubr.msk.bf16.vlgmr.msra.gmra.mrb[24].mxu0 %vm75_vm1, %v11375_v39 }
 0x96a   :  { %5707 = vmatpush1.bf16.msra.mxu0 %v5701_v41  ;;  %5738 = vmatprep.mubr.bf16.mxu0 %v13184_v10 }
 0x96b   :  { %11382 = vmatprep.subr.msk.bf16.mxu0 %vm79_vm0, %v5754_v42  ;;  %v11402_v42 = vld [vmem:[%s16336_s1 + $0x270] sm:$0xf] }
 0x975   :  { %11380 = vmatmul.mubr.msk.bf16.vlgmr.msra.gmra.mrb[24].mxu0 %vm75_vm1, %v11378_v45 }
 0x976   :  { %5766 = vmatpush1.bf16.msra.mxu0 %v5760_v46  ;;  %5797 = vmatprep.mubr.bf16.mxu0 %v13184_v10 }
 0x977   :  { %11385 = vmatprep.subr.msk.bf16.mxu0 %vm79_vm0, %v5813_v47  ;;  %v11405_v47 = vld [vmem:[%s16336_s1 + $0x280] sm:$0xf] }
 0x981   :  { %11383 = vmatmul.mubr.msk.bf16.vlgmr.msra.gmra.mrb[24].mxu0 %vm75_vm1, %v11381_v50 }
 0x982   :  { %5826 = vmatpush1.bf16.msra.mxu0 %v5820_v51  ;;  %5857 = vmatprep.mubr.bf16.mxu0 %v13184_v10 }
 0x983   :  { %11388 = vmatprep.subr.msk.bf16.mxu0 %vm79_vm0, %v5873_v52  ;;  %v11408_v52 = vld [vmem:[%s16336_s1 + $0x290] sm:$0xf] }
 0x98d   :  { %11386 = vmatmul.mubr.msk.bf16.vlgmr.msra.gmra.mrb[24].mxu0 %vm75_vm1, %v11384_v56 }
 0x98e   :  { %5886 = vmatpush1.bf16.msra.mxu0 %v5880_v59  ;;  %5917 = vmatprep.mubr.bf16.mxu0 %v13184_v10 }
 0x999   :  { %11389 = vmatmul.mubr.msk.bf16.vlgmr.msra.gmra.mrb[24].mxu0 %vm75_vm1, %v11387_v61  ;;  %v11411_v61 = vld [vmem:[%s16336_s1 + $0x2a0] sm:$0xf] }
 0x99a   :  { %6028 = vmatprep.mubr.bf16.mxu0 %v13184_v10 }
 0xa6c   :  { %v5919_v58 = vpop.f32.mrb[24].mxu0 }
 0xa6d   :  { %v5937_v63 = vmul.f32 %v5935_v28, %v5919_v58  ;;  %v5921_v0 = vpop.f32.mrb[25].mxu0 }
 0xa6e   :  { %v5938_v2 = vmul.f32 %v5935_v28, %v5921_v0  ;;  %v5923_v3 = vpop.f32.mrb[26].mxu0  ;;  %v11414_v0 = vld [vmem:[%s16336_s1 + $0x2b0] sm:$0xf] }
 0xa6f   :  { %v5944_v35 = vadd.f32 %v5942_v1, %v5937_v63  ;;  %v5924_v5 = vpop.f32.mrb[27].mxu0 }
 0xa70   :  { %v5945_v6 = vadd.f32 %v5942_v1, %v5938_v2  ;;  %v11417_v2 = vld [vmem:[%s16336_s1 + $0x2c0] sm:$0xf] }
 0xa71   :  { %v5946_v8 = vmax.f32 %v5944_v35, 0.0 }
 0xa72   :  { %v5947_v9 = vmax.f32 %v5945_v6, 0.0 }
 0xa73   :  { %v5961_v11 = vmul.f32 %v14702_v4, %v5946_v8 }
 0xa74   :  { %v5962_v12 = vmul.f32 %v14706_v7, %v5947_v9 }
 0xa76   :  { %v12847_v13 = vpack.i.bf16 %v5962_v12, %v5961_v11 }
 0xa78   :  { %12848 = vrot.lane.b32.xlu0 %v12847_v13, %s13193_s4 }
 0xaea   :  { %v12849_v14 = vpop.permute.xlu0 %12848 }
 0xaeb   :  { %v12851_v15 = vunpack.i.h.bf16 %v12849_v14  ;;  %v12850_v16 = vunpack.i.l.bf16 %v12849_v14 }
 0xaed   :  { %v5969_v33 = vsel %vm5390_vm12, %v12850_v16, %v12851_v15  ;;  %v5972_v17 = vsel %vm5390_vm12, 0.0, %v12850_v16 }
 0xaee   :  { %v5973_v18 = vsel %vm5395_vm13, %v5969_v33, 0.0  ;;  %v5974_v34 = vpack.c.bf16 %v5972_v17, %v5972_v17 }
 0xaef   :  { %v5975_v37 = vpack.c.bf16 %v5973_v18, %v5973_v18 }
 0xaf0   :  { %5982 = vrot.lane.b32.xlu1 %v5974_v34, %s13183_s25  ;;  %v6041_v25 = vsel %vm79_vm0, %v5974_v34, 0 }
 0xaf1   :  { %5984 = vrot.lane.b32.xlu0 %v5975_v37, %s13183_s25 }
 0xaf4   :  { %6089 = vrot.lane.b32.xlu1 %v5974_v34, %s13185_s27 }
 0xaf5   :  { %6091 = vrot.lane.b32.xlu0 %v5975_v37, %s13185_s27 }
 0xaf8   :  { %6148 = vrot.lane.b32.xlu1 %v5974_v34, %s13194_s23 }
 0xaf9   :  { %6150 = vrot.lane.b32.xlu0 %v5975_v37, %s13194_s23 }
 0xafc   :  { %6207 = vrot.lane.b32.xlu1 %v5974_v34, %s13195_s21 }
 0xafd   :  { %6209 = vrot.lane.b32.xlu0 %v5975_v37, %s13195_s21 }
 0xb00   :  { %6266 = vrot.lane.b32.xlu1 %v5974_v34, %s13196_s13 }
 0xb01   :  { %6268 = vrot.lane.b32.xlu0 %v5975_v37, %s13196_s13 }
 0xb04   :  { %6325 = vrot.lane.b32.xlu1 %v5974_v34, %s13188_s30 }
 0xb05   :  { %6327 = vrot.lane.b32.xlu0 %v5975_v37, %s13188_s30 }
 0xb08   :  { %6384 = vrot.lane.b32.xlu1 %v5974_v34, %s13197_s22 }
 0xb09   :  { %6386 = vrot.lane.b32.xlu0 %v5975_v37, %s13197_s22 }
 0xb0c   :  { %6443 = vrot.lane.b32.xlu1 %v5974_v34, %s13198_s24 }
 0xb0d   :  { %6445 = vrot.lane.b32.xlu0 %v5975_v37, %s13198_s24 }
 0xb10   :  { %6506 = vperm.xlu1 %12821, %v11420_v40  }
 0xb11   :  { %6513 = vperm.xlu0 %12820, %v11421_v19  }
 0xb62   :  { %v5983_v20 = vpop.permute.xlu1 %5982 }
 0xb63   :  { %v5985_v21 = vpop.permute.xlu0 %5984 }
 0xb64   :  { %v5986_v22 = vsel %vm69_vm2, %v5983_v20, %v5985_v21  ;;  %11395 = vmatprep.subr.msk.bf16.mxu0 %vm79_vm0, %v5985_v21 }
 0xb65   :  { %v5991_v23 = vsel %vm79_vm0, %v5986_v22, 0 }
 0xb66   :  { %5997 = vmatpush1.bf16.msra.mxu0 %v5991_v23  ;;  %v6090_v30 = vpop.permute.xlu1 %6089 }
 0xb67   :  { %11397 = vmatprep.subr.msk.bf16.mxu0 %vm79_vm0, %v5975_v37  ;;  %v6092_v26 = vpop.permute.xlu0 %6091 }
 0xb68   :  { %v6093_v27 = vsel %vm379_vm3, %v6090_v30, %v6092_v26  ;;  %v13018_v30 = vld [vmem:[%s16340_s5 + $0x8] sm:$0xff]  }
 0xb69   :  { %11396 = vmatmul.mubr.msk.bf16.vlgmr.msra.gmra.mrb[28].mxu0 %vm75_vm1, %v11394_v24  ;;  %v6098_v31 = vsel %vm79_vm0, %v6093_v27, 0  ;;  %v11469_v24 = vld [vmem:[%s16337_s2 + $0x160] sm:$0xff]  ;;  %v13019_v27 = vld [vmem:[%s16340_s5 + $0x10] sm:$0xff]  }
 0xb6a   :  { %6047 = vmatpush1.bf16.msra.mxu0 %v6041_v25  ;;  %6078 = vmatprep.mubr.bf16.mxu0 %v13184_v10  ;;  %v6149_v36 = vpop.permute.xlu1 %6148  ;;  %v11470_v25 = vld [vmem:[%s16337_s2 + $0x168] sm:$0xff] }
 0xb6b   :  { %11400 = vmatprep.subr.msk.bf16.mxu0 %vm79_vm0, %v6092_v26  ;;  %v6151_v32 = vpop.permute.xlu0 %6150  ;;  %v13017_v26 = vld [vmem:[%s16340_s5] sm:$0xff]  }
 0xb6c   :  { %v6152_v38 = vsel %vm5575_vm14, %v6149_v36, %v6151_v32  ;;  %v13023_v36 = vld [vmem:[%s16340_s5 + $0x30] sm:$0xff]  }
 0xb6d   :  { %v6157_v54 = vsel %vm79_vm0, %v6152_v38, 0 }
 0xb6e   :  { %v6208_v39 = vpop.permute.xlu1 %6207 }
 0xb6f   :  { %v6210_v60 = vpop.permute.xlu0 %6209 }
 0xb70   :  { %v6211_v41 = vsel %vm5635_vm15, %v6208_v39, %v6210_v60 }
 0xb71   :  { %v6216_v43 = vsel %vm79_vm0, %v6211_v41, 0  ;;  %v13008_v41 = vld [vmem:[%s16336_s1 + $0x2e0] sm:$0xff]  }
 0xb72   :  { %v6267_v45 = vpop.permute.xlu1 %6266 }
 0xb73   :  { %v6269_v44 = vpop.permute.xlu0 %6268 }
 0xb74   :  { %v6270_v46 = vsel %vm5695_vm4, %v6267_v45, %v6269_v44  ;;  %v13026_v45 = vld [vmem:[%s16340_s5 + $0x48] sm:$0xff]  }
 0xb75   :  { %11398 = vmatmul.mubr.msk.bf16.vlgmr.msra.gmra.mrb[28].mxu0 %vm75_vm1, %v11393_v29  ;;  %v6275_v48 = vsel %vm79_vm0, %v6270_v46, 0  ;;  %v13020_v29 = vld [vmem:[%s16340_s5 + $0x18] sm:$0xff]  }
 0xb76   :  { %6104 = vmatpush1.bf16.msra.mxu0 %v6098_v31  ;;  %6135 = vmatprep.mubr.bf16.mxu0 %v13184_v10  ;;  %v6326_v50 = vpop.permute.xlu1 %6325  ;;  %v13021_v31 = vld [vmem:[%s16340_s5 + $0x20] sm:$0xff]  }
 0xb77   :  { %11403 = vmatprep.subr.msk.bf16.mxu0 %vm79_vm0, %v6151_v32  ;;  %v6328_v49 = vpop.permute.xlu0 %6327  ;;  %v13022_v32 = vld [vmem:[%s16340_s5 + $0x28] sm:$0xff]  }
 0xb78   :  { %v6329_v51 = vsel %vm889_vm6, %v6326_v50, %v6328_v49 }
 0xb79   :  { %v6334_v53 = vsel %vm79_vm0, %v6329_v51, 0 }
 0xb7a   :  { %v6385_v56 = vpop.permute.xlu1 %6384 }
 0xb7b   :  { %v6387_v55 = vpop.permute.xlu0 %6386 }
 0xb7c   :  { %v6388_v59 = vsel %vm5814_vm5, %v6385_v56, %v6387_v55 }
 0xb7d   :  { %v6393_v28 = vsel %vm79_vm0, %v6388_v59, 0 }
 0xb7e   :  { %v6444_v62 = vpop.permute.xlu1 %6443 }
 0xb7f   :  { %v6446_v58 = vpop.permute.xlu0 %6445 }
 0xb80   :  { %v6447_v63 = vsel %vm5874_vm7, %v6444_v62, %v6446_v58 }
 0xb81   :  { %11401 = vmatmul.mubr.msk.bf16.vlgmr.msra.gmra.mrb[28].mxu0 %vm75_vm1, %v11399_v57  ;;  %v6452_v1 = vsel %vm79_vm0, %v6447_v63, 0 }
 0xb82   :  { %6163 = vmatpush1.bf16.msra.mxu0 %v6157_v54  ;;  %6194 = vmatprep.mubr.bf16.mxu0 %v13184_v10  ;;  %v13024_v54 = vld [vmem:[%s16340_s5 + $0x38] sm:$0xff]  }
 0xb83   :  { %11406 = vmatprep.subr.msk.bf16.mxu0 %vm79_vm0, %v6210_v60 }
 0xb8d   :  { %11404 = vmatmul.mubr.msk.bf16.vlgmr.msra.gmra.mrb[28].mxu0 %vm75_vm1, %v11402_v42  ;;  %v13025_v42 = vld [vmem:[%s16340_s5 + $0x40] sm:$0xff]  }
 0xb8e   :  { %6222 = vmatpush1.bf16.msra.mxu0 %v6216_v43  ;;  %6253 = vmatprep.mubr.bf16.mxu0 %v13184_v10 }
 0xb8f   :  { %11409 = vmatprep.subr.msk.bf16.mxu0 %vm79_vm0, %v6269_v44  ;;  %v6507_v3 = vpop.permute.xlu1 %6506 }
 0xb90   :  { %v6514_v8 = vpop.permute.xlu0 %6513 }
 0xb99   :  { %11407 = vmatmul.mubr.msk.bf16.vlgmr.msra.gmra.mrb[28].mxu0 %vm75_vm1, %v11405_v47  ;;  %v13009_v47 = vld [vmem:[%s16336_s1 + $0x2d0] sm:$0xff]  }
 0xb9a   :  { %6281 = vmatpush1.bf16.msra.mxu0 %v6275_v48  ;;  %6312 = vmatprep.mubr.bf16.mxu0 %v13184_v10 }
 0xb9b   :  { %11412 = vmatprep.subr.msk.bf16.mxu0 %vm79_vm0, %v6328_v49 }
 0xba5   :  { %11410 = vmatmul.mubr.msk.bf16.vlgmr.msra.gmra.mrb[28].mxu0 %vm75_vm1, %v11408_v52  ;;  %v13010_v52 = vld [vmem:[%s16336_s1 + $0x2f0] sm:$0xff]  }
 0xba6   :  { %6340 = vmatpush1.bf16.msra.mxu0 %v6334_v53  ;;  %6371 = vmatprep.mubr.bf16.mxu0 %v13184_v10 }
 0xba7   :  { %11415 = vmatprep.subr.msk.bf16.mxu0 %vm79_vm0, %v6387_v55 }
 0xbb1   :  { %11413 = vmatmul.mubr.msk.bf16.vlgmr.msra.gmra.mrb[28].mxu0 %vm75_vm1, %v11411_v61  ;;  %v13011_v61 = vld [vmem:[%s16336_s1 + $0x300] sm:$0xff]  }
 0xbb2   :  { %6399 = vmatpush1.bf16.msra.mxu0 %v6393_v28  ;;  %6430 = vmatprep.mubr.bf16.mxu0 %v13184_v10 }
 0xbb3   :  { %11418 = vmatprep.subr.msk.bf16.mxu0 %vm79_vm0, %v6446_v58 }
 0xbbd   :  { %11416 = vmatmul.mubr.msk.bf16.vlgmr.msra.gmra.mrb[28].mxu0 %vm75_vm1, %v11414_v0  ;;  %v13012_v0 = vld [vmem:[%s16336_s1 + $0x310] sm:$0xff]  }
 0xbbe   :  { %6458 = vmatpush1.bf16.msra.mxu0 %v6452_v1  ;;  %6489 = vmatprep.mubr.bf16.mxu0 %v13184_v10 }
 0xbbf   :  { %7292 = vmatprep.subr.bf16.mxu0 %v13184_v10 }
 0xbc9   :  { %11419 = vmatmul.mubr.msk.bf16.vlgmr.msra.gmra.mrb[28].mxu0 %vm75_vm1, %v11417_v2 }
 0xbca   :  { %7293 = vmatpush1.bf16.msra.mxu0 %v13017_v26 }
 0xbcb   :  { %7294 = vmatprep.subr.bf16.mxu0 %v13184_v10 }
 0xbce   :  { %7295 = vmatpush1.bf16.msra.mxu0 %v13018_v30 }
 0xbcf   :  { %7296 = vmatprep.subr.bf16.mxu0 %v13184_v10 }
 0xbd2   :  { %7297 = vmatpush1.bf16.msra.mxu0 %v13019_v27 }
 0xbd3   :  { %7298 = vmatprep.subr.bf16.mxu0 %v13184_v10 }
 0xbd6   :  { %7299 = vmatpush1.bf16.msra.mxu0 %v13020_v29 }
 0xbd7   :  { %7300 = vmatprep.subr.bf16.mxu0 %v13184_v10 }
 0xbda   :  { %7301 = vmatpush1.bf16.msra.mxu0 %v13021_v31 }
 0xbdb   :  { %7302 = vmatprep.subr.bf16.mxu0 %v13184_v10 }
 0xbde   :  { %7303 = vmatpush1.bf16.msra.mxu0 %v13022_v32 }
 0xbdf   :  { %7304 = vmatprep.subr.bf16.mxu0 %v13184_v10 }
 0xbe2   :  { %7305 = vmatpush1.bf16.msra.mxu0 %v13023_v36 }
 0xbe3   :  { %7306 = vmatprep.subr.bf16.mxu0 %v13184_v10 }
 0xbe6   :  { %7307 = vmatpush1.bf16.msra.mxu0 %v13024_v54 }
 0xbe7   :  { %7308 = vmatprep.subr.bf16.mxu0 %v13184_v10 }
 0xbea   :  { %7309 = vmatpush1.bf16.msra.mxu0 %v13025_v42 }
 0xbeb   :  { %7310 = vmatprep.subr.bf16.mxu0 %v13184_v10 }
 0xbee   :  { %7311 = vmatpush1.bf16.msra.mxu0 %v13026_v45 }
 0xbef   :  { %7312 = vmatprep.subr.bf16.mxu0 %v13184_v10 }
 0xc9c   :  { %v6491_v35 = vpop.f32.mrb[28].mxu0 }
 0xc9d   :  { %v6509_v5 = vmul.f32 %v6507_v3, %v6491_v35  ;;  %v6493_v6 = vpop.f32.mrb[29].mxu0 }
 0xc9e   :  { %v6510_v9 = vmul.f32 %v6507_v3, %v6493_v6  ;;  %v6495_v11 = vpop.f32.mrb[30].mxu0 }
 0xc9f   :  { %v6516_v12 = vadd.f32 %v6514_v8, %v6509_v5  ;;  %v6496_v13 = vpop.f32.mrb[31].mxu0  ;;  %v13013_v5 = vld [vmem:[%s16336_s1 + $0x320] sm:$0xff]  }
 0xca0   :  { %v6517_v14 = vadd.f32 %v6514_v8, %v6510_v9 }
 0xca1   :  { %v6518_v15 = vmax.f32 %v6516_v12, 0.0  ;;  %v13014_v12 = vld [vmem:[%s16336_s1 + $0x330] sm:$0xff]  }
 0xca2   :  { %v6519_v16 = vmax.f32 %v6517_v14, 0.0 }
 0xca3   :  { %v6520_v33 = vmul.f32 %v6518_v15, %v14702_v4  ;;  %v11467_v4 = vld [vmem:[%s16337_s2 + $0x140] sm:$0xff] }
 0xca4   :  { %v6521_v17 = vmul.f32 %v6519_v16, %v14706_v7  ;;  %v11468_v7 = vld [vmem:[%s16337_s2 + $0x148] sm:$0xff] }
 0xca6   :  { %v12852_v18 = vpack.i.bf16 %v6521_v17, %v6520_v33  ;;  %v13015_v33 = vld [vmem:[%s16336_s1 + $0x340] sm:$0xff]  }
 0xca8   :  { %12853 = vrot.lane.b32.xlu1 %v12852_v18, %s13193_s4  ;;  %s13204_s4 = smov 120  }
 0xd1a   :  { %v12854_v34 = vpop.permute.xlu1 %12853 }
 0xd1b   :  { %v12856_v37 = vunpack.i.h.bf16 %v12854_v34  ;;  %v12855_v40 = vunpack.i.l.bf16 %v12854_v34  ;;  %v13016_v34 = vld [vmem:[%s16336_s1 + $0x350] sm:$0xff]  }
 0xd1d   :  { %v6528_v19 = vsel %vm5390_vm12, %v12855_v40, %v12856_v37  ;;  %v6531_v20 = vsel %vm5390_vm12, 0.0, %v12855_v40  ;;  %v13027_v37 = vld [vmem:[%s16340_s5 + $0x50] sm:$0xff]   ;;  %v13028_v40 = vld [vmem:[%s16340_s5 + $0x58] sm:$0xff]   ;;  %vm11677_vm12 = vmpackc.low %vm9327_vm10, %vm9327_vm10 }
 0xd1e   :  { %v6532_v21 = vsel %vm5395_vm13, %v6528_v19, 0.0  ;;  %v6533_v22 = vpack.c.bf16 %v6531_v20, %v6531_v20  ;;  %7313 = vmatpush1.bf16.msra.mxu0 %v13027_v37  ;;  %v13029_v19 = vld [vmem:[%s16340_s5 + $0x60] ss:$0 sps:$4 sm:$0xff]   ;;  %s13199_s5 = smov 7   ;;  %vm10157_vm13 = vcmask 7168  }
 0xd1f   :  { %v6534_v23 = vpack.c.bf16 %v6532_v21, %v6532_v21  ;;  %7314 = vmatprep.subr.bf16.mxu0 %v13184_v10  ;;  %v7290_v20 = vsel %vm79_vm0, %v13029_v19, 0 }
 0xd20   :  { %6548 = vrot.lane.b32.xlu0 %v6533_v22, %s13183_s25  ;;  %v6614_v43 = vsel %vm79_vm0, %v6533_v22, 0 }
 0xd21   :  { %6550 = vrot.lane.b32.xlu1 %v6534_v23, %s13183_s25 }
 0xd22   :  { %7315 = vmatpush1.bf16.msra.mxu0 %v13028_v40 }
 0xd23   :  { %7316 = vmatprep.subr.bf16.mxu0 %v13184_v10 }
 0xd24   :  { %6670 = vrot.lane.b32.xlu0 %v6533_v22, %s13185_s27 }
 0xd25   :  { %6672 = vrot.lane.b32.xlu1 %v6534_v23, %s13185_s27 }
 0xd26   :  { %7317 = vmatpush1.bf16.msra.mxu0 %v7290_v20 }
 0xd28   :  { %6739 = vrot.lane.b32.xlu0 %v6533_v22, %s13194_s23 }
 0xd29   :  { %6741 = vrot.lane.b32.xlu1 %v6534_v23, %s13194_s23 }
 0xd2c   :  { %6808 = vrot.lane.b32.xlu0 %v6533_v22, %s13195_s21 }
 0xd2d   :  { %6810 = vrot.lane.b32.xlu1 %v6534_v23, %s13195_s21  ;;  %s13206_s21 = smov 115  }
 0xd30   :  { %6877 = vrot.lane.b32.xlu0 %v6533_v22, %s13196_s13 }
 0xd31   :  { %6879 = vrot.lane.b32.xlu1 %v6534_v23, %s13196_s13 }
 0xd34   :  { %6946 = vrot.lane.b32.xlu0 %v6533_v22, %s13188_s30 }
 0xd35   :  { %6948 = vrot.lane.b32.xlu1 %v6534_v23, %s13188_s30 }
 0xd38   :  { %7015 = vrot.lane.b32.xlu0 %v6533_v22, %s13197_s22 }
 0xd39   :  { %7017 = vrot.lane.b32.xlu1 %v6534_v23, %s13197_s22 }
 0xd3c   :  { %7084 = vrot.lane.b32.xlu0 %v6533_v22, %s13198_s24 }
 0xd3d   :  { %7086 = vrot.lane.b32.xlu1 %v6534_v23, %s13198_s24 }
 0xd40   :  { %7153 = vperm.xlu0 %12820, %v11467_v4  }
 0xd41   :  { %7158 = vperm.xlu1 %12821, %v11468_v7  }
 0xd44   :  { %7167 = vperm.xlu0 %12820, %v11469_v24  }
 0xd45   :  { %7172 = vperm.xlu1 %12821, %v11470_v25  }
 0xd92   :  { %v6549_v38 = vpop.permute.xlu0 %6548 }
 0xd93   :  { %v6551_v57 = vpop.permute.xlu1 %6550 }
 0xd94   :  { %v6552_v60 = vsel %vm69_vm2, %v6549_v38, %v6551_v57  ;;  %11427 = vmatprep.subr.msk.bf16.mxu1 %vm79_vm0, %v6551_v57  ;;  %vm13201_vm2 = vmmov 0  }
 0xd95   :  { %v6557_v39 = vsel %vm79_vm0, %v6552_v60, 0 }
 0xd96   :  { %6563 = vmatpush1.bf16.msra.mxu1 %v6557_v39  ;;  %v6671_v46 = vpop.permute.xlu0 %6670 }
 0xd97   :  { %11430 = vmatprep.subr.msk.bf16.mxu1 %vm79_vm0, %v6534_v23  ;;  %v6673_v44 = vpop.permute.xlu1 %6672 }
 0xd98   :  { %v6674_v48 = vsel %vm379_vm3, %v6671_v46, %v6673_v44  ;;  %vm7341_vm3 = vcmask 56320  }
 0xd99   :  { %11428 = vmatmul.mubr.msk.bf16.vlgmr.msra.gmra.mrb[20].mxu1 %vm75_vm1, %v13008_v41  ;;  %v6679_v49 = vsel %vm79_vm0, %v6674_v48, 0 }
 0xd9a   :  { %6620 = vmatpush1.bf16.msra.mxu1 %v6614_v43  ;;  %6651 = vmatprep.mubr.bf16.mxu1 %v13184_v10  ;;  %v6740_v51 = vpop.permute.xlu0 %6739 }
 0xd9b   :  { %11435 = vmatprep.subr.msk.bf16.mxu1 %vm79_vm0, %v6673_v44  ;;  %v6742_v50 = vpop.permute.xlu1 %6741 }
 0xd9c   :  { %v6743_v53 = vsel %vm5575_vm14, %v6740_v51, %v6742_v50  ;;  %vm10647_vm14 = vcmask 15360  }
 0xd9d   :  { %v6748_v55 = vsel %vm79_vm0, %v6743_v53, 0 }
 0xd9e   :  { %v6809_v59 = vpop.permute.xlu0 %6808 }
 0xd9f   :  { %v6811_v56 = vpop.permute.xlu1 %6810 }
 0xda0   :  { %v6812_v28 = vsel %vm5635_vm15, %v6809_v59, %v6811_v56  ;;  %vm11066_vm15 = vcmask 8192  }
 0xda1   :  { %v6817_v58 = vsel %vm79_vm0, %v6812_v28, 0 }
 0xda2   :  { %v6878_v63 = vpop.permute.xlu0 %6877 }
 0xda3   :  { %v6880_v62 = vpop.permute.xlu1 %6879 }
 0xda4   :  { %v6881_v1 = vsel %vm5695_vm4, %v6878_v63, %v6880_v62  ;;  %v11527_v63 = vld [vmem:[%s16337_s2 + $0x1a8] sm:$0xff] }
 0xda5   :  { %11431 = vmatmul.mubr.msk.bf16.vlgmr.msra.gmra.mrb[20].mxu1 %vm75_vm1, %v13009_v47  ;;  %v6886_v2 = vsel %vm79_vm0, %v6881_v1, 0 }
 0xda6   :  { %6685 = vmatpush1.bf16.msra.mxu1 %v6679_v49  ;;  %6716 = vmatprep.mubr.bf16.mxu1 %v13184_v10  ;;  %v6947_v35 = vpop.permute.xlu0 %6946  ;;  %v13200_v49 = vmov 0.0  }
 0xda7   :  { %11440 = vmatprep.subr.msk.bf16.mxu1 %vm79_vm0, %v6742_v50  ;;  %v6949_v3 = vpop.permute.xlu1 %6948  ;;  %12012 = vmatprep.subr.bf16.mxu0 %v13200_v49 }
 0xda8   :  { %v6950_v6 = vsel %vm889_vm6, %v6947_v35, %v6949_v3  ;;  %vm7344_vm6 = vcmask 646144   ;;  %v13031_v35 = vld [vmem:[%s16336_s1 + $0x360] sm:$0xff]  }
 0xda9   :  { %v6955_v8 = vsel %vm79_vm0, %v6950_v6, 0  ;;  %vm15001_vm9 = vmpackc.low %vm7344_vm6, %vm7344_vm6  ;;  %v13032_v6 = vld [vmem:[%s16336_s1 + $0x380] sm:$0xff]  }
 0xdaa   :  { %v7016_v11 = vpop.permute.xlu0 %7015 }
 0xdab   :  { %v7018_v9 = vpop.permute.xlu1 %7017 }
 0xdac   :  { %v7019_v13 = vsel %vm5814_vm5, %v7016_v11, %v7018_v9 }
 0xdad   :  { %v7024_v14 = vsel %vm79_vm0, %v7019_v13, 0 }
 0xdae   :  { %v7085_v16 = vpop.permute.xlu0 %7084 }
 0xdaf   :  { %v7087_v15 = vpop.permute.xlu1 %7086 }
 0xdb0   :  { %v7088_v17 = vsel %vm5874_vm7, %v7085_v16, %v7087_v15  ;;  %v13036_v16 = vld [vmem:[%s16336_s1 + $0x3c0] sm:$0xff]  }
 0xdb1   :  { %11436 = vmatmul.mubr.msk.bf16.vlgmr.msra.gmra.mrb[20].mxu1 %vm75_vm1, %v13010_v52  ;;  %v7093_v18 = vsel %vm79_vm0, %v7088_v17, 0  ;;  %v13037_v17 = vld [vmem:[%s16336_s1 + $0x3d0] sm:$0xff]  }
 0xdb2   :  { %6754 = vmatpush1.bf16.msra.mxu1 %v6748_v55  ;;  %6785 = vmatprep.mubr.bf16.mxu1 %v13184_v10 }
 0xdb3   :  { %11445 = vmatprep.subr.msk.bf16.mxu1 %vm79_vm0, %v6811_v56 }
 0xdbd   :  { %11441 = vmatmul.mubr.msk.bf16.vlgmr.msra.gmra.mrb[20].mxu1 %vm75_vm1, %v13011_v61 }
 0xdbe   :  { %6823 = vmatpush1.bf16.msra.mxu1 %v6817_v58  ;;  %6854 = vmatprep.mubr.bf16.mxu1 %v13184_v10  ;;  %v11525_v58 = vld [vmem:[%s16337_s2 + $0x188] sm:$0xff] }
 0xdbf   :  { %11450 = vmatprep.subr.msk.bf16.mxu1 %vm79_vm0, %v6880_v62  ;;  %v7154_v21 = vpop.permute.xlu0 %7153  ;;  %v11524_v62 = vld [vmem:[%s16337_s2 + $0x180] sm:$0xff] }
 0xdc0   :  { %v7159_v22 = vpop.permute.xlu1 %7158 }
 0xdc3   :  { %v7168_v24 = vpop.permute.xlu0 %7167 }
 0xdc4   :  { %v7173_v31 = vpop.permute.xlu1 %7172 }
 0xdc9   :  { %11446 = vmatmul.mubr.msk.bf16.vlgmr.msra.gmra.mrb[20].mxu1 %vm75_vm1, %v13012_v0  ;;  %v11526_v0 = vld [vmem:[%s16337_s2 + $0x1a0] sm:$0xff] }
 0xdca   :  { %6892 = vmatpush1.bf16.msra.mxu1 %v6886_v2  ;;  %6923 = vmatprep.mubr.bf16.mxu1 %v13184_v10  ;;  %v13030_v2 = vld [vmem:[%s16336_s1 + $0x370] sm:$0xff]  }
 0xdcb   :  { %11455 = vmatprep.subr.msk.bf16.mxu1 %vm79_vm0, %v6949_v3  ;;  %v13053_v3 = vld [vmem:[%s16336_s1 + $0x4a8] sm:$0xff]  }
 0xdd5   :  { %11451 = vmatmul.mubr.msk.bf16.vlgmr.msra.gmra.mrb[20].mxu1 %vm75_vm1, %v13013_v5 }
 0xdd6   :  { %6961 = vmatpush1.bf16.msra.mxu1 %v6955_v8  ;;  %6992 = vmatprep.mubr.bf16.mxu1 %v13184_v10 }
 0xdd7   :  { %11460 = vmatprep.subr.msk.bf16.mxu1 %vm79_vm0, %v7018_v9  ;;  %v13033_v9 = vld [vmem:[%s16336_s1 + $0x390] sm:$0xff]  }
 0xde1   :  { %11456 = vmatmul.mubr.msk.bf16.vlgmr.msra.gmra.mrb[20].mxu1 %vm75_vm1, %v13014_v12  ;;  %v13034_v12 = vld [vmem:[%s16336_s1 + $0x3a0] sm:$0xff]  }
 0xde2   :  { %7030 = vmatpush1.bf16.msra.mxu1 %v7024_v14  ;;  %7061 = vmatprep.mubr.bf16.mxu1 %v13184_v10  ;;  %v13035_v14 = vld [vmem:[%s16336_s1 + $0x3b0] sm:$0xff]  }
 0xde3   :  { %11465 = vmatprep.subr.msk.bf16.mxu1 %vm79_vm0, %v7087_v15 }
 0xded   :  { %11461 = vmatmul.mubr.msk.bf16.vlgmr.msra.gmra.mrb[20].mxu1 %vm75_vm1, %v13015_v33 }
 0xdee   :  { %7099 = vmatpush1.bf16.msra.mxu1 %v7093_v18  ;;  %7130 = vmatprep.mubr.bf16.mxu1 %v13184_v10 }
 0xdef   :  { %11958 = vmatprep.subr.bf16.mxu1 %v13200_v49 }
 0xdf9   :  { %11466 = vmatmul.mubr.msk.bf16.vlgmr.msra.gmra.mrb[20].mxu1 %vm75_vm1, %v13016_v34  ;;  %vm7285_vm1 = vcmask 588800   ;;  %v13038_v34 = vld [vmem:[%s16336_s1 + $0x3e0] sm:$0xff]  }
 0xdfa   :  { %11960 = vmatprep.mubr.msk.bf16.mxu1 %vm13201_vm2, %v13200_v49 }
 0xecc   :  { %v7132_v23 = vpop.f32.mrb[20].mxu1 }
 0xecd   :  { %v7161_v4 = vmul.f32 %v7154_v21, %v7132_v23  ;;  %v7134_v7 = vpop.f32.mrb[21].mxu1 }
 0xece   :  { %v7162_v25 = vmul.f32 %v7154_v21, %v7134_v7  ;;  %v7136_v26 = vpop.f32.mrb[22].mxu1 }
 0xecf   :  { %v7175_v30 = vadd.f32 %v7168_v24, %v7161_v4  ;;  %v7163_v27 = vmul.f32 %v7159_v22, %v7136_v26  ;;  %v7138_v29 = vpop.f32.mrb[23].mxu1 }
 0xed0   :  { %v7176_v32 = vadd.f32 %v7168_v24, %v7162_v25  ;;  %v7164_v36 = vmul.f32 %v7159_v22, %v7138_v29 }
 0xed1   :  { %v7177_v38 = vadd.f32 %v7173_v31, %v7163_v27  ;;  %v7179_v54 = vmax.f32 %v7175_v30, 0.0  ;;  %v15066_v27 = vld [vmem:[%s16338_s3 + $0xc] ss:$0 sm:$0xff] }
 0xed2   :  { %v7178_v57 = vadd.f32 %v7173_v31, %v7164_v36  ;;  %v7180_v39 = vmax.f32 %v7176_v32, 0.0 }
 0xed3   :  { %v7181_v60 = vmax.f32 %v7177_v38, 0.0 }
 0xed4   :  { %v7182_v41 = vmax.f32 %v7178_v57, 0.0 }
 0xed5   :  { %v7183_v42 = vpack.c.bf16 %v7181_v60, %v7179_v54 }
 0xed6   :  { %v7184_v43 = vpack.c.bf16 %v7182_v41, %v7180_v39 }
 0xed8   :  { %11484 = vmatprep.mubr.msk.bf16.mxu0 %vm7285_vm1, %v7184_v43 }
 0xed9   :  { %7325 = vmatmul.mubr.bf16.vlgmr.msra.gmra.mrb[32].mxu0 %v7183_v42 }
 0xeda   :  { %12014 = vmatprep.mubr.msk.bf16.mxu0 %vm13201_vm2, %v13200_v49 }
 0xfac   :  { %v7326_v44 = vpop.f32.mrb[32].mxu0 }
 0xfad   :  { %v7328_v45 = vpop.f32.mrb[33].mxu0 }
 0xfae   :  { %v7329_v46 = vpop.f32.mrb[34].mxu0  ;;  %v11570_v45 = vld [vmem:[%s16337_s2 + $0x1c8] sm:$0xff] }
 0xfaf   :  { %v12857_v47 = vpack.i.bf16 %v7329_v46, %v7326_v44  ;;  %v7331_v48 = vpop.f32.mrb[35].mxu0  ;;  %v11569_v46 = vld [vmem:[%s16337_s2 + $0x1c0] sm:$0xff] }
 0xfb0   :  { %v11571_v48 = vld [vmem:[%s16337_s2 + $0x1e0] sm:$0xff] }
 0xfb1   :  { %12858 = vrot.lane.b32.xlu0 %v12857_v47, %s13199_s5  ;;  %v11572_v47 = vld [vmem:[%s16337_s2 + $0x1e8] sm:$0xff] }
0x1023   :  { %v12859_v50 = vpop.permute.xlu0 %12858 }
0x1024   :  { %v12861_v51 = vunpack.i.h.bf16 %v12859_v50  ;;  %v12860_v52 = vunpack.i.l.bf16 %v12859_v50 }
0x1026   :  { %v7343_v53 = vsel %vm7341_vm3, 0.0, %v12861_v51  ;;  %v7342_v55 = vsel %vm7341_vm3, 0.0, %v12860_v52  ;;  %v13039_v51 = vld [vmem:[%s16336_s1 + $0x400] sm:$0xff]   ;;  %v13040_v52 = vld [vmem:[%s16336_s1 + $0x3f0] sm:$0xff]  }
0x1027   :  { %v7346_v56 = vsel %vm7344_vm6, %v7343_v53, 0.0  ;;  %v7345_v59 = vsel %vm7344_vm6, %v7342_v55, 0.0  ;;  %v11493_v61 = vpack.c.bf16 %v7343_v53, %v7342_v55  ;;  %v13041_v55 = vld [vmem:[%s16336_s1 + $0x410] sm:$0xff]  }
0x1028   :  { %v7347_v28 = vpack.c.bf16 %v7346_v56, %v7345_v59  ;;  %v13042_v59 = vld [vmem:[%s16336_s1 + $0x420] sm:$0xff]  }
0x102a   :  { %7465 = vrot.lane.b32.xlu0 %v7347_v28, %s13185_s27  ;;  %7360 = vrot.lane.b32.xlu1 %v7347_v28, %s13183_s25 }
0x102e   :  { %7579 = vrot.lane.b32.xlu0 %v7347_v28, %s13202_s17  ;;  %7522 = vrot.lane.b32.xlu1 %v7347_v28, %s13203_s18 }
0x1032   :  { %7693 = vrot.lane.b32.xlu0 %v7347_v28, %s13196_s13  ;;  %7636 = vrot.lane.b32.xlu1 %v7347_v28, %s13204_s4 }
0x1036   :  { %7807 = vrot.lane.b32.xlu0 %v7347_v28, %s13205_s19  ;;  %7750 = vrot.lane.b32.xlu1 %v7347_v28, %s13206_s21  ;;  %v13043_v28 = vld [vmem:[%s16336_s1 + $0x430] sm:$0xff]  }
0x103a   :  { %7869 = vperm.xlu0 %12820, %v11525_v58   ;;  %7864 = vperm.xlu1 %12821, %v11524_v62   ;;  %v13044_v62 = vld [vmem:[%s16336_s1 + $0x440] sm:$0xff]  }
0x103e   :  { %7881 = vperm.xlu0 %12820, %v11527_v63   ;;  %7876 = vperm.xlu1 %12821, %v11526_v0   ;;  %v13045_v0 = vld [vmem:[%s16336_s1 + $0x450] sm:$0xff]  }
0x109c   :  { %v7361_v1 = vpop.permute.xlu1 %7360  ;;  %v7466_v5 = vpop.permute.xlu0 %7465 }
0x109d   :  { %11959 = vmatpush3.bf16.msra.mxu1 %v7361_v1 }
0x109e   :  { %11964 = vmatprep.subr.bf16.mxu1 %v13200_v49 }
0x10a0   :  { %11961 = vmatmul.mubr.msk.bf16.vlgmr.msra.gmra.mrb[24].mxu1 %vm7363_vm8, %v13030_v2  ;;  %v7523_v8 = vpop.permute.xlu1 %7522  ;;  %v7580_v11 = vpop.permute.xlu0 %7579  ;;  %v13046_v2 = vld [vmem:[%s16336_s1 + $0x460] sm:$0xff]  }
0x10a1   :  { %11965 = vmatpush3.bf16.msk.msra.mxu1 %vm15001_vm9, %v11493_v61  ;;  %11966 = vmatprep.mubr.msk.bf16.mxu1 %vm13201_vm2, %v13200_v49 }
0x10a2   :  { %11970 = vmatprep.subr.bf16.mxu1 %v13200_v49 }
0x10a4   :  { %v7637_v13 = vpop.permute.xlu1 %7636  ;;  %v7694_v15 = vpop.permute.xlu0 %7693 }
0x10a8   :  { %v7751_v33 = vpop.permute.xlu1 %7750  ;;  %v7808_v18 = vpop.permute.xlu0 %7807 }
0x10ac   :  { %11967 = vmatmul.mubr.msk.bf16.vlgmr.msra.gmra.mrb[24].mxu1 %vm7363_vm8, %v13031_v35 }
0x10ad   :  { %11971 = vmatpush3.bf16.msra.mxu1 %v7466_v5  ;;  %11972 = vmatprep.mubr.msk.bf16.mxu1 %vm13201_vm2, %v13200_v49  ;;  %v13047_v5 = vld [vmem:[%s16336_s1 + $0x470] sm:$0xff]  }
0x10ae   :  { %11976 = vmatprep.subr.bf16.mxu1 %v13200_v49 }
0x10b8   :  { %11973 = vmatmul.mubr.msk.bf16.vlgmr.msra.gmra.mrb[24].mxu1 %vm7363_vm8, %v13032_v6 }
0x10b9   :  { %11977 = vmatpush3.bf16.msra.mxu1 %v7523_v8  ;;  %11978 = vmatprep.mubr.msk.bf16.mxu1 %vm13201_vm2, %v13200_v49  ;;  %v7865_v37 = vpop.permute.xlu1 %7864  ;;  %v7870_v40 = vpop.permute.xlu0 %7869 }
0x10ba   :  { %11982 = vmatprep.subr.bf16.mxu1 %v13200_v49 }
0x10bd   :  { %v7877_v22 = vpop.permute.xlu1 %7876  ;;  %v7882_v25 = vpop.permute.xlu0 %7881 }
0x10c4   :  { %11979 = vmatmul.mubr.msk.bf16.vlgmr.msra.gmra.mrb[24].mxu1 %vm7363_vm8, %v13033_v9 }
0x10c5   :  { %11983 = vmatpush3.bf16.msra.mxu1 %v7580_v11  ;;  %11984 = vmatprep.mubr.msk.bf16.mxu1 %vm13201_vm2, %v13200_v49 }
0x10c6   :  { %11988 = vmatprep.subr.bf16.mxu1 %v13200_v49 }
0x10d0   :  { %11985 = vmatmul.mubr.msk.bf16.vlgmr.msra.gmra.mrb[24].mxu1 %vm7363_vm8, %v13034_v12 }
0x10d1   :  { %11989 = vmatpush3.bf16.msra.mxu1 %v7637_v13  ;;  %11990 = vmatprep.mubr.msk.bf16.mxu1 %vm13201_vm2, %v13200_v49 }
0x10d2   :  { %11994 = vmatprep.subr.bf16.mxu1 %v13200_v49 }
0x10dc   :  { %11991 = vmatmul.mubr.msk.bf16.vlgmr.msra.gmra.mrb[24].mxu1 %vm7363_vm8, %v13035_v14 }
0x10dd   :  { %11995 = vmatpush3.bf16.msra.mxu1 %v7694_v15  ;;  %11996 = vmatprep.mubr.msk.bf16.mxu1 %vm13201_vm2, %v13200_v49 }
0x10de   :  { %12000 = vmatprep.subr.bf16.mxu1 %v13200_v49 }
0x10e8   :  { %11997 = vmatmul.mubr.msk.bf16.vlgmr.msra.gmra.mrb[24].mxu1 %vm7363_vm8, %v13036_v16 }
0x10e9   :  { %12001 = vmatpush3.bf16.msra.mxu1 %v7751_v33  ;;  %12002 = vmatprep.mubr.msk.bf16.mxu1 %vm13201_vm2, %v13200_v49 }
0x10ea   :  { %12006 = vmatprep.subr.bf16.mxu1 %v13200_v49 }
0x10f4   :  { %12003 = vmatmul.mubr.msk.bf16.vlgmr.msra.gmra.mrb[24].mxu1 %vm7363_vm8, %v13037_v17 }
0x10f5   :  { %12007 = vmatpush3.bf16.msra.mxu1 %v7808_v18  ;;  %12008 = vmatprep.mubr.msk.bf16.mxu1 %vm13201_vm2, %v13200_v49 }
0x1100   :  { %12009 = vmatmul.mubr.msk.bf16.vlgmr.msra.gmra.mrb[24].mxu1 %vm7363_vm8, %v13038_v34 }
0x11d3   :  { %v7847_v19 = vpop.f32.mrb[24].mxu1 }
0x11d4   :  { %v7872_v20 = vmul.f32 %v7865_v37, %v7847_v19  ;;  %v12010_v21 = vpop.f32.mrb[25].mxu1 }
0x11d5   :  { %v7850_v23 = vpop.f32.mrb[26].mxu1 }
0x11d6   :  { %v7884_v4 = vadd.f32 %v7877_v22, %v7872_v20  ;;  %v7873_v7 = vmul.f32 %v7870_v40, %v7850_v23  ;;  %v12011_v24 = vpop.f32.mrb[27].mxu1  ;;  %v13048_v20 = vld [vmem:[%s16336_s1 + $0x490] sm:$0xff]  }
0x11d7   :  { %12068 = vmatprep.mubr.msk.bf16.mxu1 %vm7363_vm8, %v13048_v20 }
0x11d8   :  { %v7886_v26 = vmax.f32 %v7884_v4, 0.0  ;;  %v7885_v30 = vadd.f32 %v7882_v25, %v7873_v7 }
0x11da   :  { %v7887_v29 = vmax.f32 %v7885_v30, 0.0  ;;  %v7896_v31 = vmul.f32 %v15066_v27, %v7886_v26 }
0x11dc   :  { %v7897_v32 = vmul.f32 %v15066_v27, %v7887_v29  ;;  %v11648_v29 = vld [vmem:[%s16337_s2 + $0x200] sm:$0xff] }
0x11de   :  { %v12862_v36 = vpack.i.bf16 %v7897_v32, %v7896_v31  ;;  %v11651_v31 = vld [vmem:[%s16337_s2 + $0x218] sm:$0xff]  ;;  %v11650_v32 = vld [vmem:[%s16337_s2 + $0x210] sm:$0xff] }
0x11e0   :  { %12863 = vrot.lane.b32.xlu1 %v12862_v36, %s13199_s5  ;;  %v11653_v36 = vld [vmem:[%s16337_s2 + $0x228] sm:$0xff] }
0x1252   :  { %v12864_v38 = vpop.permute.xlu1 %12863 }
0x1253   :  { %v12866_v57 = vunpack.i.h.bf16 %v12864_v38  ;;  %v12865_v54 = vunpack.i.l.bf16 %v12864_v38  ;;  %v11652_v38 = vld [vmem:[%s16337_s2 + $0x220] sm:$0xff] }
0x1255   :  { %v7907_v60 = vsel %vm7341_vm3, 0.0, %v12866_v57  ;;  %v7906_v39 = vsel %vm7341_vm3, 0.0, %v12865_v54  ;;  %v11655_v57 = vld [vmem:[%s16337_s2 + $0x238] sm:$0xff]  ;;  %v11654_v54 = vld [vmem:[%s16337_s2 + $0x230] sm:$0xff] }
0x1256   :  { %v7909_v41 = vsel %vm7344_vm6, %v7907_v60, 0.0  ;;  %v7908_v42 = vsel %vm7344_vm6, %v7906_v39, 0.0  ;;  %v11538_v43 = vpack.c.bf16 %v7907_v60, %v7906_v39  ;;  %v13066_v60 = vld [vmem:[%s16341_s6] sm:$0xff]   ;;  %v13067_v39 = vld [vmem:[%s16341_s6 + $0x8] sm:$0xff]  }
0x1257   :  { %v7910_v44 = vpack.c.bf16 %v7909_v41, %v7908_v42  ;;  %v13049_v42 = vld [vmem:[%s16336_s1 + $0x498] sm:$0xff]  }
0x1259   :  { %8027 = vrot.lane.b32.xlu1 %v7910_v44, %s13185_s27  ;;  %7923 = vrot.lane.b32.xlu0 %v7910_v44, %s13183_s25 }
0x125d   :  { %8141 = vrot.lane.b32.xlu1 %v7910_v44, %s13202_s17  ;;  %8084 = vrot.lane.b32.xlu0 %v7910_v44, %s13203_s18 }
0x1261   :  { %8255 = vrot.lane.b32.xlu1 %v7910_v44, %s13196_s13  ;;  %8198 = vrot.lane.b32.xlu0 %v7910_v44, %s13204_s4 }
0x1265   :  { %8369 = vrot.lane.b32.xlu1 %v7910_v44, %s13205_s19  ;;  %8312 = vrot.lane.b32.xlu0 %v7910_v44, %s13206_s21 }
0x1269   :  { %8431 = vperm.xlu1 %12821, %v11570_v45   ;;  %8426 = vperm.xlu0 %12820, %v11569_v46   ;;  %v13051_v45 = vld [vmem:[%s16336_s1 + $0x488] sm:$0xff]   ;;  %v13052_v46 = vld [vmem:[%s16336_s1 + $0x4a0] sm:$0xff]  }
0x126d   :  { %8443 = vperm.xlu1 %12821, %v11572_v47   ;;  %8438 = vperm.xlu0 %12820, %v11571_v48   ;;  %v13054_v48 = vld [vmem:[%s16336_s1 + $0x4b0] sm:$0xff]  }
0x12cb   :  { %v7924_v50 = vpop.permute.xlu0 %7923  ;;  %v8028_v53 = vpop.permute.xlu1 %8027 }
0x12cc   :  { %12013 = vmatpush3.bf16.msra.mxu0 %v7924_v50 }
0x12cd   :  { %12018 = vmatprep.subr.bf16.mxu0 %v13200_v49 }
0x12cf   :  { %12015 = vmatmul.mubr.msk.bf16.vlgmr.msra.gmra.mrb[36].mxu0 %vm7363_vm8, %v13039_v51  ;;  %v8085_v56 = vpop.permute.xlu0 %8084  ;;  %v8142_v61 = vpop.permute.xlu1 %8141  ;;  %v13055_v51 = vld [vmem:[%s16336_s1 + $0x4b8] sm:$0xff]  }
0x12d0   :  { %12019 = vmatpush3.bf16.msk.msra.mxu0 %vm15001_vm9, %v11538_v43  ;;  %12020 = vmatprep.mubr.msk.bf16.mxu0 %vm13201_vm2, %v13200_v49  ;;  %v13050_v43 = vld [vmem:[%s16336_s1 + $0x480] sm:$0xff]  }
0x12d1   :  { %12024 = vmatprep.subr.bf16.mxu0 %v13200_v49 }
0x12d3   :  { %v8199_v58 = vpop.permute.xlu0 %8198  ;;  %v8256_v63 = vpop.permute.xlu1 %8255 }
0x12d7   :  { %v8313_v1 = vpop.permute.xlu0 %8312  ;;  %v8370_v35 = vpop.permute.xlu1 %8369 }
0x12db   :  { %12021 = vmatmul.mubr.msk.bf16.vlgmr.msra.gmra.mrb[36].mxu0 %vm7363_vm8, %v13040_v52  ;;  %v13056_v52 = vld [vmem:[%s16336_s1 + $0x4c0] sm:$0xff]  }
0x12dc   :  { %12025 = vmatpush3.bf16.msra.mxu0 %v8028_v53  ;;  %12026 = vmatprep.mubr.msk.bf16.mxu0 %vm13201_vm2, %v13200_v49 }
0x12dd   :  { %12030 = vmatprep.subr.bf16.mxu0 %v13200_v49 }
0x12e7   :  { %12027 = vmatmul.mubr.msk.bf16.vlgmr.msra.gmra.mrb[36].mxu0 %vm7363_vm8, %v13041_v55  ;;  %v13057_v55 = vld [vmem:[%s16336_s1 + $0x4c8] sm:$0xff]  }
0x12e8   :  { %12031 = vmatpush3.bf16.msra.mxu0 %v8085_v56  ;;  %12032 = vmatprep.mubr.msk.bf16.mxu0 %vm13201_vm2, %v13200_v49  ;;  %v8427_v6 = vpop.permute.xlu0 %8426  ;;  %v8432_v8 = vpop.permute.xlu1 %8431  ;;  %v13058_v56 = vld [vmem:[%s16336_s1 + $0x4d0] sm:$0xff]  }
0x12e9   :  { %12036 = vmatprep.subr.bf16.mxu0 %v13200_v49 }
0x12ec   :  { %v8439_v13 = vpop.permute.xlu0 %8438  ;;  %v8444_v17 = vpop.permute.xlu1 %8443 }
0x12f3   :  { %12033 = vmatmul.mubr.msk.bf16.vlgmr.msra.gmra.mrb[36].mxu0 %vm7363_vm8, %v13042_v59 }
0x12f4   :  { %12037 = vmatpush3.bf16.msra.mxu0 %v8142_v61  ;;  %12038 = vmatprep.mubr.msk.bf16.mxu0 %vm13201_vm2, %v13200_v49  ;;  %v13059_v61 = vld [vmem:[%s16336_s1 + $0x4d8] sm:$0xff]  }
0x12f5   :  { %12042 = vmatprep.subr.bf16.mxu0 %v13200_v49 }
0x12ff   :  { %12039 = vmatmul.mubr.msk.bf16.vlgmr.msra.gmra.mrb[36].mxu0 %vm7363_vm8, %v13043_v28  ;;  %v13060_v28 = vld [vmem:[%s16336_s1 + $0x4e0] sm:$0xff]  }
0x1300   :  { %12043 = vmatpush3.bf16.msra.mxu0 %v8199_v58  ;;  %12044 = vmatprep.mubr.msk.bf16.mxu0 %vm13201_vm2, %v13200_v49 }
0x1301   :  { %12048 = vmatprep.subr.bf16.mxu0 %v13200_v49 }
0x130b   :  { %12045 = vmatmul.mubr.msk.bf16.vlgmr.msra.gmra.mrb[36].mxu0 %vm7363_vm8, %v13044_v62  ;;  %v13061_v62 = vld [vmem:[%s16336_s1 + $0x4e8] sm:$0xff]  }
0x130c   :  { %12049 = vmatpush3.bf16.msra.mxu0 %v8256_v63  ;;  %12050 = vmatprep.mubr.msk.bf16.mxu0 %vm13201_vm2, %v13200_v49  ;;  %v13062_v63 = vld [vmem:[%s16336_s1 + $0x4f0] sm:$0xff]  }
0x130d   :  { %12054 = vmatprep.subr.bf16.mxu0 %v13200_v49 }
0x1317   :  { %12051 = vmatmul.mubr.msk.bf16.vlgmr.msra.gmra.mrb[36].mxu0 %vm7363_vm8, %v13045_v0 }
0x1318   :  { %12055 = vmatpush3.bf16.msra.mxu0 %v8313_v1  ;;  %12056 = vmatprep.mubr.msk.bf16.mxu0 %vm13201_vm2, %v13200_v49  ;;  %v13063_v1 = vld [vmem:[%s16336_s1 + $0x4f8] sm:$0xff]  }
0x1319   :  { %12060 = vmatprep.subr.bf16.mxu0 %v13200_v49 }
0x1323   :  { %12057 = vmatmul.mubr.msk.bf16.vlgmr.msra.gmra.mrb[36].mxu0 %vm7363_vm8, %v13046_v2  ;;  %v13064_v2 = vld [vmem:[%s16336_s1 + $0x500] sm:$0xff]  }
0x1324   :  { %12061 = vmatpush3.bf16.msra.mxu0 %v8370_v35  ;;  %12062 = vmatprep.mubr.msk.bf16.mxu0 %vm13201_vm2, %v13200_v49  ;;  %v13065_v35 = vld [vmem:[%s16336_s1 + $0x508] sm:$0xff]  }
0x1325   :  { %12120 = vmatprep.subr.bf16.mxu0 %v13066_v60 }
0x132f   :  { %12063 = vmatmul.mubr.msk.bf16.vlgmr.msra.gmra.mrb[36].mxu0 %vm7363_vm8, %v13047_v5  ;;  %v13068_v5 = vld [vmem:[%s16341_s6 + $0x10] sm:$0xff]  }
0x1330   :  { %12121 = vmatpush3.bf16.msra.mxu0 %v13066_v60 }
0x1331   :  { %12122 = vmatprep.subr.bf16.mxu0 %v13067_v39 }
0x1334   :  { %12123 = vmatpush3.bf16.msra.mxu0 %v13067_v39 }
0x1335   :  { %12124 = vmatprep.subr.bf16.mxu0 %v13068_v5 }
0x1338   :  { %12125 = vmatpush3.bf16.msra.mxu0 %v13068_v5 }
0x1402   :  { %v8409_v9 = vpop.f32.mrb[36].mxu0 }
0x1403   :  { %v8434_v11 = vmul.f32 %v8427_v6, %v8409_v9  ;;  %v12064_v12 = vpop.f32.mrb[37].mxu0  ;;  %v13069_v6 = vld [vmem:[%s16341_s6 + $0x18] sm:$0xff]  }
0x1404   :  { %v8412_v14 = vpop.f32.mrb[38].mxu0  ;;  %12126 = vmatprep.subr.bf16.mxu0 %v13069_v6 }
0x1405   :  { %v8446_v15 = vadd.f32 %v8439_v13, %v8434_v11  ;;  %v8435_v16 = vmul.f32 %v8432_v8, %v8412_v14  ;;  %v12065_v33 = vpop.f32.mrb[39].mxu0  ;;  %12127 = vmatpush3.bf16.msra.mxu0 %v13069_v6  ;;  %v13070_v8 = vld [vmem:[%s16341_s6 + $0x20] ss:$0 sps:$4 sm:$0xff]   ;;  %s13207_s6 = smov 5  }
0x1406   :  { %12788 = vmatprep.subr.msk.bf16.mxu0 %vm79_vm0, %v13070_v8  ;;  %v9255_v9 = vsel %vm79_vm0, %v13070_v8, 0  ;;  %vm9322_vm0 = vcmask 39936   ;;  %v13072_v8 = vld [vmem:[%s16336_s1 + $0x528] sm:$0xff]  }
0x1407   :  { %v8448_v18 = vmax.f32 %v8446_v15, 0.0  ;;  %v8447_v34 = vadd.f32 %v8444_v17, %v8435_v16 }
0x1409   :  { %v8449_v49 = vmax.f32 %v8447_v34, 0.0  ;;  %v8450_v37 = vmul.f32 %v15066_v27, %v8448_v18  ;;  %12129 = vmatpush3.bf16.msra.mxu0 %v9255_v9  ;;  %v13073_v9 = vld [vmem:[%s16336_s1 + $0x510] sm:$0xff]  }
0x140b   :  { %v8451_v40 = vmul.f32 %v15066_v27, %v8449_v49  ;;  %v11649_v27 = vld [vmem:[%s16337_s2 + $0x208] sm:$0xff] }
0x140d   :  { %v12867_v19 = vpack.i.bf16 %v8451_v40, %v8450_v37 }
0x140f   :  { %12868 = vrot.lane.b32.xlu0 %v12867_v19, %s13199_s5 }
0x1481   :  { %v12869_v21 = vpop.permute.xlu0 %12868 }
0x1482   :  { %v12871_v22 = vunpack.i.h.bf16 %v12869_v21  ;;  %v12870_v23 = vunpack.i.l.bf16 %v12869_v21 }
0x1484   :  { %v8461_v4 = vsel %vm7341_vm3, 0.0, %v12871_v22  ;;  %v8460_v7 = vsel %vm7341_vm3, 0.0, %v12870_v23 }
0x1485   :  { %v8463_v24 = vsel %vm7344_vm6, %v8461_v4, 0.0  ;;  %v8462_v25 = vsel %vm7344_vm6, %v8460_v7, 0.0  ;;  %v11588_v26 = vpack.c.bf16 %v8461_v4, %v8460_v7 }
0x1486   :  { %v8464_v30 = vpack.c.bf16 %v8463_v24, %v8462_v25 }
0x1488   :  { %8624 = vrot.lane.b32.xlu0 %v8464_v30, %s13185_s27  ;;  %8486 = vrot.lane.b32.xlu1 %v8464_v30, %s13183_s25 }
0x148c   :  { %8778 = vrot.lane.b32.xlu0 %v8464_v30, %s13202_s17  ;;  %8701 = vrot.lane.b32.xlu1 %v8464_v30, %s13203_s18 }
0x1490   :  { %8932 = vrot.lane.b32.xlu0 %v8464_v30, %s13196_s13  ;;  %8855 = vrot.lane.b32.xlu1 %v8464_v30, %s13204_s4 }
0x1494   :  { %9086 = vrot.lane.b32.xlu0 %v8464_v30, %s13205_s19  ;;  %9009 = vrot.lane.b32.xlu1 %v8464_v30, %s13206_s21  ;;  %s13208_s19 = smov 124   ;;  %s13209_s21 = smov 123  }
0x1498   :  { %9165 = vperm.xlu0 %12820, %v11649_v27   ;;  %9160 = vperm.xlu1 %12821, %v11648_v29  }
0x149c   :  { %9175 = vperm.xlu0 %12820, %v11651_v31   ;;  %9170 = vperm.xlu1 %12821, %v11650_v32  }
0x14a0   :  { %9189 = vperm.xlu0 %12820, %v11653_v36   ;;  %9184 = vperm.xlu1 %12821, %v11652_v38  }
0x14a4   :  { %9199 = vperm.xlu0 %12820, %v11655_v57   ;;  %9194 = vperm.xlu1 %12821, %v11654_v54  }
0x14fa   :  { %v8487_v41 = vpop.permute.xlu1 %8486  ;;  %v8625_v44 = vpop.permute.xlu0 %8624 }
0x14fb   :  { %12066 = vmatprep.subr.bf16.mxu1 %v8487_v41 }
0x14fc   :  { %12067 = vmatpush3.bf16.msra.mxu1 %v8487_v41 }
0x14fd   :  { %12072 = vmatprep.subr.msk.bf16.mxu1 %vm15001_vm9, %v11588_v26 }
0x14fe   :  { %v8702_v47 = vpop.permute.xlu1 %8701  ;;  %v8779_v50 = vpop.permute.xlu0 %8778 }
0x14ff   :  { %12069 = vmatmul.mubr.msk.bf16.vlgmr.msra.gmra.mrb[28].mxu1 %vm7363_vm8, %v13049_v42 }
0x1500   :  { %12073 = vmatpush3.bf16.msk.msra.mxu1 %vm15001_vm9, %v11588_v26  ;;  %12074 = vmatprep.mubr.msk.bf16.mxu1 %vm7363_vm8, %v13050_v43  ;;  %v13071_v43 = vld [vmem:[%s16336_s1 + $0x520] sm:$0xff]  }
0x1501   :  { %12078 = vmatprep.subr.bf16.mxu1 %v8625_v44 }
0x1502   :  { %v8856_v53 = vpop.permute.xlu1 %8855  ;;  %v8933_v59 = vpop.permute.xlu0 %8932 }
0x1506   :  { %v9010_v58 = vpop.permute.xlu1 %9009  ;;  %v9087_v0 = vpop.permute.xlu0 %9086 }
0x150b   :  { %12075 = vmatmul.mubr.msk.bf16.vlgmr.msra.gmra.mrb[28].mxu1 %vm7363_vm8, %v13051_v45 }
0x150c   :  { %12079 = vmatpush3.bf16.msra.mxu1 %v8625_v44  ;;  %12080 = vmatprep.mubr.msk.bf16.mxu1 %vm7363_vm8, %v13052_v46 }
0x150d   :  { %12084 = vmatprep.subr.bf16.mxu1 %v8702_v47 }
0x1517   :  { %12081 = vmatmul.mubr.msk.bf16.vlgmr.msra.gmra.mrb[28].mxu1 %vm7363_vm8, %v13053_v3  ;;  %v9161_v11 = vpop.permute.xlu1 %9160  ;;  %v9166_v12 = vpop.permute.xlu0 %9165 }
0x1518   :  { %12085 = vmatpush3.bf16.msra.mxu1 %v8702_v47  ;;  %12086 = vmatprep.mubr.msk.bf16.mxu1 %vm7363_vm8, %v13054_v48 }
0x1519   :  { %12090 = vmatprep.subr.bf16.mxu1 %v8779_v50 }
0x151b   :  { %v9171_v13 = vpop.permute.xlu1 %9170  ;;  %v9176_v14 = vpop.permute.xlu0 %9175 }
0x151f   :  { %v9185_v15 = vpop.permute.xlu1 %9184  ;;  %v9190_v16 = vpop.permute.xlu0 %9189 }
0x1523   :  { %12087 = vmatmul.mubr.msk.bf16.vlgmr.msra.gmra.mrb[28].mxu1 %vm7363_vm8, %v13055_v51  ;;  %v9195_v34 = vpop.permute.xlu1 %9194  ;;  %v9200_v21 = vpop.permute.xlu0 %9199 }
0x1524   :  { %12091 = vmatpush3.bf16.msra.mxu1 %v8779_v50  ;;  %12092 = vmatprep.mubr.msk.bf16.mxu1 %vm7363_vm8, %v13056_v52 }
0x1525   :  { %12096 = vmatprep.subr.bf16.mxu1 %v8856_v53 }
0x152f   :  { %12093 = vmatmul.mubr.msk.bf16.vlgmr.msra.gmra.mrb[28].mxu1 %vm7363_vm8, %v13057_v55 }
0x1530   :  { %12097 = vmatpush3.bf16.msra.mxu1 %v8856_v53  ;;  %12098 = vmatprep.mubr.msk.bf16.mxu1 %vm7363_vm8, %v13058_v56 }
0x1531   :  { %12102 = vmatprep.subr.bf16.mxu1 %v8933_v59 }
0x153b   :  { %12099 = vmatmul.mubr.msk.bf16.vlgmr.msra.gmra.mrb[28].mxu1 %vm7363_vm8, %v13059_v61 }
0x153c   :  { %12103 = vmatpush3.bf16.msra.mxu1 %v8933_v59  ;;  %12104 = vmatprep.mubr.msk.bf16.mxu1 %vm7363_vm8, %v13060_v28  ;;  %v11742_v28 = vld [vmem:[%s16337_s2 + $0x248] sm:$0xff] }
0x153d   :  { %12108 = vmatprep.subr.bf16.mxu1 %v9010_v58 }
0x1547   :  { %12105 = vmatmul.mubr.msk.bf16.vlgmr.msra.gmra.mrb[28].mxu1 %vm7363_vm8, %v13061_v62  ;;  %v11746_v62 = vld [vmem:[%s16337_s2 + $0x268] sm:$0xff] }
0x1548   :  { %12109 = vmatpush3.bf16.msra.mxu1 %v9010_v58  ;;  %12110 = vmatprep.mubr.msk.bf16.mxu1 %vm7363_vm8, %v13062_v63  ;;  %v11741_v58 = vld [vmem:[%s16337_s2 + $0x240] sm:$0xff] }
0x1549   :  { %12114 = vmatprep.subr.bf16.mxu1 %v9087_v0  ;;  %v11745_v63 = vld [vmem:[%s16337_s2 + $0x260] sm:$0xff] }
0x1553   :  { %12111 = vmatmul.mubr.msk.bf16.vlgmr.msra.gmra.mrb[28].mxu1 %vm7363_vm8, %v13063_v1  ;;  %v11743_v1 = vld [vmem:[%s16337_s2 + $0x250] sm:$0xff] }
0x1554   :  { %12115 = vmatpush3.bf16.msra.mxu1 %v9087_v0  ;;  %12116 = vmatprep.mubr.msk.bf16.mxu1 %vm7363_vm8, %v13064_v2  ;;  %v11744_v0 = vld [vmem:[%s16337_s2 + $0x258] sm:$0xff] }
0x1555   :  { %v11748_v2 = vld [vmem:[%s16337_s2 + $0x278] sm:$0xff] }
0x155f   :  { %12117 = vmatmul.mubr.msk.bf16.vlgmr.msra.gmra.mrb[28].mxu1 %vm7363_vm8, %v13065_v35  ;;  %v11747_v35 = vld [vmem:[%s16337_s2 + $0x270] sm:$0xff] }
0x1632   :  { %v12118_v33 = vpop.f32.mrb[28].mxu1 }
0x1633   :  { %v9180_v17 = vmul.f32 %v12118_v33, %v9171_v13  ;;  %v9129_v18 = vpop.f32.mrb[29].mxu1  ;;  %v13075_v13 = vld [vmem:[%s16336_s1 + $0x530] sm:$0xff]   ;;  %v13077_v33 = vld [vmem:[%s16336_s1 + $0x540] sm:$0xff]  }
0x1634   :  { %v9178_v49 = vmul.f32 %v9161_v11, %v9129_v18  ;;  %v12119_v37 = vpop.f32.mrb[30].mxu1 }
0x1635   :  { %v9204_v40 = vadd.f32 %v9195_v34, %v9180_v17  ;;  %v9181_v19 = vmul.f32 %v12119_v37, %v9176_v14  ;;  %v9132_v20 = vpop.f32.mrb[31].mxu1  ;;  %v13078_v34 = vld [vmem:[%s16336_s1 + $0x548] sm:$0xff]  }
0x1636   :  { %v9202_v22 = vadd.f32 %v9185_v15, %v9178_v49  ;;  %v9179_v23 = vmul.f32 %v9166_v12, %v9132_v20  ;;  %v13074_v12 = vld [vmem:[%s16336_s1 + $0x518] sm:$0xff]   ;;  %v13079_v49 = vld [vmem:[%s16336_s1 + $0x550] sm:$0xff]   ;;  %v13081_v20 = vld [vmem:[%s16336_s1 + $0x560] sm:$0xff]  }
0x1637   :  { %v9205_v4 = vadd.f32 %v9200_v21, %v9181_v19  ;;  %v9208_v24 = vmax.f32 %v9204_v40, 0.0  ;;  %v13080_v19 = vld [vmem:[%s16336_s1 + $0x558] sm:$0xff]  }
0x1638   :  { %v9203_v7 = vadd.f32 %v9190_v16, %v9179_v23  ;;  %v9206_v26 = vmax.f32 %v9202_v22, 0.0  ;;  %v13076_v16 = vld [vmem:[%s16336_s1 + $0x538] sm:$0xff]   ;;  %v13082_v23 = vld [vmem:[%s16336_s1 + $0x568] sm:$0xff]  }
0x1639   :  { %v9209_v25 = vmax.f32 %v9205_v4, 0.0  ;;  %v13083_v4 = vld [vmem:[%s16336_s1 + $0x570] sm:$0xff]  }
0x163a   :  { %v9207_v30 = vmax.f32 %v9203_v7, 0.0 }
0x163b   :  { %v9211_v27 = vpack.c.bf16 %v9209_v25, %v9208_v24  ;;  %v13084_v25 = vld [vmem:[%s16336_s1 + $0x578] sm:$0xff]  }
0x163c   :  { %v9210_v29 = vpack.c.bf16 %v9207_v30, %v9206_v26  ;;  %v13085_v26 = vld [vmem:[%s16336_s1 + $0x580] sm:$0xff]  }
0x163e   :  { %12130 = vmatprep.mubr.msk.bf16.mxu0 %vm7285_vm1, %v9210_v29  ;;  %v13086_v29 = vld [vmem:[%s16336_s1 + $0x588] sm:$0xff]  }
0x163f   :  { %12131 = vmatmul.mubr.msk.bf16.vlgmr.msra.gmra.mrb[40].mxu0 %vm7285_vm1, %v9211_v27 }
0x1640   :  { %12138 = vmatprep.mubr.msk.bf16.mxu0 %vm9362_vm11, %v13071_v43 }
0x1712   :  { %v12132_v31 = vpop.f32.mrb[40].mxu0 }
0x1713   :  { %v9291_v32 = vpop.f32.mrb[41].mxu0 }
0x1714   :  { %v12133_v36 = vpop.f32.mrb[42].mxu0 }
0x1715   :  { %v12877_v38 = vpack.i.bf16 %v12133_v36, %v12132_v31  ;;  %v9294_v57 = vpop.f32.mrb[43].mxu0  ;;  %v13087_v31 = vld [vmem:[%s16336_s1 + $0x590] sm:$0xff]   ;;  %v13088_v36 = vld [vmem:[%s16336_s1 + $0x598] sm:$0xff]  }
0x1716   :  { %v12872_v54 = vpack.i.bf16 %v9294_v57, %v9291_v32 }
0x1717   :  { %12878 = vrot.lane.b32.xlu0 %v12877_v38, %s13207_s6 }
0x1718   :  { %12873 = vrot.lane.b32.xlu1 %v12872_v54, %s13207_s6 }
0x1789   :  { %v12879_v60 = vpop.permute.xlu0 %12878 }
0x178a   :  { %v12881_v39 = vunpack.i.h.bf16 %v12879_v60  ;;  %v12880_v41 = vunpack.i.l.bf16 %v12879_v60  ;;  %v12874_v42 = vpop.permute.xlu1 %12873 }
0x178b   :  { %v12876_v44 = vunpack.i.h.bf16 %v12874_v42  ;;  %v12875_v45 = vunpack.i.l.bf16 %v12874_v42 }
0x178c   :  { %v9326_v46 = vsel %vm9322_vm0, 0.0, %v12881_v39  ;;  %v9325_v47 = vsel %vm9322_vm0, 0.0, %v12880_v41 }
0x178d   :  { %v9331_v3 = vsel %vm9327_vm10, %v9326_v46, 0.0  ;;  %v9330_v48 = vsel %vm9327_vm10, %v9325_v47, 0.0  ;;  %v11681_v50 = vpack.c.bf16 %v9326_v46, %v9325_v47  ;;  %v9324_v51 = vsel %vm9322_vm0, 0.0, %v12876_v44 }
0x178e   :  { %v9333_v52 = vpack.c.bf16 %v9331_v3, %v9330_v48  ;;  %v9329_v53 = vsel %vm9327_vm10, %v9324_v51, 0.0  ;;  %v9323_v55 = vsel %vm9322_vm0, 0.0, %v12875_v45 }
0x178f   :  { %v9328_v56 = vsel %vm9327_vm10, %v9323_v55, 0.0  ;;  %v11678_v59 = vpack.c.bf16 %v9324_v51, %v9323_v55  ;;  %v11750_v55 = vld [vmem:[%s16338_s3 + $0x12] ss:$0 sm:$0xff] }
0x1790   :  { %v9332_v61 = vpack.c.bf16 %v9329_v53, %v9328_v56  ;;  %9358 = vrot.lane.b32.xlu0 %v9333_v52, %s13183_s25  ;;  %v13211_v56 = vmov 32  }
0x1792   :  { %9356 = vrot.lane.b32.xlu1 %v9332_v61, %s13183_s25 }
0x1794   :  { %9500 = vrot.lane.b32.xlu0 %v9333_v52, %s13185_s27 }
0x1796   :  { %9498 = vrot.lane.b32.xlu1 %v9332_v61, %s13185_s27  ;;  %s13212_s27 = smov 112  }
0x1798   :  { %9580 = vrot.lane.b32.xlu0 %v9333_v52, %s13208_s19 }
0x179a   :  { %9578 = vrot.lane.b32.xlu1 %v9332_v61, %s13208_s19 }
0x179c   :  { %9660 = vrot.lane.b32.xlu0 %v9333_v52, %s13209_s21 }
0x179e   :  { %9658 = vrot.lane.b32.xlu1 %v9332_v61, %s13209_s21 }
0x17a0   :  { %9740 = vrot.lane.b32.xlu0 %v9333_v52, %s13203_s18 }
0x17a2   :  { %9738 = vrot.lane.b32.xlu1 %v9332_v61, %s13203_s18 }
0x17a4   :  { %9820 = vrot.lane.b32.xlu0 %v9333_v52, %s13204_s4 }
0x17a6   :  { %9818 = vrot.lane.b32.xlu1 %v9332_v61, %s13204_s4 }
0x17a8   :  { %9900 = vrot.lane.b32.xlu0 %v9333_v52, %s13210_s26 }
0x17aa   :  { %9898 = vrot.lane.b32.xlu1 %v9332_v61, %s13210_s26 }
0x17ac   :  { %9980 = vrot.lane.b32.xlu0 %v9333_v52, %s13194_s23 }
0x17ae   :  { %9978 = vrot.lane.b32.xlu1 %v9332_v61, %s13194_s23 }
0x17b0   :  { %10060 = vperm.xlu0 %12820, %v11742_v28  }
0x17b2   :  { %10055 = vperm.xlu1 %12821, %v11741_v58  }
0x17b4   :  { %10084 = vperm.xlu0 %12820, %v11746_v62  }
0x17b6   :  { %10079 = vperm.xlu1 %12821, %v11745_v63  }
0x17b8   :  { %10070 = vperm.xlu0 %12820, %v11744_v0  }
0x17ba   :  { %10065 = vperm.xlu1 %12821, %v11743_v1  }
0x17bc   :  { %10094 = vperm.xlu0 %12820, %v11748_v2  }
0x17be   :  { %10089 = vperm.xlu1 %12821, %v11747_v35  }
0x17c0   :  { %12882 = vset.pattern.permute.xlu0 %v13211_v56 }
0x17c2   :  { %12883 = vset.pattern.permute.xlu1 %v13211_v56 }
0x1802   :  { %v9359_v6 = vpop.permute.xlu0 %9358 }
0x1804   :  { %v9357_v5 = vpop.permute.xlu1 %9356 }
0x1805   :  { %12134 = vmatprep.subr.bf16.mxu0 %v9357_v5 }
0x1806   :  { %12135 = vmatpush3.bf16.msra.mxu0 %v9357_v5  ;;  %v9501_v14 = vpop.permute.xlu0 %9500  ;;  %v10166_v5 = vld [vmem:[%s16342_s7] sm:$0xff] }
0x1807   :  { %12136 = vmatprep.subr.bf16.mxu0 %v9359_v6  ;;  %12214 = vmatprep.mubr.msk.f32.mxu1 %vm9362_vm11, %v10166_v5 }
0x1808   :  { %v9499_v11 = vpop.permute.xlu1 %9498 }
0x180a   :  { %12137 = vmatpush3.bf16.msra.mxu0 %v9359_v6  ;;  %v9581_v17 = vpop.permute.xlu0 %9580 }
0x180b   :  { %12142 = vmatprep.subr.msk.bf16.mxu0 %vm11677_vm12, %v11678_v59 }
0x180c   :  { %v9579_v15 = vpop.permute.xlu1 %9578 }
0x180d   :  { %12139 = vmatmul.mubr.msk.bf16.vlgmr.msra.gmra.mrb[44].mxu0 %vm9362_vm11, %v13072_v8 }
0x180e   :  { %12143 = vmatpush3.bf16.msk.msra.mxu0 %vm11677_vm12, %v11678_v59  ;;  %12146 = vmatprep.mubr.msk.bf16.mxu0 %vm9362_vm11, %v13073_v9  ;;  %v9661_v37 = vpop.permute.xlu0 %9660 }
0x180f   :  { %12144 = vmatprep.subr.msk.bf16.mxu0 %vm11677_vm12, %v11681_v50 }
0x1810   :  { %v9659_v18 = vpop.permute.xlu1 %9658 }
0x1812   :  { %12145 = vmatpush3.bf16.msk.msra.mxu0 %vm11677_vm12, %v11681_v50  ;;  %v9741_v21 = vpop.permute.xlu0 %9740 }
0x1813   :  { %12150 = vmatprep.subr.bf16.mxu0 %v9499_v11 }
0x1814   :  { %v9739_v40 = vpop.permute.xlu1 %9738 }
0x1816   :  { %v9821_v7 = vpop.permute.xlu0 %9820 }
0x1818   :  { %v9819_v22 = vpop.permute.xlu1 %9818 }
0x1819   :  { %12147 = vmatmul.mubr.msk.bf16.vlgmr.msra.gmra.mrb[44].mxu0 %vm9362_vm11, %v13074_v12 }
0x181a   :  { %12151 = vmatpush3.bf16.msra.mxu0 %v9499_v11  ;;  %12154 = vmatprep.mubr.msk.bf16.mxu0 %vm9362_vm11, %v13075_v13  ;;  %v9901_v30 = vpop.permute.xlu0 %9900 }
0x181b   :  { %12152 = vmatprep.subr.bf16.mxu0 %v9501_v14 }
0x181c   :  { %v9899_v24 = vpop.permute.xlu1 %9898 }
0x181e   :  { %12153 = vmatpush3.bf16.msra.mxu0 %v9501_v14  ;;  %v9981_v32 = vpop.permute.xlu0 %9980 }
0x181f   :  { %12158 = vmatprep.subr.bf16.mxu0 %v9579_v15 }
0x1820   :  { %v9979_v27 = vpop.permute.xlu1 %9978 }
0x1825   :  { %12155 = vmatmul.mubr.msk.bf16.vlgmr.msra.gmra.mrb[44].mxu0 %vm9362_vm11, %v13076_v16 }
0x1826   :  { %12159 = vmatpush3.bf16.msra.mxu0 %v9579_v15  ;;  %12162 = vmatprep.mubr.msk.bf16.mxu0 %vm9362_vm11, %v13077_v33 }
0x1827   :  { %12160 = vmatprep.subr.bf16.mxu0 %v9581_v17 }
0x182a   :  { %12161 = vmatpush3.bf16.msra.mxu0 %v9581_v17 }
0x182b   :  { %12166 = vmatprep.subr.bf16.mxu0 %v9659_v18 }
0x182f   :  { %v10061_v57 = vpop.permute.xlu0 %10060 }
0x1831   :  { %12163 = vmatmul.mubr.msk.bf16.vlgmr.msra.gmra.mrb[44].mxu0 %vm9362_vm11, %v13078_v34  ;;  %v10056_v38 = vpop.permute.xlu1 %10055  ;;  %v15425_v34 = vld [vmem:[%s16342_s7 + $0x8] sm:$0xff] }
0x1832   :  { %12167 = vmatpush3.bf16.msra.mxu0 %v9659_v18  ;;  %12170 = vmatprep.mubr.msk.bf16.mxu0 %vm9362_vm11, %v13079_v49  ;;  %v15431_v49 = vld [vmem:[%s16342_s7 + $0x10] sm:$0xff] }
0x1833   :  { %12168 = vmatprep.subr.bf16.mxu0 %v9661_v37  ;;  %v10085_v60 = vpop.permute.xlu0 %10084 }
0x1835   :  { %v10080_v54 = vpop.permute.xlu1 %10079 }
0x1836   :  { %12169 = vmatpush3.bf16.msra.mxu0 %v9661_v37  ;;  %v15437_v37 = vld [vmem:[%s16342_s7 + $0x48] sm:$0xff] }
0x1837   :  { %12174 = vmatprep.subr.bf16.mxu0 %v9739_v40  ;;  %v10071_v41 = vpop.permute.xlu0 %10070 }
0x1839   :  { %v10066_v39 = vpop.permute.xlu1 %10065 }
0x183b   :  { %v10095_v53 = vpop.permute.xlu0 %10094 }
0x183d   :  { %12171 = vmatmul.mubr.msk.bf16.vlgmr.msra.gmra.mrb[44].mxu0 %vm9362_vm11, %v13080_v19  ;;  %v10090_v47 = vpop.permute.xlu1 %10089  ;;  %v15449_v19 = vld [vmem:[%s16342_s7 + $0x58] sm:$0xff] }
0x183e   :  { %12175 = vmatpush3.bf16.msra.mxu0 %v9739_v40  ;;  %12178 = vmatprep.mubr.msk.bf16.mxu0 %vm9362_vm11, %v13081_v20  ;;  %v15442_v40 = vld [vmem:[%s16342_s7 + $0x18] sm:$0xff]  ;;  %v15454_v20 = vld [vmem:[%s16342_s7 + $0x20] sm:$0xff] }
0x183f   :  { %12176 = vmatprep.subr.bf16.mxu0 %v9741_v21 }
0x1842   :  { %12177 = vmatpush3.bf16.msra.mxu0 %v9741_v21  ;;  %v15461_v21 = vld [vmem:[%s16342_s7 + $0x68] sm:$0xff] }
0x1843   :  { %12182 = vmatprep.subr.bf16.mxu0 %v9819_v22 }
0x1849   :  { %12179 = vmatmul.mubr.msk.bf16.vlgmr.msra.gmra.mrb[44].mxu0 %vm9362_vm11, %v13082_v23  ;;  %v15473_v23 = vld [vmem:[%s16342_s7 + $0x78] sm:$0xff] }
0x184a   :  { %12183 = vmatpush3.bf16.msra.mxu0 %v9819_v22  ;;  %12186 = vmatprep.mubr.msk.bf16.mxu0 %vm9362_vm11, %v13083_v4  ;;  %v15466_v22 = vld [vmem:[%s16342_s7 + $0x28] sm:$0xff]  ;;  %v15478_v4 = vld [vmem:[%s16342_s7 + $0x30] sm:$0xff] }
0x184b   :  { %12184 = vmatprep.subr.bf16.mxu0 %v9821_v7 }
0x184e   :  { %12185 = vmatpush3.bf16.msra.mxu0 %v9821_v7  ;;  %v15485_v7 = vld [vmem:[%s16342_s7 + $0x88] sm:$0xff] }
0x184f   :  { %12190 = vmatprep.subr.bf16.mxu0 %v9899_v24 }
0x1855   :  { %12187 = vmatmul.mubr.msk.bf16.vlgmr.msra.gmra.mrb[44].mxu0 %vm9362_vm11, %v13084_v25  ;;  %v15497_v25 = vld [vmem:[%s16342_s7 + $0x98] sm:$0xff] }
0x1856   :  { %12191 = vmatpush3.bf16.msra.mxu0 %v9899_v24  ;;  %12194 = vmatprep.mubr.msk.bf16.mxu0 %vm9362_vm11, %v13085_v26  ;;  %v15490_v24 = vld [vmem:[%s16342_s7 + $0x38] sm:$0xff]  ;;  %v15502_v26 = vld [vmem:[%s16342_s7 + $0x40] sm:$0xff] }
0x1857   :  { %12192 = vmatprep.subr.bf16.mxu0 %v9901_v30 }
0x185a   :  { %12193 = vmatpush3.bf16.msra.mxu0 %v9901_v30  ;;  %v15509_v30 = vld [vmem:[%s16342_s7 + $0xa8] sm:$0xff] }
0x185b   :  { %12198 = vmatprep.subr.bf16.mxu0 %v9979_v27 }
0x1861   :  { %12195 = vmatmul.mubr.msk.bf16.vlgmr.msra.gmra.mrb[44].mxu0 %vm9362_vm11, %v13086_v29  ;;  %v15521_v29 = vld [vmem:[%s16342_s7 + $0xb8] sm:$0xff] }
0x1862   :  { %12199 = vmatpush3.bf16.msra.mxu0 %v9979_v27  ;;  %12202 = vmatprep.mubr.msk.bf16.mxu0 %vm9362_vm11, %v13087_v31  ;;  %v15514_v27 = vld [vmem:[%s16342_s7 + $0x50] sm:$0xff]  ;;  %v15526_v31 = vld [vmem:[%s16342_s7 + $0x60] sm:$0xff] }
0x1863   :  { %12200 = vmatprep.subr.bf16.mxu0 %v9981_v32 }
0x1866   :  { %12201 = vmatpush3.bf16.msra.mxu0 %v9981_v32  ;;  %v15533_v32 = vld [vmem:[%s16342_s7 + $0xc8] sm:$0xff] }
0x186d   :  { %12203 = vmatmul.mubr.msk.bf16.vlgmr.msra.gmra.mrb[44].mxu0 %vm9362_vm11, %v13088_v36  ;;  %v15538_v36 = vld [vmem:[%s16342_s7 + $0x70] sm:$0xff] }
0x1940   :  { %v12204_v42 = vpop.f32.mrb[44].mxu0 }
0x1941   :  { %v10075_v43 = vmul.f32 %v12204_v42, %v10066_v39  ;;  %v10024_v44 = vpop.f32.mrb[45].mxu0  ;;  %v15569_v39 = vld [vmem:[%s16342_s7 + $0xf8] sm:$0xff]  ;;  %v15581_v42 = vld [vmem:[%s16342_s7 + $0xb0] sm:$0xff] }
0x1942   :  { %v10073_v45 = vmul.f32 %v10056_v38, %v10024_v44  ;;  %v12205_v46 = vpop.f32.mrb[46].mxu0  ;;  %v15545_v38 = vld [vmem:[%s16342_s7 + $0xd8] sm:$0xff]  ;;  %v15591_v44 = vld [vmem:[%s16342_s7 + $0xc0] sm:$0xff] }
0x1943   :  { %v10076_v3 = vmul.f32 %v12205_v46, %v10071_v41  ;;  %v10027_v48 = vpop.f32.mrb[47].mxu0  ;;  %v10099_v50 = vadd.f32 %v10090_v47, %v10075_v43  ;;  %v15574_v41 = vld [vmem:[%s16342_s7 + $0xa0] sm:$0xff]  ;;  %v11012_v43 = vld [vmem:[%s16343_s8 + $0x8] sm:$0xff]  ;;  %v15600_v46 = vld [vmem:[%s16342_s7 + $0xd0] sm:$0xff] }
0x1944   :  { %v10097_v51 = vadd.f32 %v10080_v54, %v10073_v45  ;;  %v10074_v52 = vmul.f32 %v10061_v57, %v10027_v48  ;;  %v15550_v57 = vld [vmem:[%s16342_s7 + $0x80] sm:$0xff]  ;;  %v15557_v54 = vld [vmem:[%s16342_s7 + $0xe8] sm:$0xff] }
0x1945   :  { %v10100_v61 = vadd.f32 %v10095_v53, %v10076_v3  ;;  %v10103_v58 = vmax.f32 %v10099_v50, 0.0  ;;  %v11015_v45 = vld [vmem:[%s16343_s8 + $0x20] sm:$0x1]  ;;  %v15612_v3 = vld [vmem:[%s16342_s7 + $0xf0] sm:$0xff] }
0x1946   :  { %v10101_v59 = vmax.f32 %v10097_v51, 0.0  ;;  %v10098_v28 = vadd.f32 %v10085_v60, %v10074_v52  ;;  %v15562_v60 = vld [vmem:[%s16342_s7 + $0x90] sm:$0xff]  ;;  %v15606_v47 = vld [vmem:[%s16342_s7 + $0xe0] sm:$0xff]  ;;  %v11014_v51 = vld [vmem:[%s16343_s8 + $0x18] sm:$0xff]  ;;  %s13213_s7 = smov [#allocation2]  }
0x1947   :  { %v10104_v0 = vmax.f32 %v10100_v61, 0.0  ;;  %v10115_v2 = vmul.f32 %v11750_v55, %v10103_v58  ;;  %v11011_v48 = vld [vmem:[%s16343_s8] sm:$0xff]  ;;  %v11013_v50 = vld [vmem:[%s16343_s8 + $0x10] sm:$0xff]  ;;  %s11076_s8 = sshll.u32 %s13213_s7, 4  ;;  %s11077_s8 = int_to_ptr.vmem [resolvable:$true] %s11076_s8 }
0x1948   :  { %v10113_v62 = vmul.f32 %v11750_v55, %v10101_v59  ;;  %v10102_v63 = vmax.f32 %v10098_v28, 0.0  ;;  %s13159_s0 = scalar_lea.vmem %s11077_s8, 16  ;;  %s13163_s19 = scalar_lea.vmem %s11077_s8, 32 }
0x1949   :  { %v10116_v35 = vmul.f32 %v11750_v55, %v10104_v0  ;;  %v10123_v6 = vsel %vm7363_vm8, %v10115_v2, 0.0  ;;  %p13160_p0 = scmp.ne.s32.totalorder %s11077_s8, %s13159_s0  ;;  %p13164_p1 = scmp.lt.s32.totalorder %s11077_s8, %s11077_s8 }
0x194a   :  { %v10114_v1 = vmul.f32 %v11750_v55, %v10102_v63  ;;  %10133 = vrot.lane.b32.xlu1 %v10113_v62, %s13212_s27  ;;  %v10117_v8 = vsel %vm7363_vm8, %v10113_v62, 0.0  ;;  %p13165_p2 = scmp.lt.s32.totalorder %s13163_s19, %s13159_s0 }
0x194b   :  { %v10126_v11 = vsel %vm7363_vm8, %v10116_v35, 0.0 }
0x194c   :  { %10135 = vrot.lane.b32.xlu0 %v10114_v1, %s13212_s27  ;;  %v10120_v9 = vsel %vm7363_vm8, %v10114_v1, 0.0  ;;  %p13166_p3 = por %p13165_p2, %p13164_p1 }
0x194e   :  { %10137 = vrot.lane.b32.xlu1 %v10115_v2, %s13212_s27  ;;  %p13167_p4 = pnand %p13166_p3, %p13160_p0 }
0x1950   :  { %10139 = vrot.lane.b32.xlu0 %v10116_v35, %s13212_s27 }
0x196f   :  { %10124 = vadd.xlane.f32.xlu0 %v10123_v6 }
0x1972   :  { %10118 = vadd.xlane.f32.xlu1 %v10117_v8 }
0x1973   :  { %10121 = vadd.xlane.f32.xlu0 %v10120_v9 }
0x1976   :  { %10127 = vadd.xlane.f32.xlu1 %v10126_v11 }
0x19bc   :  { %v10134_v12 = vpop.permute.xlu1 %10133 }
0x19bd   :  { %v10145_v13 = vsel %vm7363_vm8, %v10134_v12, 0.0 }
0x19be   :  { %v10136_v14 = vpop.permute.xlu0 %10135  ;;  %10146 = vadd.xlane.f32.xlu0 %v10145_v13 }
0x19bf   :  { %v10148_v15 = vsel %vm7363_vm8, %v10136_v14, 0.0 }
0x19c0   :  { %10149 = vadd.xlane.f32.xlu1 %v10148_v15  ;;  %v10138_v16 = vpop.permute.xlu1 %10137 }
0x19c1   :  { %v10151_v33 = vsel %vm7363_vm8, %v10138_v16, 0.0 }
0x19c2   :  { %v10140_v17 = vpop.permute.xlu0 %10139  ;;  %10152 = vadd.xlane.f32.xlu0 %v10151_v33 }
0x19c3   :  { %v10154_v18 = vsel %vm7363_vm8, %v10140_v17, 0.0 }
0x19c4   :  { %10155 = vadd.xlane.f32.xlu1 %v10154_v18 }
0x19d5   :  { %10205 = vperm.xlu1 %12883, %v15425_v34  }
0x19d8   :  { %10200 = vperm.xlu0 %12882, %v10166_v5  }
0x19d9   :  { %10210 = vperm.xlu1 %12883, %v15431_v49  }
0x19dc   :  { %10245 = vperm.xlu0 %12882, %v15437_v37  }
0x19dd   :  { %10215 = vperm.xlu1 %12883, %v15442_v40  }
0x19e0   :  { %10255 = vperm.xlu0 %12882, %v15449_v19  }
0x19e1   :  { %10220 = vperm.xlu1 %12883, %v15454_v20  }
0x19e4   :  { %10265 = vperm.xlu0 %12882, %v15461_v21  }
0x19e5   :  { %10225 = vperm.xlu1 %12883, %v15466_v22  }
0x19e8   :  { %10275 = vperm.xlu0 %12882, %v15473_v23  }
0x19e9   :  { %10230 = vperm.xlu1 %12883, %v15478_v4  }
0x19ec   :  { %10285 = vperm.xlu0 %12882, %v15485_v7  }
0x19ed   :  { %10235 = vperm.xlu1 %12883, %v15490_v24  }
0x19f0   :  { %10295 = vperm.xlu0 %12882, %v15497_v25  }
0x19f1   :  { %10240 = vperm.xlu1 %12883, %v15502_v26  }
0x19f4   :  { %10305 = vperm.xlu0 %12882, %v15509_v30  }
0x19f5   :  { %10250 = vperm.xlu1 %12883, %v15514_v27  }
0x19f8   :  { %10315 = vperm.xlu0 %12882, %v15521_v29  }
0x19f9   :  { %10260 = vperm.xlu1 %12883, %v15526_v31  }
0x19fc   :  { %10325 = vperm.xlu0 %12882, %v15533_v32   ;;  %v10125_v52 = vpop.xlane.xlu0 %10124 }
0x19fd   :  { %10270 = vperm.xlu1 %12883, %v15538_v36  }
0x19ff   :  { %v10119_v53 = vpop.xlane.xlu1 %10118 }
0x1a00   :  { %10335 = vperm.xlu0 %12882, %v15545_v38   ;;  %v10122_v55 = vpop.xlane.xlu0 %10121 }
0x1a01   :  { %10280 = vperm.xlu1 %12883, %v15550_v57  }
0x1a03   :  { %v10128_v56 = vpop.xlane.xlu1 %10127 }
0x1a04   :  { %10345 = vperm.xlu0 %12882, %v15557_v54  }
0x1a05   :  { %10290 = vperm.xlu1 %12883, %v15562_v60  }
0x1a08   :  { %10355 = vperm.xlu0 %12882, %v15569_v39  }
0x1a09   :  { %10300 = vperm.xlu1 %12883, %v15574_v41  }
0x1a0c   :  { %12885 = vset.pattern.permute.xlu0 %v13184_v10 }
0x1a0d   :  { %10310 = vperm.xlu1 %12883, %v15581_v42   ;;  %11023 = vperm.xlu0 %12885, %v11012_v43  }
0x1a11   :  { %10320 = vperm.xlu1 %12883, %v15591_v44   ;;  %11055 = vperm.xlu0 %12885, %v11015_v45  }
0x1a15   :  { %10330 = vperm.xlu1 %12883, %v15600_v46  }
0x1a19   :  { %10340 = vperm.xlu1 %12883, %v15606_v47  }
0x1a1d   :  { %10350 = vperm.xlu1 %12883, %v15612_v3  }
0x1a21   :  { %12884 = vset.pattern.permute.xlu1 %v13184_v10 }
0x1a22   :  { %11018 = vperm.xlu1 %12884, %v11011_v48  }
0x1a26   :  { %11028 = vperm.xlu1 %12884, %v11013_v50  }
0x1a2a   :  { %11033 = vperm.xlu1 %12884, %v11014_v51  }
0x1a4b   :  { %v10147_v59 = vpop.xlane.xlu0 %10146 }
0x1a4c   :  { %v10158_v61 = vsel %vm10157_vm13, %v10119_v53, %v10147_v59 }
0x1a4d   :  { %v10150_v28 = vpop.xlane.xlu1 %10149  ;;  %v15625_v58 = vmul.f32 0.25, %v10158_v61 }
0x1a4e   :  { %v10159_v10 = vsel %vm10157_vm13, %v10122_v55, %v10150_v28 }
0x1a4f   :  { %v15627_v62 = vmul.f32 0.25, %v10159_v10  ;;  %v10153_v63 = vpop.xlane.xlu0 %10152 }
0x1a50   :  { %v10160_v0 = vsel %vm10157_vm13, %v10125_v52, %v10153_v63 }
0x1a51   :  { %v10156_v1 = vpop.xlane.xlu1 %10155  ;;  %v12262_v2 = vpack.c.bf16 %v15627_v62, %v15625_v58  ;;  %v15631_v5 = vmul.f32 0.25, %v10160_v0 }
0x1a52   :  { %v10161_v35 = vsel %vm10157_vm13, %v10128_v56, %v10156_v1 }
0x1a53   :  { %v15633_v6 = vmul.f32 0.25, %v10161_v35  ;;  %12263 = vmatprep.subr.bf16.mxu1 %v12262_v2 }
0x1a54   :  { %12265 = vmatpush3.bf16.msra.mxu1 %v12262_v2 }
0x1a55   :  { %v15635_v8 = vpop.permute.xlu1 %10205  ;;  %v12266_v9 = vpack.c.bf16 %v15633_v6, %v15631_v5 }
0x1a57   :  { %12267 = vmatprep.subr.bf16.mxu1 %v12266_v9  ;;  %v15639_v11 = vpop.permute.xlu0 %10200 }
0x1a58   :  { %12269 = vmatpush3.bf16.msra.mxu1 %v12266_v9 }
0x1a59   :  { %v15641_v12 = vpop.permute.xlu1 %10210 }
0x1a5b   :  { %12215 = vmatmul.mubr.msk.f32.vlgmr.msra.gmra.mrb[32].mxu1 %vm9362_vm11, %v15425_v34  ;;  %v15645_v13 = vpop.permute.xlu0 %10245 }
0x1a5c   :  { %12217 = vmatprep.mubr.msk.f32.mxu1 %vm9362_vm11, %v15431_v49 }
0x1a5d   :  { %v15649_v14 = vpop.permute.xlu1 %10215 }
0x1a5f   :  { %12218 = vmatmul.mubr.msk.f32.gmra.mrb[34].mxu1 %vm9362_vm11, %v15442_v40  ;;  %v15653_v15 = vpop.permute.xlu0 %10255 }
0x1a60   :  { %12220 = vmatprep.mubr.msk.f32.mxu1 %vm9362_vm11, %v15454_v20 }
0x1a61   :  { %v15657_v16 = vpop.permute.xlu1 %10220 }
0x1a63   :  { %12221 = vmatmul.mubr.msk.f32.gmra.mrb[36].mxu1 %vm9362_vm11, %v15466_v22  ;;  %v15663_v33 = vpop.permute.xlu0 %10265 }
0x1a64   :  { %12223 = vmatprep.mubr.msk.f32.mxu1 %vm9362_vm11, %v15478_v4 }
0x1a65   :  { %v15665_v17 = vpop.permute.xlu1 %10225 }
0x1a67   :  { %12224 = vmatmul.mubr.msk.f32.gmra.mrb[38].mxu1 %vm9362_vm11, %v15490_v24  ;;  %v15673_v34 = vpop.permute.xlu0 %10275 }
0x1a68   :  { %12226 = vmatprep.mubr.msk.f32.mxu1 %vm9362_vm11, %v15502_v26 }
0x1a69   :  { %v15671_v18 = vpop.permute.xlu1 %10230 }
0x1a6b   :  { %12227 = vmatmul.mubr.msk.f32.gmra.mrb[40].mxu1 %vm9362_vm11, %v15437_v37  ;;  %v15685_v40 = vpop.permute.xlu0 %10285 }
0x1a6c   :  { %12229 = vmatprep.mubr.msk.f32.mxu1 %vm9362_vm11, %v15514_v27 }
0x1a6d   :  { %v15679_v49 = vpop.permute.xlu1 %10235 }
0x1a6f   :  { %12230 = vmatmul.mubr.msk.f32.gmra.mrb[42].mxu1 %vm9362_vm11, %v15449_v19  ;;  %v15695_v22 = vpop.permute.xlu0 %10295 }
0x1a70   :  { %12232 = vmatprep.mubr.msk.f32.mxu1 %vm9362_vm11, %v15526_v31 }
0x1a71   :  { %v15687_v20 = vpop.permute.xlu1 %10240 }
0x1a73   :  { %12233 = vmatmul.mubr.msk.f32.gmra.mrb[44].mxu1 %vm9362_vm11, %v15461_v21  ;;  %v15707_v21 = vpop.permute.xlu0 %10305 }
0x1a74   :  { %12235 = vmatprep.mubr.msk.f32.mxu1 %vm9362_vm11, %v15538_v36 }
0x1a75   :  { %v15693_v37 = vpop.permute.xlu1 %10250 }
0x1a77   :  { %12236 = vmatmul.mubr.msk.f32.gmra.mrb[46].mxu1 %vm9362_vm11, %v15473_v23  ;;  %v15717_v24 = vpop.permute.xlu0 %10315 }
0x1a78   :  { %12238 = vmatprep.mubr.msk.f32.mxu1 %vm9362_vm11, %v15550_v57 }
0x1a79   :  { %v15701_v19 = vpop.permute.xlu1 %10260 }
0x1a7b   :  { %12239 = vmatmul.mubr.msk.f32.gmra.mrb[48].mxu1 %vm9362_vm11, %v15485_v7 }
0x1a7c   :  { %12241 = vmatprep.mubr.msk.f32.mxu1 %vm9362_vm11, %v15562_v60 }
0x1a7d   :  { %v15709_v4 = vpop.permute.xlu1 %10270 }
0x1a7f   :  { %12242 = vmatmul.mubr.msk.f32.gmra.mrb[50].mxu1 %vm9362_vm11, %v15497_v25  ;;  %v15729_v25 = vpop.permute.xlu0 %10325 }
0x1a80   :  { %12244 = vmatprep.mubr.msk.f32.mxu1 %vm9362_vm11, %v15574_v41 }
0x1a81   :  { %v15715_v23 = vpop.permute.xlu1 %10280 }
0x1a83   :  { %12245 = vmatmul.mubr.msk.f32.gmra.mrb[52].mxu1 %vm9362_vm11, %v15509_v30  ;;  %v15739_v27 = vpop.permute.xlu0 %10335 }
0x1a84   :  { %12247 = vmatprep.mubr.msk.f32.mxu1 %vm9362_vm11, %v15581_v42 }
0x1a85   :  { %v15723_v7 = vpop.permute.xlu1 %10290 }
0x1a87   :  { %12248 = vmatmul.mubr.msk.f32.gmra.mrb[54].mxu1 %vm9362_vm11, %v15521_v29  ;;  %v15751_v31 = vpop.permute.xlu0 %10345 }
0x1a88   :  { %12250 = vmatprep.mubr.msk.f32.mxu1 %vm9362_vm11, %v15591_v44 }
0x1a89   :  { %v15731_v26 = vpop.permute.xlu1 %10300 }
0x1a8b   :  { %12251 = vmatmul.mubr.msk.f32.gmra.mrb[56].mxu1 %vm9362_vm11, %v15533_v32 }
0x1a8c   :  { %12253 = vmatprep.mubr.msk.f32.mxu1 %vm9362_vm11, %v15600_v46 }
0x1a8d   :  { %v15737_v30 = vpop.permute.xlu1 %10310 }
0x1a8f   :  { %12254 = vmatmul.mubr.msk.f32.gmra.mrb[58].mxu1 %vm9362_vm11, %v15545_v38  ;;  %v15759_v38 = vpop.permute.xlu0 %10355 }
0x1a90   :  { %12256 = vmatprep.mubr.msk.f32.mxu1 %vm9362_vm11, %v15606_v47 }
0x1a91   :  { %v15745_v29 = vpop.permute.xlu1 %10320 }
0x1a93   :  { %12257 = vmatmul.mubr.msk.f32.gmra.mrb[60].mxu1 %vm9362_vm11, %v15557_v54  ;;  %v11024_v60 = vpop.permute.xlu0 %11023 }
0x1a94   :  { %12259 = vmatprep.mubr.msk.f32.mxu1 %vm9362_vm11, %v15612_v3  ;;  %v11037_v42 = vmul.f32 %v11024_v60, %v15627_v62 }
0x1a95   :  { %v15753_v32 = vpop.permute.xlu1 %10330 }
0x1a97   :  { %12260 = vmatmul.mubr.msk.f32.gmra.mrb[62].mxu1 %vm9362_vm11, %v15569_v39  ;;  %v11041_v39 = vsel %vm10647_vm14, %v11037_v42, 0.0  ;;  %v11056_v28 = vpop.permute.xlu0 %11055 }
0x1a99   :  { %v15757_v36 = vpop.permute.xlu1 %10340 }
0x1a9d   :  { %v15761_v57 = vpop.permute.xlu1 %10350 }
0x1aa1   :  { %v11019_v41 = vpop.permute.xlu1 %11018 }
0x1aa2   :  { %v11036_v54 = vmul.f32 %v11019_v41, %v15625_v58 }
0x1aa4   :  { %v11040_v44 = vsel %vm10647_vm14, %v11036_v54, 0.0 }
0x1aa5   :  { %v11029_v43 = vpop.permute.xlu1 %11028  ;;  %v11042_v47 = vadd.f32 %v11041_v39, %v11040_v44 }
0x1aa6   :  { %v11038_v45 = vmul.f32 %v11029_v43, %v15631_v5 }
0x1aa8   :  { %v11043_v46 = vsel %vm10647_vm14, %v11038_v45, 0.0 }
0x1aa9   :  { %v11034_v3 = vpop.permute.xlu1 %11033  ;;  %v11044_v50 = vadd.f32 %v11043_v46, %v11042_v47 }
0x1aaa   :  { %v11039_v48 = vmul.f32 %v11034_v3, %v15633_v6 }
0x1aac   :  { %v11045_v51 = vsel %vm10647_vm14, %v11039_v48, 0.0 }
0x1aad   :  { %v11046_v52 = vadd.f32 %v11045_v51, %v11044_v50 }
0x1aaf   :  { %v11047_v53 = vrot.slane %v11046_v52, 4 }
0x1ab1   :  { %v11048_v55 = vadd.f32 %v11047_v53, %v11046_v52 }
0x1ab3   :  { %v11049_v56 = vrot.slane %v11048_v55, 2 }
0x1ab5   :  { %v11050_v59 = vadd.f32 %v11049_v56, %v11048_v55 }
0x1ab7   :  { %v11051_v61 = vrot.slane %v11050_v59, 1 }
0x1ab9   :  { %v11052_v10 = vadd.f32 %v11051_v61, %v11050_v59 }
0x1abb   :  { %v11058_v58 = vadd.f32 %v11056_v28, %v11052_v10 }
0x1abd   :  { %v11815_v62 = vmul.f32 -1.442695, %v11058_v58 }
0x1abf   :  { %13089 = vpow2.f32 %v11815_v62 }
0x1ac9   :  { %v13090_v63 = vpop.eup %13089 }
0x1aca   :  { %v11062_v0 = vadd.f32 1.0, %v13090_v63 }
0x1acc   :  { %13091 = vrcp.f32 %v11062_v0 }
0x1ad6   :  { %v13092_v1 = vpop.eup %13091 }
0x1ad7   :  { %v11065_v2 = vmul.f32 70.0, %v13092_v1 }
0x1ad9   :  { %11067 = vst.msk [vmem:[#allocation2] sm:$0x1] %vm11066_vm15, %v11065_v2 }
0x1b2e   :  { %v12216_v35 = vpop.f32.mrb[32].mxu1 }
0x1b2f   :  { %v10488_v5 = vpop.f32.mrb[33].mxu1  ;;  %v15772_v60 = vadd.f32 %v12216_v35, %v15635_v8 }
0x1b30   :  { %v15775_v41 = vadd.f32 %v10488_v5, %v15639_v11 }
0x1b31   :  { %v10649_v45 = vsel %vm10647_vm14, %v15772_v60, -inf }
0x1b32   :  { %v12219_v6 = vpop.f32.mrb[34].mxu1  ;;  %v10648_v11 = vsel %vm10647_vm14, %v15775_v41, -inf }
0x1b33   :  { %v10498_v9 = vpop.f32.mrb[35].mxu1  ;;  %v15786_v39 = vadd.f32 %v12219_v6, %v15649_v14 }
0x1b34   :  { %v15793_v46 = vadd.f32 %v10498_v9, %v15641_v12 }
0x1b35   :  { %v10651_v51 = vsel %vm10647_vm14, %v15786_v39, -inf }
0x1b36   :  { %v12222_v54 = vpop.f32.mrb[36].mxu1  ;;  %v10650_v52 = vsel %vm10647_vm14, %v15793_v46, -inf }
0x1b37   :  { %v15778_v42 = vadd.f32 %v12222_v54, %v15665_v17  ;;  %v10508_v43 = vpop.f32.mrb[37].mxu1 }
0x1b38   :  { %v15781_v44 = vadd.f32 %v10508_v43, %v15657_v16 }
0x1b39   :  { %v10654_v8 = vsel %vm10647_vm14, %v15778_v42, -inf }
0x1b3a   :  { %v10655_v17 = vmax.f32 %v10649_v45, %v10654_v8  ;;  %v10652_v16 = vsel %vm10647_vm14, %v15781_v44, -inf  ;;  %v12225_v47 = vpop.f32.mrb[38].mxu1 }
0x1b3b   :  { %v10653_v3 = vmax.f32 %v10648_v11, %v10652_v16  ;;  %v15798_v48 = vadd.f32 %v12225_v47, %v15679_v49  ;;  %v10518_v14 = vpop.f32.mrb[39].mxu1 }
0x1b3c   :  { %v15801_v50 = vadd.f32 %v10518_v14, %v15671_v18 }
0x1b3d   :  { %v10658_v12 = vsel %vm10647_vm14, %v15798_v48, -inf }
0x1b3e   :  { %v10659_v53 = vmax.f32 %v10651_v51, %v10658_v12  ;;  %v10656_v55 = vsel %vm10647_vm14, %v15801_v50, -inf  ;;  %v12228_v56 = vpop.f32.mrb[40].mxu1 }
0x1b3f   :  { %v10657_v49 = vmax.f32 %v10650_v52, %v10656_v55  ;;  %v15812_v59 = vadd.f32 %v12228_v56, %v15645_v13  ;;  %v10528_v18 = vpop.f32.mrb[41].mxu1 }
0x1b40   :  { %v15815_v61 = vadd.f32 %v10528_v18, %v15687_v20 }
0x1b41   :  { %v10662_v28 = vsel %vm10647_vm14, %v15812_v59, -inf }
0x1b42   :  { %v10663_v10 = vmax.f32 %v10655_v17, %v10662_v28  ;;  %v10660_v58 = vsel %vm10647_vm14, %v15815_v61, -inf  ;;  %v12231_v62 = vpop.f32.mrb[42].mxu1 }
0x1b43   :  { %v10661_v63 = vmax.f32 %v10653_v3, %v10660_v58  ;;  %v15822_v0 = vadd.f32 %v12231_v62, %v15653_v15  ;;  %v10538_v1 = vpop.f32.mrb[43].mxu1 }
0x1b44   :  { %v15825_v13 = vadd.f32 %v10538_v1, %v15693_v37 }
0x1b45   :  { %v10666_v20 = vsel %vm10647_vm14, %v15822_v0, -inf }
0x1b46   :  { %v10667_v2 = vmax.f32 %v10659_v53, %v10666_v20  ;;  %v10664_v35 = vsel %vm10647_vm14, %v15825_v13, -inf  ;;  %v12234_v5 = vpop.f32.mrb[44].mxu1 }
0x1b47   :  { %v10665_v6 = vmax.f32 %v10657_v49, %v10664_v35  ;;  %v15832_v9 = vadd.f32 %v12234_v5, %v15663_v33  ;;  %v10548_v54 = vpop.f32.mrb[45].mxu1 }
0x1b48   :  { %v15835_v15 = vadd.f32 %v10548_v54, %v15701_v19 }
0x1b49   :  { %v10670_v37 = vsel %vm10647_vm14, %v15832_v9, -inf }
0x1b4a   :  { %v10671_v43 = vmax.f32 %v10663_v10, %v10670_v37  ;;  %v10668_v45 = vsel %vm10647_vm14, %v15835_v15, -inf  ;;  %v12237_v8 = vpop.f32.mrb[46].mxu1 }
0x1b4b   :  { %v10669_v11 = vmax.f32 %v10661_v63, %v10668_v45  ;;  %v15842_v17 = vadd.f32 %v12237_v8, %v15673_v34  ;;  %v10558_v16 = vpop.f32.mrb[47].mxu1 }
0x1b4c   :  { %v15845_v33 = vadd.f32 %v10558_v16, %v15709_v4 }
0x1b4d   :  { %v10674_v19 = vsel %vm10647_vm14, %v15842_v17, -inf }
0x1b4e   :  { %v10675_v47 = vmax.f32 %v10667_v2, %v10674_v19  ;;  %v10672_v3 = vsel %vm10647_vm14, %v15845_v33, -inf  ;;  %v12240_v14 = vpop.f32.mrb[48].mxu1 }
0x1b4f   :  { %v10673_v51 = vmax.f32 %v10665_v6, %v10672_v3  ;;  %v15852_v12 = vadd.f32 %v12240_v14, %v15685_v40  ;;  %v10568_v52 = vpop.f32.mrb[49].mxu1 }
0x1b50   :  { %v15855_v34 = vadd.f32 %v10568_v52, %v15715_v23 }
0x1b51   :  { %v10678_v4 = vsel %vm10647_vm14, %v15852_v12, -inf }
0x1b52   :  { %v10679_v53 = vmax.f32 %v10671_v43, %v10678_v4  ;;  %v10676_v55 = vsel %vm10647_vm14, %v15855_v34, -inf  ;;  %v12243_v56 = vpop.f32.mrb[50].mxu1 }
0x1b53   :  { %v10677_v49 = vmax.f32 %v10669_v11, %v10676_v55  ;;  %v15862_v18 = vadd.f32 %v12243_v56, %v15695_v22  ;;  %v10578_v28 = vpop.f32.mrb[51].mxu1 }
0x1b54   :  { %v15865_v40 = vadd.f32 %v10578_v28, %v15723_v7 }
0x1b55   :  { %v10682_v23 = vsel %vm10647_vm14, %v15862_v18, -inf }
0x1b56   :  { %v10683_v10 = vmax.f32 %v10675_v47, %v10682_v23  ;;  %v10680_v58 = vsel %vm10647_vm14, %v15865_v40, -inf  ;;  %v12246_v62 = vpop.f32.mrb[52].mxu1 }
0x1b57   :  { %v10681_v63 = vmax.f32 %v10673_v51, %v10680_v58  ;;  %v15872_v1 = vadd.f32 %v12246_v62, %v15707_v21  ;;  %v10588_v20 = vpop.f32.mrb[53].mxu1 }
0x1b58   :  { %v15875_v22 = vadd.f32 %v10588_v20, %v15731_v26 }
0x1b59   :  { %v10686_v7 = vsel %vm10647_vm14, %v15872_v1, -inf }
0x1b5a   :  { %v10687_v2 = vmax.f32 %v10679_v53, %v10686_v7  ;;  %v10684_v35 = vsel %vm10647_vm14, %v15875_v22, -inf  ;;  %v12249_v5 = vpop.f32.mrb[54].mxu1 }
0x1b5b   :  { %v10685_v6 = vmax.f32 %v10677_v49, %v10684_v35  ;;  %v15882_v54 = vadd.f32 %v12249_v5, %v15717_v24  ;;  %v10598_v37 = vpop.f32.mrb[55].mxu1 }
0x1b5c   :  { %v15885_v21 = vadd.f32 %v10598_v37, %v15737_v30 }
0x1b5d   :  { %v10690_v26 = vsel %vm10647_vm14, %v15882_v54, -inf }
0x1b5e   :  { %v10691_v43 = vmax.f32 %v10683_v10, %v10690_v26  ;;  %v10688_v45 = vsel %vm10647_vm14, %v15885_v21, -inf  ;;  %v12252_v8 = vpop.f32.mrb[56].mxu1 }
0x1b5f   :  { %v10689_v11 = vmax.f32 %v10681_v63, %v10688_v45  ;;  %v15892_v16 = vadd.f32 %v12252_v8, %v15729_v25  ;;  %v10608_v19 = vpop.f32.mrb[57].mxu1 }
0x1b60   :  { %v15895_v24 = vadd.f32 %v10608_v19, %v15745_v29 }
0x1b61   :  { %v10694_v30 = vsel %vm10647_vm14, %v15892_v16, -inf }
0x1b62   :  { %v10695_v47 = vmax.f32 %v10687_v2, %v10694_v30  ;;  %v10692_v3 = vsel %vm10647_vm14, %v15895_v24, -inf  ;;  %v12255_v14 = vpop.f32.mrb[58].mxu1 }
0x1b63   :  { %v10693_v51 = vmax.f32 %v10685_v6, %v10692_v3  ;;  %v15902_v52 = vadd.f32 %v12255_v14, %v15739_v27  ;;  %v10618_v4 = vpop.f32.mrb[59].mxu1 }
0x1b64   :  { %v15905_v25 = vadd.f32 %v10618_v4, %v15753_v32 }
0x1b65   :  { %v10698_v29 = vsel %vm10647_vm14, %v15902_v52, -inf }
0x1b66   :  { %v10699_v53 = vmax.f32 %v10691_v43, %v10698_v29  ;;  %v10696_v55 = vsel %vm10647_vm14, %v15905_v25, -inf  ;;  %v12258_v56 = vpop.f32.mrb[60].mxu1 }
0x1b67   :  { %v10697_v49 = vmax.f32 %v10689_v11, %v10696_v55  ;;  %v15912_v28 = vadd.f32 %v12258_v56, %v15751_v31  ;;  %v10628_v23 = vpop.f32.mrb[61].mxu1 }
0x1b68   :  { %v15915_v27 = vadd.f32 %v10628_v23, %v15757_v36 }
0x1b69   :  { %v10702_v32 = vsel %vm10647_vm14, %v15912_v28, -inf }
0x1b6a   :  { %v10703_v10 = vmax.f32 %v10695_v47, %v10702_v32  ;;  %v10700_v58 = vsel %vm10647_vm14, %v15915_v27, -inf  ;;  %v12261_v62 = vpop.f32.mrb[62].mxu1 }
0x1b6b   :  { %v10701_v63 = vmax.f32 %v10693_v51, %v10700_v58  ;;  %v15922_v20 = vadd.f32 %v12261_v62, %v15759_v38  ;;  %v10638_v7 = vpop.f32.mrb[63].mxu1 }
0x1b6c   :  { %v15925_v31 = vadd.f32 %v10638_v7, %v15761_v57 }
0x1b6d   :  { %v10708_v2 = vmax.f32 %v10701_v63, %v10703_v10  ;;  %v10706_v36 = vsel %vm10647_vm14, %v15922_v20, -inf }
0x1b6e   :  { %v10707_v35 = vmax.f32 %v10699_v53, %v10706_v36  ;;  %v10704_v5 = vsel %vm10647_vm14, %v15925_v31, -inf }
0x1b6f   :  { %v10705_v6 = vmax.f32 %v10697_v49, %v10704_v5 }
0x1b71   :  { %v10709_v37 = vmax.f32 %v10705_v6, %v10707_v35 }
0x1b73   :  { %v10710_v26 = vmax.f32 %v10708_v2, %v10709_v37 }
0x1b75   :  { %v10711_v43 = vrot.slane %v10710_v26, 4 }
0x1b77   :  { %v10712_v45 = vmax.f32 %v10710_v26, %v10711_v43 }
0x1b79   :  { %v10713_v8 = vrot.slane %v10712_v45, 2 }
0x1b7b   :  { %v10714_v38 = vmax.f32 %v10712_v45, %v10713_v8 }
0x1b7d   :  { %v10715_v11 = vrot.slane %v10714_v38, 1 }
0x1b7f   :  { %v15931_v19 = vmax.f32 %v10714_v38, %v10715_v11 }
0x1b81   :  { %v10717_v57 = vsub.f32 %v15775_v41, %v15931_v19  ;;  %v10718_v30 = vsub.f32 %v15772_v60, %v15931_v19  ;;  %v10719_v47 = vsub.f32 %v15793_v46, %v15931_v19  ;;  %v10720_v3 = vsub.f32 %v15786_v39, %v15931_v19 }
0x1b82   :  { %v10721_v14 = vsub.f32 %v15781_v44, %v15931_v19  ;;  %v10722_v51 = vsub.f32 %v15778_v42, %v15931_v19  ;;  %v10723_v4 = vsub.f32 %v15801_v50, %v15931_v19  ;;  %v10724_v41 = vsub.f32 %v15798_v48, %v15931_v19 }
0x1b83   :  { %v10725_v60 = vsub.f32 %v15815_v61, %v15931_v19  ;;  %v10726_v46 = vsub.f32 %v15812_v59, %v15931_v19  ;;  %v10727_v39 = vsub.f32 %v15825_v13, %v15931_v19  ;;  %v10728_v44 = vsub.f32 %v15822_v0, %v15931_v19 }
0x1b84   :  { %v10729_v42 = vsub.f32 %v15835_v15, %v15931_v19  ;;  %v10730_v50 = vsub.f32 %v15832_v9, %v15931_v19  ;;  %v10731_v48 = vsub.f32 %v15845_v33, %v15931_v19  ;;  %v10732_v61 = vsub.f32 %v15842_v17, %v15931_v19 }
0x1b85   :  { %v10733_v59 = vsub.f32 %v15855_v34, %v15931_v19  ;;  %v10734_v29 = vsub.f32 %v15852_v12, %v15931_v19  ;;  %v10735_v53 = vsub.f32 %v15865_v40, %v15931_v19  ;;  %v10736_v55 = vsub.f32 %v15862_v18, %v15931_v19 }
0x1b86   :  { %v10737_v56 = vsub.f32 %v15875_v22, %v15931_v19  ;;  %v10738_v49 = vsub.f32 %v15872_v1, %v15931_v19  ;;  %v10739_v23 = vsub.f32 %v15885_v21, %v15931_v19  ;;  %v10740_v32 = vsub.f32 %v15882_v54, %v15931_v19 }
0x1b87   :  { %v10741_v10 = vsub.f32 %v15895_v24, %v15931_v19  ;;  %v10742_v58 = vsub.f32 %v15892_v16, %v15931_v19  ;;  %v10743_v62 = vsub.f32 %v15905_v25, %v15931_v19  ;;  %v10744_v63 = vsub.f32 %v15902_v52, %v15931_v19 }
0x1b88   :  { %v10745_v7 = vsub.f32 %v15915_v27, %v15931_v19  ;;  %v10746_v2 = vsub.f32 %v15912_v28, %v15931_v19  ;;  %v10747_v36 = vsub.f32 %v15925_v31, %v15931_v19  ;;  %v10748_v35 = vsub.f32 %v15922_v20, %v15931_v19 }
0x1b89   :  { %v10749_v5 = vmul.f32 1.442695, %v10717_v57  ;;  %v10751_v6 = vmul.f32 1.442695, %v10718_v30  ;;  %v10753_v37 = vmul.f32 1.442695, %v10719_v47 }
0x1b8a   :  { %v10755_v26 = vmul.f32 1.442695, %v10720_v3  ;;  %v10757_v43 = vmul.f32 1.442695, %v10721_v14  ;;  %v10759_v45 = vmul.f32 1.442695, %v10722_v51 }
0x1b8b   :  { %13093 = vpow2.f32 %v10749_v5  ;;  %v10761_v8 = vmul.f32 1.442695, %v10723_v4  ;;  %v10763_v38 = vmul.f32 1.442695, %v10724_v41 }
0x1b8c   :  { %13095 = vpow2.f32 %v10751_v6 }
0x1b8d   :  { %13097 = vpow2.f32 %v10753_v37 }
0x1b8e   :  { %13099 = vpow2.f32 %v10755_v26 }
0x1b8f   :  { %13101 = vpow2.f32 %v10757_v43 }
0x1b90   :  { %13103 = vpow2.f32 %v10759_v45 }
0x1b91   :  { %13170 = shalt.err (!%p13167_p4)
}
0x1b92   :  { %s13171_s1 = scalar_lea.hbm %s16345_s10, 16 }
0x1b93   :  { %p13172_p5 = scmp.ne.s32.totalorder %s16345_s10, %s13171_s1  ;;  %p13175_p6 = scmp.lt.u32.totalorder %s13171_s1, %s16345_s10 }
0x1b95   :  { %p13177_p7 = pnand %p13175_p6, %p13172_p5 }
0x1b97   :  { %13180 = shalt.err (!%p13177_p7)
}
0x1b98   :  { %11079 = dma.vmem_to_hbm [thread:$0]  %s11077_s8, 16, %s16345_s10, [#allocation3]   ;;  %13105 = vpow2.f32 %v10761_v8  ;;  %v10765_v11 = vmul.f32 1.442695, %v10725_v60  ;;  %v16009_v57 = vpop.eup %13093  ;;  %v10767_v47 = vmul.f32 1.442695, %v10726_v46 }
0x1b99   :  { %v16011_v30 = vpop.eup %13095  ;;  %13107 = vpow2.f32 %v10763_v38  ;;  %v10813_v3 = vsel %vm10647_vm14, %v16009_v57, 0.0  ;;  %v10769_v41 = vmul.f32 1.442695, %v10727_v39  ;;  %v10771_v6 = vmul.f32 1.442695, %v10728_v44 }
0x1b9a   :  { %v16015_v14 = vpop.eup %13097  ;;  %v10814_v51 = vsel %vm10647_vm14, %v16011_v30, 0.0  ;;  %13109 = vpow2.f32 %v10765_v11  ;;  %v10773_v13 = vmul.f32 1.442695, %v10729_v42  ;;  %v10775_v0 = vmul.f32 1.442695, %v10730_v50 }
0x1b9b   :  { %v16019_v4 = vpop.eup %13099  ;;  %v10815_v60 = vadd.f32 %v10814_v51, %v10813_v3  ;;  %v10816_v5 = vsel %vm10647_vm14, %v16015_v14, 0.0  ;;  %13111 = vpow2.f32 %v10767_v47  ;;  %v10777_v15 = vmul.f32 1.442695, %v10731_v48 }
0x1b9c   :  { %v16026_v46 = vpop.eup %13101  ;;  %v10818_v26 = vsel %vm10647_vm14, %v16019_v4, 0.0  ;;  %13113 = vpow2.f32 %v10769_v41  ;;  %v10779_v9 = vmul.f32 1.442695, %v10732_v61  ;;  %v10781_v33 = vmul.f32 1.442695, %v10733_v59 }
0x1b9d   :  { %v10817_v37 = vadd.f32 %v10816_v5, %v10815_v60  ;;  %v16033_v43 = vpop.eup %13103  ;;  %v10820_v45 = vsel %vm10647_vm14, %v16026_v46, 0.0  ;;  %13115 = vpow2.f32 %v10771_v6  ;;  %v10783_v17 = vmul.f32 1.442695, %v10734_v29 }
0x1b9e   :  { %v10822_v38 = vsel %vm10647_vm14, %v16033_v43, 0.0  ;;  %13117 = vpow2.f32 %v10773_v13  ;;  %v10785_v34 = vmul.f32 1.442695, %v10735_v53  ;;  %v10787_v12 = vmul.f32 1.442695, %v10736_v55 }
0x1b9f   :  { %v10819_v39 = vadd.f32 %v10818_v26, %v10817_v37  ;;  %13119 = vpow2.f32 %v10775_v0  ;;  %v10789_v40 = vmul.f32 1.442695, %v10737_v56  ;;  %v10791_v18 = vmul.f32 1.442695, %v10738_v49 }
0x1ba0   :  { %13121 = vpow2.f32 %v10777_v15  ;;  %v10793_v22 = vmul.f32 1.442695, %v10739_v23  ;;  %v10795_v1 = vmul.f32 1.442695, %v10740_v32  ;;  %v10797_v21 = vmul.f32 1.442695, %v10741_v10 }
0x1ba1   :  { %v10821_v44 = vadd.f32 %v10820_v45, %v10819_v39  ;;  %13123 = vpow2.f32 %v10779_v9  ;;  %v10799_v54 = vmul.f32 1.442695, %v10742_v58  ;;  %v10801_v24 = vmul.f32 1.442695, %v10743_v62 }
0x1ba2   :  { %v16040_v8 = vpop.eup %13105  ;;  %13125 = vpow2.f32 %v10781_v33  ;;  %v10803_v16 = vmul.f32 1.442695, %v10744_v63  ;;  %v10805_v25 = vmul.f32 1.442695, %v10745_v7  ;;  %v10807_v52 = vmul.f32 1.442695, %v10746_v2 }
0x1ba3   :  { %v16047_v11 = vpop.eup %13107  ;;  %v10823_v42 = vadd.f32 %v10822_v38, %v10821_v44  ;;  %v10824_v47 = vsel %vm10647_vm14, %v16040_v8, 0.0  ;;  %13127 = vpow2.f32 %v10783_v17  ;;  %v10809_v27 = vmul.f32 1.442695, %v10747_v36 }
0x1ba4   :  { %v16054_v3 = vpop.eup %13109  ;;  %v10826_v51 = vsel %vm10647_vm14, %v16047_v11, 0.0  ;;  %13129 = vpow2.f32 %v10785_v34  ;;  %v10811_v28 = vmul.f32 1.442695, %v10748_v35 }
0x1ba5   :  { %v10825_v50 = vadd.f32 %v10824_v47, %v10823_v42  ;;  %v16061_v41 = vpop.eup %13111  ;;  %v10828_v60 = vsel %vm10647_vm14, %v16054_v3, 0.0  ;;  %13131 = vpow2.f32 %v10787_v12 }
0x1ba6   :  { %v16068_v5 = vpop.eup %13113  ;;  %v10830_v6 = vsel %vm10647_vm14, %v16061_v41, 0.0  ;;  %13133 = vpow2.f32 %v10789_v40 }
0x1ba7   :  { %v10827_v48 = vadd.f32 %v10826_v51, %v10825_v50  ;;  %v16075_v37 = vpop.eup %13115  ;;  %v10832_v26 = vsel %vm10647_vm14, %v16068_v5, 0.0  ;;  %13135 = vpow2.f32 %v10791_v18 }
0x1ba8   :  { %v16082_v13 = vpop.eup %13117  ;;  %v10834_v39 = vsel %vm10647_vm14, %v16075_v37, 0.0  ;;  %13137 = vpow2.f32 %v10793_v22 }
0x1ba9   :  { %v10829_v61 = vadd.f32 %v10828_v60, %v10827_v48  ;;  %v16089_v45 = vpop.eup %13119  ;;  %v10836_v0 = vsel %vm10647_vm14, %v16082_v13, 0.0  ;;  %13139 = vpow2.f32 %v10795_v1 }
0x1baa   :  { %v16096_v44 = vpop.eup %13121  ;;  %v10838_v38 = vsel %vm10647_vm14, %v16089_v45, 0.0  ;;  %13141 = vpow2.f32 %v10797_v21 }
0x1bab   :  { %v10831_v59 = vadd.f32 %v10830_v6, %v10829_v61  ;;  %v16103_v15 = vpop.eup %13123  ;;  %v10840_v42 = vsel %vm10647_vm14, %v16096_v44, 0.0  ;;  %13143 = vpow2.f32 %v10799_v54 }
0x1bac   :  { %v16110_v47 = vpop.eup %13125  ;;  %v10842_v9 = vsel %vm10647_vm14, %v16103_v15, 0.0  ;;  %13145 = vpow2.f32 %v10801_v24 }
0x1bad   :  { %v10833_v29 = vadd.f32 %v10832_v26, %v10831_v59  ;;  %v16117_v50 = vpop.eup %13127  ;;  %v10844_v51 = vsel %vm10647_vm14, %v16110_v47, 0.0  ;;  %13147 = vpow2.f32 %v10803_v16 }
0x1bae   :  { %v16124_v33 = vpop.eup %13129  ;;  %v10846_v48 = vsel %vm10647_vm14, %v16117_v50, 0.0  ;;  %13149 = vpow2.f32 %v10805_v25 }
0x1baf   :  { %v10835_v53 = vadd.f32 %v10834_v39, %v10833_v29  ;;  %v16131_v60 = vpop.eup %13131  ;;  %v10848_v17 = vsel %vm10647_vm14, %v16124_v33, 0.0  ;;  %13151 = vpow2.f32 %v10807_v52 }
0x1bb0   :  { %v16138_v61 = vpop.eup %13133  ;;  %v10850_v6 = vsel %vm10647_vm14, %v16131_v60, 0.0  ;;  %13153 = vpow2.f32 %v10809_v27 }
0x1bb1   :  { %v10837_v55 = vadd.f32 %v10836_v0, %v10835_v53  ;;  %v16145_v34 = vpop.eup %13135  ;;  %v10852_v59 = vsel %vm10647_vm14, %v16138_v61, 0.0  ;;  %13155 = vpow2.f32 %v10811_v28 }
0x1bb2   :  { %v16152_v26 = vpop.eup %13137  ;;  %v10854_v12 = vsel %vm10647_vm14, %v16145_v34, 0.0 }
0x1bb3   :  { %v10839_v56 = vadd.f32 %v10838_v38, %v10837_v55  ;;  %v16159_v29 = vpop.eup %13139  ;;  %v10856_v39 = vsel %vm10647_vm14, %v16152_v26, 0.0 }
0x1bb4   :  { %v16166_v40 = vpop.eup %13141  ;;  %v10858_v53 = vsel %vm10647_vm14, %v16159_v29, 0.0 }
0x1bb5   :  { %v10841_v49 = vadd.f32 %v10840_v42, %v10839_v56  ;;  %v13144_v0 = vpop.eup %13143  ;;  %v10860_v31 = vsel %vm10647_vm14, %v16166_v40, 0.0 }
0x1bb6   :  { %v13146_v36 = vpop.eup %13145  ;;  %v10862_v38 = vsel %vm10647_vm14, %v13144_v0, 0.0 }
0x1bb7   :  { %v10843_v23 = vadd.f32 %v10842_v9, %v10841_v49  ;;  %v13148_v22 = vpop.eup %13147  ;;  %v10864_v20 = vsel %vm10647_vm14, %v13146_v36, 0.0 }
0x1bb8   :  { %v13150_v19 = vpop.eup %13149  ;;  %v10866_v42 = vsel %vm10647_vm14, %v13148_v22, 0.0 }
0x1bb9   :  { %v10845_v32 = vadd.f32 %v10844_v51, %v10843_v23  ;;  %v13152_v1 = vpop.eup %13151  ;;  %v10868_v9 = vsel %vm10647_vm14, %v13150_v19, 0.0 }
0x1bba   :  { %v13154_v21 = vpop.eup %13153  ;;  %v10870_v51 = vsel %vm10647_vm14, %v13152_v1, 0.0 }
0x1bbb   :  { %v10847_v10 = vadd.f32 %v10846_v48, %v10845_v32  ;;  %v13156_v54 = vpop.eup %13155  ;;  %v10872_v48 = vsel %vm10647_vm14, %v13154_v21, 0.0 }
0x1bbd   :  { %v10849_v58 = vadd.f32 %v10848_v17, %v10847_v10  ;;  %v10874_v10 = vsel %vm10647_vm14, %v13156_v54, 0.0 }
0x1bbf   :  { %v10851_v62 = vadd.f32 %v10850_v6, %v10849_v58 }
0x1bc1   :  { %v10853_v63 = vadd.f32 %v10852_v59, %v10851_v62 }
0x1bc3   :  { %v10855_v7 = vadd.f32 %v10854_v12, %v10853_v63 }
0x1bc5   :  { %v10857_v2 = vadd.f32 %v10856_v39, %v10855_v7 }
0x1bc7   :  { %v10859_v18 = vadd.f32 %v10858_v53, %v10857_v2 }
0x1bc9   :  { %v10861_v55 = vadd.f32 %v10860_v31, %v10859_v18 }
0x1bcb   :  { %v10863_v56 = vadd.f32 %v10862_v38, %v10861_v55 }
0x1bcd   :  { %v10865_v35 = vadd.f32 %v10864_v20, %v10863_v56 }
0x1bcf   :  { %v10867_v49 = vadd.f32 %v10866_v42, %v10865_v35 }
0x1bd1   :  { %v10869_v23 = vadd.f32 %v10868_v9, %v10867_v49 }
0x1bd3   :  { %v10871_v32 = vadd.f32 %v10870_v51, %v10869_v23 }
0x1bd5   :  { %v10873_v24 = vadd.f32 %v10872_v48, %v10871_v32 }
0x1bd7   :  { %v10875_v17 = vadd.f32 %v10874_v10, %v10873_v24 }
0x1bd9   :  { %v10876_v16 = vrot.slane %v10875_v17, 4 }
0x1bdb   :  { %v10877_v58 = vadd.f32 %v10876_v16, %v10875_v17 }
0x1bdd   :  { %v10878_v6 = vrot.slane %v10877_v58, 2 }
0x1bdf   :  { %v10879_v25 = vadd.f32 %v10878_v6, %v10877_v58 }
0x1be1   :  { %v10880_v62 = vrot.slane %v10879_v25, 1 }
0x1be3   :  { %v10881_v59 = vadd.f32 %v10880_v62, %v10879_v25 }
0x1be5   :  { %13157 = vrcp.f32 %v10881_v59 }
0x1bef   :  { %v13158_v52 = vpop.eup %13157 }
0x1bf0   :  { %v10883_v63 = vmul.f32 %v13158_v52, %v16009_v57  ;;  %v10884_v12 = vmul.f32 %v13158_v52, %v16011_v30  ;;  %v10885_v27 = vmul.f32 %v13158_v52, %v16015_v14  ;;  %v10886_v7 = vmul.f32 %v13158_v52, %v16019_v4 }
0x1bf1   :  { %v10887_v39 = vmul.f32 %v13158_v52, %v16026_v46  ;;  %v10888_v28 = vmul.f32 %v13158_v52, %v16033_v43  ;;  %v10889_v2 = vmul.f32 %v13158_v52, %v16040_v8  ;;  %v10890_v53 = vmul.f32 %v13158_v52, %v16047_v11 }
0x1bf2   :  { %v10891_v18 = vmul.f32 %v13158_v52, %v16054_v3  ;;  %v10892_v31 = vmul.f32 %v13158_v52, %v16061_v41  ;;  %v10893_v57 = vmul.f32 %v13158_v52, %v16068_v5  ;;  %v10894_v30 = vmul.f32 %v13158_v52, %v16075_v37 }
0x1bf3   :  { %v10895_v14 = vmul.f32 %v13158_v52, %v16082_v13  ;;  %v10896_v4 = vmul.f32 %v13158_v52, %v16089_v45  ;;  %v10897_v46 = vmul.f32 %v13158_v52, %v16096_v44  ;;  %v10898_v43 = vmul.f32 %v13158_v52, %v16103_v15 }
0x1bf4   :  { %v10899_v8 = vmul.f32 %v13158_v52, %v16110_v47  ;;  %v10900_v11 = vmul.f32 %v13158_v52, %v16117_v50  ;;  %v10901_v3 = vmul.f32 %v13158_v52, %v16124_v33  ;;  %v10902_v41 = vmul.f32 %v13158_v52, %v16131_v60 }
0x1bf5   :  { %v10903_v5 = vmul.f32 %v13158_v52, %v16138_v61  ;;  %v10904_v37 = vmul.f32 %v13158_v52, %v16145_v34  ;;  %v10905_v13 = vmul.f32 %v13158_v52, %v16152_v26  ;;  %v10906_v45 = vmul.f32 %v13158_v52, %v16159_v29 }
0x1bf6   :  { %v10907_v44 = vmul.f32 %v13158_v52, %v16166_v40  ;;  %v10908_v55 = vmul.f32 %v13158_v52, %v13144_v0  ;;  %v10909_v15 = vmul.f32 %v13158_v52, %v13146_v36  ;;  %v10910_v38 = vmul.f32 %v13158_v52, %v13148_v22 }
0x1bf7   :  { %v10911_v47 = vmul.f32 %v13158_v52, %v13150_v19  ;;  %v10912_v56 = vmul.f32 %v13158_v52, %v13152_v1  ;;  %v10913_v50 = vmul.f32 %v13158_v52, %v13154_v21  ;;  %v10914_v20 = vmul.f32 %v13158_v52, %v13156_v54 }
0x1bf8   :  { %v10915_v33 = vmul.f32 255.0, %v10883_v63  ;;  %v10916_v35 = vmul.f32 255.0, %v10884_v12  ;;  %v10917_v60 = vmul.f32 255.0, %v10885_v27  ;;  %v10918_v42 = vmul.f32 255.0, %v10886_v7 }
0x1bf9   :  { %v10919_v61 = vmul.f32 255.0, %v10887_v39  ;;  %v10920_v49 = vmul.f32 255.0, %v10888_v28  ;;  %v10921_v34 = vmul.f32 255.0, %v10889_v2  ;;  %v10922_v9 = vmul.f32 255.0, %v10890_v53 }
0x1bfa   :  { %v10923_v26 = vmul.f32 255.0, %v10891_v18  ;;  %v10924_v23 = vmul.f32 255.0, %v10892_v31  ;;  %v10925_v29 = vmul.f32 255.0, %v10893_v57  ;;  %v10926_v51 = vmul.f32 255.0, %v10894_v30 }
0x1bfb   :  { %v10927_v40 = vmul.f32 255.0, %v10895_v14  ;;  %v10928_v0 = vmul.f32 255.0, %v10896_v4  ;;  %v10929_v36 = vmul.f32 255.0, %v10897_v46  ;;  %v10930_v22 = vmul.f32 255.0, %v10898_v43 }
0x1bfc   :  { %v10931_v19 = vmul.f32 255.0, %v10899_v8  ;;  %v10932_v1 = vmul.f32 255.0, %v10900_v11  ;;  %v10933_v21 = vmul.f32 255.0, %v10901_v3  ;;  %v10934_v54 = vmul.f32 255.0, %v10902_v41 }
0x1bfd   :  { %v10935_v32 = vmul.f32 255.0, %v10903_v5  ;;  %v10936_v48 = vmul.f32 255.0, %v10904_v37  ;;  %v10937_v24 = vmul.f32 255.0, %v10905_v13  ;;  %v10938_v10 = vmul.f32 255.0, %v10906_v45 }
0x1bfe   :  { %v10939_v17 = vmul.f32 255.0, %v10907_v44  ;;  %v10940_v16 = vmul.f32 255.0, %v10908_v55  ;;  %v10941_v58 = vmul.f32 255.0, %v10909_v15  ;;  %v10942_v6 = vmul.f32 255.0, %v10910_v38 }
0x1bff   :  { %v10943_v25 = vmul.f32 255.0, %v10911_v47  ;;  %v10944_v62 = vmul.f32 255.0, %v10912_v56  ;;  %v10945_v59 = vmul.f32 255.0, %v10913_v50  ;;  %v10946_v52 = vmul.f32 255.0, %v10914_v20 }
0x1c00   :  { %v11783_v63 = vadd.f32 -127.5, %v10915_v33  ;;  %v11784_v12 = vadd.f32 -127.5, %v10916_v35  ;;  %v11785_v27 = vadd.f32 -127.5, %v10917_v60  ;;  %v11786_v7 = vadd.f32 -127.5, %v10918_v42 }
0x1c01   :  { %v11787_v39 = vadd.f32 -127.5, %v10919_v61  ;;  %v11788_v28 = vadd.f32 -127.5, %v10920_v49  ;;  %v11789_v2 = vadd.f32 -127.5, %v10921_v34  ;;  %v11790_v53 = vadd.f32 -127.5, %v10922_v9 }
0x1c02   :  { %v11791_v18 = vadd.f32 -127.5, %v10923_v26  ;;  %v11792_v31 = vadd.f32 -127.5, %v10924_v23  ;;  %v11793_v57 = vadd.f32 -127.5, %v10925_v29  ;;  %v11794_v30 = vadd.f32 -127.5, %v10926_v51  ;;  %10979 = vst.msk [vmem:[%s16344_s9] sm:$0xff] %vm10647_vm14, %v11783_v63  ;;  %10980 = vst.msk [vmem:[%s16344_s9 + $0x8] sm:$0xff] %vm10647_vm14, %v11784_v12 }
0x1c03   :  { %10981 = vst.msk [vmem:[%s16344_s9 + $0x10] sm:$0xff] %vm10647_vm14, %v11785_v27  ;;  %10982 = vst.msk [vmem:[%s16344_s9 + $0x18] sm:$0xff] %vm10647_vm14, %v11786_v7  ;;  %v11795_v14 = vadd.f32 -127.5, %v10927_v40  ;;  %v11796_v4 = vadd.f32 -127.5, %v10928_v0  ;;  %v11797_v46 = vadd.f32 -127.5, %v10929_v36  ;;  %v11798_v43 = vadd.f32 -127.5, %v10930_v22 }
0x1c04   :  { %10983 = vst.msk [vmem:[%s16344_s9 + $0x20] sm:$0xff] %vm10647_vm14, %v11787_v39  ;;  %10984 = vst.msk [vmem:[%s16344_s9 + $0x28] sm:$0xff] %vm10647_vm14, %v11788_v28  ;;  %v11799_v8 = vadd.f32 -127.5, %v10931_v19  ;;  %v11800_v11 = vadd.f32 -127.5, %v10932_v1  ;;  %v11801_v3 = vadd.f32 -127.5, %v10933_v21  ;;  %v11802_v41 = vadd.f32 -127.5, %v10934_v54 }
0x1c05   :  { %10985 = vst.msk [vmem:[%s16344_s9 + $0x30] sm:$0xff] %vm10647_vm14, %v11789_v2  ;;  %10986 = vst.msk [vmem:[%s16344_s9 + $0x38] sm:$0xff] %vm10647_vm14, %v11790_v53  ;;  %v11803_v5 = vadd.f32 -127.5, %v10935_v32  ;;  %v11804_v37 = vadd.f32 -127.5, %v10936_v48  ;;  %v11805_v13 = vadd.f32 -127.5, %v10937_v24  ;;  %v11806_v45 = vadd.f32 -127.5, %v10938_v10 }
0x1c06   :  { %10987 = vst.msk [vmem:[%s16344_s9 + $0x40] sm:$0xff] %vm10647_vm14, %v11791_v18  ;;  %10988 = vst.msk [vmem:[%s16344_s9 + $0x48] sm:$0xff] %vm10647_vm14, %v11792_v31  ;;  %v11807_v44 = vadd.f32 -127.5, %v10939_v17  ;;  %v11808_v55 = vadd.f32 -127.5, %v10940_v16  ;;  %v11809_v15 = vadd.f32 -127.5, %v10941_v58  ;;  %v11810_v38 = vadd.f32 -127.5, %v10942_v6 }
0x1c07   :  { %10989 = vst.msk [vmem:[%s16344_s9 + $0x50] sm:$0xff] %vm10647_vm14, %v11793_v57  ;;  %10990 = vst.msk [vmem:[%s16344_s9 + $0x58] sm:$0xff] %vm10647_vm14, %v11794_v30  ;;  %v11811_v47 = vadd.f32 -127.5, %v10943_v25  ;;  %v11812_v56 = vadd.f32 -127.5, %v10944_v62  ;;  %v11813_v50 = vadd.f32 -127.5, %v10945_v59  ;;  %v11814_v20 = vadd.f32 -127.5, %v10946_v52 }
0x1c08   :  { %10991 = vst.msk [vmem:[%s16344_s9 + $0x60] sm:$0xff] %vm10647_vm14, %v11795_v14  ;;  %10992 = vst.msk [vmem:[%s16344_s9 + $0x68] sm:$0xff] %vm10647_vm14, %v11796_v4 }
0x1c09   :  { %10993 = vst.msk [vmem:[%s16344_s9 + $0x70] sm:$0xff] %vm10647_vm14, %v11797_v46  ;;  %10994 = vst.msk [vmem:[%s16344_s9 + $0x78] sm:$0xff] %vm10647_vm14, %v11798_v43 }
0x1c0a   :  { %10995 = vst.msk [vmem:[%s16344_s9 + $0x80] sm:$0xff] %vm10647_vm14, %v11799_v8  ;;  %10996 = vst.msk [vmem:[%s16344_s9 + $0x88] sm:$0xff] %vm10647_vm14, %v11800_v11 }
0x1c0b   :  { %10997 = vst.msk [vmem:[%s16344_s9 + $0x90] sm:$0xff] %vm10647_vm14, %v11801_v3  ;;  %10998 = vst.msk [vmem:[%s16344_s9 + $0x98] sm:$0xff] %vm10647_vm14, %v11802_v41 }
0x1c0c   :  { %10999 = vst.msk [vmem:[%s16344_s9 + $0xa0] sm:$0xff] %vm10647_vm14, %v11803_v5  ;;  %11000 = vst.msk [vmem:[%s16344_s9 + $0xa8] sm:$0xff] %vm10647_vm14, %v11804_v37 }
0x1c0d   :  { %11001 = vst.msk [vmem:[%s16344_s9 + $0xb0] sm:$0xff] %vm10647_vm14, %v11805_v13  ;;  %11002 = vst.msk [vmem:[%s16344_s9 + $0xb8] sm:$0xff] %vm10647_vm14, %v11806_v45 }
0x1c0e   :  { %11003 = vst.msk [vmem:[%s16344_s9 + $0xc0] sm:$0xff] %vm10647_vm14, %v11807_v44  ;;  %11004 = vst.msk [vmem:[%s16344_s9 + $0xc8] sm:$0xff] %vm10647_vm14, %v11808_v55 }
0x1c0f   :  { %11005 = vst.msk [vmem:[%s16344_s9 + $0xd0] sm:$0xff] %vm10647_vm14, %v11809_v15  ;;  %11006 = vst.msk [vmem:[%s16344_s9 + $0xd8] sm:$0xff] %vm10647_vm14, %v11810_v38 }
0x1c10   :  { %11007 = vst.msk [vmem:[%s16344_s9 + $0xe0] sm:$0xff] %vm10647_vm14, %v11811_v47  ;;  %11008 = vst.msk [vmem:[%s16344_s9 + $0xe8] sm:$0xff] %vm10647_vm14, %v11812_v56 }
0x1c11   :  { %11009 = vst.msk [vmem:[%s16344_s9 + $0xf0] sm:$0xff] %vm10647_vm14, %v11813_v50  ;;  %11010 = vst.msk [vmem:[%s16344_s9 + $0xf8] sm:$0xff] %vm10647_vm14, %v11814_v20 }
0x1c12   :  { %13181 = dma.done.wait [#allocation3], 16  }
0x1c13   :  { %13182 = vsyncadd [#allocation3], 4294967280 }
0x1c14   :  { %11085 = vsyncpa [#allocation3], 1 }

</bundles_post_ra>
